<compile_context>
chip_gen: v7x
topology: tpu7x:2x2x1
jax: 0.10.0
libtpu: 0.0.40
codegen_flags: <defaults>
</compile_context>

<pallas_src>
import functools

import jax
import jax.numpy as jnp
from jax.experimental import pallas as pl
from jax.experimental.pallas import tpu as pltpu


def _resnet_block_kernel(x_ref, w1_ref, b1_ref, w2_ref, b2_ref, out_ref, pad_ref,
                         *, H, W, WG, C, eps):
    """One batch element per grid step.

    Layouts (all with channels C on the lane axis):
      frame   : (G=H*WG, C)  -- image pixel (h, w) at flat row h*WG + (w+1);
                               cols 0 and W+1..WG-1 are don't-care (zero in x).
      pad_ref : (Hp*WG + 16, C) f32 scratch -- 8 guard rows, then the
                reflect-padded image (Hp=H+2 rows of width WG), then 8 guard rows.
      w*_ref  : (9*C, C) bf16 -- tap (dy,dx) weights at rows [(3*dy+dx)*C : +C]
                (row = input channel, col = output channel).
      b*_ref  : (1, C) f32.
    """
    Hp = H + 2
    G = H * WG
    OFF = 8 + WG                    # pad_ref flat row of frame position 0 (row 1, col 0)
    inv_n = 1.0 / float(H * W)

    # Hoisted masks over the frame (computed once, reused by both convs/norms).
    col = jax.lax.broadcasted_iota(jnp.int32, (G, C), 0) % WG
    valid = (col >= 1) & (col <= W)          # real pixel columns
    left = col == 0                          # left reflection column
    right = col == (W + 1)                   # right reflection column

    def reflect_store(v):
        """Write the reflect-padded image built from frame values v into pad_ref.

        Ordering matters: interior -> column reflection -> top/bottom rows
        (the copied edge rows then already carry their reflected edge columns).
        """
        # Interior (canonical rows 1..H, all WG cols); cols 0 / W+1 temporarily
        # hold v's don't-care values.  Aligned store (OFF and G are multiples of 8).
        pad_ref[OFF:OFF + G, :] = v
        # Column reflection, vectorized (no per-row loop):
        #   padded col 0   <- col 2   (i.e. pixel 1)
        #   padded col W+1 <- col W-1 (i.e. pixel W-2)
        vl = pad_ref[OFF + 2:OFF + 2 + G, :]      # value two columns to the right
        vr = pad_ref[OFF - 2:OFF - 2 + G, :]      # value two columns to the left
        pad_ref[OFF:OFF + G, :] = jnp.where(left, vl, jnp.where(right, vr, v))
        # Row reflection: padded row 0 <- row 2, row Hp-1 <- row Hp-3.
        pad_ref[8:8 + WG, :] = pad_ref[8 + 2 * WG:8 + 3 * WG, :]
        pad_ref[8 + (Hp - 1) * WG:8 + Hp * WG, :] = (
            pad_ref[8 + (Hp - 3) * WG:8 + (Hp - 2) * WG, :])

    def conv3x3(w_ref, b_ref):
        """3x3 conv as 9 shifted MXU matmuls (bf16 operands, f32 accumulation)."""
        acc = jnp.zeros((G, C), jnp.float32)
        for dy in range(3):
            for dx in range(3):
                t = dy * 3 + dx
                s = OFF + (dy - 1) * WG + (dx - 1)
                tap = pad_ref[s:s + G, :]                       # (G, C) f32, static slice
                acc = acc + jnp.dot(tap.astype(jnp.bfloat16),
                                    w_ref[t * C:(t + 1) * C, :],
                                    preferred_element_type=jnp.float32)
        return acc + b_ref[...]

    def instance_norm(h):
        """Per-channel IN over the H*W valid pixels (masked, two-pass, f32)."""
        mean = jnp.sum(jnp.where(valid, h, 0.0), axis=0, keepdims=True) * inv_n
        cent = jnp.where(valid, h - mean, 0.0)
        var = jnp.sum(cent * cent, axis=0, keepdims=True) * inv_n
        return cent * jax.lax.rsqrt(var + eps)   # don't-care columns -> 0

    # Zero the guard rows once (only discarded, non-valid outputs ever read them;
    # keeps everything finite/deterministic -- VMEM scratch is uninitialized).
    pad_ref[0:8, :] = jnp.zeros((8, C), jnp.float32)
    pad_ref[8 + Hp * WG:8 + Hp * WG + 8, :] = jnp.zeros((8, C), jnp.float32)

    # ---- reflect-pad(x) -> conv1 -> InstanceNorm -> ReLU --------------------
    reflect_store(x_ref[...])
    y1 = jnp.maximum(instance_norm(conv3x3(w1_ref, b1_ref)), 0.0)

    # ---- reflect-pad(y1) -> conv2 -> InstanceNorm -> residual add -----------
    reflect_store(y1)
    y2 = instance_norm(conv3x3(w2_ref, b2_ref))
    out_ref[...] = x_ref[...] + y2               # residual reuses the input block


def resnet_block_forward(x_nchw, params, *, eps=1e-5):
    """x_nchw: (N, C, H, W) float32  ->  (N, C, H, W) float32."""
    n, c, h, w = x_nchw.shape
    assert h >= 2 and w >= 2, "ReflectionPad2d(1) needs spatial dims >= 2"
    wg = ((w + 2 + 7) // 8) * 8       # padded row width, rounded to the 8-sublane tile
    hp = h + 2
    g = h * wg                        # frame rows per image
    r_rows = hp * wg + 16             # pad scratch rows (8 guard rows front/back)

    # NCHW -> NHWC, then "frame" layout: pixel (h, w) at flat row h*wg + (w+1).
    x = jnp.transpose(x_nchw, (0, 2, 3, 1)).astype(jnp.float32)       # (N, H, W, C)
    xf = jnp.pad(x, ((0, 0), (0, 0), (1, wg - w - 1), (0, 0)))        # (N, H, WG, C)
    xf = xf.reshape(n, g, c)

    # Weights in bf16 (MXU-native operands); biases stay f32.
    w1 = params["w1"].astype(jnp.bfloat16)
    w2 = params["w2"].astype(jnp.bfloat16)
    b1 = params["b1"].reshape(1, c).astype(jnp.float32)
    b2 = params["b2"].reshape(1, c).astype(jnp.float32)

    # Explicit VMEM budget: double-buffered in/out blocks + bf16 weights +
    # f32 pad scratch + headroom for f32 temporaries (conv accumulators, etc.).
    est_vmem = (2 * (g * c * 4) * 2                 # x block + out block, 2 buffers each
                + 2 * (9 * c * c * 2) * 2           # w1, w2 (bf16), 2 buffers each
                + 2 * (c * 4) * 2                   # biases
                + r_rows * c * 4                    # pad scratch (f32)
                + 10 * (g * c * 4))                 # f32 temporaries headroom
    vmem_limit = int(min(max(est_vmem, 32 * 1024 * 1024), 96 * 1024 * 1024))

    out_flat = pl.pallas_call(
        functools.partial(_resnet_block_kernel, H=h, W=w, WG=wg, C=c, eps=eps),
        out_shape=jax.ShapeDtypeStruct((n, g, c), jnp.float32),
        grid_spec=pltpu.PrefetchScalarGridSpec(
            num_scalar_prefetch=0,
            grid=(n,),
            in_specs=[
                pl.BlockSpec((None, g, c), lambda i: (i, 0, 0)),   # x frame
                pl.BlockSpec((9 * c, c), lambda i: (0, 0)),        # w1 (bf16)
                pl.BlockSpec((1, c), lambda i: (0, 0)),            # b1
                pl.BlockSpec((9 * c, c), lambda i: (0, 0)),        # w2 (bf16)
                pl.BlockSpec((1, c), lambda i: (0, 0)),            # b2
            ],
            out_specs=pl.BlockSpec((None, g, c), lambda i: (i, 0, 0)),
            scratch_shapes=[pltpu.VMEM((r_rows, c), jnp.float32)],
        ),
        compiler_params=pltpu.CompilerParams(
            dimension_semantics=("parallel",),
            vmem_limit_bytes=vmem_limit),
    )(xf, w1, b1, w2, b2)

    out = out_flat.reshape(n, h, wg, c)[:, :, 1:w + 1, :]             # drop pad/garbage cols
    return jnp.transpose(out, (0, 3, 1, 2))                           # back to NCHW


def init_params(key, dim):
    """Synthetic weights. w* rows [(3*dy+dx)*dim : +dim] == torch weight[:, :, dy, dx].T."""
    k1, k2, k3, k4 = jax.random.split(key, 4)
    s = 0.1
    return {
        "w1": s * jax.random.normal(k1, (9 * dim, dim), jnp.float32),
        "b1": s * jax.random.normal(k2, (dim,), jnp.float32),
        "w2": s * jax.random.normal(k3, (9 * dim, dim), jnp.float32),
        "b2": s * jax.random.normal(k4, (dim,), jnp.float32),
    }


def _reference_forward(x_nchw, p, eps=1e-5, mxu_dtype=jnp.bfloat16):
    """Pure-JAX reference of the same ResnetBlock forward (independent code path).

    mxu_dtype=jnp.bfloat16 mirrors the kernel's numerics (bf16 matmul operands,
    f32 accumulation / statistics); mxu_dtype=jnp.float32 is the pure-f32 module.
    """
    x = jnp.transpose(x_nchw, (0, 2, 3, 1)).astype(jnp.float32)       # NHWC
    c = x.shape[-1]

    def conv3x3(a, w_flat, b):
        wgt = w_flat.reshape(3, 3, c, c).astype(mxu_dtype)             # HWIO
        ap = jnp.pad(a, ((0, 0), (1, 1), (1, 1), (0, 0)), mode="reflect")
        y = jax.lax.conv_general_dilated(
            ap.astype(mxu_dtype), wgt, window_strides=(1, 1), padding="VALID",
            dimension_numbers=("NHWC", "HWIO", "NHWC"),
            preferred_element_type=jnp.float32)
        return y + b

    def inorm(a):
        m = jnp.mean(a, axis=(1, 2), keepdims=True)
        v = jnp.mean((a - m) ** 2, axis=(1, 2), keepdims=True)
        return (a - m) * jax.lax.rsqrt(v + eps)

    y = jnp.maximum(inorm(conv3x3(x, p["w1"], p["b1"])), 0.0)
    y = inorm(conv3x3(y, p["w2"], p["b2"]))
    return jnp.transpose(x + y, (0, 3, 1, 2))


if __name__ == "__main__":
    key = jax.random.PRNGKey(0)
    kx, kp = jax.random.split(key)

    N, DIM, H, W = 2, 32, 16, 16                   # small self-test shapes
    x = jax.random.normal(kx, (N, DIM, H, W), jnp.float32)
    params = init_params(kp, DIM)

    out = jax.block_until_ready(resnet_block_forward(x, params))
    assert out.shape == (N, DIM, H, W), out.shape

    # Reference matching the kernel's numerics (bf16 MXU operands, f32 accum/stats).
    ref_bf16 = _reference_forward(x, params, mxu_dtype=jnp.bfloat16)
    err = float(jnp.max(jnp.abs(out - ref_bf16)))
    assert err < 3e-3, f"mismatch vs bf16-matched reference: {err}"

    # Loose sanity check against the pure-f32 module (bf16 operands => looser bound).
    ref_f32 = _reference_forward(x, params, mxu_dtype=jnp.float32)
    err32 = float(jnp.max(jnp.abs(out - ref_f32)))
    assert err32 < 1e-1, f"mismatch vs f32 reference: {err32}"

    print("KERNEL_OK")
</pallas_src>

<mosaic_0001>
module attributes {stable_mosaic.version = 11 : i64} {
  func.func @_resnet_block_kernel(%arg0: i32, %arg1: memref<1x384x32xf32, #tpu.memory_space<vmem>>, %arg2: memref<288x32xbf16, #tpu.memory_space<vmem>>, %arg3: memref<1x32xf32, #tpu.memory_space<vmem>>, %arg4: memref<288x32xbf16, #tpu.memory_space<vmem>>, %arg5: memref<1x32xf32, #tpu.memory_space<vmem>>, %arg6: memref<1x384x32xf32, #tpu.memory_space<vmem>>, %arg7: memref<448x32xf32, #tpu.memory_space<vmem>>) attributes {dimension_semantics = [#tpu.dimension_semantics<parallel>], iteration_bounds = array<i64: 2>, scalar_prefetch = 0 : i64, scratch_operands = 1 : i64, tpu.core_type = #tpu.core_type<tc>, window_params = [{transform_indices = @transform_0, window_bounds = array<i64: 1, 384, 32>}, {pipeline_mode = #tpu.pipeline_mode<synchronous>, transform_indices = @transform_1, window_bounds = array<i64: 288, 32>}, {pipeline_mode = #tpu.pipeline_mode<synchronous>, transform_indices = @transform_2, window_bounds = array<i64: 1, 32>}, {pipeline_mode = #tpu.pipeline_mode<synchronous>, transform_indices = @transform_3, window_bounds = array<i64: 288, 32>}, {pipeline_mode = #tpu.pipeline_mode<synchronous>, transform_indices = @transform_4, window_bounds = array<i64: 1, 32>}, {transform_indices = @transform_5, window_bounds = array<i64: 1, 384, 32>}]} {
    %0 = tpu.iota {dimensions = array<i32: 0>} : vector<384x32xi32>
    %c24_i32 = arith.constant 24 : i32
    %c0_i32 = arith.constant 0 : i32
    %1 = arith.cmpi eq, %c24_i32, %c0_i32 : i32
    %c1_i32 = arith.constant 1 : i32
    %2 = arith.select %1, %c1_i32, %c24_i32 : i32
    %3 = vector.broadcast %2 : i32 to vector<384x32xi32>
    %4 = arith.remsi %0, %3 : vector<384x32xi32>
    %c0_i32_0 = arith.constant 0 : i32
    %5 = vector.broadcast %c0_i32_0 : i32 to vector<384x32xi32>
    %6 = arith.cmpi ne, %4, %5 : vector<384x32xi32>
    %c0_i32_1 = arith.constant 0 : i32
    %7 = vector.broadcast %c0_i32_1 : i32 to vector<384x32xi32>
    %8 = arith.cmpi slt, %4, %7 : vector<384x32xi32>
    %c0_i32_2 = arith.constant 0 : i32
    %9 = arith.cmpi slt, %2, %c0_i32_2 : i32
    %10 = vector.broadcast %9 : i1 to vector<384x32xi1>
    %11 = vector.broadcast %10 : vector<384x32xi1> to vector<384x32xi1>
    %12 = arith.xori %8, %11 : vector<384x32xi1>
    %13 = arith.andi %12, %6 : vector<384x32xi1>
    %14 = vector.broadcast %2 : i32 to vector<384x32xi32>
    %15 = arith.addi %4, %14 : vector<384x32xi32>
    %16 = arith.select %13, %15, %4 : vector<384x32xi1>, vector<384x32xi32>
    %c1_i32_3 = arith.constant 1 : i32
    %17 = vector.broadcast %c1_i32_3 : i32 to vector<384x32xi32>
    %18 = arith.cmpi sge, %16, %17 : vector<384x32xi32>
    %c16_i32 = arith.constant 16 : i32
    %19 = vector.broadcast %c16_i32 : i32 to vector<384x32xi32>
    %20 = arith.cmpi sle, %16, %19 : vector<384x32xi32>
    %21 = arith.andi %18, %20 : vector<384x32xi1>
    %c0_i32_4 = arith.constant 0 : i32
    %22 = vector.broadcast %c0_i32_4 : i32 to vector<384x32xi32>
    %23 = arith.cmpi eq, %16, %22 : vector<384x32xi32>
    %c17_i32 = arith.constant 17 : i32
    %24 = vector.broadcast %c17_i32 : i32 to vector<384x32xi32>
    %25 = arith.cmpi eq, %16, %24 : vector<384x32xi32>
    %cst = arith.constant 0.000000e+00 : f32
    %26 = vector.broadcast %cst : f32 to vector<8x32xf32>
    %c0 = arith.constant 0 : index
    %c0_5 = arith.constant 0 : index
    %27 = vector.load %arg7[%c0, %c0_5] : memref<448x32xf32, #tpu.memory_space<vmem>>, vector<8x32xf32>
    tpu.vector_store %arg7[%c0, %c0_5], %26 {strides = array<i32>} : memref<448x32xf32, #tpu.memory_space<vmem>>, vector<8x32xf32>,
    %cst_6 = arith.constant 0.000000e+00 : f32
    %28 = vector.broadcast %cst_6 : f32 to vector<8x32xf32>
    %c440 = arith.constant 440 : index
    %c0_7 = arith.constant 0 : index
    %29 = vector.load %arg7[%c440, %c0_7] : memref<448x32xf32, #tpu.memory_space<vmem>>, vector<8x32xf32>
    tpu.vector_store %arg7[%c440, %c0_7], %28 {strides = array<i32>} : memref<448x32xf32, #tpu.memory_space<vmem>>, vector<8x32xf32>,
    %c0_8 = arith.constant 0 : index
    %c0_9 = arith.constant 0 : index
    %c0_10 = arith.constant 0 : index
    %30 = vector.load %arg1[%c0_8, %c0_9, %c0_10] : memref<1x384x32xf32, #tpu.memory_space<vmem>>, vector<1x384x32xf32>
    %31 = vector.shape_cast %30 : vector<1x384x32xf32> to vector<384x32xf32>
    %c32 = arith.constant 32 : index
    %c0_11 = arith.constant 0 : index
    %32 = vector.load %arg7[%c32, %c0_11] : memref<448x32xf32, #tpu.memory_space<vmem>>, vector<384x32xf32>
    tpu.vector_store %arg7[%c32, %c0_11], %31 {strides = array<i32>} : memref<448x32xf32, #tpu.memory_space<vmem>>, vector<384x32xf32>,
    %c34 = arith.constant 34 : index
    %c0_12 = arith.constant 0 : index
    %33 = vector.load %arg7[%c34, %c0_12] : memref<448x32xf32, #tpu.memory_space<vmem>>, vector<384x32xf32>
    %c30 = arith.constant 30 : index
    %c0_13 = arith.constant 0 : index
    %34 = vector.load %arg7[%c30, %c0_13] : memref<448x32xf32, #tpu.memory_space<vmem>>, vector<384x32xf32>
    %35 = arith.select %25, %34, %31 : vector<384x32xi1>, vector<384x32xf32>
    %36 = arith.select %23, %33, %35 : vector<384x32xi1>, vector<384x32xf32>
    %c32_14 = arith.constant 32 : index
    %c0_15 = arith.constant 0 : index
    %37 = vector.load %arg7[%c32_14, %c0_15] : memref<448x32xf32, #tpu.memory_space<vmem>>, vector<384x32xf32>
    tpu.vector_store %arg7[%c32_14, %c0_15], %36 {strides = array<i32>} : memref<448x32xf32, #tpu.memory_space<vmem>>, vector<384x32xf32>,
    %c56 = arith.constant 56 : index
    %c0_16 = arith.constant 0 : index
    %38 = vector.load %arg7[%c56, %c0_16] : memref<448x32xf32, #tpu.memory_space<vmem>>, vector<24x32xf32>
    %c8 = arith.constant 8 : index
    %c0_17 = arith.constant 0 : index
    %39 = vector.load %arg7[%c8, %c0_17] : memref<448x32xf32, #tpu.memory_space<vmem>>, vector<24x32xf32>
    tpu.vector_store %arg7[%c8, %c0_17], %38 {strides = array<i32>} : memref<448x32xf32, #tpu.memory_space<vmem>>, vector<24x32xf32>,
    %c368 = arith.constant 368 : index
    %c0_18 = arith.constant 0 : index
    %40 = vector.load %arg7[%c368, %c0_18] : memref<448x32xf32, #tpu.memory_space<vmem>>, vector<24x32xf32>
    %c416 = arith.constant 416 : index
    %c0_19 = arith.constant 0 : index
    %41 = vector.load %arg7[%c416, %c0_19] : memref<448x32xf32, #tpu.memory_space<vmem>>, vector<24x32xf32>
    tpu.vector_store %arg7[%c416, %c0_19], %40 {strides = array<i32>} : memref<448x32xf32, #tpu.memory_space<vmem>>, vector<24x32xf32>,
    %cst_20 = arith.constant 0.000000e+00 : f32
    %42 = vector.broadcast %cst_20 : f32 to vector<384x32xf32>
    %c7 = arith.constant 7 : index
    %c0_21 = arith.constant 0 : index
    %43 = vector.load %arg7[%c7, %c0_21] : memref<448x32xf32, #tpu.memory_space<vmem>>, vector<384x32xf32>
    %44 = arith.truncf %43 : vector<384x32xf32> to vector<384x32xbf16>
    %c0_22 = arith.constant 0 : index
    %c0_23 = arith.constant 0 : index
    %45 = vector.load %arg2[%c0_22, %c0_23] : memref<288x32xbf16, #tpu.memory_space<vmem>>, vector<32x32xbf16>
    %cst_24 = arith.constant dense<0.000000e+00> : vector<384x32xf32>
    %46 = tpu.matmul %44, %45, %cst_24 {dimension_numbers = #tpu.dot_dimension_numbers<[1], [0], [0], [1], [0, 0, 1, 1], [], []>} : vector<384x32xbf16>, vector<32x32xbf16>, vector<384x32xf32> -> vector<384x32xf32>
    %47 = arith.addf %42, %46 : vector<384x32xf32>
    %c8_25 = arith.constant 8 : index
    %c0_26 = arith.constant 0 : index
    %48 = vector.load %arg7[%c8_25, %c0_26] : memref<448x32xf32, #tpu.memory_space<vmem>>, vector<384x32xf32>
    %49 = arith.truncf %48 : vector<384x32xf32> to vector<384x32xbf16>
    %c32_27 = arith.constant 32 : index
    %c0_28 = arith.constant 0 : index
    %50 = vector.load %arg2[%c32_27, %c0_28] : memref<288x32xbf16, #tpu.memory_space<vmem>>, vector<32x32xbf16>
    %cst_29 = arith.constant dense<0.000000e+00> : vector<384x32xf32>
    %51 = tpu.matmul %49, %50, %cst_29 {dimension_numbers = #tpu.dot_dimension_numbers<[1], [0], [0], [1], [0, 0, 1, 1], [], []>} : vector<384x32xbf16>, vector<32x32xbf16>, vector<384x32xf32> -> vector<384x32xf32>
    %52 = arith.addf %47, %51 : vector<384x32xf32>
    %c9 = arith.constant 9 : index
    %c0_30 = arith.constant 0 : index
    %53 = vector.load %arg7[%c9, %c0_30] : memref<448x32xf32, #tpu.memory_space<vmem>>, vector<384x32xf32>
    %54 = arith.truncf %53 : vector<384x32xf32> to vector<384x32xbf16>
    %c64 = arith.constant 64 : index
    %c0_31 = arith.constant 0 : index
    %55 = vector.load %arg2[%c64, %c0_31] : memref<288x32xbf16, #tpu.memory_space<vmem>>, vector<32x32xbf16>
    %cst_32 = arith.constant dense<0.000000e+00> : vector<384x32xf32>
    %56 = tpu.matmul %54, %55, %cst_32 {dimension_numbers = #tpu.dot_dimension_numbers<[1], [0], [0], [1], [0, 0, 1, 1], [], []>} : vector<384x32xbf16>, vector<32x32xbf16>, vector<384x32xf32> -> vector<384x32xf32>
    %57 = arith.addf %52, %56 : vector<384x32xf32>
    %c31 = arith.constant 31 : index
    %c0_33 = arith.constant 0 : index
    %58 = vector.load %arg7[%c31, %c0_33] : memref<448x32xf32, #tpu.memory_space<vmem>>, vector<384x32xf32>
    %59 = arith.truncf %58 : vector<384x32xf32> to vector<384x32xbf16>
    %c96 = arith.constant 96 : index
    %c0_34 = arith.constant 0 : index
    %60 = vector.load %arg2[%c96, %c0_34] : memref<288x32xbf16, #tpu.memory_space<vmem>>, vector<32x32xbf16>
    %cst_35 = arith.constant dense<0.000000e+00> : vector<384x32xf32>
    %61 = tpu.matmul %59, %60, %cst_35 {dimension_numbers = #tpu.dot_dimension_numbers<[1], [0], [0], [1], [0, 0, 1, 1], [], []>} : vector<384x32xbf16>, vector<32x32xbf16>, vector<384x32xf32> -> vector<384x32xf32>
    %62 = arith.addf %57, %61 : vector<384x32xf32>
    %c32_36 = arith.constant 32 : index
    %c0_37 = arith.constant 0 : index
    %63 = vector.load %arg7[%c32_36, %c0_37] : memref<448x32xf32, #tpu.memory_space<vmem>>, vector<384x32xf32>
    %64 = arith.truncf %63 : vector<384x32xf32> to vector<384x32xbf16>
    %c128 = arith.constant 128 : index
    %c0_38 = arith.constant 0 : index
    %65 = vector.load %arg2[%c128, %c0_38] : memref<288x32xbf16, #tpu.memory_space<vmem>>, vector<32x32xbf16>
    %cst_39 = arith.constant dense<0.000000e+00> : vector<384x32xf32>
    %66 = tpu.matmul %64, %65, %cst_39 {dimension_numbers = #tpu.dot_dimension_numbers<[1], [0], [0], [1], [0, 0, 1, 1], [], []>} : vector<384x32xbf16>, vector<32x32xbf16>, vector<384x32xf32> -> vector<384x32xf32>
    %67 = arith.addf %62, %66 : vector<384x32xf32>
    %c33 = arith.constant 33 : index
    %c0_40 = arith.constant 0 : index
    %68 = vector.load %arg7[%c33, %c0_40] : memref<448x32xf32, #tpu.memory_space<vmem>>, vector<384x32xf32>
    %69 = arith.truncf %68 : vector<384x32xf32> to vector<384x32xbf16>
    %c160 = arith.constant 160 : index
    %c0_41 = arith.constant 0 : index
    %70 = vector.load %arg2[%c160, %c0_41] : memref<288x32xbf16, #tpu.memory_space<vmem>>, vector<32x32xbf16>
    %cst_42 = arith.constant dense<0.000000e+00> : vector<384x32xf32>
    %71 = tpu.matmul %69, %70, %cst_42 {dimension_numbers = #tpu.dot_dimension_numbers<[1], [0], [0], [1], [0, 0, 1, 1], [], []>} : vector<384x32xbf16>, vector<32x32xbf16>, vector<384x32xf32> -> vector<384x32xf32>
    %72 = arith.addf %67, %71 : vector<384x32xf32>
    %c55 = arith.constant 55 : index
    %c0_43 = arith.constant 0 : index
    %73 = vector.load %arg7[%c55, %c0_43] : memref<448x32xf32, #tpu.memory_space<vmem>>, vector<384x32xf32>
    %74 = arith.truncf %73 : vector<384x32xf32> to vector<384x32xbf16>
    %c192 = arith.constant 192 : index
    %c0_44 = arith.constant 0 : index
    %75 = vector.load %arg2[%c192, %c0_44] : memref<288x32xbf16, #tpu.memory_space<vmem>>, vector<32x32xbf16>
    %cst_45 = arith.constant dense<0.000000e+00> : vector<384x32xf32>
    %76 = tpu.matmul %74, %75, %cst_45 {dimension_numbers = #tpu.dot_dimension_numbers<[1], [0], [0], [1], [0, 0, 1, 1], [], []>} : vector<384x32xbf16>, vector<32x32xbf16>, vector<384x32xf32> -> vector<384x32xf32>
    %77 = arith.addf %72, %76 : vector<384x32xf32>
    %c56_46 = arith.constant 56 : index
    %c0_47 = arith.constant 0 : index
    %78 = vector.load %arg7[%c56_46, %c0_47] : memref<448x32xf32, #tpu.memory_space<vmem>>, vector<384x32xf32>
    %79 = arith.truncf %78 : vector<384x32xf32> to vector<384x32xbf16>
    %c224 = arith.constant 224 : index
    %c0_48 = arith.constant 0 : index
    %80 = vector.load %arg2[%c224, %c0_48] : memref<288x32xbf16, #tpu.memory_space<vmem>>, vector<32x32xbf16>
    %cst_49 = arith.constant dense<0.000000e+00> : vector<384x32xf32>
    %81 = tpu.matmul %79, %80, %cst_49 {dimension_numbers = #tpu.dot_dimension_numbers<[1], [0], [0], [1], [0, 0, 1, 1], [], []>} : vector<384x32xbf16>, vector<32x32xbf16>, vector<384x32xf32> -> vector<384x32xf32>
    %82 = arith.addf %77, %81 : vector<384x32xf32>
    %c57 = arith.constant 57 : index
    %c0_50 = arith.constant 0 : index
    %83 = vector.load %arg7[%c57, %c0_50] : memref<448x32xf32, #tpu.memory_space<vmem>>, vector<384x32xf32>
    %84 = arith.truncf %83 : vector<384x32xf32> to vector<384x32xbf16>
    %c256 = arith.constant 256 : index
    %c0_51 = arith.constant 0 : index
    %85 = vector.load %arg2[%c256, %c0_51] : memref<288x32xbf16, #tpu.memory_space<vmem>>, vector<32x32xbf16>
    %cst_52 = arith.constant dense<0.000000e+00> : vector<384x32xf32>
    %86 = tpu.matmul %84, %85, %cst_52 {dimension_numbers = #tpu.dot_dimension_numbers<[1], [0], [0], [1], [0, 0, 1, 1], [], []>} : vector<384x32xbf16>, vector<32x32xbf16>, vector<384x32xf32> -> vector<384x32xf32>
    %87 = arith.addf %82, %86 : vector<384x32xf32>
    %c0_53 = arith.constant 0 : index
    %c0_54 = arith.constant 0 : index
    %88 = vector.load %arg3[%c0_53, %c0_54] : memref<1x32xf32, #tpu.memory_space<vmem>>, vector<1x32xf32>
    %89 = vector.broadcast %88 : vector<1x32xf32> to vector<384x32xf32>
    %90 = arith.addf %87, %89 : vector<384x32xf32>
    %cst_55 = arith.constant 0.000000e+00 : f32
    %91 = vector.broadcast %cst_55 : f32 to vector<384x32xf32>
    %92 = arith.select %21, %90, %91 : vector<384x32xi1>, vector<384x32xf32>
    %cst_56 = arith.constant dense<0.000000e+00> : vector<32xf32>
    %93 = vector.multi_reduction <add>, %92, %cst_56 [0] : vector<384x32xf32> to vector<32xf32>
    %94 = vector.shape_cast %93 : vector<32xf32> to vector<1x32xf32>
    %cst_57 = arith.constant 3.906250e-03 : f32
    %95 = vector.broadcast %cst_57 : f32 to vector<1x32xf32>
    %96 = arith.mulf %94, %95 : vector<1x32xf32>
    %97 = vector.broadcast %96 : vector<1x32xf32> to vector<384x32xf32>
    %98 = arith.subf %90, %97 : vector<384x32xf32>
    %cst_58 = arith.constant 0.000000e+00 : f32
    %99 = vector.broadcast %cst_58 : f32 to vector<384x32xf32>
    %100 = arith.select %21, %98, %99 : vector<384x32xi1>, vector<384x32xf32>
    %101 = arith.mulf %100, %100 : vector<384x32xf32>
    %cst_59 = arith.constant dense<0.000000e+00> : vector<32xf32>
    %102 = vector.multi_reduction <add>, %101, %cst_59 [0] : vector<384x32xf32> to vector<32xf32>
    %103 = vector.shape_cast %102 : vector<32xf32> to vector<1x32xf32>
    %cst_60 = arith.constant 3.906250e-03 : f32
    %104 = vector.broadcast %cst_60 : f32 to vector<1x32xf32>
    %105 = arith.mulf %103, %104 : vector<1x32xf32>
    %cst_61 = arith.constant 9.99999974E-6 : f32
    %106 = vector.broadcast %cst_61 : f32 to vector<1x32xf32>
    %107 = arith.addf %105, %106 : vector<1x32xf32>
    %108 = math.rsqrt %107 : vector<1x32xf32>
    %109 = vector.broadcast %108 : vector<1x32xf32> to vector<384x32xf32>
    %110 = arith.mulf %100, %109 : vector<384x32xf32>
    %cst_62 = arith.constant 0.000000e+00 : f32
    %111 = vector.broadcast %cst_62 : f32 to vector<384x32xf32>
    %112 = arith.maximumf %110, %111 : vector<384x32xf32>
    %c32_63 = arith.constant 32 : index
    %c0_64 = arith.constant 0 : index
    %113 = vector.load %arg7[%c32_63, %c0_64] : memref<448x32xf32, #tpu.memory_space<vmem>>, vector<384x32xf32>
    tpu.vector_store %arg7[%c32_63, %c0_64], %112 {strides = array<i32>} : memref<448x32xf32, #tpu.memory_space<vmem>>, vector<384x32xf32>,
    %c34_65 = arith.constant 34 : index
    %c0_66 = arith.constant 0 : index
    %114 = vector.load %arg7[%c34_65, %c0_66] : memref<448x32xf32, #tpu.memory_space<vmem>>, vector<384x32xf32>
    %c30_67 = arith.constant 30 : index
    %c0_68 = arith.constant 0 : index
    %115 = vector.load %arg7[%c30_67, %c0_68] : memref<448x32xf32, #tpu.memory_space<vmem>>, vector<384x32xf32>
    %116 = arith.select %25, %115, %112 : vector<384x32xi1>, vector<384x32xf32>
    %117 = arith.select %23, %114, %116 : vector<384x32xi1>, vector<384x32xf32>
    %c32_69 = arith.constant 32 : index
    %c0_70 = arith.constant 0 : index
    %118 = vector.load %arg7[%c32_69, %c0_70] : memref<448x32xf32, #tpu.memory_space<vmem>>, vector<384x32xf32>
    tpu.vector_store %arg7[%c32_69, %c0_70], %117 {strides = array<i32>} : memref<448x32xf32, #tpu.memory_space<vmem>>, vector<384x32xf32>,
    %c56_71 = arith.constant 56 : index
    %c0_72 = arith.constant 0 : index
    %119 = vector.load %arg7[%c56_71, %c0_72] : memref<448x32xf32, #tpu.memory_space<vmem>>, vector<24x32xf32>
    %c8_73 = arith.constant 8 : index
    %c0_74 = arith.constant 0 : index
    %120 = vector.load %arg7[%c8_73, %c0_74] : memref<448x32xf32, #tpu.memory_space<vmem>>, vector<24x32xf32>
    tpu.vector_store %arg7[%c8_73, %c0_74], %119 {strides = array<i32>} : memref<448x32xf32, #tpu.memory_space<vmem>>, vector<24x32xf32>,
    %c368_75 = arith.constant 368 : index
    %c0_76 = arith.constant 0 : index
    %121 = vector.load %arg7[%c368_75, %c0_76] : memref<448x32xf32, #tpu.memory_space<vmem>>, vector<24x32xf32>
    %c416_77 = arith.constant 416 : index
    %c0_78 = arith.constant 0 : index
    %122 = vector.load %arg7[%c416_77, %c0_78] : memref<448x32xf32, #tpu.memory_space<vmem>>, vector<24x32xf32>
    tpu.vector_store %arg7[%c416_77, %c0_78], %121 {strides = array<i32>} : memref<448x32xf32, #tpu.memory_space<vmem>>, vector<24x32xf32>,
    %cst_79 = arith.constant 0.000000e+00 : f32
    %123 = vector.broadcast %cst_79 : f32 to vector<384x32xf32>
    %c7_80 = arith.constant 7 : index
    %c0_81 = arith.constant 0 : index
    %124 = vector.load %arg7[%c7_80, %c0_81] : memref<448x32xf32, #tpu.memory_space<vmem>>, vector<384x32xf32>
    %125 = arith.truncf %124 : vector<384x32xf32> to vector<384x32xbf16>
    %c0_82 = arith.constant 0 : index
    %c0_83 = arith.constant 0 : index
    %126 = vector.load %arg4[%c0_82, %c0_83] : memref<288x32xbf16, #tpu.memory_space<vmem>>, vector<32x32xbf16>
    %cst_84 = arith.constant dense<0.000000e+00> : vector<384x32xf32>
    %127 = tpu.matmul %125, %126, %cst_84 {dimension_numbers = #tpu.dot_dimension_numbers<[1], [0], [0], [1], [0, 0, 1, 1], [], []>} : vector<384x32xbf16>, vector<32x32xbf16>, vector<384x32xf32> -> vector<384x32xf32>
    %128 = arith.addf %123, %127 : vector<384x32xf32>
    %c8_85 = arith.constant 8 : index
    %c0_86 = arith.constant 0 : index
    %129 = vector.load %arg7[%c8_85, %c0_86] : memref<448x32xf32, #tpu.memory_space<vmem>>, vector<384x32xf32>
    %130 = arith.truncf %129 : vector<384x32xf32> to vector<384x32xbf16>
    %c32_87 = arith.constant 32 : index
    %c0_88 = arith.constant 0 : index
    %131 = vector.load %arg4[%c32_87, %c0_88] : memref<288x32xbf16, #tpu.memory_space<vmem>>, vector<32x32xbf16>
    %cst_89 = arith.constant dense<0.000000e+00> : vector<384x32xf32>
    %132 = tpu.matmul %130, %131, %cst_89 {dimension_numbers = #tpu.dot_dimension_numbers<[1], [0], [0], [1], [0, 0, 1, 1], [], []>} : vector<384x32xbf16>, vector<32x32xbf16>, vector<384x32xf32> -> vector<384x32xf32>
    %133 = arith.addf %128, %132 : vector<384x32xf32>
    %c9_90 = arith.constant 9 : index
    %c0_91 = arith.constant 0 : index
    %134 = vector.load %arg7[%c9_90, %c0_91] : memref<448x32xf32, #tpu.memory_space<vmem>>, vector<384x32xf32>
    %135 = arith.truncf %134 : vector<384x32xf32> to vector<384x32xbf16>
    %c64_92 = arith.constant 64 : index
    %c0_93 = arith.constant 0 : index
    %136 = vector.load %arg4[%c64_92, %c0_93] : memref<288x32xbf16, #tpu.memory_space<vmem>>, vector<32x32xbf16>
    %cst_94 = arith.constant dense<0.000000e+00> : vector<384x32xf32>
    %137 = tpu.matmul %135, %136, %cst_94 {dimension_numbers = #tpu.dot_dimension_numbers<[1], [0], [0], [1], [0, 0, 1, 1], [], []>} : vector<384x32xbf16>, vector<32x32xbf16>, vector<384x32xf32> -> vector<384x32xf32>
    %138 = arith.addf %133, %137 : vector<384x32xf32>
    %c31_95 = arith.constant 31 : index
    %c0_96 = arith.constant 0 : index
    %139 = vector.load %arg7[%c31_95, %c0_96] : memref<448x32xf32, #tpu.memory_space<vmem>>, vector<384x32xf32>
    %140 = arith.truncf %139 : vector<384x32xf32> to vector<384x32xbf16>
    %c96_97 = arith.constant 96 : index
    %c0_98 = arith.constant 0 : index
    %141 = vector.load %arg4[%c96_97, %c0_98] : memref<288x32xbf16, #tpu.memory_space<vmem>>, vector<32x32xbf16>
    %cst_99 = arith.constant dense<0.000000e+00> : vector<384x32xf32>
    %142 = tpu.matmul %140, %141, %cst_99 {dimension_numbers = #tpu.dot_dimension_numbers<[1], [0], [0], [1], [0, 0, 1, 1], [], []>} : vector<384x32xbf16>, vector<32x32xbf16>, vector<384x32xf32> -> vector<384x32xf32>
    %143 = arith.addf %138, %142 : vector<384x32xf32>
    %c32_100 = arith.constant 32 : index
    %c0_101 = arith.constant 0 : index
    %144 = vector.load %arg7[%c32_100, %c0_101] : memref<448x32xf32, #tpu.memory_space<vmem>>, vector<384x32xf32>
    %145 = arith.truncf %144 : vector<384x32xf32> to vector<384x32xbf16>
    %c128_102 = arith.constant 128 : index
    %c0_103 = arith.constant 0 : index
    %146 = vector.load %arg4[%c128_102, %c0_103] : memref<288x32xbf16, #tpu.memory_space<vmem>>, vector<32x32xbf16>
    %cst_104 = arith.constant dense<0.000000e+00> : vector<384x32xf32>
    %147 = tpu.matmul %145, %146, %cst_104 {dimension_numbers = #tpu.dot_dimension_numbers<[1], [0], [0], [1], [0, 0, 1, 1], [], []>} : vector<384x32xbf16>, vector<32x32xbf16>, vector<384x32xf32> -> vector<384x32xf32>
    %148 = arith.addf %143, %147 : vector<384x32xf32>
    %c33_105 = arith.constant 33 : index
    %c0_106 = arith.constant 0 : index
    %149 = vector.load %arg7[%c33_105, %c0_106] : memref<448x32xf32, #tpu.memory_space<vmem>>, vector<384x32xf32>
    %150 = arith.truncf %149 : vector<384x32xf32> to vector<384x32xbf16>
    %c160_107 = arith.constant 160 : index
    %c0_108 = arith.constant 0 : index
    %151 = vector.load %arg4[%c160_107, %c0_108] : memref<288x32xbf16, #tpu.memory_space<vmem>>, vector<32x32xbf16>
    %cst_109 = arith.constant dense<0.000000e+00> : vector<384x32xf32>
    %152 = tpu.matmul %150, %151, %cst_109 {dimension_numbers = #tpu.dot_dimension_numbers<[1], [0], [0], [1], [0, 0, 1, 1], [], []>} : vector<384x32xbf16>, vector<32x32xbf16>, vector<384x32xf32> -> vector<384x32xf32>
    %153 = arith.addf %148, %152 : vector<384x32xf32>
    %c55_110 = arith.constant 55 : index
    %c0_111 = arith.constant 0 : index
    %154 = vector.load %arg7[%c55_110, %c0_111] : memref<448x32xf32, #tpu.memory_space<vmem>>, vector<384x32xf32>
    %155 = arith.truncf %154 : vector<384x32xf32> to vector<384x32xbf16>
    %c192_112 = arith.constant 192 : index
    %c0_113 = arith.constant 0 : index
    %156 = vector.load %arg4[%c192_112, %c0_113] : memref<288x32xbf16, #tpu.memory_space<vmem>>, vector<32x32xbf16>
    %cst_114 = arith.constant dense<0.000000e+00> : vector<384x32xf32>
    %157 = tpu.matmul %155, %156, %cst_114 {dimension_numbers = #tpu.dot_dimension_numbers<[1], [0], [0], [1], [0, 0, 1, 1], [], []>} : vector<384x32xbf16>, vector<32x32xbf16>, vector<384x32xf32> -> vector<384x32xf32>
    %158 = arith.addf %153, %157 : vector<384x32xf32>
    %c56_115 = arith.constant 56 : index
    %c0_116 = arith.constant 0 : index
    %159 = vector.load %arg7[%c56_115, %c0_116] : memref<448x32xf32, #tpu.memory_space<vmem>>, vector<384x32xf32>
    %160 = arith.truncf %159 : vector<384x32xf32> to vector<384x32xbf16>
    %c224_117 = arith.constant 224 : index
    %c0_118 = arith.constant 0 : index
    %161 = vector.load %arg4[%c224_117, %c0_118] : memref<288x32xbf16, #tpu.memory_space<vmem>>, vector<32x32xbf16>
    %cst_119 = arith.constant dense<0.000000e+00> : vector<384x32xf32>
    %162 = tpu.matmul %160, %161, %cst_119 {dimension_numbers = #tpu.dot_dimension_numbers<[1], [0], [0], [1], [0, 0, 1, 1], [], []>} : vector<384x32xbf16>, vector<32x32xbf16>, vector<384x32xf32> -> vector<384x32xf32>
    %163 = arith.addf %158, %162 : vector<384x32xf32>
    %c57_120 = arith.constant 57 : index
    %c0_121 = arith.constant 0 : index
    %164 = vector.load %arg7[%c57_120, %c0_121] : memref<448x32xf32, #tpu.memory_space<vmem>>, vector<384x32xf32>
    %165 = arith.truncf %164 : vector<384x32xf32> to vector<384x32xbf16>
    %c256_122 = arith.constant 256 : index
    %c0_123 = arith.constant 0 : index
    %166 = vector.load %arg4[%c256_122, %c0_123] : memref<288x32xbf16, #tpu.memory_space<vmem>>, vector<32x32xbf16>
    %cst_124 = arith.constant dense<0.000000e+00> : vector<384x32xf32>
    %167 = tpu.matmul %165, %166, %cst_124 {dimension_numbers = #tpu.dot_dimension_numbers<[1], [0], [0], [1], [0, 0, 1, 1], [], []>} : vector<384x32xbf16>, vector<32x32xbf16>, vector<384x32xf32> -> vector<384x32xf32>
    %168 = arith.addf %163, %167 : vector<384x32xf32>
    %c0_125 = arith.constant 0 : index
    %c0_126 = arith.constant 0 : index
    %169 = vector.load %arg5[%c0_125, %c0_126] : memref<1x32xf32, #tpu.memory_space<vmem>>, vector<1x32xf32>
    %170 = vector.broadcast %169 : vector<1x32xf32> to vector<384x32xf32>
    %171 = arith.addf %168, %170 : vector<384x32xf32>
    %cst_127 = arith.constant 0.000000e+00 : f32
    %172 = vector.broadcast %cst_127 : f32 to vector<384x32xf32>
    %173 = arith.select %21, %171, %172 : vector<384x32xi1>, vector<384x32xf32>
    %cst_128 = arith.constant dense<0.000000e+00> : vector<32xf32>
    %174 = vector.multi_reduction <add>, %173, %cst_128 [0] : vector<384x32xf32> to vector<32xf32>
    %175 = vector.shape_cast %174 : vector<32xf32> to vector<1x32xf32>
    %cst_129 = arith.constant 3.906250e-03 : f32
    %176 = vector.broadcast %cst_129 : f32 to vector<1x32xf32>
    %177 = arith.mulf %175, %176 : vector<1x32xf32>
    %178 = vector.broadcast %177 : vector<1x32xf32> to vector<384x32xf32>
    %179 = arith.subf %171, %178 : vector<384x32xf32>
    %cst_130 = arith.constant 0.000000e+00 : f32
    %180 = vector.broadcast %cst_130 : f32 to vector<384x32xf32>
    %181 = arith.select %21, %179, %180 : vector<384x32xi1>, vector<384x32xf32>
    %182 = arith.mulf %181, %181 : vector<384x32xf32>
    %cst_131 = arith.constant dense<0.000000e+00> : vector<32xf32>
    %183 = vector.multi_reduction <add>, %182, %cst_131 [0] : vector<384x32xf32> to vector<32xf32>
    %184 = vector.shape_cast %183 : vector<32xf32> to vector<1x32xf32>
    %cst_132 = arith.constant 3.906250e-03 : f32
    %185 = vector.broadcast %cst_132 : f32 to vector<1x32xf32>
    %186 = arith.mulf %184, %185 : vector<1x32xf32>
    %cst_133 = arith.constant 9.99999974E-6 : f32
    %187 = vector.broadcast %cst_133 : f32 to vector<1x32xf32>
    %188 = arith.addf %186, %187 : vector<1x32xf32>
    %189 = math.rsqrt %188 : vector<1x32xf32>
    %190 = vector.broadcast %189 : vector<1x32xf32> to vector<384x32xf32>
    %191 = arith.mulf %181, %190 : vector<384x32xf32>
    %c0_134 = arith.constant 0 : index
    %c0_135 = arith.constant 0 : index
    %c0_136 = arith.constant 0 : index
    %192 = vector.load %arg1[%c0_134, %c0_135, %c0_136] : memref<1x384x32xf32, #tpu.memory_space<vmem>>, vector<1x384x32xf32>
    %193 = vector.shape_cast %192 : vector<1x384x32xf32> to vector<384x32xf32>
    %194 = arith.addf %193, %191 : vector<384x32xf32>
    %c0_137 = arith.constant 0 : index
    %c0_138 = arith.constant 0 : index
    %c0_139 = arith.constant 0 : index
    %195 = vector.load %arg6[%c0_137, %c0_138, %c0_139] : memref<1x384x32xf32, #tpu.memory_space<vmem>>, vector<1x384x32xf32>
    %196 = vector.shape_cast %195 : vector<1x384x32xf32> to vector<384x32xf32>
    %197 = vector.shape_cast %194 : vector<384x32xf32> to vector<1x384x32xf32>
    tpu.vector_store %arg6[%c0_137, %c0_138, %c0_139], %197 {strides = array<i32>} : memref<1x384x32xf32, #tpu.memory_space<vmem>>, vector<1x384x32xf32>,
    return
  }
  func.func @transform_0(%arg0: i32) -> (i32, i32, i32) {
    %c0_i32 = arith.constant 0 : i32
    %c0_i32_0 = arith.constant 0 : i32
    %c0_i32_1 = arith.constant 0 : i32
    return %arg0, %c0_i32, %c0_i32_0 : i32, i32, i32
  }
  func.func @transform_1(%arg0: i32) -> (i32, i32) {
    %c0_i32 = arith.constant 0 : i32
    %c0_i32_0 = arith.constant 0 : i32
    %c0_i32_1 = arith.constant 0 : i32
    return %c0_i32, %c0_i32_0 : i32, i32
  }
  func.func @transform_2(%arg0: i32) -> (i32, i32) {
    %c0_i32 = arith.constant 0 : i32
    %c0_i32_0 = arith.constant 0 : i32
    %c0_i32_1 = arith.constant 0 : i32
    return %c0_i32, %c0_i32_0 : i32, i32
  }
  func.func @transform_3(%arg0: i32) -> (i32, i32) {
    %c0_i32 = arith.constant 0 : i32
    %c0_i32_0 = arith.constant 0 : i32
    %c0_i32_1 = arith.constant 0 : i32
    return %c0_i32, %c0_i32_0 : i32, i32
  }
  func.func @transform_4(%arg0: i32) -> (i32, i32) {
    %c0_i32 = arith.constant 0 : i32
    %c0_i32_0 = arith.constant 0 : i32
    %c0_i32_1 = arith.constant 0 : i32
    return %c0_i32, %c0_i32_0 : i32, i32
  }
  func.func @transform_5(%arg0: i32) -> (i32, i32, i32) {
    %c0_i32 = arith.constant 0 : i32
    %c0_i32_0 = arith.constant 0 : i32
    %c0_i32_1 = arith.constant 0 : i32
    return %arg0, %c0_i32, %c0_i32_0 : i32, i32, i32
  }
}

</mosaic_0001>

<bundles_post_ra>
// kernel: tpu_custom_call.1
= control target key start
LH: loop header
LB: loop body
LE: loop exit
PB: predicated region body
PF: predicated region fallthrough
CT: control target
= control target key end

     0   :  { %s13622_s18 = smov 0   ;;  %s19938_s0 = inlined_call_operand.vmem [shape: f32[2,384,32], index: 0, kind: input, shape index: {}]   ;;  %s19939_s1 = inlined_call_operand.vmem [shape: bf16[288,32], index: 1, kind: input, shape index: {}]   ;;  %s19940_s2 = inlined_call_operand.vmem [shape: f32[1,32], index: 2, kind: input, shape index: {}]   ;;  %s19941_s3 = inlined_call_operand.vmem [shape: bf16[288,32], index: 3, kind: input, shape index: {}]   ;;  %s19942_s4 = inlined_call_operand.vmem [shape: f32[1,32], index: 4, kind: input, shape index: {}]   ;;  %s19943_s5 = inlined_call_operand.vmem [shape: f32[2,384,32], index: 5, kind: output, shape index: {}]  }
   0x1 LB: > { %s10785_s19 = sadd.s32 4294967295, %s13589_s18   ;;  %p10789_p0 = scmp.ge.s32.totalorder %s13589_s18, 1  ;;  %s13589_s18 = sphi %s13622_s18, %s15_s18  }
   0x2   : > { %p187_p1 = scmp.lt.s32.totalorder %s13589_s18, 3 }
   0x4   : > { %p188_p2 = pnand %p10789_p0, %p187_p1 }
   0x6   : > { %191 = sbr.rel (%p188_p2) target bundleno = 2786 (0xae2), region = 40 }
   0xd   : > { %v13542_v0 = vld [vmem:[%s19939_s1 + $0x10] sm:$0xff]   ;;  %p215_p3 = scmp.lt.s32.totalorder %s10785_s19, 1  ;;  %v226_v1 = vlaneseq  ;;  %v13543_v2 = vld [vmem:[%s19939_s1 + $0x18] sm:$0xff]   ;;  %vm20186_vm0 = vcmask 261120   ;;  %v13650_v6 = vld [vmem:[%s19939_s1] sm:$0xff]  }
   0xe   : > { %11732 = vmatprep.subr.bf16.mxu0 %v13542_v0 }
   0xf   : > { %s22441_s19 = smov (!%p215_p3, %s10785_s19), 1  ;;  %v13638_v3 = vshrl.u32 %v226_v1, 7  ;;  %11733 = vmatpush3.bf16.msra.mxu0 %v13542_v0 }
  0x10   : > { %11734 = vmatprep.subr.bf16.mxu0 %v13543_v2  ;;  %s13436_s24 = smul.u32 384, %s22441_s19 }
  0x11   : > { %v13642_v4 = vadd.s32 24, %v13638_v3  ;;  %v13645_v5 = vadd.s32 32, %v13638_v3  ;;  %v13653_v7 = vadd.s32 40, %v13638_v3  ;;  %v13656_v8 = vadd.s32 8, %v13638_v3 }
  0x12   : > { %v13659_v9 = vmul.u32.u64.low 2863311531, %v13638_v3  ;;  %v13660_v10 = vmul.u32.u64.high 2863311531, %v13638_v3, %v13659_v9  ;;  %v13663_v11 = vadd.s32 16, %v13638_v3  ;;  %v13666_v12 = vadd.s32 48, %v13638_v3  ;;  %s13673_s29 = scalar_lea.vmem %s19938_s0, %s13436_s24  ;;  %s19741_s16 = scalar_lea.vmem %s19943_s5, %s13436_s24 }
  0x13   : > { %v13676_v13 = vmul.u32.u64.low 2863311531, %v13642_v4  ;;  %v13677_v14 = vmul.u32.u64.high 2863311531, %v13642_v4, %v13676_v13  ;;  %v13680_v15 = vmul.u32.u64.low 2863311531, %v13645_v5  ;;  %v13681_v16 = vmul.u32.u64.high 2863311531, %v13645_v5, %v13680_v15  ;;  %11735 = vmatpush3.bf16.msra.mxu0 %v13543_v2  ;;  %v13684_v17 = vld [vmem:[%s13673_s29 + $0x10] sm:$0xff]  ;;  %v13687_v18 = vld [vmem:[%s13673_s29 + $0x18] sm:$0xff] }
  0x14   : > { %v13690_v19 = vld [vmem:[%s13673_s29 + $0x20] sm:$0xff]  ;;  %v13693_v20 = vmul.u32.u64.low 2863311531, %v13653_v7  ;;  %v13694_v21 = vmul.u32.u64.high 2863311531, %v13653_v7, %v13693_v20  ;;  %v13697_v22 = vadd.s32 56, %v13638_v3  ;;  %v13700_v23 = vld [vmem:[%s13673_s29 + $0x28] sm:$0xff]  ;;  %1336 = vst.msk [vmem:[#allocation2 + $0x30] sm:$0xff] %vm20186_vm0, %v13684_v17  ;;  %11784 = vmatprep.subr.bf16.mxu0 %v13650_v6 }
  0x15   : > { %1337 = vst.msk [vmem:[#allocation2 + $0x38] sm:$0xff] %vm20186_vm0, %v13687_v18  ;;  %1338 = vst.msk [vmem:[#allocation2 + $0x40] sm:$0xff] %vm20186_vm0, %v13690_v19  ;;  %v13710_v24 = vld [vmem:[%s13673_s29] sm:$0xff]  ;;  %v13713_v25 = vld [vmem:[%s13673_s29 + $0x8] sm:$0xff]  ;;  %v13716_v26 = vmul.u32.u64.low 2863311531, %v13656_v8  ;;  %v13717_v27 = vmul.u32.u64.high 2863311531, %v13656_v8, %v13716_v26 }
  0x16   : > { %v13720_v28 = vadd.s32 64, %v13638_v3  ;;  %1339 = vst.msk [vmem:[#allocation2 + $0x48] sm:$0xff] %vm20186_vm0, %v13700_v23  ;;  %v281_v29 = vshrl.u32 %v13660_v10, 4  ;;  %v13726_v30 = vld [vmem:[%s13673_s29 + $0x30] sm:$0xff]  ;;  %1334 = vst.msk [vmem:[#allocation2 + $0x20] sm:$0xff] %vm20186_vm0, %v13710_v24  ;;  %v13737_v33 = vld [vmem:[%s13673_s29 + $0x38] sm:$0xff] }
  0x17   : > { %1335 = vst.msk [vmem:[#allocation2 + $0x28] sm:$0xff] %vm20186_vm0, %v13713_v25  ;;  %v13733_v31 = vmul.u32.u64.low 2863311531, %v13663_v11  ;;  %v13734_v32 = vmul.u32.u64.high 2863311531, %v13663_v11, %v13733_v31  ;;  %v13740_v34 = vld [vmem:[%s13673_s29 + $0x40] sm:$0xff]  ;;  %v314_v35 = vshrl.u32 %v13677_v14, 4  ;;  %v325_v36 = vshrl.u32 %v13681_v16, 4 }
  0x18   : > { %1340 = vst.msk [vmem:[#allocation2 + $0x50] sm:$0xff] %vm20186_vm0, %v13726_v30  ;;  %v13747_v37 = vmul.u32.u64.low 2863311531, %v13666_v12  ;;  %v13748_v38 = vmul.u32.u64.high 2863311531, %v13666_v12, %v13747_v37  ;;  %1341 = vst.msk [vmem:[#allocation2 + $0x58] sm:$0xff] %vm20186_vm0, %v13737_v33  ;;  %v13753_v39 = vld [vmem:[%s13673_s29 + $0x48] sm:$0xff]  ;;  %v13758_v40 = vld [vmem:[%s13673_s29 + $0x50] sm:$0xff] }
  0x19   : > { %1342 = vst.msk [vmem:[#allocation2 + $0x60] sm:$0xff] %vm20186_vm0, %v13740_v34  ;;  %v282_v41 = vmul.u32 24, %v281_v29  ;;  %v336_v42 = vshrl.u32 %v13694_v21, 4  ;;  %v13762_v43 = vmul.u32.u64.low 2863311531, %v13697_v22  ;;  %v13763_v44 = vmul.u32.u64.high 2863311531, %v13697_v22, %v13762_v43  ;;  %1343 = vst.msk [vmem:[#allocation2 + $0x68] sm:$0xff] %vm20186_vm0, %v13753_v39 }
  0x1a   : > { %v13769_v45 = vld [vmem:[%s13673_s29 + $0x58] sm:$0xff]  ;;  %1344 = vst.msk [vmem:[#allocation2 + $0x70] sm:$0xff] %vm20186_vm0, %v13758_v40  ;;  %v13774_v46 = vld [vmem:[%s13673_s29 + $0x60] sm:$0xff]  ;;  %v315_v47 = vmul.u32 24, %v314_v35  ;;  %v326_v48 = vmul.u32 24, %v325_v36  ;;  %v292_v49 = vshrl.u32 %v13717_v27, 4 }
  0x1b   : > { %v13778_v50 = vadd.s32 72, %v13638_v3  ;;  %1345 = vst.msk [vmem:[#allocation2 + $0x78] sm:$0xff] %vm20186_vm0, %v13769_v45  ;;  %v13783_v51 = vld [vmem:[%s13673_s29 + $0x68] sm:$0xff]  ;;  %1346 = vst.msk [vmem:[#allocation2 + $0x80] sm:$0xff] %vm20186_vm0, %v13774_v46  ;;  %v13788_v52 = vld [vmem:[%s13673_s29 + $0x70] sm:$0xff]  ;;  %v283_v53 = vsub.s32 %v13638_v3, %v282_v41  ;;  %v337_v54 = vmul.u32 24, %v336_v42 }
  0x1c   : > { %v303_v55 = vshrl.u32 %v13734_v32, 4  ;;  %v13793_v56 = vadd.s32 80, %v13638_v3  ;;  %1347 = vst.msk [vmem:[#allocation2 + $0x88] sm:$0xff] %vm20186_vm0, %v13783_v51  ;;  %v13798_v57 = vld [vmem:[%s13673_s29 + $0x78] sm:$0xff]  ;;  %1348 = vst.msk [vmem:[#allocation2 + $0x90] sm:$0xff] %vm20186_vm0, %v13788_v52  ;;  %v13803_v58 = vld [vmem:[%s13673_s29 + $0x80] sm:$0xff]  ;;  %v316_v60 = vsub.s32 %v13642_v4, %v315_v47  ;;  %v327_v61 = vsub.s32 %v13645_v5, %v326_v48 }
  0x1d   : > { %v13806_v59 = vld [vmem:[%s13673_s29 + $0x88] sm:$0xff]  ;;  %v293_v62 = vmul.u32 24, %v292_v49  ;;  %v347_v63 = vshrl.u32 %v13748_v38, 4  ;;  %1349 = vst.msk [vmem:[#allocation2 + $0x98] sm:$0xff] %vm20186_vm0, %v13798_v57  ;;  %1350 = vst.msk [vmem:[#allocation2 + $0xa0] sm:$0xff] %vm20186_vm0, %v13803_v58  ;;  %v13818_v0 = vld [vmem:[%s13673_s29 + $0x90] sm:$0xff]  ;;  %v338_v4 = vsub.s32 %v13653_v7, %v337_v54 }
  0x1e   : > { %1351 = vst.msk [vmem:[#allocation2 + $0xa8] sm:$0xff] %vm20186_vm0, %v13806_v59  ;;  %v13821_v1 = vld [vmem:[%s13673_s29 + $0x98] sm:$0xff]  ;;  %v13824_v2 = vld [vmem:[%s13673_s29 + $0xa0] sm:$0xff]  ;;  %vm803_vm1 = vcmp.ne.s32.totalorder %v283_v53, 0  ;;  %vm851_vm2 = vcmp.lt.s32.totalorder %v283_v53, 0  ;;  %v947_v5 = vadd.s32 24, %v283_v53 }
  0x1f   : > { %1352 = vst.msk [vmem:[#allocation2 + $0xb0] sm:$0xff] %vm20186_vm0, %v13818_v0  ;;  %1353 = vst.msk [vmem:[#allocation2 + $0xb8] sm:$0xff] %vm20186_vm0, %v13821_v1  ;;  %vm806_vm3 = vcmp.ne.s32.totalorder %v316_v60, 0  ;;  %vm807_vm4 = vcmp.ne.s32.totalorder %v327_v61, 0  ;;  %vm854_vm5 = vcmp.lt.s32.totalorder %v316_v60, 0  ;;  %vm855_vm6 = vcmp.lt.s32.totalorder %v327_v61, 0 }
  0x20   : > { %1354 = vst.msk [vmem:[#allocation2 + $0xc0] sm:$0xff] %vm20186_vm0, %v13824_v2  ;;  %vm899_vm7 = vmand %vm851_vm2, %vm803_vm1  ;;  %v950_v9 = vadd.s32 24, %v316_v60  ;;  %v951_v7 = vadd.s32 24, %v327_v61  ;;  %v1433_v10 = vld [vmem:[#allocation2 + $0x36] sm:$0xff]  ;;  %vm808_vm9 = vcmp.ne.s32.totalorder %v338_v4, 0  ;;  %vm856_vm10 = vcmp.lt.s32.totalorder %v338_v4, 0 }
  0x21   : > { %vm902_vm8 = vmand %vm854_vm5, %vm806_vm3  ;;  %v13833_v13 = vld [vmem:[#allocation2 + $0x32] sm:$0xff]  ;;  %v1434_v14 = vld [vmem:[#allocation2 + $0x3e] sm:$0xff]  ;;  %v952_v15 = vadd.s32 24, %v338_v4  ;;  %v13835_v16 = vsel %vm899_vm7, %v947_v5, %v283_v53  ;;  %v294_v21 = vsub.s32 %v13656_v8, %v293_v62  ;;  %v304_v26 = vmul.u32 24, %v303_v55 }
  0x22   : > { %vm903_vm11 = vmand %vm855_vm6, %vm807_vm4  ;;  %20687 = vst [vmem:[#allocation3_spill] sm:$0xff] %v13835_v16  ;;  %v1430_v20 = vld [vmem:[#allocation2 + $0x1e] sm:$0xff]  ;;  %v13838_v27 = vsel %vm902_vm8, %v950_v9, %v316_v60  ;;  %vm20172_vm13 = vcmp.eq.s32.totalorder %v13835_v16, 0  ;;  %vm20173_vm14 = vcmp.eq.s32.totalorder %v13835_v16, 17  ;;  %v1435_v8 = vld [vmem:[#allocation2 + $0x46] sm:$0xff]  ;;  %v348_v60 = vmul.u32 24, %v347_v63 }
  0x23   : > { %20688 = vst [vmem:[#allocation4_spill] sm:$0xff] %v13838_v27  ;;  %v13840_v29 = vsel %vm903_vm11, %v951_v7, %v327_v61  ;;  %v1385_v31 = vld [vmem:[#allocation2 + $0x3a] sm:$0xff]  ;;  %v1386_v32 = vld [vmem:[#allocation2 + $0x42] sm:$0xff]  ;;  %vm904_vm12 = vmand %vm856_vm10, %vm808_vm9  ;;  %vm19947_vm15 = vcmp.eq.s32.totalorder %v13838_v27, 0  ;;  %vm20143_vm2 = vcmp.eq.s32.totalorder %v13838_v27, 17  ;;  %v1478_v47 = vsel %vm20173_vm14, %v1430_v20, %v13710_v24 }
  0x24   : > { %20689 = vst [vmem:[#allocation5_spill] sm:$0xff] %v13840_v29  ;;  %vm19945_vm1 = vcmp.eq.s32.totalorder %v13840_v29, 0  ;;  %vm19995_vm3 = vcmp.eq.s32.totalorder %v13840_v29, 17  ;;  %v1382_v35 = vld [vmem:[#allocation2 + $0x22] sm:$0xff]  ;;  %v1481_v36 = vsel %vm20143_vm2, %v1433_v10, %v13687_v18  ;;  %v13854_v41 = vsel %vm904_vm12, %v952_v15, %v338_v4  ;;  %v1387_v42 = vld [vmem:[#allocation2 + $0x4a] sm:$0xff] }
  0x25   : > { %v1482_v37 = vsel %vm19995_vm3, %v1434_v14, %v13690_v19  ;;  %20690 = vst [vmem:[#allocation6_spill] sm:$0xff] %v13854_v41  ;;  %v1431_v43 = vld [vmem:[#allocation2 + $0x26] sm:$0xff]  ;;  %v1529_v48 = vsel %vm19947_vm15, %v1385_v31, %v1481_v36  ;;  %vm19944_vm4 = vcmp.eq.s32.totalorder %v13854_v41, 0  ;;  %vm19957_vm5 = vcmp.eq.s32.totalorder %v13854_v41, 17  ;;  %v1436_v18 = vld [vmem:[#allocation2 + $0x4e] sm:$0xff] }
  0x26   : > { %v1530_v49 = vsel %vm19945_vm1, %v1386_v32, %v1482_v37  ;;  %1577 = vst.msk [vmem:[#allocation2 + $0x38] sm:$0xff] %vm20186_vm0, %v1529_v48  ;;  %v1483_v19 = vsel %vm19957_vm5, %v1435_v8, %v13700_v23  ;;  %v1526_v24 = vsel %vm20172_vm13, %v1382_v35, %v1478_v47  ;;  %v305_v53 = vsub.s32 %v13663_v11, %v304_v26  ;;  %v1383_v62 = vld [vmem:[#allocation2 + $0x2a] sm:$0xff]  ;;  %v1437_v37 = vld [vmem:[#allocation2 + $0x56] sm:$0xff] }
  0x27   : > { %1578 = vst.msk [vmem:[#allocation2 + $0x40] sm:$0xff] %vm20186_vm0, %v1530_v49  ;;  %vm804_vm6 = vcmp.ne.s32.totalorder %v294_v21, 0  ;;  %v1531_v54 = vsel %vm19944_vm4, %v1387_v42, %v1483_v19  ;;  %1574 = vst.msk [vmem:[#allocation2 + $0x20] sm:$0xff] %vm20186_vm0, %v1526_v24  ;;  %vm852_vm7 = vcmp.lt.s32.totalorder %v294_v21, 0  ;;  %v948_v55 = vadd.s32 24, %v294_v21  ;;  %v1432_v4 = vld [vmem:[#allocation2 + $0x2e] sm:$0xff] }
  0x28   : > { %1579 = vst.msk [vmem:[#allocation2 + $0x48] sm:$0xff] %vm20186_vm0, %v1531_v54  ;;  %vm805_vm8 = vcmp.ne.s32.totalorder %v305_v53, 0  ;;  %vm853_vm9 = vcmp.lt.s32.totalorder %v305_v53, 0  ;;  %vm900_vm10 = vmand %vm852_vm7, %vm804_vm6  ;;  %v949_v23 = vadd.s32 24, %v305_v53  ;;  %v358_v61 = vshrl.u32 %v13763_v44, 4  ;;  %v13928_v35 = vld [vmem:[%s13673_s29 + $0xa8] sm:$0xff] }
  0x29   : > { %vm901_vm11 = vmand %vm853_vm9, %vm805_vm8  ;;  %v13880_v11 = vsel %vm900_vm10, %v948_v55, %v294_v21  ;;  %v349_v5 = vsub.s32 %v13666_v12, %v348_v60  ;;  %v13884_v9 = vmul.u32.u64.low 2863311531, %v13720_v28  ;;  %v13885_v7 = vmul.u32.u64.high 2863311531, %v13720_v28, %v13884_v9  ;;  %1355 = vst.msk [vmem:[#allocation2 + $0xc8] sm:$0xff] %vm20186_vm0, %v13928_v35  ;;  %v13945_v49 = vld [vmem:[%s13673_s29 + $0xb0] sm:$0xff]  ;;  %v13948_v19 = vld [vmem:[%s13673_s29 + $0xb8] sm:$0xff] }
  0x2a   : > { %20691 = vst [vmem:[#allocation7_spill] sm:$0xff] %v13880_v11  ;;  %v13887_v38 = vsel %vm901_vm11, %v949_v23, %v305_v53  ;;  %vm19993_vm12 = vcmp.eq.s32.totalorder %v13880_v11, 0  ;;  %vm20171_vm6 = vcmp.eq.s32.totalorder %v13880_v11, 17  ;;  %v359_v63 = vmul.u32 24, %v358_v61  ;;  %1356 = vst.msk [vmem:[#allocation2 + $0xd0] sm:$0xff] %vm20186_vm0, %v13945_v49  ;;  %v13962_v54 = vld [vmem:[%s13673_s29 + $0xc0] sm:$0xff] }
  0x2b   : > { %20692 = vst [vmem:[#allocation8_spill] sm:$0xff] %v13887_v38  ;;  %vm19953_vm7 = vcmp.eq.s32.totalorder %v13887_v38, 0  ;;  %vm20144_vm8 = vcmp.eq.s32.totalorder %v13887_v38, 17  ;;  %v1479_v44 = vsel %vm20171_vm6, %v1431_v43, %v13713_v25  ;;  %vm809_vm9 = vcmp.ne.s32.totalorder %v349_v5, 0  ;;  %1357 = vst.msk [vmem:[#allocation2 + $0xd8] sm:$0xff] %vm20186_vm0, %v13948_v19  ;;  %v13965_v55 = vld [vmem:[%s13673_s29 + $0xc8] sm:$0xff] }
  0x2c   : > { %v1480_v12 = vsel %vm20144_vm8, %v1432_v4, %v13684_v17  ;;  %v1527_v10 = vsel %vm19993_vm12, %v1383_v62, %v1479_v44  ;;  %vm857_vm10 = vcmp.lt.s32.totalorder %v349_v5, 0  ;;  %v953_v14 = vadd.s32 24, %v349_v5  ;;  %v1389_v60 = vld [vmem:[#allocation2 + $0x5a] sm:$0xff]  ;;  %1358 = vst.msk [vmem:[#allocation2 + $0xe0] sm:$0xff] %vm20186_vm0, %v13962_v54  ;;  %1359 = vst.msk [vmem:[#allocation2 + $0xe8] sm:$0xff] %vm20186_vm0, %v13965_v55 }
  0x2d   : > { %v13901_v15 = vld [vmem:[#allocation2 + $0x38] sm:$0xff]  ;;  %v1528_v21 = vsel %vm19953_vm7, %v13833_v13, %v1480_v12  ;;  %1575 = vst.msk [vmem:[#allocation2 + $0x28] sm:$0xff] %vm20186_vm0, %v1527_v10  ;;  %vm905_vm11 = vmand %vm857_vm10, %vm809_vm9  ;;  %v360_v25 = vsub.s32 %v13697_v22, %v359_v63  ;;  %v369_v17 = vshrl.u32 %v13885_v7, 4  ;;  %v13912_v26 = vadd.s32 88, %v13638_v3  ;;  %v13986_v7 = vld [vmem:[%s13673_s29 + $0xe0] sm:$0xff] }
  0x2e   : > { %v13903_v20 = vld [vmem:[#allocation2 + $0x40] sm:$0xff]  ;;  %1625 = vst.msk [vmem:[#allocation2 + $0x8] sm:$0xff] %vm20186_vm0, %v13901_v15  ;;  %1576 = vst.msk [vmem:[#allocation2 + $0x30] sm:$0xff] %vm20186_vm0, %v1528_v21  ;;  %v13921_v31 = vsel %vm905_vm11, %v953_v14, %v349_v5  ;;  %v1388_v22 = vld [vmem:[#allocation2 + $0x52] sm:$0xff]  ;;  %v13924_v32 = vmul.u32.u64.low 2863311531, %v13778_v50  ;;  %v13925_v8 = vmul.u32.u64.high 2863311531, %v13778_v50, %v13924_v32 }
  0x2f   : > { %1626 = vst.msk [vmem:[#allocation2 + $0x10] sm:$0xff] %vm20186_vm0, %v13903_v20  ;;  %20693 = vst [vmem:[#allocation9_spill] sm:$0xff] %v13921_v31  ;;  %v13930_v36 = vld [vmem:[#allocation2 + $0x48] sm:$0xff]  ;;  %vm19946_vm9 = vcmp.eq.s32.totalorder %v13921_v31, 0  ;;  %vm19955_vm10 = vcmp.eq.s32.totalorder %v13921_v31, 17  ;;  %v370_v42 = vmul.u32 24, %v369_v17 }
  0x30   : > { %vm810_vm11 = vcmp.ne.s32.totalorder %v360_v25, 0  ;;  %1627 = vst.msk [vmem:[#allocation2 + $0x18] sm:$0xff] %vm20186_vm0, %v13930_v36  ;;  %v1484_v43 = vsel %vm19955_vm10, %v1436_v18, %v13726_v30  ;;  %vm858_vm4 = vcmp.lt.s32.totalorder %v360_v25, 0  ;;  %v954_v47 = vadd.s32 24, %v360_v25  ;;  %v1438_v23 = vld [vmem:[#allocation2 + $0x5e] sm:$0xff]  ;;  %v13980_v5 = vld [vmem:[%s13673_s29 + $0xd0] sm:$0xff] }
  0x31   : > { %v13942_v48 = vadd.s32 96, %v13638_v3  ;;  %v1532_v24 = vsel %vm19946_vm9, %v1388_v22, %v1484_v43  ;;  %v371_v53 = vsub.s32 %v13720_v28, %v370_v42  ;;  %vm906_vm1 = vmand %vm858_vm4, %vm810_vm11  ;;  %v380_v61 = vshrl.u32 %v13925_v8, 4  ;;  %v13983_v9 = vld [vmem:[%s13673_s29 + $0xd8] sm:$0xff]  ;;  %v1713_v63 = vld [vmem:[#allocation2 + $0x20] sm:$0xff]  ;;  %1360 = vst.msk [vmem:[#allocation2 + $0xf0] sm:$0xff] %vm20186_vm0, %v13980_v5 }
  0x32   : > { %v13954_v30 = vmul.u32.u64.low 2863311531, %v13793_v56  ;;  %v13955_v18 = vmul.u32.u64.high 2863311531, %v13793_v56, %v13954_v30  ;;  %1580 = vst.msk [vmem:[#allocation2 + $0x50] sm:$0xff] %vm20186_vm0, %v1532_v24  ;;  %v13968_v28 = vsel %vm906_vm1, %v954_v47, %v360_v25  ;;  %v1390_v12 = vld [vmem:[#allocation2 + $0x62] sm:$0xff]  ;;  %1361 = vst.msk [vmem:[#allocation2 + $0xf8] sm:$0xff] %vm20186_vm0, %v13983_v9  ;;  %v13999_v14 = vld [vmem:[%s13673_s29 + $0xf0] sm:$0xff] }
  0x33   : > { %20694 = vst [vmem:[#allocation10_spill] sm:$0xff] %v13968_v28  ;;  %v13972_v62 = vmul.u32.u64.low 2863311531, %v13912_v26  ;;  %v13973_v4 = vmul.u32.u64.high 2863311531, %v13912_v26, %v13972_v62  ;;  %vm811_vm1 = vcmp.ne.s32.totalorder %v371_v53, 0  ;;  %vm859_vm4 = vcmp.lt.s32.totalorder %v371_v53, 0  ;;  %v13994_v10 = vld [vmem:[%s13673_s29 + $0xe8] sm:$0xff] }
  0x34   : > { %v955_v44 = vadd.s32 24, %v371_v53  ;;  %vm19951_vm11 = vcmp.eq.s32.totalorder %v13968_v28, 0  ;;  %1362 = vst.msk [vmem:[#allocation2 + $0x100] sm:$0xff] %vm20186_vm0, %v13986_v7  ;;  %v1714_v21 = vld [vmem:[#allocation2 + $0x28] sm:$0xff]  ;;  %vm907_vm9 = vmand %vm859_vm4, %vm811_vm1  ;;  %vm19954_vm15 = vcmp.eq.s32.totalorder %v13968_v28, 17  ;;  %v381_v25 = vmul.u32 24, %v380_v61 }
  0x35   : > { %v14003_v17 = vmul.u32.u64.low 2863311531, %v13942_v48  ;;  %v14004_v22 = vmul.u32.u64.high 2863311531, %v13942_v48, %v14003_v17  ;;  %1363 = vst.msk [vmem:[#allocation2 + $0x108] sm:$0xff] %vm20186_vm0, %v13994_v10  ;;  %v14009_v32 = vld [vmem:[%s13673_s29 + $0xf8] sm:$0xff]  ;;  %1364 = vst.msk [vmem:[#allocation2 + $0x110] sm:$0xff] %vm20186_vm0, %v13999_v14  ;;  %v1710_v8 = vld [vmem:[#allocation2 + $0x8] sm:$0xff]  ;;  %v1485_v24 = vsel %vm19954_vm15, %v1437_v37, %v13737_v33 }
  0x36   : > { %v1711_v42 = vld [vmem:[#allocation2 + $0x10] sm:$0xff]  ;;  %v14013_v47 = vsel %vm907_vm9, %v955_v44, %v371_v53  ;;  %v391_v30 = vshrl.u32 %v13955_v18, 4  ;;  %v14020_v61 = vadd.s32 104, %v13638_v3  ;;  %1365 = vst.msk [vmem:[#allocation2 + $0x118] sm:$0xff] %vm20186_vm0, %v14009_v32  ;;  %v1439_v53 = vld [vmem:[#allocation2 + $0x66] sm:$0xff]  ;;  %v1533_v37 = vsel %vm19951_vm11, %v1389_v60, %v1485_v24 }
  0x37   : > { %v1715_v43 = vld [vmem:[#allocation2 + $0x30] sm:$0xff]  ;;  %20695 = vst [vmem:[#allocation11_spill] sm:$0xff] %v14013_v47  ;;  %v1758_v62 = vpack.c.bf16 %v1711_v42, %v1710_v8  ;;  %vm19950_vm1 = vcmp.eq.s32.totalorder %v14013_v47, 0  ;;  %vm19952_vm9 = vcmp.eq.s32.totalorder %v14013_v47, 17  ;;  %v14027_v44 = vld [vmem:[%s13673_s29 + $0x100] sm:$0xff]  ;;  %v1712_v13 = vld [vmem:[#allocation2 + $0x18] sm:$0xff]  ;;  %v382_v18 = vsub.s32 %v13778_v50, %v381_v25 }
  0x38   : > { %v1760_v17 = vpack.c.bf16 %v1715_v43, %v1714_v21  ;;  %v1486_v33 = vsel %vm19952_vm9, %v1438_v23, %v13740_v34  ;;  %v392_v41 = vmul.u32 24, %v391_v30  ;;  %v14036_v8 = vld [vmem:[%s13673_s29 + $0x108] sm:$0xff]  ;;  %1366 = vst.msk [vmem:[#allocation2 + $0x120] sm:$0xff] %vm20186_vm0, %v14027_v44  ;;  %v14041_v21 = vld [vmem:[%s13673_s29 + $0x110] sm:$0xff]  ;;  %v1759_v42 = vpack.c.bf16 %v1713_v63, %v1712_v13  ;;  %1581 = vst.msk [vmem:[#allocation2 + $0x58] sm:$0xff] %vm20186_vm0, %v1533_v37 }
  0x39   : > { %11736 = vmatprep.mubr.msk.bf16.mxu0 %vm20186_vm0, %v1758_v62  ;;  %v1534_v43 = vsel %vm19950_vm1, %v1390_v12, %v1486_v33  ;;  %v402_v34 = vshrl.u32 %v13973_v4, 4  ;;  %v413_v50 = vshrl.u32 %v14004_v22, 4  ;;  %v13545_v60 = vld [vmem:[%s19939_s1 + $0x8] sm:$0xff]   ;;  %1367 = vst.msk [vmem:[#allocation2 + $0x128] sm:$0xff] %vm20186_vm0, %v14036_v8  ;;  %1368 = vst.msk [vmem:[#allocation2 + $0x130] sm:$0xff] %vm20186_vm0, %v14041_v21  ;;  %v14056_v13 = vld [vmem:[#allocation2 + $0x50] sm:$0xff] }
  0x3a   : > { %1582 = vst.msk [vmem:[#allocation2 + $0x60] sm:$0xff] %vm20186_vm0, %v1534_v43  ;;  %v393_v23 = vsub.s32 %v13793_v56, %v392_v41  ;;  %vm812_vm4 = vcmp.ne.s32.totalorder %v382_v18, 0  ;;  %vm860_vm1 = vcmp.lt.s32.totalorder %v382_v18, 0  ;;  %v956_v4 = vadd.s32 24, %v382_v18  ;;  %11737 = vmatmul.mubr.msk.bf16.vlgmr.msra.gmra.mrb[0].mxu0 %vm20186_vm0, %v1759_v42  ;;  %v1391_v24 = vld [vmem:[#allocation2 + $0x6a] sm:$0xff]  ;;  %v1441_v42 = vld [vmem:[#allocation2 + $0x76] sm:$0xff] }
  0x3b   : > { %v1762_v63 = vpack.c.bf16 %v14056_v13, %v13930_v36  ;;  %vm908_vm11 = vmand %vm860_vm1, %vm812_vm4  ;;  %v403_v12 = vmul.u32 24, %v402_v34  ;;  %v414_v25 = vmul.u32 24, %v413_v50  ;;  %v14064_v22 = vadd.s32 112, %v13638_v3  ;;  %11785 = vmatpush3.bf16.msra.mxu0 %v13650_v6  ;;  %11740 = vmatprep.mubr.msk.bf16.mxu0 %vm20186_vm0, %v1760_v17  ;;  %v1440_v36 = vld [vmem:[#allocation2 + $0x6e] sm:$0xff]  ;;  %v13546_v28 = vld [vmem:[%s19939_s1 + $0x20] sm:$0xff]  }
  0x3c   : > { %vm813_vm9 = vcmp.ne.s32.totalorder %v393_v23, 0  ;;  %vm861_vm7 = vcmp.lt.s32.totalorder %v393_v23, 0  ;;  %v957_v56 = vadd.s32 24, %v393_v23  ;;  %v14068_v41 = vsel %vm908_vm11, %v956_v4, %v382_v18  ;;  %11786 = vmatprep.subr.bf16.mxu0 %v13545_v60  ;;  %v1392_v17 = vld [vmem:[#allocation2 + $0x72] sm:$0xff] }
  0x3d   : > { %20696 = vst [vmem:[#allocation12_spill] sm:$0xff] %v14068_v41  ;;  %vm909_vm15 = vmand %vm861_vm7, %vm813_vm9  ;;  %vm19958_vm10 = vcmp.eq.s32.totalorder %v14068_v41, 0  ;;  %vm19956_vm1 = vcmp.eq.s32.totalorder %v14068_v41, 17  ;;  %v404_v30 = vsub.s32 %v13912_v26, %v403_v12  ;;  %v415_v62 = vsub.s32 %v13942_v48, %v414_v25 }
  0x3e   : > { %v14074_v6 = vsel %vm909_vm15, %v957_v56, %v393_v23  ;;  %v1487_v33 = vsel %vm19956_vm1, %v1439_v53, %v13753_v39  ;;  %v14080_v37 = vmul.u32.u64.low 2863311531, %v14020_v61  ;;  %v14081_v18 = vmul.u32.u64.high 2863311531, %v14020_v61, %v14080_v37  ;;  %v1442_v23 = vld [vmem:[#allocation2 + $0x7e] sm:$0xff] }
  0x3f   : > { %20697 = vst [vmem:[#allocation13_spill] sm:$0xff] %v14074_v6  ;;  %vm19977_vm7 = vcmp.eq.s32.totalorder %v14074_v6, 0  ;;  %vm19992_vm11 = vcmp.eq.s32.totalorder %v14074_v6, 17  ;;  %v1535_v26 = vsel %vm19958_vm10, %v1391_v24, %v1487_v33  ;;  %vm814_vm9 = vcmp.ne.s32.totalorder %v404_v30, 0  ;;  %v14087_v48 = vld [vmem:[#allocation2 + $0x58] sm:$0xff]  ;;  %11787 = vmatpush3.bf16.msra.mxu0 %v13545_v60 }
  0x40   : > { %v1488_v43 = vsel %vm19992_vm11, %v1440_v36, %v13758_v40  ;;  %1583 = vst.msk [vmem:[#allocation2 + $0x68] sm:$0xff] %vm20186_vm0, %v1535_v26  ;;  %vm815_vm15 = vcmp.ne.s32.totalorder %v415_v62, 0  ;;  %vm862_vm4 = vcmp.lt.s32.totalorder %v404_v30, 0  ;;  %vm863_vm1 = vcmp.lt.s32.totalorder %v415_v62, 0  ;;  %v1393_v36 = vld [vmem:[#allocation2 + $0x7a] sm:$0xff]  ;;  %v14212_v40 = vld [vmem:[%s13673_s29 + $0x168] sm:$0xff]  ;;  %11836 = vmatprep.subr.bf16.mxu0 %v13546_v28 }
  0x41   : > { %v14093_v39 = vld [vmem:[#allocation2 + $0x60] sm:$0xff]  ;;  %v1536_v53 = vsel %vm19977_vm7, %v1392_v17, %v1488_v43  ;;  %vm910_vm5 = vmand %vm862_vm4, %vm814_vm9  ;;  %v958_v34 = vadd.s32 24, %v404_v30  ;;  %v959_v50 = vadd.s32 24, %v415_v62  ;;  %v14098_v13 = vadd.s32 120, %v13638_v3  ;;  %v14147_v43 = vld [vmem:[%s13673_s29 + $0x128] sm:$0xff]  ;;  %1379 = vst.msk [vmem:[#allocation2 + $0x188] sm:$0xff] %vm20186_vm0, %v14212_v40 }
  0x42   : > { %1584 = vst.msk [vmem:[#allocation2 + $0x70] sm:$0xff] %vm20186_vm0, %v1536_v53  ;;  %vm911_vm10 = vmand %vm863_vm1, %vm815_vm15  ;;  %v424_v60 = vshrl.u32 %v14081_v18, 4  ;;  %v14105_v4 = vmul.u32.u64.low 2863311531, %v14064_v22  ;;  %v14106_v12 = vmul.u32.u64.high 2863311531, %v14064_v22, %v14105_v4  ;;  %v20698_v25 = vpack.c.bf16 %v13903_v20, %v13901_v15  ;;  %v1394_v17 = vld [vmem:[#allocation2 + $0x82] sm:$0xff]  ;;  %v14123_v18 = vld [vmem:[%s13673_s29 + $0x118] sm:$0xff] }
  0x43   : > { %v14112_v56 = vsel %vm910_vm5, %v958_v34, %v404_v30  ;;  %v14114_v24 = vsel %vm911_vm10, %v959_v50, %v415_v62  ;;  %v14117_v33 = vadd.s32 128, %v13638_v3  ;;  %v14120_v37 = vadd.s32 136, %v13638_v3  ;;  %v14130_v15 = vld [vmem:[#allocation2 + $0x86] sm:$0xff]  ;;  %1369 = vst.msk [vmem:[#allocation2 + $0x138] sm:$0xff] %vm20186_vm0, %v14123_v18  ;;  %v14152_v53 = vld [vmem:[%s13673_s29 + $0x130] sm:$0xff]  ;;  %v14155_v34 = vld [vmem:[%s13673_s29 + $0x138] sm:$0xff] }
  0x44   : > { %11741 = vmatmul.mubr.msk.bf16.gmra.mrb[4].mxu0 %vm20186_vm0, %v20698_v25  ;;  %20699 = vst [vmem:[#allocation14_spill] sm:$0xff] %v14112_v56  ;;  %20700 = vst [vmem:[#allocation15_spill] sm:$0xff] %v14114_v24  ;;  %vm19976_vm5 = vcmp.eq.s32.totalorder %v14112_v56, 0  ;;  %vm19965_vm10 = vcmp.eq.s32.totalorder %v14114_v24, 0  ;;  %vm19991_vm1 = vcmp.eq.s32.totalorder %v14112_v56, 17  ;;  %vm19978_vm9 = vcmp.eq.s32.totalorder %v14114_v24, 17 }
  0x45   : > { %11744 = vmatprep.mubr.msk.bf16.mxu0 %vm20186_vm0, %v1762_v63  ;;  %v14135_v20 = vld [vmem:[%s13673_s29 + $0x120] sm:$0xff]  ;;  %v1489_v63 = vsel %vm19991_vm1, %v1441_v42, %v13769_v45  ;;  %v1490_v30 = vsel %vm19978_vm9, %v1442_v23, %v13774_v46  ;;  %v425_v62 = vmul.u32 24, %v424_v60  ;;  %v14144_v26 = vadd.s32 144, %v13638_v3  ;;  %1371 = vst.msk [vmem:[#allocation2 + $0x148] sm:$0xff] %vm20186_vm0, %v14147_v43  ;;  %1372 = vst.msk [vmem:[#allocation2 + $0x150] sm:$0xff] %vm20186_vm0, %v14152_v53  ;;  %v14175_v60 = vld [vmem:[%s13673_s29 + $0x148] sm:$0xff] }
  0x46   : > { %1370 = vst.msk [vmem:[#allocation2 + $0x140] sm:$0xff] %vm20186_vm0, %v14135_v20  ;;  %v1537_v45 = vsel %vm19976_vm5, %v1393_v36, %v1489_v63  ;;  %v1538_v46 = vsel %vm19965_vm10, %v1394_v17, %v1490_v30  ;;  %v435_v42 = vshrl.u32 %v14106_v12, 4  ;;  %v14163_v50 = vadd.s32 152, %v13638_v3  ;;  %1373 = vst.msk [vmem:[#allocation2 + $0x158] sm:$0xff] %vm20186_vm0, %v14155_v34  ;;  %v14172_v23 = vld [vmem:[%s13673_s29 + $0x140] sm:$0xff]  ;;  %v14178_v4 = vld [vmem:[%s13673_s29 + $0x150] sm:$0xff] }
  0x47   : > { %v1722_v12 = vld [vmem:[#allocation2 + $0x68] sm:$0xff]  ;;  %1585 = vst.msk [vmem:[#allocation2 + $0x78] sm:$0xff] %vm20186_vm0, %v1537_v45  ;;  %1586 = vst.msk [vmem:[#allocation2 + $0x80] sm:$0xff] %vm20186_vm0, %v1538_v46  ;;  %v426_v25 = vsub.s32 %v14020_v61, %v425_v62  ;;  %v14184_v36 = vmul.u32.u64.low 2863311531, %v14098_v13  ;;  %v14185_v17 = vmul.u32.u64.high 2863311531, %v14098_v13, %v14184_v36  ;;  %v14188_v63 = vadd.s32 160, %v13638_v3 }
  0x48   : > { %1374 = vst.msk [vmem:[#allocation2 + $0x160] sm:$0xff] %vm20186_vm0, %v14172_v23  ;;  %1375 = vst.msk [vmem:[#allocation2 + $0x168] sm:$0xff] %vm20186_vm0, %v14175_v60  ;;  %v14195_v30 = vld [vmem:[%s13673_s29 + $0x158] sm:$0xff]  ;;  %v14200_v45 = vld [vmem:[%s13673_s29 + $0x160] sm:$0xff]  ;;  %v436_v61 = vmul.u32 24, %v435_v42  ;;  %v14207_v36 = vadd.s32 168, %v13638_v3  ;;  %v20701_v31 = vpack.c.bf16 %v14093_v39, %v14087_v48 }
  0x49   : > { %1376 = vst.msk [vmem:[#allocation2 + $0x170] sm:$0xff] %vm20186_vm0, %v14178_v4  ;;  %v14203_v62 = vmul.u32.u64.low 2863311531, %v14117_v33  ;;  %v14204_v46 = vmul.u32.u64.high 2863311531, %v14117_v33, %v14203_v62  ;;  %1377 = vst.msk [vmem:[#allocation2 + $0x178] sm:$0xff] %vm20186_vm0, %v14195_v30  ;;  %v1723_v24 = vld [vmem:[#allocation2 + $0x70] sm:$0xff]  ;;  %vm816_vm15 = vcmp.ne.s32.totalorder %v426_v25, 0 }
  0x4a   : > { %1378 = vst.msk [vmem:[#allocation2 + $0x180] sm:$0xff] %vm20186_vm0, %v14200_v45  ;;  %vm864_vm4 = vcmp.lt.s32.totalorder %v426_v25, 0  ;;  %v960_v56 = vadd.s32 24, %v426_v25  ;;  %v14217_v42 = vadd.s32 176, %v13638_v3  ;;  %v1764_v62 = vpack.c.bf16 %v1723_v24, %v1722_v12 }
  0x4b   : > { %v437_v41 = vsub.s32 %v14064_v22, %v436_v61  ;;  %vm912_vm10 = vmand %vm864_vm4, %vm816_vm15  ;;  %v14223_v6 = vmul.u32.u64.low 2863311531, %v14120_v37  ;;  %v14224_v47 = vmul.u32.u64.high 2863311531, %v14120_v37, %v14223_v6  ;;  %v446_v24 = vshrl.u32 %v14185_v17, 4  ;;  %v1395_v61 = vld [vmem:[#allocation2 + $0x8a] sm:$0xff] }
  0x4c   : > { %11745 = vmatmul.mubr.msk.bf16.gmra.mrb[8].mxu0 %vm20186_vm0, %v20701_v31  ;;  %v14233_v29 = vsel %vm912_vm10, %v960_v56, %v426_v25  ;;  %v14237_v22 = vmul.u32.u64.low 2863311531, %v14144_v26  ;;  %v14238_v12 = vmul.u32.u64.high 2863311531, %v14144_v26, %v14237_v22  ;;  %v1444_v31 = vld [vmem:[#allocation2 + $0x8e] sm:$0xff]  ;;  %v457_v39 = vshrl.u32 %v14204_v46, 4  ;;  %v1445_v46 = vld [vmem:[#allocation2 + $0x96] sm:$0xff] }
  0x4d   : > { %20702 = vst [vmem:[#allocation16_spill] sm:$0xff] %v14233_v29  ;;  %11748 = vmatprep.mubr.msk.bf16.mxu0 %vm20186_vm0, %v1764_v62  ;;  %vm817_vm15 = vcmp.ne.s32.totalorder %v437_v41, 0  ;;  %vm865_vm4 = vcmp.lt.s32.totalorder %v437_v41, 0  ;;  %v961_v6 = vadd.s32 24, %v437_v41  ;;  %vm19987_vm5 = vcmp.eq.s32.totalorder %v14233_v29, 0  ;;  %v1396_v22 = vld [vmem:[#allocation2 + $0x92] sm:$0xff] }
  0x4e   : > { %vm913_vm7 = vmand %vm865_vm4, %vm817_vm15  ;;  %vm19990_vm9 = vcmp.eq.s32.totalorder %v14233_v29, 17  ;;  %v447_v48 = vmul.u32 24, %v446_v24  ;;  %v14245_v56 = vadd.s32 184, %v13638_v3  ;;  %v1724_v25 = vld [vmem:[#allocation2 + $0x78] sm:$0xff]  ;;  %v1725_v17 = vld [vmem:[#allocation2 + $0x80] sm:$0xff]  ;;  %v468_v27 = vshrl.u32 %v14224_v47, 4 }
  0x4f   : > { %v14247_v62 = vsel %vm913_vm7, %v961_v6, %v437_v41  ;;  %v1491_v28 = vsel %vm19990_vm9, %v14130_v15, %v13783_v51  ;;  %v14255_v11 = vadd.s32 192, %v13638_v3  ;;  %v1765_v24 = vpack.c.bf16 %v1725_v17, %v1724_v25  ;;  %v15039_v29 = vld [vmem:[#allocation2 + $0x61] sm:$0xff] }
  0x50   : > { %20703 = vst [vmem:[#allocation17_spill] sm:$0xff] %v14247_v62  ;;  %vm19988_vm10 = vcmp.eq.s32.totalorder %v14247_v62, 0  ;;  %vm19989_vm15 = vcmp.eq.s32.totalorder %v14247_v62, 17  ;;  %v1539_v41 = vsel %vm19987_vm5, %v1395_v61, %v1491_v28  ;;  %v448_v51 = vsub.s32 %v14098_v13, %v447_v48  ;;  %v1447_v28 = vld [vmem:[#allocation2 + $0xa6] sm:$0xff]  ;;  %20747 = vst [vmem:[#allocation61_spill] sm:$0xff] %v15039_v29 }
  0x51   : > { %v1492_v6 = vsel %vm19989_vm15, %v1444_v31, %v13788_v52  ;;  %1587 = vst.msk [vmem:[#allocation2 + $0x88] sm:$0xff] %vm20186_vm0, %v1539_v41  ;;  %v458_v47 = vmul.u32 24, %v457_v39  ;;  %v469_v15 = vmul.u32 24, %v468_v27  ;;  %v479_v17 = vshrl.u32 %v14238_v12, 4  ;;  %v1397_v39 = vld [vmem:[#allocation2 + $0x9a] sm:$0xff]  ;;  %v15041_v62 = vld [vmem:[#allocation2 + $0x69] sm:$0xff] }
  0x52   : > { %v1540_v25 = vsel %vm19988_vm10, %v1396_v22, %v1492_v6  ;;  %v14270_v38 = vmul.u32.u64.low 2863311531, %v14163_v50  ;;  %v14271_v16 = vmul.u32.u64.high 2863311531, %v14163_v50, %v14270_v38  ;;  %vm818_vm7 = vcmp.ne.s32.totalorder %v448_v51, 0  ;;  %v1446_v22 = vld [vmem:[#allocation2 + $0x9e] sm:$0xff]  ;;  %20748 = vst [vmem:[#allocation62_spill] sm:$0xff] %v15041_v62 }
  0x53   : > { %1588 = vst.msk [vmem:[#allocation2 + $0x90] sm:$0xff] %vm20186_vm0, %v1540_v25  ;;  %v459_v61 = vsub.s32 %v14117_v33, %v458_v47  ;;  %vm866_vm4 = vcmp.lt.s32.totalorder %v448_v51, 0  ;;  %v962_v52 = vadd.s32 24, %v448_v51  ;;  %v470_v27 = vsub.s32 %v14120_v37, %v469_v15  ;;  %v1398_v33 = vld [vmem:[#allocation2 + $0xa2] sm:$0xff] }
  0x54   : > { %11749 = vmatmul.mubr.msk.bf16.gmra.mrb[12].mxu0 %vm20186_vm0, %v1765_v24  ;;  %vm914_vm5 = vmand %vm866_vm4, %vm818_vm7  ;;  %v480_v13 = vmul.u32 24, %v479_v17  ;;  %v14278_v31 = vmul.u32.u64.low 2863311531, %v14188_v63  ;;  %v14279_v12 = vmul.u32.u64.high 2863311531, %v14188_v63, %v14278_v31 }
  0x55   : > { %vm819_vm10 = vcmp.ne.s32.totalorder %v459_v61, 0  ;;  %vm867_vm15 = vcmp.lt.s32.totalorder %v459_v61, 0  ;;  %v963_v38 = vadd.s32 24, %v459_v61  ;;  %v14281_v48 = vsel %vm914_vm5, %v962_v52, %v448_v51  ;;  %v1399_v51 = vld [vmem:[#allocation2 + $0xaa] sm:$0xff]  ;;  %v1400_v31 = vld [vmem:[#allocation2 + $0xb2] sm:$0xff] }
  0x56   : > { %20704 = vst [vmem:[#allocation18_spill] sm:$0xff] %v14281_v48  ;;  %vm915_vm9 = vmand %vm867_vm15, %vm819_vm10  ;;  %vm19996_vm1 = vcmp.eq.s32.totalorder %v14281_v48, 0  ;;  %vm19994_vm11 = vcmp.eq.s32.totalorder %v14281_v48, 17  ;;  %v481_v37 = vsub.s32 %v14144_v26, %v480_v13  ;;  %vm820_vm7 = vcmp.ne.s32.totalorder %v470_v27, 0  ;;  %v15028_v48 = vld [vmem:[%s19939_s1 + $0x40] sm:$0xff]  }
  0x57   : > { %v14286_v24 = vsel %vm915_vm9, %v963_v38, %v459_v61  ;;  %v1493_v41 = vsel %vm19994_vm11, %v1445_v46, %v13798_v57  ;;  %vm868_vm5 = vcmp.lt.s32.totalorder %v470_v27, 0  ;;  %v964_v6 = vadd.s32 24, %v470_v27  ;;  %v1448_v61 = vld [vmem:[#allocation2 + $0xae] sm:$0xff] }
  0x58   : > { %20705 = vst [vmem:[#allocation19_spill] sm:$0xff] %v14286_v24  ;;  %v1726_v47 = vld [vmem:[#allocation2 + $0x88] sm:$0xff]  ;;  %vm19999_vm10 = vcmp.eq.s32.totalorder %v14286_v24, 0  ;;  %vm20142_vm15 = vcmp.eq.s32.totalorder %v14286_v24, 17  ;;  %v1541_v15 = vsel %vm19996_vm1, %v1397_v39, %v1493_v41  ;;  %vm821_vm4 = vcmp.ne.s32.totalorder %v481_v37, 0  ;;  %vm916_vm12 = vmand %vm868_vm5, %vm820_vm7  ;;  %v1449_v39 = vld [vmem:[#allocation2 + $0xb6] sm:$0xff] }
  0x59   : > { %v1494_v26 = vsel %vm20142_vm15, %v1446_v22, %v13803_v58  ;;  %1589 = vst.msk [vmem:[#allocation2 + $0x98] sm:$0xff] %vm20186_vm0, %v1541_v15  ;;  %vm869_vm9 = vcmp.lt.s32.totalorder %v481_v37, 0  ;;  %v965_v57 = vadd.s32 24, %v481_v37  ;;  %v14299_v46 = vsel %vm916_vm12, %v964_v6, %v470_v27 }
  0x5a   : > { %20706 = vst [vmem:[#allocation20_spill] sm:$0xff] %v14299_v46  ;;  %v1727_v25 = vld [vmem:[#allocation2 + $0x90] sm:$0xff]  ;;  %v1542_v17 = vsel %vm19999_vm10, %v1398_v33, %v1494_v26  ;;  %vm917_vm11 = vmand %vm869_vm9, %vm821_vm4  ;;  %vm19998_vm3 = vcmp.eq.s32.totalorder %v14299_v46, 0  ;;  %vm20017_vm1 = vcmp.eq.s32.totalorder %v14299_v46, 17  ;;  %v490_v52 = vshrl.u32 %v14271_v16, 4  ;;  %v15002_v46 = vld [vmem:[#allocation2 + $0x21] sm:$0xff] }
  0x5b   : > { %v1766_v13 = vpack.c.bf16 %v1727_v25, %v1726_v47  ;;  %1590 = vst.msk [vmem:[#allocation2 + $0xa0] sm:$0xff] %vm20186_vm0, %v1542_v17  ;;  %v14307_v58 = vsel %vm917_vm11, %v965_v57, %v481_v37  ;;  %v1495_v27 = vsel %vm20017_vm1, %v1447_v28, %v13806_v59  ;;  %v501_v38 = vshrl.u32 %v14279_v12, 4  ;;  %v1401_v25 = vld [vmem:[#allocation2 + $0xba] sm:$0xff]  ;;  %20739 = vst [vmem:[#allocation53_spill] sm:$0xff] %v15002_v46 }
  0x5c   : > { %20707 = vst [vmem:[#allocation21_spill] sm:$0xff] %v14307_v58  ;;  %vm19997_vm12 = vcmp.eq.s32.totalorder %v14307_v58, 0  ;;  %vm20004_vm7 = vcmp.eq.s32.totalorder %v14307_v58, 17  ;;  %v1543_v16 = vsel %vm19998_vm3, %v1399_v51, %v1495_v27  ;;  %v491_v33 = vmul.u32 24, %v490_v52 }
  0x5d   : > { %11752 = vmatprep.mubr.msk.bf16.mxu0 %vm20186_vm0, %v1766_v13  ;;  %v1496_v22 = vsel %vm20004_vm7, %v1448_v61, %v13818_v0  ;;  %1591 = vst.msk [vmem:[#allocation2 + $0xa8] sm:$0xff] %vm20186_vm0, %v1543_v16  ;;  %v502_v59 = vmul.u32 24, %v501_v38  ;;  %v14323_v12 = vmul.u32.u64.low 2863311531, %v14207_v36  ;;  %v14324_v28 = vmul.u32.u64.high 2863311531, %v14207_v36, %v14323_v12 }
  0x5e   : > { %v1544_v37 = vsel %vm19997_vm12, %v1400_v31, %v1496_v22  ;;  %v492_v41 = vsub.s32 %v14163_v50, %v491_v33  ;;  %v14330_v6 = vmul.u32.u64.low 2863311531, %v14217_v42  ;;  %v14331_v51 = vmul.u32.u64.high 2863311531, %v14217_v42, %v14330_v6  ;;  %v1402_v33 = vld [vmem:[#allocation2 + $0xc2] sm:$0xff] }
  0x5f   : > { %1592 = vst.msk [vmem:[#allocation2 + $0xb0] sm:$0xff] %vm20186_vm0, %v1544_v37  ;;  %v503_v0 = vsub.s32 %v14188_v63, %v502_v59  ;;  %v14336_v47 = vmul.u32.u64.low 2863311531, %v14245_v56  ;;  %v14337_v15 = vmul.u32.u64.high 2863311531, %v14245_v56, %v14336_v47  ;;  %v512_v17 = vshrl.u32 %v14324_v28, 4  ;;  %v1450_v63 = vld [vmem:[#allocation2 + $0xbe] sm:$0xff]  ;;  %v1451_v22 = vld [vmem:[#allocation2 + $0xc6] sm:$0xff] }
  0x60   : > { %v1728_v26 = vld [vmem:[#allocation2 + $0x98] sm:$0xff]  ;;  %vm822_vm11 = vcmp.ne.s32.totalorder %v492_v41, 0  ;;  %vm870_vm5 = vcmp.lt.s32.totalorder %v492_v41, 0  ;;  %v966_v57 = vadd.s32 24, %v492_v41  ;;  %v523_v13 = vshrl.u32 %v14331_v51, 4 }
  0x61   : > { %vm823_vm4 = vcmp.ne.s32.totalorder %v503_v0, 0  ;;  %vm871_vm9 = vcmp.lt.s32.totalorder %v503_v0, 0  ;;  %vm918_vm12 = vmand %vm870_vm5, %vm822_vm11  ;;  %v967_v50 = vadd.s32 24, %v503_v0  ;;  %v513_v28 = vmul.u32 24, %v512_v17 }
  0x62   : > { %v1729_v61 = vld [vmem:[#allocation2 + $0xa0] sm:$0xff]  ;;  %vm919_vm3 = vmand %vm871_vm9, %vm823_vm4  ;;  %v14340_v52 = vsel %vm918_vm12, %v966_v57, %v492_v41  ;;  %v14344_v31 = vmul.u32.u64.low 2863311531, %v14255_v11  ;;  %v14345_v27 = vmul.u32.u64.high 2863311531, %v14255_v11, %v14344_v31  ;;  %v524_v6 = vmul.u32 24, %v523_v13  ;;  %v1452_v13 = vld [vmem:[#allocation2 + $0xce] sm:$0xff] }
  0x63   : > { %20708 = vst [vmem:[#allocation22_spill] sm:$0xff] %v14340_v52  ;;  %v1767_v38 = vpack.c.bf16 %v1729_v61, %v1728_v26  ;;  %v14347_v16 = vsel %vm919_vm3, %v967_v50, %v503_v0  ;;  %vm20001_vm10 = vcmp.eq.s32.totalorder %v14340_v52, 0  ;;  %vm20003_vm11 = vcmp.eq.s32.totalorder %v14340_v52, 17  ;;  %v2406_v52 = vld [vmem:[#allocation2 + $0x19] sm:$0xff] }
  0x64   : > { %20709 = vst [vmem:[#allocation23_spill] sm:$0xff] %v14347_v16  ;;  %v1730_v59 = vld [vmem:[#allocation2 + $0xa8] sm:$0xff]  ;;  %vm20000_vm12 = vcmp.eq.s32.totalorder %v14347_v16, 0  ;;  %vm20002_vm5 = vcmp.eq.s32.totalorder %v14347_v16, 17  ;;  %v1497_v12 = vsel %vm20003_vm11, %v1449_v39, %v13821_v1  ;;  %v534_v51 = vshrl.u32 %v14337_v15, 4 }
  0x65   : > { %11753 = vmatmul.mubr.msk.bf16.gmra.mrb[16].mxu0 %vm20186_vm0, %v1767_v38  ;;  %v1498_v37 = vsel %vm20002_vm5, %v1450_v63, %v13824_v2  ;;  %v1545_v41 = vsel %vm20001_vm10, %v1401_v25, %v1497_v12  ;;  %v514_v1 = vsub.s32 %v14207_v36, %v513_v28  ;;  %v545_v39 = vshrl.u32 %v14345_v27, 4 }
  0x66   : > { %v1731_v0 = vld [vmem:[#allocation2 + $0xb0] sm:$0xff]  ;;  %v1546_v47 = vsel %vm20000_vm12, %v1402_v33, %v1498_v37  ;;  %1593 = vst.msk [vmem:[#allocation2 + $0xb8] sm:$0xff] %vm20186_vm0, %v1545_v41  ;;  %v14369_v26 = vadd.s32 200, %v13638_v3  ;;  %v525_v57 = vsub.s32 %v14217_v42, %v524_v6  ;;  %v535_v25 = vmul.u32 24, %v534_v51  ;;  %v1454_v41 = vld [vmem:[#allocation2 + $0xde] sm:$0xff] }
  0x67   : > { %v1768_v2 = vpack.c.bf16 %v1731_v0, %v1730_v59  ;;  %1594 = vst.msk [vmem:[#allocation2 + $0xc0] sm:$0xff] %vm20186_vm0, %v1546_v47  ;;  %v14374_v15 = vadd.s32 208, %v13638_v3  ;;  %vm824_vm3 = vcmp.ne.s32.totalorder %v514_v1, 0  ;;  %vm872_vm4 = vcmp.lt.s32.totalorder %v514_v1, 0  ;;  %v1403_v42 = vld [vmem:[#allocation2 + $0xca] sm:$0xff]  ;;  %v1404_v59 = vld [vmem:[#allocation2 + $0xd2] sm:$0xff] }
  0x68   : > { %v968_v50 = vadd.s32 24, %v514_v1  ;;  %v546_v17 = vmul.u32 24, %v545_v39  ;;  %vm825_vm9 = vcmp.ne.s32.totalorder %v525_v57, 0  ;;  %vm873_vm12 = vcmp.lt.s32.totalorder %v525_v57, 0  ;;  %vm920_vm10 = vmand %vm872_vm4, %vm824_vm3  ;;  %v1405_v0 = vld [vmem:[#allocation2 + $0xda] sm:$0xff]  ;;  %v1406_v47 = vld [vmem:[#allocation2 + $0xe2] sm:$0xff] }
  0x69   : > { %11756 = vmatprep.mubr.msk.bf16.mxu0 %vm20186_vm0, %v1768_v2  ;;  %v969_v36 = vadd.s32 24, %v525_v57  ;;  %v536_v61 = vsub.s32 %v14245_v56, %v535_v25  ;;  %vm921_vm5 = vmand %vm873_vm12, %vm825_vm9  ;;  %v14382_v27 = vmul.u32.u64.low 2863311531, %v14369_v26  ;;  %v14383_v38 = vmul.u32.u64.high 2863311531, %v14369_v26, %v14382_v27  ;;  %v1453_v56 = vld [vmem:[#allocation2 + $0xd6] sm:$0xff]  ;;  %v1455_v39 = vld [vmem:[#allocation2 + $0xe6] sm:$0xff] }
  0x6a   : > { %v14378_v63 = vsel %vm920_vm10, %v968_v50, %v514_v1  ;;  %v547_v31 = vsub.s32 %v14255_v11, %v546_v17  ;;  %v2453_v58 = vpack.c.bf16 %v15002_v46, %v2406_v52  ;;  %v15023_v52 = vld [vmem:[#allocation2 + $0x51] sm:$0xff] }
  0x6b   : > { %20710 = vst [vmem:[#allocation24_spill] sm:$0xff] %v14378_v63  ;;  %v14385_v33 = vsel %vm921_vm5, %v969_v36, %v525_v57  ;;  %vm20006_vm11 = vcmp.eq.s32.totalorder %v14378_v63, 0  ;;  %vm20005_vm3 = vcmp.eq.s32.totalorder %v14378_v63, 17  ;;  %vm826_vm4 = vcmp.ne.s32.totalorder %v536_v61, 0  ;;  %v2405_v63 = vld [vmem:[#allocation2 + $0x11] sm:$0xff]  ;;  %20745 = vst [vmem:[#allocation59_spill] sm:$0xff] %v15023_v52 }
  0x6c   : > { %20711 = vst [vmem:[#allocation25_spill] sm:$0xff] %v14385_v33  ;;  %vm20007_vm12 = vcmp.eq.s32.totalorder %v14385_v33, 0  ;;  %vm20016_vm10 = vcmp.eq.s32.totalorder %v14385_v33, 17  ;;  %v1499_v11 = vsel %vm20005_vm3, %v1451_v22, %v13928_v35  ;;  %vm827_vm9 = vcmp.ne.s32.totalorder %v547_v31, 0 }
  0x6d   : > { %v1732_v12 = vld [vmem:[#allocation2 + $0xb8] sm:$0xff]  ;;  %v1500_v28 = vsel %vm20016_vm10, %v1452_v13, %v13945_v49  ;;  %v1547_v37 = vsel %vm20006_vm11, %v1403_v42, %v1499_v11  ;;  %vm874_vm5 = vcmp.lt.s32.totalorder %v536_v61, 0  ;;  %vm875_vm7 = vcmp.lt.s32.totalorder %v547_v31, 0  ;;  %v1407_v11 = vld [vmem:[#allocation2 + $0xea] sm:$0xff] }
  0x6e   : > { %v1733_v6 = vld [vmem:[#allocation2 + $0xc0] sm:$0xff]  ;;  %v1548_v51 = vsel %vm20007_vm12, %v1404_v59, %v1500_v28  ;;  %1595 = vst.msk [vmem:[#allocation2 + $0xc8] sm:$0xff] %vm20186_vm0, %v1547_v37  ;;  %vm922_vm3 = vmand %vm874_vm5, %vm826_vm4  ;;  %v970_v35 = vadd.s32 24, %v536_v61  ;;  %v971_v22 = vadd.s32 24, %v547_v31  ;;  %v556_v49 = vshrl.u32 %v14383_v38, 4 }
  0x6f   : > { %v1769_v1 = vpack.c.bf16 %v1733_v6, %v1732_v12  ;;  %1596 = vst.msk [vmem:[#allocation2 + $0xd0] sm:$0xff] %vm20186_vm0, %v1548_v51  ;;  %vm923_vm11 = vmand %vm875_vm7, %vm827_vm9  ;;  %v14407_v2 = vmul.u32.u64.low 2863311531, %v14374_v15  ;;  %v14408_v57 = vmul.u32.u64.high 2863311531, %v14374_v15, %v14407_v2  ;;  %v14415_v36 = vadd.s32 216, %v13638_v3  ;;  %v15087_v46 = vld [vmem:[#allocation2 + $0xb9] sm:$0xff] }
  0x70   : > { %v14410_v25 = vsel %vm922_vm3, %v970_v35, %v536_v61  ;;  %v14412_v50 = vsel %vm923_vm11, %v971_v22, %v547_v31  ;;  %v557_v17 = vmul.u32 24, %v556_v49  ;;  %v255_v31 = vadd.s32 224, %v13638_v3 }
  0x71   : > { %20712 = vst [vmem:[#allocation26_spill] sm:$0xff] %v14410_v25  ;;  %20713 = vst [vmem:[#allocation27_spill] sm:$0xff] %v14412_v50  ;;  %11757 = vmatmul.mubr.msk.bf16.gmra.mrb[20].mxu0 %vm20186_vm0, %v1769_v1  ;;  %vm20009_vm4 = vcmp.eq.s32.totalorder %v14410_v25, 0  ;;  %vm20008_vm5 = vcmp.eq.s32.totalorder %v14412_v50, 0  ;;  %vm20015_vm7 = vcmp.eq.s32.totalorder %v14410_v25, 17  ;;  %vm20013_vm9 = vcmp.eq.s32.totalorder %v14412_v50, 17 }
  0x72   : > { %v1501_v61 = vsel %vm20015_vm7, %v1453_v56, %v13948_v19  ;;  %v1502_v42 = vsel %vm20013_vm9, %v1454_v41, %v13962_v54  ;;  %v558_v13 = vsub.s32 %v14369_v26, %v557_v17  ;;  %v567_v59 = vshrl.u32 %v14408_v57, 4  ;;  %v1456_v17 = vld [vmem:[#allocation2 + $0xee] sm:$0xff] }
  0x73   : > { %v1549_v27 = vsel %vm20009_vm4, %v1405_v0, %v1501_v61  ;;  %v1550_v38 = vsel %vm20008_vm5, %v1406_v47, %v1502_v42  ;;  %v14438_v54 = vadd.s32 232, %v13638_v3  ;;  %v257_v37 = vadd.s32 240, %v13638_v3  ;;  %v2404_v25 = vld [vmem:[#allocation2 + $0x9] sm:$0xff] }
  0x74   : > { %1597 = vst.msk [vmem:[#allocation2 + $0xd8] sm:$0xff] %vm20186_vm0, %v1549_v27  ;;  %1598 = vst.msk [vmem:[#allocation2 + $0xe0] sm:$0xff] %vm20186_vm0, %v1550_v38  ;;  %vm828_vm11 = vcmp.ne.s32.totalorder %v558_v13, 0  ;;  %vm876_vm3 = vcmp.lt.s32.totalorder %v558_v13, 0  ;;  %v972_v19 = vadd.s32 24, %v558_v13  ;;  %v568_v56 = vmul.u32 24, %v567_v59 }
  0x75   : > { %v1734_v26 = vld [vmem:[#allocation2 + $0xc8] sm:$0xff]  ;;  %vm924_vm12 = vmand %vm876_vm3, %vm828_vm11  ;;  %v14441_v12 = vmul.u32.u64.low 2863311531, %v14415_v36  ;;  %v14442_v28 = vmul.u32.u64.high 2863311531, %v14415_v36, %v14441_v12  ;;  %v14447_v51 = vmul.u32.u64.low 2863311531, %v255_v31  ;;  %v14448_v35 = vmul.u32.u64.high 2863311531, %v255_v31, %v14447_v51  ;;  %v1408_v59 = vld [vmem:[#allocation2 + $0xf2] sm:$0xff] }
  0x76   : > { %v1735_v41 = vld [vmem:[#allocation2 + $0xd0] sm:$0xff]  ;;  %v14445_v6 = vsel %vm924_vm12, %v972_v19, %v558_v13  ;;  %v14451_v22 = vadd.s32 248, %v13638_v3  ;;  %v569_v47 = vsub.s32 %v14374_v15, %v568_v56  ;;  %v2452_v16 = vpack.c.bf16 %v2405_v63, %v2404_v25  ;;  %v13549_v63 = vld [vmem:[%s19939_s1 + $0x38] sm:$0xff]  }
  0x77   : > { %20714 = vst [vmem:[#allocation28_spill] sm:$0xff] %v14445_v6  ;;  %v1770_v0 = vpack.c.bf16 %v1735_v41, %v1734_v26  ;;  %vm20010_vm11 = vcmp.eq.s32.totalorder %v14445_v6, 0  ;;  %vm20012_vm3 = vcmp.eq.s32.totalorder %v14445_v6, 17  ;;  %v578_v61 = vshrl.u32 %v14442_v28, 4  ;;  %v15021_v25 = vld [vmem:[#allocation2 + $0x49] sm:$0xff] }
  0x78   : > { %v1503_v49 = vsel %vm20012_vm3, %v1455_v39, %v13965_v55  ;;  %v14460_v1 = vmul.u32.u64.low 2863311531, %v14438_v54  ;;  %v14461_v2 = vmul.u32.u64.high 2863311531, %v14438_v54, %v14460_v1  ;;  %vm829_vm12 = vcmp.ne.s32.totalorder %v569_v47, 0  ;;  %20744 = vst [vmem:[#allocation58_spill] sm:$0xff] %v15021_v25 }
  0x79   : > { %11760 = vmatprep.mubr.msk.bf16.mxu0 %vm20186_vm0, %v1770_v0  ;;  %vm877_vm5 = vcmp.lt.s32.totalorder %v569_v47, 0  ;;  %v973_v57 = vadd.s32 24, %v569_v47  ;;  %v1551_v15 = vsel %vm20010_vm11, %v1407_v11, %v1503_v49  ;;  %v589_v55 = vshrl.u32 %v14448_v35, 4  ;;  %v1457_v11 = vld [vmem:[#allocation2 + $0xf6] sm:$0xff] }
  0x7a   : > { %vm925_vm4 = vmand %vm877_vm5, %vm829_vm12  ;;  %1599 = vst.msk [vmem:[#allocation2 + $0xe8] sm:$0xff] %vm20186_vm0, %v1551_v15  ;;  %v14469_v39 = vmul.u32.u64.low 2863311531, %v257_v37  ;;  %v14470_v42 = vmul.u32.u64.high 2863311531, %v257_v37, %v14469_v39  ;;  %v14475_v19 = vmul.u32.u64.low 2863311531, %v14451_v22  ;;  %v14476_v26 = vmul.u32.u64.high 2863311531, %v14451_v22, %v14475_v19 }
  0x7b   : > { %v1736_v13 = vld [vmem:[#allocation2 + $0xd8] sm:$0xff]  ;;  %v1737_v27 = vld [vmem:[#allocation2 + $0xe0] sm:$0xff]  ;;  %v14472_v38 = vsel %vm925_vm4, %v973_v57, %v569_v47  ;;  %v579_v12 = vmul.u32 24, %v578_v61  ;;  %v590_v41 = vmul.u32 24, %v589_v55  ;;  %v600_v51 = vshrl.u32 %v14461_v2, 4 }
  0x7c   : > { %20715 = vst [vmem:[#allocation29_spill] sm:$0xff] %v14472_v38  ;;  %v1771_v56 = vpack.c.bf16 %v1737_v27, %v1736_v13  ;;  %vm20014_vm5 = vcmp.eq.s32.totalorder %v14472_v38, 0  ;;  %vm20011_vm12 = vcmp.eq.s32.totalorder %v14472_v38, 17  ;;  %v611_v47 = vshrl.u32 %v14470_v42, 4  ;;  %v1410_v61 = vld [vmem:[#allocation2 + $0x102] sm:$0xff] }
  0x7d   : > { %v1504_v28 = vsel %vm20011_vm12, %v1456_v17, %v13980_v5  ;;  %v580_v0 = vsub.s32 %v14415_v36, %v579_v12  ;;  %v591_v49 = vsub.s32 %v255_v31, %v590_v41  ;;  %v601_v1 = vmul.u32 24, %v600_v51  ;;  %v1409_v17 = vld [vmem:[#allocation2 + $0xfa] sm:$0xff]  ;;  %v1460_v51 = vld [vmem:[#allocation2 + $0x10e] sm:$0xff] }
  0x7e   : > { %11761 = vmatmul.mubr.msk.bf16.gmra.mrb[24].mxu0 %vm20186_vm0, %v1771_v56  ;;  %v1552_v35 = vsel %vm20014_vm5, %v1408_v59, %v1504_v28  ;;  %v622_v57 = vshrl.u32 %v14476_v26, 4  ;;  %v612_v2 = vmul.u32 24, %v611_v47  ;;  %v1458_v39 = vld [vmem:[#allocation2 + $0xfe] sm:$0xff]  ;;  %v14495_v42 = vadd.s32 256, %v13638_v3  ;;  %v1459_v59 = vld [vmem:[#allocation2 + $0x106] sm:$0xff] }
  0x7f   : > { %1600 = vst.msk [vmem:[#allocation2 + $0xf0] sm:$0xff] %vm20186_vm0, %v1552_v35  ;;  %vm830_vm4 = vcmp.ne.s32.totalorder %v580_v0, 0  ;;  %vm878_vm11 = vcmp.lt.s32.totalorder %v580_v0, 0  ;;  %v974_v5 = vadd.s32 24, %v580_v0  ;;  %vm831_vm12 = vcmp.ne.s32.totalorder %v591_v49, 0 }
  0x80   : > { %vm879_vm3 = vcmp.lt.s32.totalorder %v591_v49, 0  ;;  %vm926_vm9 = vmand %vm878_vm11, %vm830_vm4  ;;  %v975_v15 = vadd.s32 24, %v591_v49  ;;  %v602_v36 = vsub.s32 %v14438_v54, %v601_v1  ;;  %v613_v31 = vsub.s32 %v257_v37, %v612_v2 }
  0x81   : > { %vm927_vm5 = vmand %vm879_vm3, %vm831_vm12  ;;  %v14492_v55 = vsel %vm926_vm9, %v974_v5, %v580_v0  ;;  %v623_v13 = vmul.u32 24, %v622_v57  ;;  %v1738_v19 = vld [vmem:[#allocation2 + $0xe8] sm:$0xff]  ;;  %v1461_v0 = vld [vmem:[#allocation2 + $0x116] sm:$0xff]  ;;  %v14522_v1 = vadd.s32 264, %v13638_v3 }
  0x82   : > { %20716 = vst [vmem:[#allocation30_spill] sm:$0xff] %v14492_v55  ;;  %v14497_v27 = vsel %vm927_vm5, %v975_v15, %v591_v49  ;;  %vm20018_vm7 = vcmp.eq.s32.totalorder %v14492_v55, 0  ;;  %vm20021_vm10 = vcmp.eq.s32.totalorder %v14492_v55, 17  ;;  %vm832_vm11 = vcmp.ne.s32.totalorder %v602_v36, 0 }
  0x83   : > { %20717 = vst [vmem:[#allocation31_spill] sm:$0xff] %v14497_v27  ;;  %vm20019_vm4 = vcmp.eq.s32.totalorder %v14497_v27, 0  ;;  %vm20020_vm9 = vcmp.eq.s32.totalorder %v14497_v27, 17  ;;  %v1505_v54 = vsel %vm20021_vm10, %v1457_v11, %v13983_v9  ;;  %vm833_vm3 = vcmp.ne.s32.totalorder %v613_v31, 0  ;;  %v1411_v9 = vld [vmem:[#allocation2 + $0x10a] sm:$0xff]  ;;  %v1412_v11 = vld [vmem:[#allocation2 + $0x112] sm:$0xff] }
  0x84   : > { %v1506_v37 = vsel %vm20020_vm9, %v1458_v39, %v13986_v7  ;;  %v1553_v26 = vsel %vm20018_vm7, %v1409_v17, %v1505_v54  ;;  %vm880_vm5 = vcmp.lt.s32.totalorder %v602_v36, 0  ;;  %vm881_vm12 = vcmp.lt.s32.totalorder %v613_v31, 0 }
  0x85   : > { %v1554_v12 = vsel %vm20019_vm4, %v1410_v61, %v1506_v37  ;;  %1601 = vst.msk [vmem:[#allocation2 + $0xf8] sm:$0xff] %vm20186_vm0, %v1553_v26  ;;  %vm928_vm1 = vmand %vm880_vm5, %vm832_vm11  ;;  %v976_v28 = vadd.s32 24, %v602_v36  ;;  %v977_v41 = vadd.s32 24, %v613_v31  ;;  %v624_v35 = vsub.s32 %v14451_v22, %v623_v13  ;;  %v1462_v37 = vld [vmem:[#allocation2 + $0x11e] sm:$0xff] }
  0x86   : > { %v1739_v56 = vld [vmem:[#allocation2 + $0xf0] sm:$0xff]  ;;  %1602 = vst.msk [vmem:[#allocation2 + $0x100] sm:$0xff] %vm20186_vm0, %v1554_v12  ;;  %vm929_vm7 = vmand %vm881_vm12, %vm833_vm3  ;;  %v14518_v47 = vmul.u32.u64.low 2863311531, %v14495_v42  ;;  %v14519_v49 = vmul.u32.u64.high 2863311531, %v14495_v42, %v14518_v47  ;;  %v14540_v15 = vadd.s32 272, %v13638_v3  ;;  %v14561_v26 = vadd.s32 288, %v13638_v3 }
  0x87   : > { %v1772_v7 = vpack.c.bf16 %v1739_v56, %v1738_v19  ;;  %v14524_v57 = vsel %vm928_vm1, %v976_v28, %v602_v36  ;;  %v14526_v5 = vsel %vm929_vm7, %v977_v41, %v613_v31  ;;  %vm834_vm11 = vcmp.ne.s32.totalorder %v624_v35, 0 }
  0x88   : > { %20718 = vst [vmem:[#allocation32_spill] sm:$0xff] %v14524_v57  ;;  %20719 = vst [vmem:[#allocation33_spill] sm:$0xff] %v14526_v5  ;;  %vm882_vm5 = vcmp.lt.s32.totalorder %v624_v35, 0  ;;  %vm20025_vm4 = vcmp.eq.s32.totalorder %v14524_v57, 0  ;;  %vm20023_vm3 = vcmp.eq.s32.totalorder %v14526_v5, 0  ;;  %vm20048_vm12 = vcmp.eq.s32.totalorder %v14524_v57, 17 }
  0x89   : > { %11764 = vmatprep.mubr.msk.bf16.mxu0 %vm20186_vm0, %v1772_v7  ;;  %vm20029_vm9 = vcmp.eq.s32.totalorder %v14526_v5, 17  ;;  %vm930_vm10 = vmand %vm882_vm5, %vm834_vm11  ;;  %v1507_v22 = vsel %vm20048_vm12, %v1459_v59, %v13994_v10  ;;  %v978_v2 = vadd.s32 24, %v624_v35  ;;  %v633_v39 = vshrl.u32 %v14519_v49, 4 }
  0x8a   : > { %v1508_v17 = vsel %vm20029_vm9, %v1460_v51, %v13999_v14  ;;  %v1555_v61 = vsel %vm20025_vm4, %v1411_v9, %v1507_v22  ;;  %v14548_v31 = vadd.s32 280, %v13638_v3  ;;  %v1413_v14 = vld [vmem:[#allocation2 + $0x11a] sm:$0xff]  ;;  %v13591_v56 = vmov 0.0  }
  0x8b   : > { %v1556_v36 = vsel %vm20023_vm3, %v1412_v11, %v1508_v17  ;;  %1603 = vst.msk [vmem:[#allocation2 + $0x108] sm:$0xff] %vm20186_vm0, %v1555_v61  ;;  %v14552_v10 = vsel %vm930_vm10, %v978_v2, %v624_v35  ;;  %v14555_v13 = vmul.u32.u64.low 2863311531, %v14522_v1  ;;  %v14556_v59 = vmul.u32.u64.high 2863311531, %v14522_v1, %v14555_v13  ;;  %1284 = vst.msk [vmem:[#allocation2] sm:$0xff] %vm20186_vm0, %v13591_v56 }
  0x8c   : > { %1604 = vst.msk [vmem:[#allocation2 + $0x110] sm:$0xff] %vm20186_vm0, %v1556_v36  ;;  %20720 = vst [vmem:[#allocation34_spill] sm:$0xff] %v14552_v10  ;;  %v1740_v19 = vld [vmem:[#allocation2 + $0xf8] sm:$0xff]  ;;  %v634_v54 = vmul.u32 24, %v633_v39  ;;  %vm20022_vm1 = vcmp.eq.s32.totalorder %v14552_v10, 0  ;;  %vm20028_vm7 = vcmp.eq.s32.totalorder %v14552_v10, 17 }
  0x8d   : > { %1285 = vst.msk [vmem:[#allocation2 + $0x1b8] sm:$0xff] %vm20186_vm0, %v13591_v56  ;;  %v1741_v12 = vld [vmem:[#allocation2 + $0x100] sm:$0xff]  ;;  %v1509_v28 = vsel %vm20028_vm7, %v1461_v0, %v14009_v32  ;;  %v14569_v41 = vmul.u32.u64.low 2863311531, %v14540_v15  ;;  %v14570_v9 = vmul.u32.u64.high 2863311531, %v14540_v15, %v14569_v41  ;;  %v14573_v11 = vadd.s32 296, %v13638_v3 }
  0x8e   : > { %v1773_v51 = vpack.c.bf16 %v1741_v12, %v1740_v19  ;;  %v635_v35 = vsub.s32 %v14495_v42, %v634_v54  ;;  %v1557_v7 = vsel %vm20022_vm1, %v1413_v14, %v1509_v28  ;;  %v644_v47 = vshrl.u32 %v14556_v59, 4  ;;  %v1414_v13 = vld [vmem:[#allocation2 + $0x122] sm:$0xff] }
  0x8f   : > { %1605 = vst.msk [vmem:[#allocation2 + $0x118] sm:$0xff] %vm20186_vm0, %v1557_v7  ;;  %v14581_v49 = vmul.u32.u64.low 2863311531, %v14548_v31  ;;  %v14582_v32 = vmul.u32.u64.high 2863311531, %v14548_v31, %v14581_v49  ;;  %v14586_v22 = vadd.s32 304, %v13638_v3  ;;  %v655_v17 = vshrl.u32 %v14570_v9, 4  ;;  %v1463_v12 = vld [vmem:[#allocation2 + $0x126] sm:$0xff] }
  0x90   : > { %11765 = vmatmul.mubr.msk.bf16.gmra.mrb[28].mxu0 %vm20186_vm0, %v1773_v51  ;;  %vm835_vm10 = vcmp.ne.s32.totalorder %v635_v35, 0  ;;  %vm883_vm11 = vcmp.lt.s32.totalorder %v635_v35, 0  ;;  %v979_v0 = vadd.s32 24, %v635_v35  ;;  %v645_v42 = vmul.u32 24, %v644_v47 }
  0x91   : > { %vm931_vm5 = vmand %vm883_vm11, %vm835_vm10  ;;  %v14590_v2 = vmul.u32.u64.low 2863311531, %v14561_v26  ;;  %v14591_v61 = vmul.u32.u64.high 2863311531, %v14561_v26, %v14590_v2  ;;  %v14596_v59 = vmul.u32.u64.low 2863311531, %v14573_v11  ;;  %v14597_v19 = vmul.u32.u64.high 2863311531, %v14573_v11, %v14596_v59 }
  0x92   : > { %v1742_v36 = vld [vmem:[#allocation2 + $0x108] sm:$0xff]  ;;  %v14593_v14 = vsel %vm931_vm5, %v979_v0, %v635_v35  ;;  %v14600_v54 = vadd.s32 312, %v13638_v3  ;;  %v646_v28 = vsub.s32 %v14522_v1, %v645_v42  ;;  %v656_v9 = vmul.u32 24, %v655_v17 }
  0x93   : > { %v1743_v39 = vld [vmem:[#allocation2 + $0x110] sm:$0xff]  ;;  %20721 = vst [vmem:[#allocation35_spill] sm:$0xff] %v14593_v14  ;;  %vm20024_vm10 = vcmp.eq.s32.totalorder %v14593_v14, 0  ;;  %vm20026_vm11 = vcmp.eq.s32.totalorder %v14593_v14, 17  ;;  %v666_v51 = vshrl.u32 %v14582_v32, 4  ;;  %v14610_v35 = vadd.s32 320, %v13638_v3 }
  0x94   : > { %v1774_v56 = vpack.c.bf16 %v1743_v39, %v1742_v36  ;;  %v1510_v41 = vsel %vm20026_vm11, %v1462_v37, %v14027_v44  ;;  %vm836_vm5 = vcmp.ne.s32.totalorder %v646_v28, 0  ;;  %vm884_vm1 = vcmp.lt.s32.totalorder %v646_v28, 0 }
  0x95   : > { %v1558_v7 = vsel %vm20024_vm10, %v1414_v13, %v1510_v41  ;;  %v980_v47 = vadd.s32 24, %v646_v28  ;;  %v657_v1 = vsub.s32 %v14540_v15, %v656_v9  ;;  %vm932_vm3 = vmand %vm884_vm1, %vm836_vm5  ;;  %v667_v44 = vmul.u32 24, %v666_v51  ;;  %v1415_v15 = vld [vmem:[#allocation2 + $0x12a] sm:$0xff]  ;;  %v1465_v51 = vld [vmem:[#allocation2 + $0x136] sm:$0xff] }
  0x96   : > { %11768 = vmatprep.mubr.msk.bf16.mxu0 %vm20186_vm0, %v1774_v56  ;;  %1606 = vst.msk [vmem:[#allocation2 + $0x120] sm:$0xff] %vm20186_vm0, %v1558_v7  ;;  %v677_v37 = vshrl.u32 %v14591_v61, 4  ;;  %v688_v49 = vshrl.u32 %v14597_v19, 4  ;;  %v14622_v0 = vmul.u32.u64.low 2863311531, %v14586_v22  ;;  %v14623_v42 = vmul.u32.u64.high 2863311531, %v14586_v22, %v14622_v0  ;;  %v1464_v61 = vld [vmem:[#allocation2 + $0x12e] sm:$0xff] }
  0x97   : > { %v14619_v32 = vsel %vm932_vm3, %v980_v47, %v646_v28  ;;  %v14626_v17 = vadd.s32 328, %v13638_v3  ;;  %vm837_vm10 = vcmp.ne.s32.totalorder %v657_v1, 0  ;;  %vm885_vm4 = vcmp.lt.s32.totalorder %v657_v1, 0  ;;  %v1416_v19 = vld [vmem:[#allocation2 + $0x132] sm:$0xff] }
  0x98   : > { %20722 = vst [vmem:[#allocation36_spill] sm:$0xff] %v14619_v32  ;;  %v981_v2 = vadd.s32 24, %v657_v1  ;;  %vm20030_vm11 = vcmp.eq.s32.totalorder %v14619_v32, 0  ;;  %vm933_vm1 = vmand %vm885_vm4, %vm837_vm10  ;;  %vm20027_vm5 = vcmp.eq.s32.totalorder %v14619_v32, 17  ;;  %v668_v36 = vsub.s32 %v14548_v31, %v667_v44  ;;  %v1744_v9 = vld [vmem:[#allocation2 + $0x118] sm:$0xff] }
  0x99   : > { %v678_v39 = vmul.u32 24, %v677_v37  ;;  %v689_v13 = vmul.u32 24, %v688_v49  ;;  %v1511_v56 = vsel %vm20027_vm5, %v1463_v12, %v14036_v8  ;;  %v1466_v49 = vld [vmem:[#allocation2 + $0x13e] sm:$0xff] }
  0x9a   : > { %v14631_v59 = vsel %vm933_vm1, %v981_v2, %v657_v1  ;;  %v14637_v28 = vmul.u32.u64.low 2863311531, %v14600_v54  ;;  %v14638_v41 = vmul.u32.u64.high 2863311531, %v14600_v54, %v14637_v28  ;;  %v1559_v31 = vsel %vm20030_vm11, %v1415_v15, %v1511_v56  ;;  %v14940_v32 = vld [vmem:[#allocation2 + $0xff] sm:$0xff] }
  0x9b   : > { %20723 = vst [vmem:[#allocation37_spill] sm:$0xff] %v14631_v59  ;;  %vm20031_vm4 = vcmp.eq.s32.totalorder %v14631_v59, 0  ;;  %vm20032_vm3 = vcmp.eq.s32.totalorder %v14631_v59, 17  ;;  %v679_v7 = vsub.s32 %v14561_v26, %v678_v39  ;;  %1607 = vst.msk [vmem:[#allocation2 + $0x128] sm:$0xff] %vm20186_vm0, %v1559_v31  ;;  %vm838_vm10 = vcmp.ne.s32.totalorder %v668_v36, 0  ;;  %v14942_v59 = vld [vmem:[#allocation2 + $0x107] sm:$0xff] }
  0x9c   : > { %v1512_v47 = vsel %vm20032_vm3, %v1464_v61, %v14041_v21  ;;  %vm886_vm1 = vcmp.lt.s32.totalorder %v668_v36, 0  ;;  %v982_v8 = vadd.s32 24, %v668_v36  ;;  %v1417_v21 = vld [vmem:[#allocation2 + $0x13a] sm:$0xff]  ;;  %v690_v0 = vsub.s32 %v14573_v11, %v689_v13  ;;  %v1418_v61 = vld [vmem:[#allocation2 + $0x142] sm:$0xff] }
  0x9d   : > { %v1745_v12 = vld [vmem:[#allocation2 + $0x120] sm:$0xff]  ;;  %v1560_v1 = vsel %vm20031_vm4, %v1416_v19, %v1512_v47  ;;  %vm839_vm5 = vcmp.ne.s32.totalorder %v679_v7, 0  ;;  %vm887_vm7 = vcmp.lt.s32.totalorder %v679_v7, 0  ;;  %vm934_vm9 = vmand %vm886_vm1, %vm838_vm10  ;;  %v983_v44 = vadd.s32 24, %v679_v7 }
  0x9e   : > { %v1775_v37 = vpack.c.bf16 %v1745_v12, %v1744_v9  ;;  %1608 = vst.msk [vmem:[#allocation2 + $0x130] sm:$0xff] %vm20186_vm0, %v1560_v1  ;;  %vm935_vm11 = vmand %vm887_vm7, %vm839_vm5  ;;  %v14652_v26 = vsel %vm934_vm9, %v982_v8, %v668_v36  ;;  %v699_v2 = vshrl.u32 %v14623_v42, 4  ;;  %v710_v39 = vshrl.u32 %v14638_v41, 4  ;;  %v1467_v36 = vld [vmem:[#allocation2 + $0x146] sm:$0xff]  ;;  %v1468_v1 = vld [vmem:[#allocation2 + $0x14e] sm:$0xff] }
  0x9f   : > { %20724 = vst [vmem:[#allocation38_spill] sm:$0xff] %v14652_v26  ;;  %v14656_v15 = vsel %vm935_vm11, %v983_v44, %v679_v7  ;;  %vm20034_vm4 = vcmp.eq.s32.totalorder %v14652_v26, 0  ;;  %vm20043_vm3 = vcmp.eq.s32.totalorder %v14652_v26, 17  ;;  %vm840_vm11 = vcmp.ne.s32.totalorder %v690_v0, 0 }
  0xa0   : > { %20725 = vst [vmem:[#allocation39_spill] sm:$0xff] %v14656_v15  ;;  %11769 = vmatmul.mubr.msk.bf16.gmra.mrb[32].mxu0 %vm20186_vm0, %v1775_v37  ;;  %vm20033_vm9 = vcmp.eq.s32.totalorder %v14656_v15, 0  ;;  %vm20042_vm7 = vcmp.eq.s32.totalorder %v14656_v15, 17  ;;  %v1513_v11 = vsel %vm20043_vm3, %v1465_v51, %v14123_v18  ;;  %v700_v42 = vmul.u32 24, %v699_v2  ;;  %v1420_v2 = vld [vmem:[#allocation2 + $0x152] sm:$0xff] }
  0xa1   : > { %v1514_v13 = vsel %vm20042_vm7, %v1466_v49, %v14135_v20  ;;  %v1561_v19 = vsel %vm20034_vm4, %v1417_v21, %v1513_v11  ;;  %vm888_vm5 = vcmp.lt.s32.totalorder %v690_v0, 0  ;;  %v984_v41 = vadd.s32 24, %v690_v0 }
  0xa2   : > { %v1562_v56 = vsel %vm20033_vm9, %v1418_v61, %v1514_v13  ;;  %1609 = vst.msk [vmem:[#allocation2 + $0x138] sm:$0xff] %vm20186_vm0, %v1561_v19  ;;  %v701_v28 = vsub.s32 %v14586_v22, %v700_v42  ;;  %vm936_vm10 = vmand %vm888_vm5, %vm840_vm11  ;;  %v711_v18 = vmul.u32 24, %v710_v39  ;;  %v1746_v9 = vld [vmem:[#allocation2 + $0x128] sm:$0xff]  ;;  %v14691_v37 = vadd.s32 336, %v13638_v3  ;;  %v1469_v39 = vld [vmem:[#allocation2 + $0x156] sm:$0xff] }
  0xa3   : > { %1610 = vst.msk [vmem:[#allocation2 + $0x140] sm:$0xff] %vm20186_vm0, %v1562_v56  ;;  %v14678_v20 = vmul.u32.u64.low 2863311531, %v14610_v35  ;;  %v14679_v51 = vmul.u32.u64.high 2863311531, %v14610_v35, %v14678_v20  ;;  %v14682_v31 = vmul.u32.u64.low 2863311531, %v14626_v17  ;;  %v14683_v7 = vmul.u32.u64.high 2863311531, %v14626_v17, %v14682_v31  ;;  %v1419_v22 = vld [vmem:[#allocation2 + $0x14a] sm:$0xff] }
  0xa4   : > { %vm841_vm1 = vcmp.ne.s32.totalorder %v701_v28, 0  ;;  %vm889_vm9 = vcmp.lt.s32.totalorder %v701_v28, 0  ;;  %v985_v47 = vadd.s32 24, %v701_v28  ;;  %v14685_v8 = vsel %vm936_vm10, %v984_v41, %v690_v0 }
  0xa5   : > { %20726 = vst [vmem:[#allocation40_spill] sm:$0xff] %v14685_v8  ;;  %v1747_v12 = vld [vmem:[#allocation2 + $0x130] sm:$0xff]  ;;  %vm937_vm11 = vmand %vm889_vm9, %vm841_vm1  ;;  %vm20037_vm5 = vcmp.eq.s32.totalorder %v14685_v8, 0  ;;  %vm20035_vm4 = vcmp.eq.s32.totalorder %v14685_v8, 17  ;;  %v712_v44 = vsub.s32 %v14600_v54, %v711_v18  ;;  %v14699_v61 = vadd.s32 344, %v13638_v3  ;;  %v1421_v18 = vld [vmem:[#allocation2 + $0x15a] sm:$0xff] }
  0xa6   : > { %v1776_v21 = vpack.c.bf16 %v1747_v12, %v1746_v9  ;;  %v14693_v49 = vsel %vm937_vm11, %v985_v47, %v701_v28  ;;  %v1515_v0 = vsel %vm20035_vm4, %v1467_v36, %v14147_v43  ;;  %v721_v11 = vshrl.u32 %v14679_v51, 4  ;;  %v14913_v8 = vld [vmem:[#allocation2 + $0xdf] sm:$0xff] }
  0xa7   : > { %20727 = vst [vmem:[#allocation41_spill] sm:$0xff] %v14693_v49  ;;  %vm20036_vm9 = vcmp.eq.s32.totalorder %v14693_v49, 0  ;;  %vm20039_vm10 = vcmp.eq.s32.totalorder %v14693_v49, 17  ;;  %v1563_v54 = vsel %vm20037_vm5, %v1419_v22, %v1515_v0  ;;  %vm842_vm1 = vcmp.ne.s32.totalorder %v712_v44, 0  ;;  %v14917_v49 = vld [vmem:[#allocation2 + $0xef] sm:$0xff] }
  0xa8   : > { %11772 = vmatprep.mubr.msk.bf16.mxu0 %vm20186_vm0, %v1776_v21  ;;  %v1516_v42 = vsel %vm20039_vm10, %v1468_v1, %v14152_v53  ;;  %1611 = vst.msk [vmem:[#allocation2 + $0x148] sm:$0xff] %vm20186_vm0, %v1563_v54  ;;  %vm890_vm11 = vcmp.lt.s32.totalorder %v712_v44, 0  ;;  %v986_v43 = vadd.s32 24, %v712_v44  ;;  %v722_v19 = vmul.u32 24, %v721_v11  ;;  %v1422_v11 = vld [vmem:[#allocation2 + $0x162] sm:$0xff] }
  0xa9   : > { %v1748_v36 = vld [vmem:[#allocation2 + $0x138] sm:$0xff]  ;;  %v1564_v13 = vsel %vm20036_vm9, %v1420_v2, %v1516_v42  ;;  %vm938_vm4 = vmand %vm890_vm11, %vm842_vm1  ;;  %v732_v56 = vshrl.u32 %v14683_v7, 4  ;;  %v14718_v53 = vmul.u32.u64.low 2863311531, %v14691_v37  ;;  %v14719_v9 = vmul.u32.u64.high 2863311531, %v14691_v37, %v14718_v53  ;;  %v1471_v42 = vld [vmem:[#allocation2 + $0x166] sm:$0xff] }
  0xaa   : > { %v1749_v28 = vld [vmem:[#allocation2 + $0x140] sm:$0xff]  ;;  %1612 = vst.msk [vmem:[#allocation2 + $0x150] sm:$0xff] %vm20186_vm0, %v1564_v13  ;;  %v14715_v41 = vsel %vm938_vm4, %v986_v43, %v712_v44  ;;  %v271_v20 = vadd.s32 352, %v13638_v3  ;;  %v723_v31 = vsub.s32 %v14610_v35, %v722_v19 }
  0xab   : > { %20728 = vst [vmem:[#allocation42_spill] sm:$0xff] %v14715_v41  ;;  %v1777_v51 = vpack.c.bf16 %v1749_v28, %v1748_v36  ;;  %vm20040_vm9 = vcmp.eq.s32.totalorder %v14715_v41, 0  ;;  %vm20038_vm1 = vcmp.eq.s32.totalorder %v14715_v41, 17  ;;  %v733_v47 = vmul.u32 24, %v732_v56  ;;  %v1470_v44 = vld [vmem:[#allocation2 + $0x15e] sm:$0xff]  ;;  %v14903_v41 = vld [vmem:[%s13673_s29 + $0x170] sm:$0xff] }
  0xac   : > { %v1517_v7 = vsel %vm20038_vm1, %v1469_v39, %v14155_v34  ;;  %v14729_v22 = vmul.u32.u64.low 2863311531, %v14699_v61  ;;  %v14730_v12 = vmul.u32.u64.high 2863311531, %v14699_v61, %v14729_v22  ;;  %vm843_vm4 = vcmp.ne.s32.totalorder %v723_v31, 0  ;;  %1380 = vst.msk [vmem:[#allocation2 + $0x190] sm:$0xff] %vm20186_vm0, %v14903_v41 }
  0xad   : > { %11773 = vmatmul.mubr.msk.bf16.gmra.mrb[36].mxu0 %vm20186_vm0, %v1777_v51  ;;  %vm891_vm11 = vcmp.lt.s32.totalorder %v723_v31, 0  ;;  %v987_v1 = vadd.s32 24, %v723_v31  ;;  %v1565_v35 = vsel %vm20040_vm9, %v1421_v18, %v1517_v7  ;;  %v734_v21 = vsub.s32 %v14626_v17, %v733_v47 }
  0xae   : > { %vm939_vm5 = vmand %vm891_vm11, %vm843_vm4  ;;  %1613 = vst.msk [vmem:[#allocation2 + $0x158] sm:$0xff] %vm20186_vm0, %v1565_v35  ;;  %v743_v34 = vshrl.u32 %v14719_v9, 4  ;;  %v14738_v2 = vmul.u32.u64.low 2863311531, %v271_v20  ;;  %v14739_v0 = vmul.u32.u64.high 2863311531, %v271_v20, %v14738_v2  ;;  %v754_v19 = vshrl.u32 %v14730_v12, 4  ;;  %v1424_v12 = vld [vmem:[#allocation2 + $0x172] sm:$0xff] }
  0xaf   : > { %v1750_v39 = vld [vmem:[#allocation2 + $0x148] sm:$0xff]  ;;  %v14741_v54 = vsel %vm939_vm5, %v987_v1, %v723_v31  ;;  %vm844_vm4 = vcmp.ne.s32.totalorder %v734_v21, 0  ;;  %vm892_vm11 = vcmp.lt.s32.totalorder %v734_v21, 0  ;;  %v988_v13 = vadd.s32 24, %v734_v21 }
  0xb0   : > { %20729 = vst [vmem:[#allocation43_spill] sm:$0xff] %v14741_v54  ;;  %vm20044_vm1 = vcmp.eq.s32.totalorder %v14741_v54, 0  ;;  %vm20041_vm10 = vcmp.eq.s32.totalorder %v14741_v54, 17  ;;  %v744_v43 = vmul.u32 24, %v743_v34  ;;  %vm940_vm5 = vmand %vm892_vm11, %vm844_vm4  ;;  %v765_v53 = vshrl.u32 %v14739_v0, 4  ;;  %v1423_v31 = vld [vmem:[#allocation2 + $0x16a] sm:$0xff] }
  0xb1   : > { %v1751_v36 = vld [vmem:[#allocation2 + $0x150] sm:$0xff]  ;;  %v1518_v17 = vsel %vm20041_vm10, %v1470_v44, %v14172_v23  ;;  %v14754_v9 = vsel %vm940_vm5, %v988_v13, %v734_v21  ;;  %v755_v51 = vmul.u32 24, %v754_v19  ;;  %v14970_v10 = vld [vmem:[#allocation2 + $0x147] sm:$0xff] }
  0xb2   : > { %v1778_v56 = vpack.c.bf16 %v1751_v36, %v1750_v39  ;;  %v1566_v28 = vsel %vm20044_vm1, %v1422_v11, %v1518_v17  ;;  %v745_v18 = vsub.s32 %v14691_v37, %v744_v43  ;;  %20730 = vst [vmem:[#allocation44_spill] sm:$0xff] %v14754_v9  ;;  %vm20046_vm7 = vcmp.eq.s32.totalorder %v14754_v9, 0  ;;  %v1472_v37 = vld [vmem:[#allocation2 + $0x16e] sm:$0xff]  ;;  %v1473_v44 = vld [vmem:[#allocation2 + $0x176] sm:$0xff]  ;;  %v1426_v36 = vld [vmem:[#allocation2 + $0x182] sm:$0xff] }
  0xb3   : > { %1614 = vst.msk [vmem:[#allocation2 + $0x160] sm:$0xff] %vm20186_vm0, %v1566_v28  ;;  %vm20045_vm1 = vcmp.eq.s32.totalorder %v14754_v9, 17  ;;  %v756_v7 = vsub.s32 %v14699_v61, %v755_v51  ;;  %v766_v47 = vmul.u32 24, %v765_v53  ;;  %v1425_v39 = vld [vmem:[#allocation2 + $0x17a] sm:$0xff]  ;;  %v14784_v17 = vld [vmem:[#allocation2 + $0x186] sm:$0xff]  ;;  %v14931_v26 = vld [vmem:[#allocation2 + $0x18e] sm:$0xff] }
  0xb4   : > { %11776 = vmatprep.mubr.msk.bf16.mxu0 %vm20186_vm0, %v1778_v56  ;;  %vm845_vm9 = vcmp.ne.s32.totalorder %v745_v18, 0  ;;  %vm893_vm10 = vcmp.lt.s32.totalorder %v745_v18, 0  ;;  %v989_v23 = vadd.s32 24, %v745_v18  ;;  %v1519_v1 = vsel %vm20045_vm1, %v1471_v42, %v14175_v60  ;;  %v14972_v57 = vld [vmem:[#allocation2 + $0x14f] sm:$0xff] }
  0xb5   : > { %vm941_vm3 = vmand %vm893_vm10, %vm845_vm9  ;;  %v1567_v35 = vsel %vm20046_vm7, %v1423_v31, %v1519_v1  ;;  %v767_v21 = vsub.s32 %v271_v20, %v766_v47  ;;  %v1752_v34 = vld [vmem:[#allocation2 + $0x158] sm:$0xff]  ;;  %vm894_vm9 = vcmp.lt.s32.totalorder %v756_v7, 0  ;;  %v990_v2 = vadd.s32 24, %v756_v7  ;;  %v14810_v1 = vld [vmem:[#allocation2 + $0x27] sm:$0xff] }
  0xb6   : > { %v14760_v22 = vsel %vm941_vm3, %v989_v23, %v745_v18  ;;  %1615 = vst.msk [vmem:[#allocation2 + $0x168] sm:$0xff] %vm20186_vm0, %v1567_v35  ;;  %vm846_vm3 = vcmp.ne.s32.totalorder %v756_v7, 0  ;;  %v1635_v23 = vld [vmem:[#allocation2 + $0xf] sm:$0xff]  ;;  %v1636_v47 = vld [vmem:[#allocation2 + $0x17] sm:$0xff]  ;;  %v1702_v27 = vpack.c.bf16 %v14972_v57, %v14970_v10 }
  0xb7   : > { %20731 = vst [vmem:[#allocation45_spill] sm:$0xff] %v14760_v22  ;;  %vm20049_vm4 = vcmp.eq.s32.totalorder %v14760_v22, 0  ;;  %vm20047_vm11 = vcmp.eq.s32.totalorder %v14760_v22, 17  ;;  %vm847_vm10 = vcmp.ne.s32.totalorder %v767_v21, 0  ;;  %vm895_vm5 = vcmp.lt.s32.totalorder %v767_v21, 0  ;;  %vm942_vm1 = vmand %vm894_vm9, %vm846_vm3 }
  0xb8   : > { %v1520_v61 = vsel %vm20047_vm11, %v1472_v37, %v14178_v4  ;;  %v991_v0 = vadd.s32 24, %v767_v21  ;;  %vm943_vm7 = vmand %vm895_vm5, %vm847_vm10  ;;  %v14776_v20 = vsel %vm942_vm1, %v990_v2, %v756_v7  ;;  %v1474_v4 = vld [vmem:[#allocation2 + $0x17e] sm:$0xff] }
  0xb9   : > { %v1568_v60 = vsel %vm20049_vm4, %v1424_v12, %v1520_v61  ;;  %20732 = vst [vmem:[#allocation46_spill] sm:$0xff] %v14776_v20  ;;  %vm20139_vm11 = vcmp.eq.s32.totalorder %v14776_v20, 0  ;;  %vm20140_vm12 = vcmp.eq.s32.totalorder %v14776_v20, 17  ;;  %v14808_v12 = vld [vmem:[#allocation2 + $0x1f] sm:$0xff]  ;;  %v14825_v2 = vld [vmem:[#allocation2 + $0x37] sm:$0xff]  ;;  %v14897_v20 = vld [vmem:[#allocation2 + $0xcf] sm:$0xff] }
  0xba   : > { %v1753_v11 = vld [vmem:[#allocation2 + $0x160] sm:$0xff]  ;;  %1616 = vst.msk [vmem:[#allocation2 + $0x170] sm:$0xff] %vm20186_vm0, %v1568_v60  ;;  %v14778_v43 = vsel %vm943_vm7, %v991_v0, %v767_v21  ;;  %v1521_v13 = vsel %vm20140_vm12, %v1473_v44, %v14195_v30  ;;  %v14812_v44 = vld [vmem:[#allocation2 + $0x2f] sm:$0xff]  ;;  %v1683_v35 = vpack.c.bf16 %v14808_v12, %v1636_v47  ;;  %v14873_v47 = vld [vmem:[#allocation2 + $0x97] sm:$0xff] }
  0xbb   : > { %v1779_v42 = vpack.c.bf16 %v1753_v11, %v1752_v34  ;;  %20733 = vst [vmem:[#allocation47_spill] sm:$0xff] %v14778_v43  ;;  %vm20178_vm4 = vcmp.eq.s32.totalorder %v14778_v43, 0  ;;  %vm20181_vm3 = vcmp.eq.s32.totalorder %v14778_v43, 17  ;;  %v1569_v56 = vsel %vm20139_vm11, %v1425_v39, %v1521_v13  ;;  %v1634_v30 = vld [vmem:[#allocation2 + $0x7] sm:$0xff]  ;;  %v14827_v60 = vld [vmem:[#allocation2 + $0x3f] sm:$0xff]  ;;  %v14831_v39 = vld [vmem:[#allocation2 + $0x4f] sm:$0xff] }
  0xbc   : > { %v1522_v19 = vsel %vm20181_vm3, %v1474_v4, %v14200_v45  ;;  %1617 = vst.msk [vmem:[#allocation2 + $0x178] sm:$0xff] %vm20186_vm0, %v1569_v56  ;;  %v1682_v37 = vpack.c.bf16 %v1635_v23, %v1634_v30  ;;  %v1684_v21 = vpack.c.bf16 %v14812_v44, %v14810_v1  ;;  %v13547_v34 = vld [vmem:[%s19939_s1 + $0x28] sm:$0xff]   ;;  %v13582_v61 = vld [vmem:[%s19939_s1 + $0x20] sm:$0xff]   ;;  %v14836_v11 = vld [vmem:[%s19939_s1 + $0x30] sm:$0xff]   ;;  %v1685_v4 = vpack.c.bf16 %v14827_v60, %v14825_v2 }
  0xbd   : > { %11777 = vmatmul.mubr.msk.bf16.gmra.mrb[40].mxu0 %vm20186_vm0, %v1779_v42  ;;  %v1570_v28 = vsel %vm20178_vm4, %v1426_v36, %v1522_v19  ;;  %v1754_v18 = vld [vmem:[#allocation2 + $0x168] sm:$0xff]  ;;  %v14845_v36 = vld [vmem:[#allocation2 + $0x57] sm:$0xff]  ;;  %v14847_v13 = vld [vmem:[#allocation2 + $0x5f] sm:$0xff] }
  0xbe   : > { %1618 = vst.msk [vmem:[#allocation2 + $0x180] sm:$0xff] %vm20186_vm0, %v1570_v28  ;;  %v14829_v0 = vld [vmem:[#allocation2 + $0x47] sm:$0xff]  ;;  %v14851_v56 = vld [vmem:[#allocation2 + $0x6f] sm:$0xff]  ;;  %v1687_v28 = vpack.c.bf16 %v14847_v13, %v14845_v36 }
  0xbf   : > { %v1686_v42 = vpack.c.bf16 %v14831_v39, %v14829_v0  ;;  %v14849_v19 = vld [vmem:[#allocation2 + $0x67] sm:$0xff]  ;;  %v14865_v23 = vld [vmem:[#allocation2 + $0x8f] sm:$0xff] }
  0xc0   : > { %v14863_v30 = vld [vmem:[#allocation2 + $0x87] sm:$0xff] }
  0xc1   : > { %v1755_v53 = vld [vmem:[#allocation2 + $0x170] sm:$0xff]  ;;  %v14895_v43 = vld [vmem:[#allocation2 + $0xc7] sm:$0xff] }
  0xc2   : > { %v1780_v51 = vpack.c.bf16 %v1755_v53, %v1754_v18  ;;  %v1688_v18 = vpack.c.bf16 %v14851_v56, %v14849_v19  ;;  %v14859_v53 = vld [vmem:[#allocation2 + $0x77] sm:$0xff]  ;;  %v14984_v55 = vld [vmem:[#allocation2 + $0x167] sm:$0xff]  ;;  %v14986_v6 = vld [vmem:[#allocation2 + $0x16f] sm:$0xff] }
  0xc3   : > { %v14800_v31 = vld [vmem:[#allocation2 + $0x178] sm:$0xff]  ;;  %v1704_v50 = vpack.c.bf16 %v14986_v6, %v14984_v55 }
  0xc4   : > { %11780 = vmatprep.mubr.msk.bf16.mxu0 %vm20186_vm0, %v1780_v51  ;;  %20734 = vst [vmem:[#allocation48_spill] sm:$0xff] %v14800_v31  ;;  %v14861_v51 = vld [vmem:[#allocation2 + $0x7f] sm:$0xff] }
  0xc5   : > { %v14802_v45 = vld [vmem:[#allocation2 + $0x180] sm:$0xff] }
  0xc6   : > { %20735 = vst [vmem:[#allocation49_spill] sm:$0xff] %v14802_v45  ;;  %v1781_v7 = vpack.c.bf16 %v14802_v45, %v14800_v31 }
  0xc8   : > { %11781 = vmatmul.mubr.msk.bf16.gmra.mrb[44].mxu0 %vm20186_vm0, %v1781_v7  ;;  %v1690_v7 = vpack.c.bf16 %v14865_v23, %v14863_v30 }
  0xc9   : > { %11788 = vmatprep.mubr.msk.bf16.mxu0 %vm20186_vm0, %v1682_v37  ;;  %v1689_v37 = vpack.c.bf16 %v14861_v51, %v14859_v53 }
  0xd0   : > { %11789 = vmatmul.mubr.msk.bf16.vlgmr.msra.gmra.mrb[0].mxu0 %vm20186_vm0, %v1683_v35  ;;  %v14875_v35 = vld [vmem:[#allocation2 + $0x9f] sm:$0xff] }
  0xd1   : > { %11837 = vmatpush3.bf16.msra.mxu0 %v13582_v61  ;;  %11792 = vmatprep.mubr.msk.bf16.mxu0 %vm20186_vm0, %v1684_v21  ;;  %v14877_v21 = vld [vmem:[#allocation2 + $0xa7] sm:$0xff]  ;;  %v1691_v61 = vpack.c.bf16 %v14875_v35, %v14873_v47 }
  0xd2   : > { %11838 = vmatprep.subr.bf16.mxu0 %v13547_v34 }
  0xd5   : > { %11839 = vmatpush3.bf16.msra.mxu0 %v13547_v34  ;;  %v14879_v34 = vld [vmem:[#allocation2 + $0xaf] sm:$0xff] }
  0xd6   : > { %11888 = vmatprep.subr.bf16.mxu0 %v14836_v11 }
  0xd8   : > { %11793 = vmatmul.mubr.msk.bf16.gmra.mrb[4].mxu0 %vm20186_vm0, %v1685_v4  ;;  %v272_v4 = vadd.s32 360, %v13638_v3 }
  0xd9   : > { %11796 = vmatprep.mubr.msk.bf16.mxu0 %vm20186_vm0, %v1686_v42  ;;  %v1692_v42 = vpack.c.bf16 %v14879_v34, %v14877_v21 }
  0xe0   : > { %11797 = vmatmul.mubr.msk.bf16.gmra.mrb[8].mxu0 %vm20186_vm0, %v1687_v28 }
  0xe1   : > { %11800 = vmatprep.mubr.msk.bf16.mxu0 %vm20186_vm0, %v1688_v18  ;;  %v14886_v28 = vmul.u32.u64.low 2863311531, %v272_v4  ;;  %v14887_v18 = vmul.u32.u64.high 2863311531, %v272_v4, %v14886_v28 }
  0xe3   : > { %v776_v9 = vshrl.u32 %v14887_v18, 4  ;;  %v14911_v18 = vld [vmem:[#allocation2 + $0xd7] sm:$0xff] }
  0xe5   : > { %v777_v54 = vmul.u32 24, %v776_v9  ;;  %v14915_v9 = vld [vmem:[#allocation2 + $0xe7] sm:$0xff] }
  0xe8   : > { %11801 = vmatmul.mubr.msk.bf16.gmra.mrb[12].mxu0 %vm20186_vm0, %v1689_v37  ;;  %v14891_v37 = vld [vmem:[#allocation2 + $0xb7] sm:$0xff] }
  0xe9   : > { %11804 = vmatprep.mubr.msk.bf16.mxu0 %vm20186_vm0, %v1690_v7  ;;  %v14893_v7 = vld [vmem:[#allocation2 + $0xbf] sm:$0xff] }
  0xea   : > { %v1693_v22 = vpack.c.bf16 %v14893_v7, %v14891_v37 }
  0xf0   : > { %11805 = vmatmul.mubr.msk.bf16.gmra.mrb[16].mxu0 %vm20186_vm0, %v1691_v61  ;;  %v1694_v61 = vpack.c.bf16 %v14897_v20, %v14895_v43 }
  0xf1   : > { %11808 = vmatprep.mubr.msk.bf16.mxu0 %vm20186_vm0, %v1692_v42  ;;  %v778_v42 = vsub.s32 %v272_v4, %v777_v54  ;;  %v1695_v54 = vpack.c.bf16 %v14913_v8, %v14911_v18 }
  0xf3   : > { %vm848_vm7 = vcmp.ne.s32.totalorder %v778_v42, 0  ;;  %vm896_vm1 = vcmp.lt.s32.totalorder %v778_v42, 0  ;;  %v992_v28 = vadd.s32 24, %v778_v42 }
  0xf4   : > { %vm944_vm9 = vmand %vm896_vm1, %vm848_vm7 }
  0xf5   : > { %v14919_v15 = vsel %vm944_vm9, %v992_v28, %v778_v42  ;;  %v14938_v28 = vld [vmem:[#allocation2 + $0xf7] sm:$0xff] }
  0xf6   : > { %20736 = vst [vmem:[#allocation50_spill] sm:$0xff] %v14919_v15  ;;  %vm20180_vm10 = vcmp.eq.s32.totalorder %v14919_v15, 17  ;;  %vm20177_vm5 = vcmp.eq.s32.totalorder %v14919_v15, 0 }
  0xf7   : > { %v1523_v4 = vsel %vm20180_vm10, %v14784_v17, %v14212_v40  ;;  %v14944_v40 = vld [vmem:[#allocation2 + $0x10f] sm:$0xff]  ;;  %v1697_v17 = vpack.c.bf16 %v14940_v32, %v14938_v28 }
  0xf8   : > { %11809 = vmatmul.mubr.msk.bf16.gmra.mrb[20].mxu0 %vm20186_vm0, %v1693_v22  ;;  %v1427_v22 = vld [vmem:[#allocation2 + $0x18a] sm:$0xff] }
  0xf9   : > { %11812 = vmatprep.mubr.msk.bf16.mxu0 %vm20186_vm0, %v1694_v61  ;;  %v1696_v61 = vpack.c.bf16 %v14917_v49, %v14915_v9  ;;  %v1571_v42 = vsel %vm20177_vm5, %v1427_v22, %v1523_v4  ;;  %v1698_v22 = vpack.c.bf16 %v14944_v40, %v14942_v59  ;;  %v14954_v4 = vld [vmem:[#allocation2 + $0x11f] sm:$0xff] }
  0xfa   : > { %1619 = vst.msk [vmem:[#allocation2 + $0x188] sm:$0xff] %vm20186_vm0, %v1571_v42  ;;  %v14958_v42 = vld [vmem:[#allocation2 + $0x12f] sm:$0xff] }
 0x100   : > { %11813 = vmatmul.mubr.msk.bf16.gmra.mrb[24].mxu0 %vm20186_vm0, %v1695_v54  ;;  %v14952_v54 = vld [vmem:[#allocation2 + $0x117] sm:$0xff] }
 0x101   : > { %11816 = vmatprep.mubr.msk.bf16.mxu0 %vm20186_vm0, %v1696_v61  ;;  %v14956_v61 = vld [vmem:[#allocation2 + $0x127] sm:$0xff]  ;;  %v1699_v15 = vpack.c.bf16 %v14954_v4, %v14952_v54 }
 0x102   : > { %v1700_v14 = vpack.c.bf16 %v14958_v42, %v14956_v61 }
 0x108   : > { %11817 = vmatmul.mubr.msk.bf16.gmra.mrb[28].mxu0 %vm20186_vm0, %v1697_v17  ;;  %v14966_v17 = vld [vmem:[#allocation2 + $0x137] sm:$0xff] }
 0x109   : > { %11820 = vmatprep.mubr.msk.bf16.mxu0 %vm20186_vm0, %v1698_v22  ;;  %v14968_v22 = vld [vmem:[#allocation2 + $0x13f] sm:$0xff] }
 0x10a   : > { %v1701_v5 = vpack.c.bf16 %v14968_v22, %v14966_v17 }
 0x110   : > { %11821 = vmatmul.mubr.msk.bf16.gmra.mrb[32].mxu0 %vm20186_vm0, %v1699_v15  ;;  %v14980_v15 = vld [vmem:[#allocation2 + $0x157] sm:$0xff] }
 0x111   : > { %11824 = vmatprep.mubr.msk.bf16.mxu0 %vm20186_vm0, %v1700_v14  ;;  %v14982_v14 = vld [vmem:[#allocation2 + $0x15f] sm:$0xff] }
 0x112   : > { %v1703_v38 = vpack.c.bf16 %v14982_v14, %v14980_v15 }
 0x118   : > { %11825 = vmatmul.mubr.msk.bf16.gmra.mrb[36].mxu0 %vm20186_vm0, %v1701_v5  ;;  %v14994_v5 = vld [vmem:[#allocation2 + $0x177] sm:$0xff] }
 0x119   : > { %11828 = vmatprep.mubr.msk.bf16.mxu0 %vm20186_vm0, %v1702_v27  ;;  %20737 = vst [vmem:[#allocation51_spill] sm:$0xff] %v14994_v5  ;;  %v14996_v27 = vld [vmem:[#allocation2 + $0x17f] sm:$0xff] }
 0x11a   : > { %20738 = vst [vmem:[#allocation52_spill] sm:$0xff] %v14996_v27  ;;  %v1705_v33 = vpack.c.bf16 %v14996_v27, %v14994_v5  ;;  %v15104_v5 = vld [vmem:[#allocation2 + $0xd9] sm:$0xff] }
 0x120   : > { %11829 = vmatmul.mubr.msk.bf16.gmra.mrb[40].mxu0 %vm20186_vm0, %v1703_v38  ;;  %v15004_v38 = vld [vmem:[#allocation2 + $0x29] sm:$0xff] }
 0x121   : > { %11832 = vmatprep.mubr.msk.bf16.mxu0 %vm20186_vm0, %v1704_v50  ;;  %20740 = vst [vmem:[#allocation54_spill] sm:$0xff] %v15004_v38  ;;  %v15006_v50 = vld [vmem:[#allocation2 + $0x31] sm:$0xff] }
 0x122   : > { %20741 = vst [vmem:[#allocation55_spill] sm:$0xff] %v15006_v50  ;;  %v2454_v24 = vpack.c.bf16 %v15006_v50, %v15004_v38  ;;  %v15043_v50 = vld [vmem:[#allocation2 + $0x71] sm:$0xff] }
 0x123   : > { %20749 = vst [vmem:[#allocation63_spill] sm:$0xff] %v15043_v50 }
 0x128   : > { %11833 = vmatmul.mubr.msk.bf16.gmra.mrb[44].mxu0 %vm20186_vm0, %v1705_v33  ;;  %v15019_v33 = vld [vmem:[#allocation2 + $0x41] sm:$0xff] }
 0x129   : > { %11840 = vmatprep.mubr.msk.bf16.mxu0 %vm20186_vm0, %v2452_v16  ;;  %v15017_v16 = vld [vmem:[#allocation2 + $0x39] sm:$0xff]  ;;  %20743 = vst [vmem:[#allocation57_spill] sm:$0xff] %v15019_v33 }
 0x12a   : > { %20742 = vst [vmem:[#allocation56_spill] sm:$0xff] %v15017_v16 }
 0x130   : > { %11841 = vmatmul.mubr.msk.bf16.vlgmr.msra.gmra.mrb[0].mxu0 %vm20186_vm0, %v2453_v58  ;;  %v2455_v58 = vpack.c.bf16 %v15019_v33, %v15017_v16 }
 0x131   : > { %11889 = vmatpush3.bf16.msra.mxu0 %v14836_v11  ;;  %11844 = vmatprep.mubr.msk.bf16.mxu0 %vm20186_vm0, %v2454_v24  ;;  %v2456_v24 = vpack.c.bf16 %v15023_v52, %v15021_v25  ;;  %v15037_v11 = vld [vmem:[#allocation2 + $0x59] sm:$0xff]  ;;  %v15055_v52 = vld [vmem:[#allocation2 + $0x89] sm:$0xff]  ;;  %v15057_v25 = vld [vmem:[#allocation2 + $0x91] sm:$0xff] }
 0x132   : > { %11890 = vmatprep.subr.bf16.mxu0 %v13549_v63  ;;  %20746 = vst [vmem:[#allocation60_spill] sm:$0xff] %v15037_v11  ;;  %v2457_v33 = vpack.c.bf16 %v15039_v29, %v15037_v11  ;;  %20752 = vst [vmem:[#allocation66_spill] sm:$0xff] %v15055_v52  ;;  %v2460_v29 = vpack.c.bf16 %v15057_v25, %v15055_v52 }
 0x133   : > { %20753 = vst [vmem:[#allocation67_spill] sm:$0xff] %v15057_v25  ;;  %v274_v25 = vadd.s32 376, %v13638_v3 }
 0x135   : > { %11891 = vmatpush3.bf16.msra.mxu0 %v13549_v63  ;;  %v2458_v63 = vpack.c.bf16 %v15043_v50, %v15041_v62  ;;  %v15069_v50 = vld [vmem:[#allocation2 + $0xa9] sm:$0xff]  ;;  %v15071_v62 = vld [vmem:[#allocation2 + $0xb1] sm:$0xff] }
 0x136   : > { %11940 = vmatprep.subr.bf16.mxu0 %v15028_v48  ;;  %20756 = vst [vmem:[#allocation70_spill] sm:$0xff] %v15069_v50  ;;  %20757 = vst [vmem:[#allocation71_spill] sm:$0xff] %v15071_v62 }
 0x138   : > { %11845 = vmatmul.mubr.msk.bf16.gmra.mrb[4].mxu0 %vm20186_vm0, %v2455_v58  ;;  %v15051_v58 = vld [vmem:[#allocation2 + $0x79] sm:$0xff] }
 0x139   : > { %11848 = vmatprep.mubr.msk.bf16.mxu0 %vm20186_vm0, %v2456_v24  ;;  %20750 = vst [vmem:[#allocation64_spill] sm:$0xff] %v15051_v58  ;;  %v15053_v24 = vld [vmem:[#allocation2 + $0x81] sm:$0xff] }
 0x13a   : > { %20751 = vst [vmem:[#allocation65_spill] sm:$0xff] %v15053_v24  ;;  %v2459_v16 = vpack.c.bf16 %v15053_v24, %v15051_v58  ;;  %v273_v24 = vadd.s32 368, %v13638_v3  ;;  %v15082_v58 = vmul.u32.u64.low 2863311531, %v274_v25  ;;  %v15083_v38 = vmul.u32.u64.high 2863311531, %v274_v25, %v15082_v58  ;;  %v15093_v3 = vld [vmem:[#allocation2 + $0xd1] sm:$0xff] }
 0x13b   : > { %20759 = vst [vmem:[#allocation73_spill] sm:$0xff] %v15093_v3 }
 0x140   : > { %11849 = vmatmul.mubr.msk.bf16.gmra.mrb[8].mxu0 %vm20186_vm0, %v2457_v33  ;;  %v15065_v33 = vld [vmem:[#allocation2 + $0x99] sm:$0xff] }
 0x141   : > { %11852 = vmatprep.mubr.msk.bf16.mxu0 %vm20186_vm0, %v2458_v63  ;;  %20754 = vst [vmem:[#allocation68_spill] sm:$0xff] %v15065_v33  ;;  %v15067_v63 = vld [vmem:[#allocation2 + $0xa1] sm:$0xff] }
 0x142   : > { %20755 = vst [vmem:[#allocation69_spill] sm:$0xff] %v15067_v63  ;;  %v2461_v11 = vpack.c.bf16 %v15067_v63, %v15065_v33  ;;  %v15089_v63 = vld [vmem:[#allocation2 + $0xc1] sm:$0xff]  ;;  %v15091_v33 = vld [vmem:[#allocation2 + $0xc9] sm:$0xff] }
 0x143   : > { %20758 = vst [vmem:[#allocation72_spill] sm:$0xff] %v15091_v33  ;;  %v2463_v58 = vpack.c.bf16 %v15089_v63, %v15087_v46 }
 0x148   : > { %11853 = vmatmul.mubr.msk.bf16.gmra.mrb[12].mxu0 %vm20186_vm0, %v2459_v16  ;;  %v2462_v16 = vpack.c.bf16 %v15071_v62, %v15069_v50  ;;  %v798_v50 = vshrl.u32 %v15083_v38, 4 }
 0x149   : > { %11856 = vmatprep.mubr.msk.bf16.mxu0 %vm20186_vm0, %v2460_v29  ;;  %v15079_v29 = vmul.u32.u64.low 2863311531, %v273_v24  ;;  %v15080_v52 = vmul.u32.u64.high 2863311531, %v273_v24, %v15079_v29 }
 0x14a   : > { %v1333_v29 = vld [vmem:[%s13673_s29 + $0x178] sm:$0xff] }
 0x14b   : > { %v787_v62 = vshrl.u32 %v15080_v52, 4  ;;  %1381 = vst.msk [vmem:[#allocation2 + $0x198] sm:$0xff] %vm20186_vm0, %v1333_v29  ;;  %v15106_v52 = vld [vmem:[#allocation2 + $0xe1] sm:$0xff] }
 0x14d   : > { %v788_v45 = vmul.u32 24, %v787_v62 }
 0x14f   : > { %v789_v31 = vsub.s32 %v273_v24, %v788_v45  ;;  %v2465_v45 = vpack.c.bf16 %v15106_v52, %v15104_v5 }
 0x150   : > { %11857 = vmatmul.mubr.msk.bf16.gmra.mrb[16].mxu0 %vm20186_vm0, %v2461_v11  ;;  %v799_v11 = vmul.u32 24, %v798_v50  ;;  %v15109_v50 = vld [vmem:[#allocation2 + $0xe9] sm:$0xff] }
 0x151   : > { %11860 = vmatprep.mubr.msk.bf16.mxu0 %vm20186_vm0, %v2462_v16  ;;  %v2464_v16 = vpack.c.bf16 %v15093_v3, %v15091_v33  ;;  %vm849_vm7 = vcmp.ne.s32.totalorder %v789_v31, 0  ;;  %vm897_vm9 = vcmp.lt.s32.totalorder %v789_v31, 0  ;;  %v993_v62 = vadd.s32 24, %v789_v31  ;;  %v15111_v3 = vld [vmem:[#allocation2 + $0xf1] sm:$0xff] }
 0x152   : > { %v800_v27 = vsub.s32 %v274_v25, %v799_v11  ;;  %vm945_vm12 = vmand %vm897_vm9, %vm849_vm7  ;;  %20760 = vst [vmem:[#allocation74_spill] sm:$0xff] %v15111_v3  ;;  %v1428_v11 = vld [vmem:[#allocation2 + $0x192] sm:$0xff]  ;;  %v2466_v33 = vpack.c.bf16 %v15111_v3, %v15109_v50 }
 0x153   : > { %v15115_v25 = vsel %vm945_vm12, %v993_v62, %v789_v31  ;;  %v15139_v3 = vld [vmem:[#allocation2 + $0xf9] sm:$0xff] }
 0x154   : > { %vm850_vm1 = vcmp.ne.s32.totalorder %v800_v27, 0  ;;  %vm898_vm11 = vcmp.lt.s32.totalorder %v800_v27, 0  ;;  %v994_v38 = vadd.s32 24, %v800_v27  ;;  %20761 = vst [vmem:[#allocation75_spill] sm:$0xff] %v15115_v25  ;;  %vm20176_vm2 = vcmp.eq.s32.totalorder %v15115_v25, 0 }
 0x155   : > { %vm946_vm15 = vmand %vm898_vm11, %vm850_vm1  ;;  %vm20179_vm7 = vcmp.eq.s32.totalorder %v15115_v25, 17 }
 0x156   : > { %v15117_v24 = vsel %vm946_vm15, %v994_v38, %v800_v27  ;;  %v1524_v31 = vsel %vm20179_vm7, %v14931_v26, %v14903_v41  ;;  %v15141_v26 = vld [vmem:[#allocation2 + $0x101] sm:$0xff]  ;;  %v15143_v41 = vld [vmem:[#allocation2 + $0x109] sm:$0xff] }
 0x157   : > { %20762 = vst [vmem:[#allocation76_spill] sm:$0xff] %v15117_v24  ;;  %vm20174_vm8 = vcmp.eq.s32.totalorder %v15117_v24, 0  ;;  %vm20175_vm9 = vcmp.eq.s32.totalorder %v15117_v24, 17  ;;  %v1572_v62 = vsel %vm20176_vm2, %v1428_v11, %v1524_v31  ;;  %v15159_v31 = vld [vmem:[#allocation2 + $0x131] sm:$0xff] }
 0x158   : > { %11861 = vmatmul.mubr.msk.bf16.gmra.mrb[20].mxu0 %vm20186_vm0, %v2463_v58  ;;  %v1477_v58 = vld [vmem:[#allocation2 + $0x196] sm:$0xff]  ;;  %20766 = vst [vmem:[#allocation80_spill] sm:$0xff] %v15159_v31 }
 0x159   : > { %11864 = vmatprep.mubr.msk.bf16.mxu0 %vm20186_vm0, %v2464_v16  ;;  %v1429_v16 = vld [vmem:[#allocation2 + $0x19a] sm:$0xff]  ;;  %v1525_v27 = vsel %vm20175_vm9, %v1477_v58, %v1333_v29  ;;  %1620 = vst.msk [vmem:[#allocation2 + $0x190] sm:$0xff] %vm20186_vm0, %v1572_v62  ;;  %v15145_v29 = vld [vmem:[#allocation2 + $0x111] sm:$0xff]  ;;  %v2467_v58 = vpack.c.bf16 %v15141_v26, %v15139_v3 }
 0x15a   : > { %v1573_v38 = vsel %vm20174_vm8, %v1429_v16, %v1525_v27  ;;  %v2468_v11 = vpack.c.bf16 %v15145_v29, %v15143_v41  ;;  %v15157_v16 = vld [vmem:[#allocation2 + $0x129] sm:$0xff]  ;;  %v15173_v24 = vld [vmem:[#allocation2 + $0x151] sm:$0xff] }
 0x15b   : > { %1621 = vst.msk [vmem:[#allocation2 + $0x198] sm:$0xff] %vm20186_vm0, %v1573_v38  ;;  %20765 = vst [vmem:[#allocation79_spill] sm:$0xff] %v15157_v16  ;;  %v2470_v62 = vpack.c.bf16 %v15159_v31, %v15157_v16  ;;  %v15167_v38 = vld [vmem:[#allocation2 + $0x139] sm:$0xff]  ;;  %v15185_v31 = vld [vmem:[#allocation2 + $0x169] sm:$0xff] }
 0x15c   : > { %20769 = vst [vmem:[#allocation83_spill] sm:$0xff] %v15173_v24  ;;  %v15187_v16 = vld [vmem:[#allocation2 + $0x171] sm:$0xff] }
 0x15d   : > { %20770 = vst [vmem:[#allocation84_spill] sm:$0xff] %v15187_v16 }
 0x160   : > { %11865 = vmatmul.mubr.msk.bf16.gmra.mrb[24].mxu0 %vm20186_vm0, %v2465_v45  ;;  %v15153_v45 = vld [vmem:[#allocation2 + $0x119] sm:$0xff] }
 0x161   : > { %11868 = vmatprep.mubr.msk.bf16.mxu0 %vm20186_vm0, %v2466_v33  ;;  %20763 = vst [vmem:[#allocation77_spill] sm:$0xff] %v15153_v45  ;;  %v15155_v33 = vld [vmem:[#allocation2 + $0x121] sm:$0xff] }
 0x162   : > { %20764 = vst [vmem:[#allocation78_spill] sm:$0xff] %v15155_v33  ;;  %v2469_v27 = vpack.c.bf16 %v15155_v33, %v15153_v45 }
 0x168   : > { %11869 = vmatmul.mubr.msk.bf16.gmra.mrb[28].mxu0 %vm20186_vm0, %v2467_v58  ;;  %v15169_v58 = vld [vmem:[#allocation2 + $0x141] sm:$0xff] }
 0x169   : > { %11872 = vmatprep.mubr.msk.bf16.mxu0 %vm20186_vm0, %v2468_v11  ;;  %20767 = vst [vmem:[#allocation81_spill] sm:$0xff] %v15169_v58  ;;  %v15171_v11 = vld [vmem:[#allocation2 + $0x149] sm:$0xff]  ;;  %v2471_v25 = vpack.c.bf16 %v15169_v58, %v15167_v38  ;;  %v2474_v58 = vpack.c.bf16 %v15187_v16, %v15185_v31  ;;  %v2886_v16 = vpack.c.bf16 %v14825_v2, %v14812_v44 }
 0x16a   : > { %20768 = vst [vmem:[#allocation82_spill] sm:$0xff] %v15171_v11  ;;  %v2472_v33 = vpack.c.bf16 %v15173_v24, %v15171_v11  ;;  %v2885_v11 = vpack.c.bf16 %v14810_v1, %v14808_v12  ;;  %v13552_v12 = vld [vmem:[%s19939_s1 + $0x50] sm:$0xff]   ;;  %v2888_v1 = vpack.c.bf16 %v14845_v36, %v14831_v39  ;;  %v2889_v44 = vpack.c.bf16 %v14849_v19, %v14847_v13 }
 0x16b   : > { %v2891_v2 = vpack.c.bf16 %v14863_v30, %v14861_v51  ;;  %v2894_v39 = vpack.c.bf16 %v14891_v37, %v14879_v34  ;;  %v2895_v36 = vpack.c.bf16 %v14895_v43, %v14893_v7  ;;  %v2896_v13 = vpack.c.bf16 %v14911_v18, %v14897_v20  ;;  %v15276_v30 = vld [vmem:[#allocation2 + $0x187] sm:$0xff]  ;;  %v15292_v18 = vld [vmem:[#allocation2 + $0x38] sm:$0xff] }
 0x16c   : > { %v2897_v19 = vpack.c.bf16 %v14915_v9, %v14913_v8  ;;  %v2898_v43 = vpack.c.bf16 %v14938_v28, %v14917_v49  ;;  %v2900_v8 = vpack.c.bf16 %v14952_v54, %v14944_v40  ;;  %v2901_v20 = vpack.c.bf16 %v14956_v61, %v14954_v4  ;;  %v3271_v34 = vld [vmem:[#allocation2 + $0x28] sm:$0xff]  ;;  %v15294_v9 = vld [vmem:[#allocation2 + $0x40] sm:$0xff]  ;;  %v13553_v4 = vld [vmem:[%s19939_s1 + $0x58] sm:$0xff]  }
 0x16d   : > { %v2902_v49 = vpack.c.bf16 %v14966_v17, %v14958_v42  ;;  %v2905_v51 = vpack.c.bf16 %v14984_v55, %v14982_v14  ;;  %v3270_v55 = vld [vmem:[#allocation2 + $0x20] sm:$0xff]  ;;  %v15296_v28 = vld [vmem:[#allocation2 + $0x48] sm:$0xff]  ;;  %v15306_v61 = vld [vmem:[#allocation2 + $0x50] sm:$0xff] }
 0x16e   : > { %v3318_v7 = vpack.c.bf16 %v3271_v34, %v3270_v55  ;;  %v3320_v54 = vpack.c.bf16 %v15296_v28, %v15294_v9  ;;  %v15308_v42 = vld [vmem:[#allocation2 + $0x58] sm:$0xff]  ;;  %v15310_v17 = vld [vmem:[#allocation2 + $0x60] sm:$0xff]  ;;  %v15388_v55 = vld [vmem:[#allocation2 + $0x108] sm:$0xff] }
 0x16f   : > { %v3321_v14 = vpack.c.bf16 %v15308_v42, %v15306_v61 }
 0x170   : > { %11873 = vmatmul.mubr.msk.bf16.gmra.mrb[32].mxu0 %vm20186_vm0, %v2469_v27  ;;  %v15181_v27 = vld [vmem:[#allocation2 + $0x159] sm:$0xff] }
 0x171   : > { %11876 = vmatprep.mubr.msk.bf16.mxu0 %vm20186_vm0, %v2470_v62  ;;  %v15183_v62 = vld [vmem:[#allocation2 + $0x161] sm:$0xff] }
 0x172   : > { %v2473_v45 = vpack.c.bf16 %v15183_v62, %v15181_v27 }
 0x178   : > { %11877 = vmatmul.mubr.msk.bf16.gmra.mrb[36].mxu0 %vm20186_vm0, %v2471_v25  ;;  %v15195_v25 = vld [vmem:[#allocation2 + $0x179] sm:$0xff] }
 0x179   : > { %11880 = vmatprep.mubr.msk.bf16.mxu0 %vm20186_vm0, %v2472_v33  ;;  %v15197_v33 = vld [vmem:[#allocation2 + $0x181] sm:$0xff] }
 0x17a   : > { %v2475_v24 = vpack.c.bf16 %v15197_v33, %v15195_v25 }
 0x180   : > { %11881 = vmatmul.mubr.msk.bf16.gmra.mrb[40].mxu0 %vm20186_vm0, %v2473_v45  ;;  %v2887_v45 = vpack.c.bf16 %v14829_v0, %v14827_v60  ;;  %v2892_v60 = vpack.c.bf16 %v14873_v47, %v14865_v23  ;;  %v2893_v0 = vpack.c.bf16 %v14877_v21, %v14875_v35  ;;  %v20772_v23 = vld [vmem:[#allocation51_spill] sm:$0xff]  ;;  %v15286_v21 = vld [vmem:[#allocation2 + $0x197] sm:$0xff] }
 0x181   : > { %11884 = vmatprep.mubr.msk.bf16.mxu0 %vm20186_vm0, %v2474_v58  ;;  %v13551_v58 = vld [vmem:[%s19939_s1 + $0x48] sm:$0xff]   ;;  %v2906_v47 = vpack.c.bf16 %v20772_v23, %v14986_v6  ;;  %v3272_v6 = vld [vmem:[#allocation2 + $0x30] sm:$0xff] }
 0x182   : > { %v3319_v40 = vpack.c.bf16 %v15292_v18, %v3272_v6  ;;  %v15398_v6 = vld [vmem:[#allocation2 + $0x118] sm:$0xff] }
 0x188   : > { %11885 = vmatmul.mubr.msk.bf16.gmra.mrb[44].mxu0 %vm20186_vm0, %v2475_v24 }
 0x189   : > { %11892 = vmatprep.mubr.msk.bf16.mxu0 %vm20186_vm0, %v2885_v11  ;;  %v15328_v11 = vld [vmem:[#allocation2 + $0x78] sm:$0xff] }
 0x190   : > { %11893 = vmatmul.mubr.msk.bf16.vlgmr.msra.gmra.mrb[0].mxu0 %vm20186_vm0, %v2886_v16  ;;  %v15326_v16 = vld [vmem:[#allocation2 + $0x70] sm:$0xff] }
 0x191   : > { %11941 = vmatpush3.bf16.msra.mxu0 %v15028_v48  ;;  %11896 = vmatprep.mubr.msk.bf16.mxu0 %vm20186_vm0, %v2887_v45  ;;  %v2890_v48 = vpack.c.bf16 %v14859_v53, %v14851_v56  ;;  %v15248_v56 = vld [vmem:[#allocation2 + $0x170] sm:$0xff]  ;;  %v2899_v53 = vpack.c.bf16 %v14942_v59, %v14940_v32  ;;  %v2903_v32 = vpack.c.bf16 %v14970_v10, %v14968_v22  ;;  %v20773_v10 = vld [vmem:[#allocation52_spill] sm:$0xff]  ;;  %v15330_v45 = vld [vmem:[#allocation2 + $0x80] sm:$0xff] }
 0x192   : > { %11942 = vmatprep.subr.bf16.mxu0 %v13551_v58  ;;  %20771 = vst [vmem:[#allocation85_spill] sm:$0xff] %v15248_v56  ;;  %1631 = vst.msk [vmem:[#allocation2 + $0x1a0] sm:$0xff] %vm20186_vm0, %v15248_v56  ;;  %v2904_v59 = vpack.c.bf16 %v14980_v15, %v14972_v57  ;;  %v2907_v35 = vpack.c.bf16 %v15276_v30, %v20773_v10  ;;  %v15284_v57 = vld [vmem:[#allocation2 + $0x18f] sm:$0xff]  ;;  %v15317_v15 = vld [vmem:[%s19939_s1 + $0x60] sm:$0xff]  }
 0x193   : > { %v2908_v37 = vpack.c.bf16 %v15286_v21, %v15284_v57  ;;  %v15312_v22 = vld [vmem:[#allocation2 + $0x68] sm:$0xff]  ;;  %v15384_v10 = vld [vmem:[#allocation2 + $0xf8] sm:$0xff] }
 0x194   : > { %v3322_v24 = vpack.c.bf16 %v15312_v22, %v15310_v17 }
 0x195   : > { %11943 = vmatpush3.bf16.msra.mxu0 %v13551_v58  ;;  %v15332_v58 = vld [vmem:[#allocation2 + $0x88] sm:$0xff] }
 0x196   : > { %11992 = vmatprep.subr.bf16.mxu0 %v13552_v12 }
 0x198   : > { %11897 = vmatmul.mubr.msk.bf16.gmra.mrb[4].mxu0 %vm20186_vm0, %v2888_v1  ;;  %v3324_v1 = vpack.c.bf16 %v15332_v58, %v15330_v45 }
 0x199   : > { %11900 = vmatprep.mubr.msk.bf16.mxu0 %vm20186_vm0, %v2889_v44  ;;  %v15340_v44 = vld [vmem:[#allocation2 + $0x90] sm:$0xff] }
 0x1a0   : > { %11901 = vmatmul.mubr.msk.bf16.gmra.mrb[8].mxu0 %vm20186_vm0, %v2890_v48  ;;  %v15342_v48 = vld [vmem:[#allocation2 + $0x98] sm:$0xff] }
 0x1a1   : > { %11904 = vmatprep.mubr.msk.bf16.mxu0 %vm20186_vm0, %v2891_v2  ;;  %v15344_v2 = vld [vmem:[#allocation2 + $0xa0] sm:$0xff] }
 0x1a8   : > { %11905 = vmatmul.mubr.msk.bf16.gmra.mrb[12].mxu0 %vm20186_vm0, %v2892_v60  ;;  %v15346_v60 = vld [vmem:[#allocation2 + $0xa8] sm:$0xff] }
 0x1a9   : > { %11908 = vmatprep.mubr.msk.bf16.mxu0 %vm20186_vm0, %v2893_v0  ;;  %v3325_v0 = vpack.c.bf16 %v15342_v48, %v15340_v44 }
 0x1b0   : > { %11909 = vmatmul.mubr.msk.bf16.gmra.mrb[16].mxu0 %vm20186_vm0, %v2894_v39  ;;  %v3326_v39 = vpack.c.bf16 %v15346_v60, %v15344_v2 }
 0x1b1   : > { %11912 = vmatprep.mubr.msk.bf16.mxu0 %vm20186_vm0, %v2895_v36  ;;  %v15354_v36 = vld [vmem:[#allocation2 + $0xb0] sm:$0xff] }
 0x1b8   : > { %11913 = vmatmul.mubr.msk.bf16.gmra.mrb[20].mxu0 %vm20186_vm0, %v2896_v13  ;;  %v15356_v13 = vld [vmem:[#allocation2 + $0xb8] sm:$0xff] }
 0x1b9   : > { %11916 = vmatprep.mubr.msk.bf16.mxu0 %vm20186_vm0, %v2897_v19  ;;  %v15358_v19 = vld [vmem:[#allocation2 + $0xc0] sm:$0xff] }
 0x1c0   : > { %11917 = vmatmul.mubr.msk.bf16.gmra.mrb[24].mxu0 %vm20186_vm0, %v2898_v43  ;;  %v15360_v43 = vld [vmem:[#allocation2 + $0xc8] sm:$0xff] }
 0x1c1   : > { %11920 = vmatprep.mubr.msk.bf16.mxu0 %vm20186_vm0, %v2899_v53  ;;  %v3327_v53 = vpack.c.bf16 %v15356_v13, %v15354_v36 }
 0x1c8   : > { %11921 = vmatmul.mubr.msk.bf16.gmra.mrb[28].mxu0 %vm20186_vm0, %v2900_v8  ;;  %v3328_v8 = vpack.c.bf16 %v15360_v43, %v15358_v19 }
 0x1c9   : > { %11924 = vmatprep.mubr.msk.bf16.mxu0 %vm20186_vm0, %v2901_v20  ;;  %v15368_v20 = vld [vmem:[#allocation2 + $0xd0] sm:$0xff] }
 0x1d0   : > { %11925 = vmatmul.mubr.msk.bf16.gmra.mrb[32].mxu0 %vm20186_vm0, %v2902_v49  ;;  %v15370_v49 = vld [vmem:[#allocation2 + $0xd8] sm:$0xff] }
 0x1d1   : > { %11928 = vmatprep.mubr.msk.bf16.mxu0 %vm20186_vm0, %v2903_v32  ;;  %v15372_v32 = vld [vmem:[#allocation2 + $0xe0] sm:$0xff] }
 0x1d8   : > { %11929 = vmatmul.mubr.msk.bf16.gmra.mrb[36].mxu0 %vm20186_vm0, %v2904_v59  ;;  %v15374_v59 = vld [vmem:[#allocation2 + $0xe8] sm:$0xff] }
 0x1d9   : > { %11932 = vmatprep.mubr.msk.bf16.mxu0 %vm20186_vm0, %v2905_v51  ;;  %v3329_v51 = vpack.c.bf16 %v15370_v49, %v15368_v20  ;;  %v3330_v23 = vpack.c.bf16 %v15374_v59, %v15372_v32 }
 0x1e0   : > { %11933 = vmatmul.mubr.msk.bf16.gmra.mrb[40].mxu0 %vm20186_vm0, %v2906_v47  ;;  %v15382_v47 = vld [vmem:[#allocation2 + $0xf0] sm:$0xff] }
 0x1e1   : > { %11936 = vmatprep.mubr.msk.bf16.mxu0 %vm20186_vm0, %v2907_v35  ;;  %v15386_v35 = vld [vmem:[#allocation2 + $0x100] sm:$0xff]  ;;  %v3331_v34 = vpack.c.bf16 %v15384_v10, %v15382_v47 }
 0x1e8   : > { %11937 = vmatmul.mubr.msk.bf16.gmra.mrb[44].mxu0 %vm20186_vm0, %v2908_v37  ;;  %v3332_v37 = vpack.c.bf16 %v15388_v55, %v15386_v35 }
 0x1e9   : > { %11944 = vmatprep.mubr.msk.bf16.mxu0 %vm20186_vm0, %v3318_v7  ;;  %v15396_v7 = vld [vmem:[#allocation2 + $0x110] sm:$0xff] }
 0x1f0   : > { %11945 = vmatmul.mubr.msk.bf16.vlgmr.msra.gmra.mrb[0].mxu0 %vm20186_vm0, %v3319_v40  ;;  %v15400_v40 = vld [vmem:[#allocation2 + $0x120] sm:$0xff] }
 0x1f1   : > { %11993 = vmatpush3.bf16.msra.mxu0 %v13552_v12  ;;  %11948 = vmatprep.mubr.msk.bf16.mxu0 %vm20186_vm0, %v3320_v54  ;;  %v3323_v12 = vpack.c.bf16 %v15328_v11, %v15326_v16  ;;  %v15402_v54 = vld [vmem:[#allocation2 + $0x128] sm:$0xff] }
 0x1f2   : > { %11994 = vmatprep.subr.bf16.mxu0 %v13553_v4 }
 0x1f5   : > { %11995 = vmatpush3.bf16.msra.mxu0 %v13553_v4  ;;  %v3333_v4 = vpack.c.bf16 %v15398_v6, %v15396_v7 }
 0x1f6   : > { %12044 = vmatprep.subr.bf16.mxu0 %v15317_v15 }
 0x1f8   : > { %11949 = vmatmul.mubr.msk.bf16.gmra.mrb[4].mxu0 %vm20186_vm0, %v3321_v14  ;;  %v3334_v14 = vpack.c.bf16 %v15402_v54, %v15400_v40 }
 0x1f9   : > { %11952 = vmatprep.mubr.msk.bf16.mxu0 %vm20186_vm0, %v3322_v24  ;;  %v15410_v24 = vld [vmem:[#allocation2 + $0x130] sm:$0xff] }
 0x1fa   : > { %20774 = vst [vmem:[#allocation51_spill] sm:$0xff] %v15410_v24 }
 0x200   : > { %11953 = vmatmul.mubr.msk.bf16.gmra.mrb[8].mxu0 %vm20186_vm0, %v3323_v12  ;;  %v15412_v12 = vld [vmem:[#allocation2 + $0x138] sm:$0xff] }
 0x201   : > { %11956 = vmatprep.mubr.msk.bf16.mxu0 %vm20186_vm0, %v3324_v1  ;;  %20775 = vst [vmem:[#allocation52_spill] sm:$0xff] %v15412_v12  ;;  %v15414_v1 = vld [vmem:[#allocation2 + $0x140] sm:$0xff] }
 0x202   : > { %20776 = vst [vmem:[#allocation86_spill] sm:$0xff] %v15414_v1 }
 0x208   : > { %11957 = vmatmul.mubr.msk.bf16.gmra.mrb[12].mxu0 %vm20186_vm0, %v3325_v0  ;;  %v15416_v0 = vld [vmem:[#allocation2 + $0x148] sm:$0xff] }
 0x209   : > { %11960 = vmatprep.mubr.msk.bf16.mxu0 %vm20186_vm0, %v3326_v39  ;;  %20777 = vst [vmem:[#allocation87_spill] sm:$0xff] %v15416_v0  ;;  %v3335_v39 = vpack.c.bf16 %v15412_v12, %v15410_v24  ;;  %v13555_v12 = vld [vmem:[%s19939_s1 + $0x68] sm:$0xff]  }
 0x210   : > { %11961 = vmatmul.mubr.msk.bf16.gmra.mrb[16].mxu0 %vm20186_vm0, %v3327_v53  ;;  %v3336_v53 = vpack.c.bf16 %v15416_v0, %v15414_v1  ;;  %v20784_v0 = vld [vmem:[#allocation49_spill] sm:$0xff] }
 0x211   : > { %11964 = vmatprep.mubr.msk.bf16.mxu0 %vm20186_vm0, %v3328_v8  ;;  %v15424_v8 = vld [vmem:[#allocation2 + $0x150] sm:$0xff] }
 0x212   : > { %20778 = vst [vmem:[#allocation88_spill] sm:$0xff] %v15424_v8 }
 0x218   : > { %11965 = vmatmul.mubr.msk.bf16.gmra.mrb[20].mxu0 %vm20186_vm0, %v3329_v51  ;;  %v15426_v51 = vld [vmem:[#allocation2 + $0x158] sm:$0xff] }
 0x219   : > { %11968 = vmatprep.mubr.msk.bf16.mxu0 %vm20186_vm0, %v3330_v23  ;;  %20779 = vst [vmem:[#allocation89_spill] sm:$0xff] %v15426_v51  ;;  %v15428_v23 = vld [vmem:[#allocation2 + $0x160] sm:$0xff] }
 0x21a   : > { %20780 = vst [vmem:[#allocation90_spill] sm:$0xff] %v15428_v23 }
 0x220   : > { %11969 = vmatmul.mubr.msk.bf16.gmra.mrb[24].mxu0 %vm20186_vm0, %v3331_v34  ;;  %v15430_v34 = vld [vmem:[#allocation2 + $0x168] sm:$0xff] }
 0x221   : > { %11972 = vmatprep.mubr.msk.bf16.mxu0 %vm20186_vm0, %v3332_v37  ;;  %20781 = vst [vmem:[#allocation91_spill] sm:$0xff] %v15430_v34  ;;  %v3337_v37 = vpack.c.bf16 %v15426_v51, %v15424_v8  ;;  %v15446_v51 = vld [vmem:[#allocation2 + $0x190] sm:$0xff]  ;;  %v15448_v8 = vld [vmem:[#allocation2 + $0x198] sm:$0xff] }
 0x222   : > { %20786 = vst [vmem:[#allocation49_spill] sm:$0xff] %v15448_v8 }
 0x228   : > { %11973 = vmatmul.mubr.msk.bf16.gmra.mrb[28].mxu0 %vm20186_vm0, %v3333_v4  ;;  %v3338_v4 = vpack.c.bf16 %v15430_v34, %v15428_v23  ;;  %v20788_v34 = vld [vmem:[#allocation54_spill] sm:$0xff] }
 0x229   : > { %11976 = vmatprep.mubr.msk.bf16.mxu0 %vm20186_vm0, %v3334_v14  ;;  %v15438_v14 = vld [vmem:[#allocation2 + $0x188] sm:$0xff] }
 0x22a   : > { %20782 = vst [vmem:[#allocation92_spill] sm:$0xff] %v15438_v14  ;;  %v3340_v1 = vpack.c.bf16 %v15438_v14, %v20784_v0  ;;  %v20790_v0 = vld [vmem:[#allocation56_spill] sm:$0xff] }
 0x230   : > { %11977 = vmatmul.mubr.msk.bf16.gmra.mrb[32].mxu0 %vm20186_vm0, %v3335_v39  ;;  %v20783_v39 = vld [vmem:[#allocation48_spill] sm:$0xff] }
 0x231   : > { %11980 = vmatprep.mubr.msk.bf16.mxu0 %vm20186_vm0, %v3336_v53  ;;  %v3339_v53 = vpack.c.bf16 %v20783_v39, %v15248_v56  ;;  %20785 = vst [vmem:[#allocation48_spill] sm:$0xff] %v15446_v51  ;;  %v20789_v39 = vld [vmem:[#allocation55_spill] sm:$0xff]  ;;  %v20792_v56 = vld [vmem:[#allocation58_spill] sm:$0xff] }
 0x232   : > { %v3752_v14 = vpack.c.bf16 %v20790_v0, %v20789_v39  ;;  %v20796_v39 = vld [vmem:[#allocation62_spill] sm:$0xff] }
 0x238   : > { %11981 = vmatmul.mubr.msk.bf16.gmra.mrb[36].mxu0 %vm20186_vm0, %v3337_v37  ;;  %v3341_v37 = vpack.c.bf16 %v15448_v8, %v15446_v51  ;;  %v20800_v8 = vld [vmem:[#allocation66_spill] sm:$0xff] }
 0x239   : > { %11984 = vmatprep.mubr.msk.bf16.mxu0 %vm20186_vm0, %v3338_v4  ;;  %v20787_v4 = vld [vmem:[#allocation53_spill] sm:$0xff] }
 0x23a   : > { %v3751_v23 = vpack.c.bf16 %v20788_v34, %v20787_v4  ;;  %v20793_v34 = vld [vmem:[#allocation59_spill] sm:$0xff] }
 0x240   : > { %11985 = vmatmul.mubr.msk.bf16.gmra.mrb[40].mxu0 %vm20186_vm0, %v3339_v53  ;;  %v20791_v53 = vld [vmem:[#allocation57_spill] sm:$0xff] }
 0x241   : > { %11988 = vmatprep.mubr.msk.bf16.mxu0 %vm20186_vm0, %v3340_v1  ;;  %v3753_v1 = vpack.c.bf16 %v20792_v56, %v20791_v53  ;;  %v20795_v56 = vld [vmem:[#allocation61_spill] sm:$0xff] }
 0x242   : > { %v3755_v0 = vpack.c.bf16 %v20796_v39, %v20795_v56  ;;  %v20804_v39 = vld [vmem:[#allocation70_spill] sm:$0xff] }
 0x248   : > { %11989 = vmatmul.mubr.msk.bf16.gmra.mrb[44].mxu0 %vm20186_vm0, %v3341_v37  ;;  %v20794_v37 = vld [vmem:[#allocation60_spill] sm:$0xff] }
 0x249   : > { %11996 = vmatprep.mubr.msk.bf16.mxu0 %vm20186_vm0, %v3751_v23  ;;  %v15469_v23 = vld [vmem:[%s19939_s1 + $0x70] sm:$0xff]   ;;  %v3754_v4 = vpack.c.bf16 %v20794_v37, %v20793_v34  ;;  %v20801_v34 = vld [vmem:[#allocation67_spill] sm:$0xff]  ;;  %v20802_v37 = vld [vmem:[#allocation68_spill] sm:$0xff] }
 0x24a   : > { %v3758_v56 = vpack.c.bf16 %v20802_v37, %v20801_v34  ;;  %v15508_v34 = vld [vmem:[#allocation2 + $0x180] sm:$0xff] }
 0x24b   : > { %1633 = vst.msk [vmem:[#allocation2 + $0x1b0] sm:$0xff] %vm20186_vm0, %v15508_v34 }
 0x250   : > { %11997 = vmatmul.mubr.msk.bf16.vlgmr.msra.gmra.mrb[0].mxu0 %vm20186_vm0, %v3752_v14  ;;  %v20798_v14 = vld [vmem:[#allocation64_spill] sm:$0xff] }
 0x251   : > { %12045 = vmatpush3.bf16.msra.mxu0 %v15317_v15  ;;  %12000 = vmatprep.mubr.msk.bf16.mxu0 %vm20186_vm0, %v3753_v1  ;;  %v20797_v15 = vld [vmem:[#allocation63_spill] sm:$0xff]  ;;  %v20799_v1 = vld [vmem:[#allocation65_spill] sm:$0xff] }
 0x252   : > { %12046 = vmatprep.subr.bf16.mxu0 %v13555_v12  ;;  %v3756_v53 = vpack.c.bf16 %v20798_v14, %v20797_v15  ;;  %v3757_v51 = vpack.c.bf16 %v20800_v8, %v20799_v1  ;;  %v20806_v15 = vld [vmem:[#allocation72_spill] sm:$0xff]  ;;  %v15506_v1 = vld [vmem:[#allocation2 + $0x178] sm:$0xff] }
 0x253   : > { %v3761_v8 = vpack.c.bf16 %v20806_v15, %v15089_v63  ;;  %v3765_v63 = vpack.c.bf16 %v15143_v41, %v15141_v26  ;;  %1632 = vst.msk [vmem:[#allocation2 + $0x1a8] sm:$0xff] %vm20186_vm0, %v15506_v1  ;;  %v20812_v41 = vld [vmem:[#allocation80_spill] sm:$0xff] }
 0x254   : > { %v3768_v37 = vpack.c.bf16 %v15167_v38, %v20812_v41  ;;  %v15534_v15 = vld [vmem:[#allocation2 + $0x189] sm:$0xff]  ;;  %v4144_v41 = vld [vmem:[#allocation2 + $0x77] sm:$0xff] }
 0x255   : > { %12047 = vmatpush3.bf16.msra.mxu0 %v13555_v12  ;;  %v20803_v12 = vld [vmem:[#allocation69_spill] sm:$0xff]  ;;  %v20816_v38 = vld [vmem:[#allocation84_spill] sm:$0xff] }
 0x256   : > { %12096 = vmatprep.subr.bf16.mxu0 %v15469_v23  ;;  %v3759_v24 = vpack.c.bf16 %v20804_v39, %v20803_v12  ;;  %v20814_v12 = vld [vmem:[#allocation82_spill] sm:$0xff] }
 0x258   : > { %12001 = vmatmul.mubr.msk.bf16.gmra.mrb[4].mxu0 %vm20186_vm0, %v3754_v4  ;;  %v20805_v4 = vld [vmem:[#allocation71_spill] sm:$0xff] }
 0x259   : > { %12004 = vmatprep.mubr.msk.bf16.mxu0 %vm20186_vm0, %v3755_v0  ;;  %v3760_v0 = vpack.c.bf16 %v15087_v46, %v20805_v4  ;;  %v20815_v4 = vld [vmem:[#allocation83_spill] sm:$0xff] }
 0x260   : > { %12005 = vmatmul.mubr.msk.bf16.gmra.mrb[8].mxu0 %vm20186_vm0, %v3756_v53  ;;  %v3763_v53 = vpack.c.bf16 %v15109_v50, %v15106_v52  ;;  %v20810_v52 = vld [vmem:[#allocation78_spill] sm:$0xff]  ;;  %v20811_v50 = vld [vmem:[#allocation79_spill] sm:$0xff] }
 0x261   : > { %12008 = vmatprep.mubr.msk.bf16.mxu0 %vm20186_vm0, %v3757_v51  ;;  %v20807_v51 = vld [vmem:[#allocation73_spill] sm:$0xff]  ;;  %v3767_v26 = vpack.c.bf16 %v20811_v50, %v20810_v52  ;;  %v13557_v52 = vld [vmem:[%s19939_s1 + $0x78] sm:$0xff]   ;;  %v4142_v50 = vld [vmem:[#allocation2 + $0x67] sm:$0xff] }
 0x262   : > { %v3762_v14 = vpack.c.bf16 %v15104_v5, %v20807_v51  ;;  %v20809_v5 = vld [vmem:[#allocation77_spill] sm:$0xff]  ;;  %v3773_v51 = vpack.c.bf16 %v15534_v15, %v15197_v33 }
 0x263   : > { %v4139_v33 = vld [vmem:[#allocation2 + $0x4f] sm:$0xff] }
 0x268   : > { %12009 = vmatmul.mubr.msk.bf16.gmra.mrb[12].mxu0 %vm20186_vm0, %v3758_v56  ;;  %v20813_v56 = vld [vmem:[#allocation81_spill] sm:$0xff] }
 0x269   : > { %12012 = vmatprep.mubr.msk.bf16.mxu0 %vm20186_vm0, %v3759_v24  ;;  %v20808_v24 = vld [vmem:[#allocation74_spill] sm:$0xff]  ;;  %v3769_v39 = vpack.c.bf16 %v20814_v12, %v20813_v56  ;;  %v15559_v56 = vld [vmem:[%s19939_s1 + $0x80] sm:$0xff]  }
 0x26a   : > { %v3764_v46 = vpack.c.bf16 %v15139_v3, %v20808_v24  ;;  %v3766_v3 = vpack.c.bf16 %v20809_v5, %v15145_v29  ;;  %v3770_v29 = vpack.c.bf16 %v15181_v27, %v20815_v4  ;;  %v15542_v27 = vld [vmem:[#allocation2 + $0x191] sm:$0xff] }
 0x26b   : > { %v4147_v4 = vld [vmem:[#allocation2 + $0x8f] sm:$0xff] }
 0x270   : > { %12013 = vmatmul.mubr.msk.bf16.gmra.mrb[16].mxu0 %vm20186_vm0, %v3760_v0  ;;  %v3771_v0 = vpack.c.bf16 %v15185_v31, %v15183_v62  ;;  %v4136_v31 = vld [vmem:[#allocation2 + $0x37] sm:$0xff]  ;;  %v4137_v62 = vld [vmem:[#allocation2 + $0x3f] sm:$0xff] }
 0x271   : > { %12016 = vmatprep.mubr.msk.bf16.mxu0 %vm20186_vm0, %v3761_v8  ;;  %v3772_v8 = vpack.c.bf16 %v15195_v25, %v20816_v38  ;;  %v4184_v24 = vpack.c.bf16 %v4137_v62, %v4136_v31  ;;  %v4138_v25 = vld [vmem:[#allocation2 + $0x47] sm:$0xff]  ;;  %v4151_v31 = vld [vmem:[#allocation2 + $0xaf] sm:$0xff]  ;;  %v4152_v62 = vld [vmem:[#allocation2 + $0xb7] sm:$0xff] }
 0x272   : > { %v4185_v5 = vpack.c.bf16 %v4139_v33, %v4138_v25  ;;  %v4154_v33 = vld [vmem:[#allocation2 + $0xc7] sm:$0xff] }
 0x278   : > { %12017 = vmatmul.mubr.msk.bf16.gmra.mrb[20].mxu0 %vm20186_vm0, %v3762_v14  ;;  %v15544_v14 = vld [vmem:[#allocation2 + $0x199] sm:$0xff] }
 0x279   : > { %12020 = vmatprep.mubr.msk.bf16.mxu0 %vm20186_vm0, %v3763_v53  ;;  %v3774_v53 = vpack.c.bf16 %v15544_v14, %v15542_v27 }
 0x280   : > { %12021 = vmatmul.mubr.msk.bf16.gmra.mrb[24].mxu0 %vm20186_vm0, %v3764_v46  ;;  %v4140_v46 = vld [vmem:[#allocation2 + $0x57] sm:$0xff] }
 0x281   : > { %12024 = vmatprep.mubr.msk.bf16.mxu0 %vm20186_vm0, %v3765_v63  ;;  %v4141_v63 = vld [vmem:[#allocation2 + $0x5f] sm:$0xff] }
 0x288   : > { %12025 = vmatmul.mubr.msk.bf16.gmra.mrb[28].mxu0 %vm20186_vm0, %v3766_v3  ;;  %v4186_v3 = vpack.c.bf16 %v4141_v63, %v4140_v46  ;;  %v4155_v46 = vld [vmem:[#allocation2 + $0xcf] sm:$0xff]  ;;  %v4156_v63 = vld [vmem:[#allocation2 + $0xd7] sm:$0xff] }
 0x289   : > { %12028 = vmatprep.mubr.msk.bf16.mxu0 %vm20186_vm0, %v3767_v26  ;;  %v4143_v26 = vld [vmem:[#allocation2 + $0x6f] sm:$0xff] }
 0x28a   : > { %v4187_v12 = vpack.c.bf16 %v4143_v26, %v4142_v50  ;;  %v4158_v50 = vld [vmem:[#allocation2 + $0xe7] sm:$0xff]  ;;  %v4159_v26 = vld [vmem:[#allocation2 + $0xef] sm:$0xff] }
 0x290   : > { %12029 = vmatmul.mubr.msk.bf16.gmra.mrb[32].mxu0 %vm20186_vm0, %v3768_v37  ;;  %v4145_v37 = vld [vmem:[#allocation2 + $0x7f] sm:$0xff] }
 0x291   : > { %12032 = vmatprep.mubr.msk.bf16.mxu0 %vm20186_vm0, %v3769_v39  ;;  %v4188_v39 = vpack.c.bf16 %v4145_v37, %v4144_v41  ;;  %v4160_v41 = vld [vmem:[#allocation2 + $0xf7] sm:$0xff]  ;;  %v4161_v37 = vld [vmem:[#allocation2 + $0xff] sm:$0xff] }
 0x298   : > { %12033 = vmatmul.mubr.msk.bf16.gmra.mrb[36].mxu0 %vm20186_vm0, %v3770_v29  ;;  %v4148_v29 = vld [vmem:[#allocation2 + $0x97] sm:$0xff] }
 0x299   : > { %12036 = vmatprep.mubr.msk.bf16.mxu0 %vm20186_vm0, %v3771_v0  ;;  %v4149_v0 = vld [vmem:[#allocation2 + $0x9f] sm:$0xff] }
 0x2a0   : > { %12037 = vmatmul.mubr.msk.bf16.gmra.mrb[40].mxu0 %vm20186_vm0, %v3772_v8  ;;  %v4190_v8 = vpack.c.bf16 %v4149_v0, %v4148_v29  ;;  %v4164_v29 = vld [vmem:[#allocation2 + $0x117] sm:$0xff]  ;;  %v4165_v0 = vld [vmem:[#allocation2 + $0x11f] sm:$0xff] }
 0x2a1   : > { %12040 = vmatprep.mubr.msk.bf16.mxu0 %vm20186_vm0, %v3773_v51  ;;  %v4150_v51 = vld [vmem:[#allocation2 + $0xa7] sm:$0xff] }
 0x2a8   : > { %12041 = vmatmul.mubr.msk.bf16.gmra.mrb[44].mxu0 %vm20186_vm0, %v3774_v53  ;;  %v4153_v53 = vld [vmem:[#allocation2 + $0xbf] sm:$0xff] }
 0x2a9   : > { %12048 = vmatprep.mubr.msk.bf16.mxu0 %vm20186_vm0, %v4184_v24  ;;  %v4191_v24 = vpack.c.bf16 %v4151_v31, %v4150_v51  ;;  %v4192_v25 = vpack.c.bf16 %v4153_v53, %v4152_v62  ;;  %v4166_v51 = vld [vmem:[#allocation2 + $0x127] sm:$0xff]  ;;  %v4167_v31 = vld [vmem:[#allocation2 + $0x12f] sm:$0xff]  ;;  %v4168_v62 = vld [vmem:[#allocation2 + $0x137] sm:$0xff] }
 0x2aa   : > { %v4169_v53 = vld [vmem:[#allocation2 + $0x13f] sm:$0xff] }
 0x2b0   : > { %12049 = vmatmul.mubr.msk.bf16.vlgmr.msra.gmra.mrb[0].mxu0 %vm20186_vm0, %v4185_v5  ;;  %v4157_v5 = vld [vmem:[#allocation2 + $0xdf] sm:$0xff] }
 0x2b1   : > { %12097 = vmatpush3.bf16.msra.mxu0 %v15469_v23  ;;  %12052 = vmatprep.mubr.msk.bf16.mxu0 %vm20186_vm0, %v4186_v3  ;;  %v4146_v23 = vld [vmem:[#allocation2 + $0x87] sm:$0xff]  ;;  %v4193_v3 = vpack.c.bf16 %v4155_v46, %v4154_v33  ;;  %v4171_v46 = vld [vmem:[#allocation2 + $0x14f] sm:$0xff] }
 0x2b2   : > { %12098 = vmatprep.subr.bf16.mxu0 %v13557_v52  ;;  %v4189_v38 = vpack.c.bf16 %v4147_v4, %v4146_v23  ;;  %v4162_v23 = vld [vmem:[#allocation2 + $0x107] sm:$0xff]  ;;  %v4163_v4 = vld [vmem:[#allocation2 + $0x10f] sm:$0xff] }
 0x2b3   : > { %v4170_v33 = vld [vmem:[#allocation2 + $0x147] sm:$0xff] }
 0x2b5   : > { %12099 = vmatpush3.bf16.msra.mxu0 %v13557_v52  ;;  %v4194_v52 = vpack.c.bf16 %v4157_v5, %v4156_v63  ;;  %v4172_v63 = vld [vmem:[#allocation2 + $0x157] sm:$0xff]  ;;  %v4173_v5 = vld [vmem:[#allocation2 + $0x15f] sm:$0xff] }
 0x2b6   : > { %12148 = vmatprep.subr.bf16.mxu0 %v15559_v56 }
 0x2b8   : > { %12053 = vmatmul.mubr.msk.bf16.gmra.mrb[4].mxu0 %vm20186_vm0, %v4187_v12  ;;  %v4195_v12 = vpack.c.bf16 %v4159_v26, %v4158_v50  ;;  %v4174_v50 = vld [vmem:[#allocation2 + $0x167] sm:$0xff]  ;;  %v4175_v26 = vld [vmem:[#allocation2 + $0x16f] sm:$0xff] }
 0x2b9   : > { %12056 = vmatprep.mubr.msk.bf16.mxu0 %vm20186_vm0, %v4188_v39  ;;  %v4196_v39 = vpack.c.bf16 %v4161_v37, %v4160_v41  ;;  %v4176_v41 = vld [vmem:[#allocation2 + $0x177] sm:$0xff]  ;;  %v4177_v37 = vld [vmem:[#allocation2 + $0x17f] sm:$0xff] }
 0x2c0   : > { %12057 = vmatmul.mubr.msk.bf16.gmra.mrb[8].mxu0 %vm20186_vm0, %v4189_v38  ;;  %v4197_v38 = vpack.c.bf16 %v4163_v4, %v4162_v23  ;;  %v4181_v23 = vld [vmem:[#allocation2 + $0x19f] sm:$0xff]  ;;  %v4205_v4 = vpack.c.bf16 %v15284_v57, %v15276_v30  ;;  %v4619_v30 = vpack.c.bf16 %v15310_v17, %v15308_v42  ;;  %v13559_v57 = vld [vmem:[%s19939_s1 + $0x88] sm:$0xff]   ;;  %v4625_v42 = vpack.c.bf16 %v15358_v19, %v15356_v13 }
 0x2c1   : > { %12060 = vmatprep.mubr.msk.bf16.mxu0 %vm20186_vm0, %v4190_v8  ;;  %v4198_v8 = vpack.c.bf16 %v4165_v0, %v4164_v29  ;;  %v4206_v29 = vpack.c.bf16 %v4181_v23, %v15286_v21  ;;  %v4182_v0 = vld [vmem:[#allocation2 + $0x1a7] sm:$0xff]  ;;  %v4620_v21 = vpack.c.bf16 %v15326_v16, %v15312_v22  ;;  %v4626_v17 = vpack.c.bf16 %v15368_v20, %v15360_v43  ;;  %v20822_v20 = vld [vmem:[#allocation89_spill] sm:$0xff] }
 0x2c2   : > { %v4627_v22 = vpack.c.bf16 %v15372_v32, %v15370_v49  ;;  %v4628_v16 = vpack.c.bf16 %v15382_v47, %v15374_v59  ;;  %v20820_v13 = vld [vmem:[#allocation87_spill] sm:$0xff]  ;;  %v20821_v19 = vld [vmem:[#allocation88_spill] sm:$0xff]  ;;  %v20823_v49 = vld [vmem:[#allocation90_spill] sm:$0xff] }
 0x2c3   : > { %v4634_v43 = vpack.c.bf16 %v20821_v19, %v20820_v13  ;;  %v4635_v32 = vpack.c.bf16 %v20823_v49, %v20822_v20  ;;  %v20824_v59 = vld [vmem:[#allocation91_spill] sm:$0xff]  ;;  %v20825_v47 = vld [vmem:[#allocation85_spill] sm:$0xff] }
 0x2c4   : > { %v5012_v23 = vld [vmem:[#allocation2 + $0x89] sm:$0xff]  ;;  %v5031_v13 = vld [vmem:[#allocation2 + $0x121] sm:$0xff]  ;;  %v5033_v49 = vld [vmem:[#allocation2 + $0x131] sm:$0xff] }
 0x2c5   : > { %v5032_v20 = vld [vmem:[#allocation2 + $0x129] sm:$0xff] }
 0x2c8   : > { %12061 = vmatmul.mubr.msk.bf16.gmra.mrb[12].mxu0 %vm20186_vm0, %v4191_v24  ;;  %v4199_v24 = vpack.c.bf16 %v4167_v31, %v4166_v51  ;;  %v4617_v51 = vpack.c.bf16 %v15294_v9, %v15292_v18  ;;  %v4618_v31 = vpack.c.bf16 %v15306_v61, %v15296_v28  ;;  %v4621_v18 = vpack.c.bf16 %v15330_v45, %v15328_v11 }
 0x2c9   : > { %12064 = vmatprep.mubr.msk.bf16.mxu0 %vm20186_vm0, %v4192_v25  ;;  %v4200_v25 = vpack.c.bf16 %v4169_v53, %v4168_v62  ;;  %v4622_v9 = vpack.c.bf16 %v15340_v44, %v15332_v58  ;;  %v4623_v28 = vpack.c.bf16 %v15344_v2, %v15342_v48  ;;  %v4624_v61 = vpack.c.bf16 %v15354_v36, %v15346_v60  ;;  %v20817_v44 = vld [vmem:[#allocation51_spill] sm:$0xff]  ;;  %v20818_v2 = vld [vmem:[#allocation52_spill] sm:$0xff]  ;;  %v20819_v60 = vld [vmem:[#allocation86_spill] sm:$0xff] }
 0x2ca   : > { %v4629_v11 = vpack.c.bf16 %v15386_v35, %v15384_v10  ;;  %v4630_v45 = vpack.c.bf16 %v15396_v7, %v15388_v55  ;;  %v4631_v58 = vpack.c.bf16 %v15400_v40, %v15398_v6  ;;  %v4632_v48 = vpack.c.bf16 %v20817_v44, %v15402_v54  ;;  %v4614_v55 = vld [vmem:[#allocation2 + $0x1a0] sm:$0xff]  ;;  %v20826_v7 = vld [vmem:[#allocation92_spill] sm:$0xff]  ;;  %v20828_v54 = vld [vmem:[#allocation49_spill] sm:$0xff] }
 0x2cb   : > { %v4633_v36 = vpack.c.bf16 %v20819_v60, %v20818_v2  ;;  %v4636_v10 = vpack.c.bf16 %v20825_v47, %v20824_v59  ;;  %v4637_v35 = vpack.c.bf16 %v15508_v34, %v15506_v1  ;;  %v20827_v6 = vld [vmem:[#allocation48_spill] sm:$0xff]  ;;  %v4616_v53 = vld [vmem:[#allocation2 + $0x1b0] sm:$0xff]  ;;  %v5065_v47 = vpack.c.bf16 %v5033_v49, %v5032_v20 }
 0x2cc   : > { %v4638_v40 = vpack.c.bf16 %v20827_v6, %v20826_v7  ;;  %v4615_v62 = vld [vmem:[#allocation2 + $0x1a8] sm:$0xff]  ;;  %v5029_v60 = vld [vmem:[#allocation2 + $0x111] sm:$0xff]  ;;  %v5038_v7 = vld [vmem:[#allocation2 + $0x159] sm:$0xff] }
 0x2cd   : > { %v5004_v34 = vld [vmem:[#allocation2 + $0x49] sm:$0xff]  ;;  %v5035_v59 = vld [vmem:[#allocation2 + $0x141] sm:$0xff] }
 0x2ce   : > { %v5028_v2 = vld [vmem:[#allocation2 + $0x109] sm:$0xff]  ;;  %v5039_v6 = vld [vmem:[#allocation2 + $0x161] sm:$0xff] }
 0x2cf   : > { %v5063_v19 = vpack.c.bf16 %v5029_v60, %v5028_v2 }
 0x2d0   : > { %12065 = vmatmul.mubr.msk.bf16.gmra.mrb[16].mxu0 %vm20186_vm0, %v4193_v3  ;;  %v4201_v3 = vpack.c.bf16 %v4171_v46, %v4170_v33  ;;  %v4640_v33 = vpack.c.bf16 %v4616_v53, %v4615_v62  ;;  %v5005_v46 = vld [vmem:[#allocation2 + $0x51] sm:$0xff]  ;;  %v5042_v53 = vld [vmem:[#allocation2 + $0x179] sm:$0xff] }
 0x2d1   : > { %12068 = vmatprep.mubr.msk.bf16.mxu0 %vm20186_vm0, %v4194_v52  ;;  %v4202_v52 = vpack.c.bf16 %v4173_v5, %v4172_v63  ;;  %v5006_v63 = vld [vmem:[#allocation2 + $0x59] sm:$0xff]  ;;  %v5007_v5 = vld [vmem:[#allocation2 + $0x61] sm:$0xff]  ;;  %v5041_v62 = vld [vmem:[#allocation2 + $0x171] sm:$0xff] }
 0x2d8   : > { %12069 = vmatmul.mubr.msk.bf16.gmra.mrb[20].mxu0 %vm20186_vm0, %v4195_v12  ;;  %v4203_v12 = vpack.c.bf16 %v4175_v26, %v4174_v50  ;;  %v5008_v50 = vld [vmem:[#allocation2 + $0x69] sm:$0xff]  ;;  %v5009_v26 = vld [vmem:[#allocation2 + $0x71] sm:$0xff] }
 0x2d9   : > { %12072 = vmatprep.mubr.msk.bf16.mxu0 %vm20186_vm0, %v4196_v39  ;;  %v4204_v39 = vpack.c.bf16 %v4177_v37, %v4176_v41  ;;  %v5010_v41 = vld [vmem:[#allocation2 + $0x79] sm:$0xff]  ;;  %v5011_v37 = vld [vmem:[#allocation2 + $0x81] sm:$0xff] }
 0x2e0   : > { %12073 = vmatmul.mubr.msk.bf16.gmra.mrb[24].mxu0 %vm20186_vm0, %v4197_v38  ;;  %v4183_v38 = vld [vmem:[#allocation2 + $0x1af] sm:$0xff] }
 0x2e1   : > { %12076 = vmatprep.mubr.msk.bf16.mxu0 %vm20186_vm0, %v4198_v8  ;;  %v4207_v8 = vpack.c.bf16 %v4183_v38, %v4182_v0  ;;  %v5015_v0 = vld [vmem:[#allocation2 + $0xa1] sm:$0xff] }
 0x2e8   : > { %12077 = vmatmul.mubr.msk.bf16.gmra.mrb[28].mxu0 %vm20186_vm0, %v4199_v24  ;;  %v5002_v24 = vld [vmem:[#allocation2 + $0x39] sm:$0xff] }
 0x2e9   : > { %12080 = vmatprep.mubr.msk.bf16.mxu0 %vm20186_vm0, %v4200_v25  ;;  %v5003_v25 = vld [vmem:[#allocation2 + $0x41] sm:$0xff] }
 0x2ea   : > { %v5050_v1 = vpack.c.bf16 %v5003_v25, %v5002_v24  ;;  %v5043_v24 = vld [vmem:[#allocation2 + $0x181] sm:$0xff] }
 0x2f0   : > { %12081 = vmatmul.mubr.msk.bf16.gmra.mrb[32].mxu0 %vm20186_vm0, %v4201_v3  ;;  %v5051_v3 = vpack.c.bf16 %v5005_v46, %v5004_v34  ;;  %v5071_v34 = vpack.c.bf16 %v15542_v27, %v15534_v15  ;;  %v15693_v15 = vld [vmem:[%s19940_s2] ss:$0 sm:$0xff] }
 0x2f1   : > { %12084 = vmatprep.mubr.msk.bf16.mxu0 %vm20186_vm0, %v4202_v52  ;;  %v5052_v52 = vpack.c.bf16 %v5007_v5, %v5006_v63  ;;  %v5048_v63 = vld [vmem:[#allocation2 + $0x1a9] sm:$0xff]  ;;  %v5049_v5 = vld [vmem:[#allocation2 + $0x1b1] sm:$0xff] }
 0x2f8   : > { %12085 = vmatmul.mubr.msk.bf16.gmra.mrb[36].mxu0 %vm20186_vm0, %v4203_v12  ;;  %v5053_v12 = vpack.c.bf16 %v5009_v26, %v5008_v50  ;;  %v20830_v50 = vld [vmem:[#allocation8_spill] sm:$0xff]  ;;  %v20832_v26 = vmov 0 }
 0x2f9   : > { %12088 = vmatprep.mubr.msk.bf16.mxu0 %vm20186_vm0, %v4204_v39  ;;  %v5054_v39 = vpack.c.bf16 %v5011_v37, %v5010_v41  ;;  %vm1045_vm11 = vcmp.ge.s32.totalorder %v20830_v50, 1  ;;  %vm1093_vm1 = vcmp.le.s32.totalorder %v20830_v50, 16  ;;  %v20835_v37 = vmov 0 }
 0x2fa   : > { %vm15701_vm8 = vmand %vm1045_vm11, %vm1093_vm1  ;;  %v20956_v50 = vmov 0 }
 0x2fb   : > { %v20836_v37 = vsel %vm15701_vm8, 4294967295, %v20835_v37 }
 0x2fc   : > { %20837 = vst [vmem:[#allocation54_spill] sm:$0xff] %v20836_v37 }
 0x300   : > { %12089 = vmatmul.mubr.msk.bf16.gmra.mrb[40].mxu0 %vm20186_vm0, %v4205_v4  ;;  %v5013_v4 = vld [vmem:[#allocation2 + $0x91] sm:$0xff] }
 0x301   : > { %12092 = vmatprep.mubr.msk.bf16.mxu0 %vm20186_vm0, %v4206_v29  ;;  %v5014_v29 = vld [vmem:[#allocation2 + $0x99] sm:$0xff]  ;;  %v5055_v38 = vpack.c.bf16 %v5013_v4, %v5012_v23  ;;  %v20838_v23 = vld [vmem:[#allocation4_spill] sm:$0xff] }
 0x302   : > { %vm1046_vm9 = vcmp.ge.s32.totalorder %v20838_v23, 1  ;;  %vm1094_vm2 = vcmp.le.s32.totalorder %v20838_v23, 16  ;;  %v20950_v23 = vld [vmem:[#allocation28_spill] sm:$0xff] }
 0x308   : > { %12093 = vmatmul.mubr.msk.bf16.gmra.mrb[44].mxu0 %vm20186_vm0, %v4207_v8  ;;  %v5056_v8 = vpack.c.bf16 %v5015_v0, %v5014_v29  ;;  %v20839_v29 = vmov 0 }
 0x309   : > { %12100 = vmatprep.mubr.msk.bf16.mxu0 %vm20186_vm0, %v4617_v51  ;;  %v5016_v51 = vld [vmem:[#allocation2 + $0xa9] sm:$0xff] }
 0x310   : > { %12101 = vmatmul.mubr.msk.bf16.vlgmr.msra.gmra.mrb[0].mxu0 %vm20186_vm0, %v4618_v31  ;;  %v5017_v31 = vld [vmem:[#allocation2 + $0xb1] sm:$0xff] }
 0x311   : > { %12149 = vmatpush3.bf16.msra.mxu0 %v15559_v56  ;;  %12104 = vmatprep.mubr.msk.bf16.mxu0 %vm20186_vm0, %v4619_v30  ;;  %v4639_v56 = vpack.c.bf16 %v4614_v55, %v20828_v54  ;;  %v5018_v30 = vld [vmem:[#allocation2 + $0xb9] sm:$0xff]  ;;  %v5037_v55 = vld [vmem:[#allocation2 + $0x151] sm:$0xff]  ;;  %v5068_v54 = vpack.c.bf16 %v5039_v6, %v5038_v7 }
 0x312   : > { %12150 = vmatprep.subr.bf16.mxu0 %v13559_v57 }
 0x315   : > { %12151 = vmatpush3.bf16.msra.mxu0 %v13559_v57  ;;  %v5019_v57 = vld [vmem:[#allocation2 + $0xc1] sm:$0xff] }
 0x318   : > { %12105 = vmatmul.mubr.msk.bf16.gmra.mrb[4].mxu0 %vm20186_vm0, %v4620_v21  ;;  %v5057_v21 = vpack.c.bf16 %v5017_v31, %v5016_v51  ;;  %v20842_v31 = vmov 0 }
 0x319   : > { %12108 = vmatprep.mubr.msk.bf16.mxu0 %vm20186_vm0, %v4621_v18  ;;  %v5058_v18 = vpack.c.bf16 %v5019_v57, %v5018_v30 }
 0x320   : > { %12109 = vmatmul.mubr.msk.bf16.gmra.mrb[8].mxu0 %vm20186_vm0, %v4622_v9  ;;  %v5020_v9 = vld [vmem:[#allocation2 + $0xc9] sm:$0xff] }
 0x321   : > { %12112 = vmatprep.mubr.msk.bf16.mxu0 %vm20186_vm0, %v4623_v28  ;;  %v5021_v28 = vld [vmem:[#allocation2 + $0xd1] sm:$0xff] }
 0x328   : > { %12113 = vmatmul.mubr.msk.bf16.gmra.mrb[12].mxu0 %vm20186_vm0, %v4624_v61  ;;  %v5022_v61 = vld [vmem:[#allocation2 + $0xd9] sm:$0xff] }
 0x329   : > { %12116 = vmatprep.mubr.msk.bf16.mxu0 %vm20186_vm0, %v4625_v42  ;;  %v5023_v42 = vld [vmem:[#allocation2 + $0xe1] sm:$0xff] }
 0x330   : > { %12117 = vmatmul.mubr.msk.bf16.gmra.mrb[16].mxu0 %vm20186_vm0, %v4626_v17  ;;  %v5059_v17 = vpack.c.bf16 %v5021_v28, %v5020_v9  ;;  %v20846_v28 = vld [vmem:[#allocation9_spill] sm:$0xff] }
 0x331   : > { %12120 = vmatprep.mubr.msk.bf16.mxu0 %vm20186_vm0, %v4627_v22  ;;  %v5060_v22 = vpack.c.bf16 %v5023_v42, %v5022_v61 }
 0x338   : > { %12121 = vmatmul.mubr.msk.bf16.gmra.mrb[20].mxu0 %vm20186_vm0, %v4628_v16  ;;  %v5024_v16 = vld [vmem:[#allocation2 + $0xe9] sm:$0xff] }
 0x339   : > { %12124 = vmatprep.mubr.msk.bf16.mxu0 %vm20186_vm0, %v4629_v11  ;;  %v5025_v11 = vld [vmem:[#allocation2 + $0xf1] sm:$0xff] }
 0x33a   : > { %v5061_v44 = vpack.c.bf16 %v5025_v11, %v5024_v16  ;;  %v20848_v11 = vmov 0 }
 0x340   : > { %12125 = vmatmul.mubr.msk.bf16.gmra.mrb[24].mxu0 %vm20186_vm0, %v4630_v45  ;;  %v5026_v45 = vld [vmem:[#allocation2 + $0xf9] sm:$0xff] }
 0x341   : > { %12128 = vmatprep.mubr.msk.bf16.mxu0 %vm20186_vm0, %v4631_v58  ;;  %v5027_v58 = vld [vmem:[#allocation2 + $0x101] sm:$0xff] }
 0x348   : > { %12129 = vmatmul.mubr.msk.bf16.gmra.mrb[28].mxu0 %vm20186_vm0, %v4632_v48  ;;  %v5062_v48 = vpack.c.bf16 %v5027_v58, %v5026_v45  ;;  %v20851_v58 = vld [vmem:[#allocation10_spill] sm:$0xff] }
 0x349   : > { %12132 = vmatprep.mubr.msk.bf16.mxu0 %vm20186_vm0, %v4633_v36  ;;  %v5030_v36 = vld [vmem:[#allocation2 + $0x119] sm:$0xff]  ;;  %vm1050_vm4 = vcmp.ge.s32.totalorder %v20851_v58, 1  ;;  %vm1098_vm10 = vcmp.le.s32.totalorder %v20851_v58, 16 }
 0x350   : > { %12133 = vmatmul.mubr.msk.bf16.gmra.mrb[32].mxu0 %vm20186_vm0, %v4634_v43  ;;  %v5064_v43 = vpack.c.bf16 %v5031_v13, %v5030_v36 }
 0x351   : > { %12136 = vmatprep.mubr.msk.bf16.mxu0 %vm20186_vm0, %v4635_v32  ;;  %v5034_v32 = vld [vmem:[#allocation2 + $0x139] sm:$0xff] }
 0x358   : > { %12137 = vmatmul.mubr.msk.bf16.gmra.mrb[36].mxu0 %vm20186_vm0, %v4636_v10  ;;  %v5066_v10 = vpack.c.bf16 %v5035_v59, %v5034_v32 }
 0x359   : > { %12140 = vmatprep.mubr.msk.bf16.mxu0 %vm20186_vm0, %v4637_v35  ;;  %v5036_v35 = vld [vmem:[#allocation2 + $0x149] sm:$0xff] }
 0x360   : > { %12141 = vmatmul.mubr.msk.bf16.gmra.mrb[40].mxu0 %vm20186_vm0, %v4638_v40  ;;  %v5067_v40 = vpack.c.bf16 %v5037_v55, %v5036_v35  ;;  %v20861_v35 = vld [vmem:[#allocation11_spill] sm:$0xff] }
 0x361   : > { %12144 = vmatprep.mubr.msk.bf16.mxu0 %vm20186_vm0, %v4639_v56  ;;  %v5040_v56 = vld [vmem:[#allocation2 + $0x169] sm:$0xff] }
 0x362   : > { %v5069_v25 = vpack.c.bf16 %v5041_v62, %v5040_v56 }
 0x368   : > { %12145 = vmatmul.mubr.msk.bf16.gmra.mrb[44].mxu0 %vm20186_vm0, %v4640_v33  ;;  %v5070_v33 = vpack.c.bf16 %v5043_v24, %v5042_v53  ;;  %v20863_v24 = vld [vmem:[#allocation12_spill] sm:$0xff] }
 0x369   : > { %12152 = vmatprep.mubr.msk.bf16.mxu0 %vm20186_vm0, %v5050_v1  ;;  %v5047_v1 = vld [vmem:[#allocation2 + $0x1a1] sm:$0xff] }
 0x36a   : > { %v5072_v46 = vpack.c.bf16 %v5047_v1, %v15544_v14  ;;  %v20831_v14 = vld [vmem:[#allocation7_spill] sm:$0xff] }
 0x36b   : > { %vm1044_vm6 = vcmp.ge.s32.totalorder %v20831_v14, 1  ;;  %vm1092_vm13 = vcmp.le.s32.totalorder %v20831_v14, 16  ;;  %v20962_v14 = vmov 0 }
 0x370   : > { %12153 = vmatmul.mubr.msk.bf16.vlgmr.msra.gmra.mrb[0].mxu0 %vm20186_vm0, %v5051_v3  ;;  %v5073_v3 = vpack.c.bf16 %v5049_v5, %v5048_v63  ;;  %v20868_v63 = vmov 0 }
 0x371   : > { %12156 = vmatprep.mubr.msk.bf16.mxu0 %vm20186_vm0, %v5052_v52  ;;  %v20829_v52 = vld [vmem:[#allocation3_spill] sm:$0xff] }
 0x372   : > { %vm1043_vm15 = vcmp.ge.s32.totalorder %v20829_v52, 1  ;;  %vm1091_vm12 = vcmp.le.s32.totalorder %v20829_v52, 16 }
 0x373   : > { %vm15697_vm14 = vmand %vm1043_vm15, %vm1091_vm12 }
 0x374   : > { %v20833_v26 = vsel %vm15697_vm14, 4294967295, %v20832_v26  ;;  %vm15713_vm15 = vmand %vm1044_vm6, %vm1092_vm13 }
 0x375   : > { %20834 = vst [vmem:[#allocation53_spill] sm:$0xff] %v20833_v26  ;;  %v20840_v29 = vsel %vm15713_vm15, 4294967295, %v20839_v29  ;;  %vm15726_vm12 = vmand %vm1046_vm9, %vm1094_vm2  ;;  %vm1049_vm2 = vcmp.ge.s32.totalorder %v20846_v28, 1  ;;  %vm1097_vm9 = vcmp.le.s32.totalorder %v20846_v28, 16  ;;  %v20948_v28 = vld [vmem:[#allocation27_spill] sm:$0xff] }
 0x376   : > { %20841 = vst [vmem:[#allocation55_spill] sm:$0xff] %v20840_v29  ;;  %v20843_v31 = vsel %vm15726_vm12, 4294967295, %v20842_v31  ;;  %vm15753_vm7 = vmand %vm1049_vm2, %vm1097_vm9  ;;  %vm1051_vm2 = vcmp.ge.s32.totalorder %v20861_v35, 1  ;;  %vm1099_vm9 = vcmp.le.s32.totalorder %v20861_v35, 16 }
 0x377   : > { %20844 = vst [vmem:[#allocation56_spill] sm:$0xff] %v20843_v31  ;;  %vm15802_vm3 = vmand %vm1051_vm2, %vm1099_vm9  ;;  %vm20871_vm2 = vcmask 261120  }
 0x378   : > { %12157 = vmatmul.mubr.msk.bf16.gmra.mrb[4].mxu0 %vm20186_vm0, %v5053_v12 }
 0x379   : > { %12160 = vmatprep.mubr.msk.bf16.mxu0 %vm20186_vm0, %v5054_v39 }
 0x380   : > { %12161 = vmatmul.mubr.msk.bf16.gmra.mrb[8].mxu0 %vm20186_vm0, %v5055_v38 }
 0x381   : > { %12164 = vmatprep.mubr.msk.bf16.mxu0 %vm20186_vm0, %v5056_v8 }
 0x388   : > { %12165 = vmatmul.mubr.msk.bf16.gmra.mrb[12].mxu0 %vm20186_vm0, %v5057_v21  ;;  %v20845_v21 = vld [vmem:[#allocation5_spill] sm:$0xff] }
 0x389   : > { %12168 = vmatprep.mubr.msk.bf16.mxu0 %vm20186_vm0, %v5058_v18  ;;  %vm1047_vm13 = vcmp.ge.s32.totalorder %v20845_v21, 1  ;;  %vm1095_vm6 = vcmp.le.s32.totalorder %v20845_v21, 16 }
 0x38a   : > { %vm15748_vm5 = vmand %vm1047_vm13, %vm1095_vm6 }
 0x38b   : > { %v20849_v11 = vsel %vm15748_vm5, 4294967295, %v20848_v11  ;;  %vm15781_vm6 = vmand %vm1050_vm4, %vm1098_vm10 }
 0x38c   : > { %20850 = vst [vmem:[#allocation57_spill] sm:$0xff] %v20849_v11 }
 0x390   : > { %12169 = vmatmul.mubr.msk.bf16.gmra.mrb[16].mxu0 %vm20186_vm0, %v5059_v17 }
 0x391   : > { %12172 = vmatprep.mubr.msk.bf16.mxu0 %vm20186_vm0, %v5060_v22  ;;  %v20847_v22 = vld [vmem:[#allocation6_spill] sm:$0xff] }
 0x392   : > { %vm1048_vm11 = vcmp.ge.s32.totalorder %v20847_v22, 1  ;;  %vm1096_vm1 = vcmp.le.s32.totalorder %v20847_v22, 16 }
 0x393   : > { %vm15765_vm13 = vmand %vm1048_vm11, %vm1096_vm1  ;;  %vm1052_vm11 = vcmp.ge.s32.totalorder %v20863_v24, 1  ;;  %vm1100_vm1 = vcmp.le.s32.totalorder %v20863_v24, 16  ;;  %v20939_v24 = vmov 0 }
 0x394   : > { %vm15819_vm9 = vmand %vm1052_vm11, %vm1100_vm1 }
 0x398   : > { %12173 = vmatmul.mubr.msk.bf16.gmra.mrb[20].mxu0 %vm20186_vm0, %v5061_v44 }
 0x399   : > { %12176 = vmatprep.mubr.msk.bf16.mxu0 %vm20186_vm0, %v5062_v48  ;;  %v20852_v48 = vmov 0 }
 0x39a   : > { %v20853_v48 = vsel %vm15753_vm7, 4294967295, %v20852_v48 }
 0x39b   : > { %20854 = vst [vmem:[#allocation58_spill] sm:$0xff] %v20853_v48 }
 0x3a0   : > { %12177 = vmatmul.mubr.msk.bf16.gmra.mrb[24].mxu0 %vm20186_vm0, %v5063_v19  ;;  %v20855_v19 = vmov 0 }
 0x3a1   : > { %12180 = vmatprep.mubr.msk.bf16.mxu0 %vm20186_vm0, %v5064_v43  ;;  %v20856_v19 = vsel %vm15765_vm13, 4294967295, %v20855_v19 }
 0x3a2   : > { %20857 = vst [vmem:[#allocation59_spill] sm:$0xff] %v20856_v19 }
 0x3a8   : > { %12181 = vmatmul.mubr.msk.bf16.gmra.mrb[28].mxu0 %vm20186_vm0, %v5065_v47 }
 0x3a9   : > { %12184 = vmatprep.mubr.msk.bf16.mxu0 %vm20186_vm0, %v5066_v10  ;;  %v20858_v10 = vmov 0 }
 0x3aa   : > { %v20859_v10 = vsel %vm15781_vm6, 4294967295, %v20858_v10 }
 0x3ab   : > { %20860 = vst [vmem:[#allocation60_spill] sm:$0xff] %v20859_v10 }
 0x3b0   : > { %12185 = vmatmul.mubr.msk.bf16.gmra.mrb[32].mxu0 %vm20186_vm0, %v5067_v40 }
 0x3b1   : > { %12188 = vmatprep.mubr.msk.bf16.mxu0 %vm20186_vm0, %v5068_v54  ;;  %v20862_v54 = vld [vmem:[#allocation13_spill] sm:$0xff] }
 0x3b2   : > { %vm1053_vm4 = vcmp.ge.s32.totalorder %v20862_v54, 1  ;;  %vm1101_vm10 = vcmp.le.s32.totalorder %v20862_v54, 16  ;;  %v20933_v54 = vmov 0 }
 0x3b8   : > { %12189 = vmatmul.mubr.msk.bf16.gmra.mrb[36].mxu0 %vm20186_vm0, %v5069_v25 }
 0x3b9   : > { %12192 = vmatprep.mubr.msk.bf16.mxu0 %vm20186_vm0, %v5070_v33  ;;  %v20864_v33 = vmov 0 }
 0x3ba   : > { %v20865_v33 = vsel %vm15802_vm3, 4294967295, %v20864_v33 }
 0x3bb   : > { %20866 = vst [vmem:[#allocation61_spill] sm:$0xff] %v20865_v33 }
 0x3c0   : > { %12193 = vmatmul.mubr.msk.bf16.gmra.mrb[40].mxu0 %vm20186_vm0, %v5071_v34  ;;  %v20867_v34 = vld [vmem:[#allocation14_spill] sm:$0xff] }
 0x3c1   : > { %12196 = vmatprep.mubr.msk.bf16.mxu0 %vm20186_vm0, %v5072_v46 }
 0x3c8   : > { %12197 = vmatmul.mubr.msk.bf16.gmra.mrb[44].mxu0 %vm20186_vm0, %v5073_v3 }
 0x443   : > { %v12154_v27 = vpop.f32.mrb[0].mxu0 }
 0x444   : > { %v5196_v41 = vpop.f32.mrb[1].mxu0  ;;  %v15706_v12 = vadd.f32 %v12154_v27, %v15693_v15 }
 0x445   : > { %v15709_v39 = vadd.f32 %v15693_v15, %v5196_v41  ;;  %v12155_v4 = vpop.f32.mrb[2].mxu0 }
 0x446   : > { %v5199_v0 = vpop.f32.mrb[3].mxu0  ;;  %v15721_v8 = vadd.f32 %v12155_v4, %v15693_v15  ;;  %v5492_v30 = vsel %vm15701_vm8, %v15706_v12, 0.0  ;;  %v20872_v4 = vmov 0 }
 0x447   : > { %v5490_v38 = vsel %vm15697_vm14, %v15709_v39, 0.0  ;;  %v15724_v51 = vadd.f32 %v15693_v15, %v5199_v0  ;;  %v5541_v16 = vsel %vm20186_vm0, %v5492_v30, 0.0  ;;  %v20873_v4 = vsel %vm15819_vm9, 4294967295, %v20872_v4 }
 0x448   : > { %v5538_v18 = vsel %vm20186_vm0, %v5490_v38, 0.0  ;;  %v5493_v61 = vsel %vm15726_vm12, %v15721_v8, 0.0  ;;  %20874 = vst [vmem:[#allocation63_spill] sm:$0xff] %v20873_v4 }
 0x449   : > { %v5491_v57 = vsel %vm15713_vm15, %v15724_v51, 0.0  ;;  %v5543_v13 = vsel %vm20186_vm0, %v5493_v61, 0.0  ;;  %v20876_v61 = vmov 0 }
 0x44a   : > { %v5539_v9 = vsel %vm20186_vm0, %v5491_v57, 0.0 }
 0x44b   : > { %v5540_v42 = vadd.f32 %v5539_v9, %v5538_v18  ;;  %v12158_v17 = vpop.f32.mrb[4].mxu0 }
 0x44c   : > { %v5212_v45 = vpop.f32.mrb[5].mxu0  ;;  %v15758_v2 = vadd.f32 %v12158_v17, %v15693_v15 }
 0x44d   : > { %v5542_v44 = vadd.f32 %v5541_v16, %v5540_v42  ;;  %v15761_v60 = vadd.f32 %v15693_v15, %v5212_v45  ;;  %v12159_v36 = vpop.f32.mrb[6].mxu0  ;;  %v20879_v42 = vld [vmem:[#allocation15_spill] sm:$0xff] }
 0x44e   : > { %v5215_v43 = vpop.f32.mrb[7].mxu0  ;;  %v15773_v32 = vadd.f32 %v12159_v36, %v15693_v15  ;;  %v5496_v55 = vsel %vm15753_vm7, %v15758_v2, 0.0  ;;  %vm1054_vm7 = vcmp.ge.s32.totalorder %v20867_v34, 1  ;;  %vm1055_vm11 = vcmp.ge.s32.totalorder %v20879_v42, 1  ;;  %v20880_v36 = vld [vmem:[#allocation17_spill] sm:$0xff] }
 0x44f   : > { %v5494_v20 = vsel %vm15748_vm5, %v15761_v60, 0.0  ;;  %v5544_v49 = vadd.f32 %v5543_v13, %v5542_v44  ;;  %v15776_v59 = vadd.f32 %v15693_v15, %v5215_v43  ;;  %v5549_v25 = vsel %vm20186_vm0, %v5496_v55, 0.0 }
 0x450   : > { %v5545_v47 = vsel %vm20186_vm0, %v5494_v20, 0.0  ;;  %v5497_v56 = vsel %vm15781_vm6, %v15773_v32, 0.0  ;;  %vm1103_vm1 = vcmp.le.s32.totalorder %v20879_v42, 16  ;;  %v20883_v55 = vmov 0 }
 0x451   : > { %v5546_v7 = vadd.f32 %v5545_v47, %v5544_v49  ;;  %v5495_v6 = vsel %vm15765_vm13, %v15776_v59, 0.0  ;;  %vm15807_vm13 = vmand %vm1053_vm4, %vm1101_vm10  ;;  %v5551_v41 = vsel %vm20871_vm2, %v5497_v56, 0.0  ;;  %v20881_v49 = vld [vmem:[#allocation16_spill] sm:$0xff]  ;;  %v20887_v56 = vmov 0 }
 0x452   : > { %v5547_v40 = vsel %vm20186_vm0, %v5495_v6, 0.0  ;;  %v20869_v63 = vsel %vm15807_vm13, 4294967295, %v20868_v63  ;;  %vm1102_vm0 = vcmp.le.s32.totalorder %v20867_v34, 16  ;;  %vm20875_vm4 = vmmov %vm20871_vm2  ;;  %v20886_v6 = vld [vmem:[#allocation18_spill] sm:$0xff]  ;;  %v20927_v34 = vld [vmem:[#allocation24_spill] sm:$0xff] }
 0x453   : > { %v5548_v62 = vadd.f32 %v5547_v40, %v5546_v7  ;;  %v12162_v53 = vpop.f32.mrb[8].mxu0  ;;  %20870 = vst [vmem:[#allocation62_spill] sm:$0xff] %v20869_v63  ;;  %vm15835_vm10 = vmand %vm1054_vm7, %vm1102_vm0  ;;  %vm1057_vm0 = vcmp.ge.s32.totalorder %v20880_v36, 1  ;;  %vm1105_vm7 = vcmp.le.s32.totalorder %v20880_v36, 16  ;;  %v20924_v36 = vld [vmem:[#allocation23_spill] sm:$0xff] }
 0x454   : > { %v5228_v1 = vpop.f32.mrb[9].mxu0  ;;  %v15812_v5 = vadd.f32 %v12162_v53, %v15693_v15  ;;  %v20877_v61 = vsel %vm15835_vm10, 4294967295, %v20876_v61  ;;  %vm15861_vm6 = vmand %vm1057_vm0, %vm1105_vm7 }
 0x455   : > { %v5550_v46 = vadd.f32 %v5549_v25, %v5548_v62  ;;  %v15815_v3 = vadd.f32 %v15693_v15, %v5228_v1  ;;  %v12163_v27 = vpop.f32.mrb[10].mxu0  ;;  %20878 = vst [vmem:[#allocation64_spill] sm:$0xff] %v20877_v61  ;;  %v20888_v56 = vsel %vm15861_vm6, 4294967295, %v20887_v56 }
 0x456   : > { %v5231_v0 = vpop.f32.mrb[11].mxu0  ;;  %v15827_v57 = vadd.f32 %v12163_v27, %v15693_v15  ;;  %v5500_v17 = vsel %vm15807_vm13, %v15812_v5, 0.0  ;;  %vm1104_vm13 = vcmp.le.s32.totalorder %v20881_v49, 16  ;;  %20889 = vst [vmem:[#allocation66_spill] sm:$0xff] %v20888_v56 }
 0x457   : > { %v5498_v38 = vsel %vm15802_vm3, %v15815_v3, 0.0  ;;  %v5552_v30 = vadd.f32 %v5551_v41, %v5550_v46  ;;  %v15830_v18 = vadd.f32 %v15693_v15, %v5231_v0  ;;  %vm20882_vm3 = vmmov %vm20871_vm2  ;;  %v20892_v46 = vmov 0 }
 0x458   : > { %v5553_v9 = vsel %vm20875_vm4, %v5498_v38, 0.0  ;;  %v5501_v13 = vsel %vm15835_vm10, %v15827_v57, 0.0  ;;  %vm1056_vm4 = vcmp.ge.s32.totalorder %v20881_v49, 1  ;;  %v5557_v47 = vsel %vm20882_vm3, %v5500_v17, 0.0 }
 0x459   : > { %v5554_v16 = vadd.f32 %v5553_v9, %v5552_v30  ;;  %v5499_v45 = vsel %vm15819_vm9, %v15830_v18, 0.0  ;;  %vm15856_vm9 = vmand %vm1055_vm11, %vm1103_vm1  ;;  %vm1106_vm3 = vcmp.le.s32.totalorder %v20886_v6, 16  ;;  %vm20891_vm11 = vcmask 261120  }
 0x45a   : > { %v5555_v44 = vsel %vm20871_vm2, %v5499_v45, 0.0  ;;  %v20884_v55 = vsel %vm15856_vm9, 4294967295, %v20883_v55  ;;  %vm1058_vm2 = vcmp.ge.s32.totalorder %v20886_v6, 1  ;;  %v5559_v1 = vsel %vm20891_vm11, %v5501_v13, 0.0  ;;  %vm15873_vm1 = vmand %vm1056_vm4, %vm1104_vm13 }
 0x45b   : > { %v5556_v43 = vadd.f32 %v5555_v44, %v5554_v16  ;;  %v12166_v20 = vpop.f32.mrb[12].mxu0  ;;  %20885 = vst [vmem:[#allocation65_spill] sm:$0xff] %v20884_v55  ;;  %v20893_v46 = vsel %vm15873_vm1, 4294967295, %v20892_v46  ;;  %vm20896_vm0 = vmmov %vm20891_vm11  ;;  %v20897_v17 = vmov 0  ;;  %v20900_v16 = vld [vmem:[#allocation19_spill] sm:$0xff] }
 0x45c   : > { %v5244_v7 = vpop.f32.mrb[13].mxu0  ;;  %v15866_v62 = vadd.f32 %v12166_v20, %v15693_v15  ;;  %20894 = vst [vmem:[#allocation68_spill] sm:$0xff] %v20893_v46  ;;  %vm15889_vm13 = vmand %vm1058_vm2, %vm1106_vm3  ;;  %vm1059_vm7 = vcmp.ge.s32.totalorder %v20900_v16, 1  ;;  %vm1107_vm4 = vcmp.le.s32.totalorder %v20900_v16, 16  ;;  %v20902_v20 = vld [vmem:[#allocation21_spill] sm:$0xff] }
 0x45d   : > { %v5558_v40 = vadd.f32 %v5557_v47, %v5556_v43  ;;  %v15869_v53 = vadd.f32 %v15693_v15, %v5244_v7  ;;  %v12167_v25 = vpop.f32.mrb[14].mxu0  ;;  %v20898_v17 = vsel %vm15889_vm13, 4294967295, %v20897_v17  ;;  %vm20901_vm11 = vmmov %vm20896_vm0  ;;  %vm1061_vm2 = vcmp.ge.s32.totalorder %v20902_v20, 1 }
 0x45e   : > { %20890 = vst [vmem:[#allocation67_spill] sm:$0xff] %v15866_v62  ;;  %v5247_v27 = vpop.f32.mrb[15].mxu0  ;;  %v15881_v38 = vadd.f32 %v12167_v25, %v15693_v15  ;;  %20899 = vst [vmem:[#allocation70_spill] sm:$0xff] %v20898_v17  ;;  %v5504_v45 = vsel %vm15861_vm6, %v15866_v62, 0.0  ;;  %vm1109_vm3 = vcmp.le.s32.totalorder %v20902_v20, 16  ;;  %v20903_v25 = vld [vmem:[#allocation20_spill] sm:$0xff] }
 0x45f   : > { %v5502_v41 = vsel %vm15856_vm9, %v15869_v53, 0.0  ;;  %v5560_v0 = vadd.f32 %v5559_v1, %v5558_v40  ;;  %v15884_v30 = vadd.f32 %v15693_v15, %v5247_v27  ;;  %vm1108_vm6 = vcmp.le.s32.totalorder %v20903_v25, 16  ;;  %vm20904_vm9 = vmmov %vm20901_vm11  ;;  %v21050_v17 = vld [vmem:[#allocation50_spill] sm:$0xff] }
 0x460   : > { %20895 = vst [vmem:[#allocation69_spill] sm:$0xff] %v15881_v38  ;;  %v5561_v9 = vsel %vm20896_vm0, %v5502_v41, 0.0  ;;  %v5505_v47 = vsel %vm15889_vm13, %v15881_v38, 0.0  ;;  %vm1060_vm0 = vcmp.ge.s32.totalorder %v20903_v25, 1  ;;  %v5565_v1 = vsel %vm20904_vm9, %v5504_v45, 0.0  ;;  %vm15915_vm10 = vmand %vm1061_vm2, %vm1109_vm3 }
 0x461   : > { %v5562_v44 = vadd.f32 %v5561_v9, %v5560_v0  ;;  %v5503_v13 = vsel %vm15873_vm1, %v15884_v30, 0.0  ;;  %vm15910_vm1 = vmand %vm1059_vm7, %vm1107_vm4  ;;  %v20905_v27 = vmov 0  ;;  %v20908_v0 = vld [vmem:[#allocation22_spill] sm:$0xff]  ;;  %vm20914_vm7 = vcmask 261120  }
 0x462   : > { %v5563_v43 = vsel %vm20901_vm11, %v5503_v13, 0.0  ;;  %v20906_v27 = vsel %vm15910_vm1, 4294967295, %v20905_v27  ;;  %vm1062_vm11 = vcmp.ge.s32.totalorder %v20908_v0, 1  ;;  %v20909_v13 = vmov 0  ;;  %vm15927_vm4 = vmand %vm1060_vm0, %vm1108_vm6 }
 0x463   : > { %v5564_v7 = vadd.f32 %v5563_v43, %v5562_v44  ;;  %v12170_v40 = vpop.f32.mrb[16].mxu0  ;;  %20907 = vst [vmem:[#allocation71_spill] sm:$0xff] %v20906_v27  ;;  %v20910_v13 = vsel %vm15915_vm10, 4294967295, %v20909_v13  ;;  %vm1110_vm9 = vcmp.le.s32.totalorder %v20908_v0, 16  ;;  %v5567_v20 = vsel %vm20914_vm7, %v5505_v47, 0.0  ;;  %vm20920_vm2 = vmmov %vm20914_vm7 }
 0x464   : > { %v5260_v41 = vpop.f32.mrb[17].mxu0  ;;  %20911 = vst [vmem:[#allocation72_spill] sm:$0xff] %v20910_v13  ;;  %v15920_v44 = vadd.f32 %v12170_v40, %v15693_v15  ;;  %v20915_v25 = vmov 0  ;;  %vm15943_vm6 = vmand %vm1062_vm11, %vm1110_vm9  ;;  %v20921_v47 = vmov 0  ;;  %vm1063_vm3 = vcmp.ge.s32.totalorder %v20924_v36, 1 }
 0x465   : > { %v5566_v9 = vadd.f32 %v5565_v1, %v5564_v7  ;;  %v15923_v43 = vadd.f32 %v15693_v15, %v5260_v41  ;;  %v12171_v45 = vpop.f32.mrb[18].mxu0  ;;  %v20916_v25 = vsel %vm15927_vm4, 4294967295, %v20915_v25  ;;  %v20922_v47 = vsel %vm15943_vm6, 4294967295, %v20921_v47  ;;  %vm20925_vm7 = vmmov %vm20920_vm2 }
 0x466   : > { %20912 = vst [vmem:[#allocation73_spill] sm:$0xff] %v15920_v44  ;;  %20917 = vst [vmem:[#allocation77_spill] sm:$0xff] %v20916_v25  ;;  %v5263_v7 = vpop.f32.mrb[19].mxu0  ;;  %v15935_v40 = vadd.f32 %v12171_v45, %v15693_v15  ;;  %vm1111_vm0 = vcmp.le.s32.totalorder %v20924_v36, 16  ;;  %v20932_v36 = vld [vmem:[#allocation26_spill] sm:$0xff]  ;;  %v21031_v25 = vld [vmem:[#allocation44_spill] sm:$0xff] }
 0x467   : > { %20913 = vst [vmem:[#allocation74_spill] sm:$0xff] %v15923_v43  ;;  %v5506_v1 = vsel %vm15910_vm1, %v15923_v43, 0.0  ;;  %v5568_v16 = vadd.f32 %v5567_v20, %v5566_v9  ;;  %v15938_v41 = vadd.f32 %v15693_v15, %v5263_v7  ;;  %20923 = vst [vmem:[#allocation80_spill] sm:$0xff] %v20922_v47  ;;  %v5508_v20 = vsel %vm15915_vm10, %v15920_v44, 0.0  ;;  %v21012_v47 = vld [vmem:[#allocation40_spill] sm:$0xff]  ;;  %v21048_v44 = vld [vmem:[#allocation47_spill] sm:$0xff] }
 0x468   : > { %20918 = vst [vmem:[#allocation78_spill] sm:$0xff] %v15935_v40  ;;  %v5569_v6 = vsel %vm20920_vm2, %v5506_v1, 0.0  ;;  %v20926_v1 = vld [vmem:[#allocation25_spill] sm:$0xff]  ;;  %v5509_v0 = vsel %vm15943_vm6, %v15935_v40, 0.0  ;;  %vm1064_vm2 = vcmp.ge.s32.totalorder %v20927_v34, 1  ;;  %vm1112_vm10 = vcmp.le.s32.totalorder %v20927_v34, 16  ;;  %vm20928_vm1 = vmmov %vm20925_vm7 }
 0x469   : > { %20919 = vst [vmem:[#allocation79_spill] sm:$0xff] %v15938_v41  ;;  %v5570_v9 = vadd.f32 %v5569_v6, %v5568_v16  ;;  %v5507_v45 = vsel %vm15927_vm4, %v15938_v41, 0.0  ;;  %vm1065_vm11 = vcmp.ge.s32.totalorder %v20926_v1, 1  ;;  %vm1113_vm9 = vcmp.le.s32.totalorder %v20926_v1, 16  ;;  %vm15964_vm4 = vmand %vm1063_vm3, %vm1111_vm0 }
 0x46a   : > { %v5571_v7 = vsel %vm20925_vm7, %v5507_v45, 0.0  ;;  %v5573_v6 = vsel %vm20928_vm1, %v5508_v20, 0.0  ;;  %v20929_v16 = vmov 0  ;;  %vm1066_vm7 = vcmp.ge.s32.totalorder %v20932_v36, 1  ;;  %vm15969_vm13 = vmand %vm1065_vm11, %vm1113_vm9 }
 0x46b   : > { %v5572_v49 = vadd.f32 %v5571_v7, %v5570_v9  ;;  %v12174_v42 = vpop.f32.mrb[20].mxu0  ;;  %v20930_v16 = vsel %vm15964_vm4, 4294967295, %v20929_v16  ;;  %v20934_v54 = vsel %vm15969_vm13, 4294967295, %v20933_v54  ;;  %vm1114_vm1 = vcmp.le.s32.totalorder %v20932_v36, 16  ;;  %vm15981_vm0 = vmand %vm1064_vm2, %vm1112_vm10 }
 0x46c   : > { %20931 = vst [vmem:[#allocation81_spill] sm:$0xff] %v20930_v16  ;;  %v5276_v45 = vpop.f32.mrb[21].mxu0  ;;  %20935 = vst [vmem:[#allocation82_spill] sm:$0xff] %v20934_v54  ;;  %v15974_v9 = vadd.f32 %v12174_v42, %v15693_v15  ;;  %vm20938_vm3 = vcmask 261120   ;;  %v20940_v24 = vsel %vm15981_vm0, 4294967295, %v20939_v24  ;;  %vm1067_vm9 = vcmp.ge.s32.totalorder %v20948_v28, 1 }
 0x46d   : > { %v5574_v1 = vadd.f32 %v5573_v6, %v5572_v49  ;;  %v15977_v7 = vadd.f32 %v15693_v15, %v5276_v45  ;;  %v12175_v20 = vpop.f32.mrb[22].mxu0  ;;  %v5575_v34 = vsel %vm20938_vm3, %v5509_v0, 0.0  ;;  %20941 = vst [vmem:[#allocation51_spill] sm:$0xff] %v20940_v24  ;;  %vm20944_vm11 = vmmov %vm20938_vm3  ;;  %v20945_v0 = vmov 0  ;;  %v20971_v54 = vld [vmem:[#allocation31_spill] sm:$0xff]  ;;  %v20993_v24 = vld [vmem:[#allocation36_spill] sm:$0xff] }
 0x46e   : > { %20936 = vst [vmem:[#allocation83_spill] sm:$0xff] %v15974_v9  ;;  %v5279_v49 = vpop.f32.mrb[23].mxu0  ;;  %v15989_v42 = vadd.f32 %v12175_v20, %v15693_v15  ;;  %vm15997_vm10 = vmand %vm1066_vm7, %vm1114_vm1  ;;  %vm1115_vm2 = vcmp.le.s32.totalorder %v20948_v28, 16  ;;  %v20955_v28 = vld [vmem:[#allocation30_spill] sm:$0xff] }
 0x46f   : > { %20937 = vst [vmem:[#allocation84_spill] sm:$0xff] %v15977_v7  ;;  %v5510_v6 = vsel %vm15964_vm4, %v15977_v7, 0.0  ;;  %v5576_v35 = vadd.f32 %v5575_v34, %v5574_v1  ;;  %v15992_v45 = vadd.f32 %v15693_v15, %v5279_v49  ;;  %v20946_v0 = vsel %vm15997_vm10, 4294967295, %v20945_v0  ;;  %vm20951_vm4 = vmmov %vm20938_vm3  ;;  %v21029_v7 = vld [vmem:[#allocation43_spill] sm:$0xff] }
 0x470   : > { %20942 = vst [vmem:[#allocation52_spill] sm:$0xff] %v15989_v42  ;;  %v5577_v58 = vsel %vm20944_vm11, %v5510_v6, 0.0  ;;  %20947 = vst [vmem:[#allocation87_spill] sm:$0xff] %v20946_v0  ;;  %v5512_v34 = vsel %vm15969_vm13, %v15974_v9, 0.0  ;;  %v20949_v6 = vld [vmem:[#allocation29_spill] sm:$0xff]  ;;  %v5513_v36 = vsel %vm15997_vm10, %v15989_v42, 0.0 }
 0x471   : > { %20943 = vst [vmem:[#allocation86_spill] sm:$0xff] %v15992_v45  ;;  %v5578_v1 = vadd.f32 %v5577_v58, %v5576_v35  ;;  %v5511_v20 = vsel %vm15981_vm0, %v15992_v45, 0.0  ;;  %vm1069_vm7 = vcmp.ge.s32.totalorder %v20949_v6, 1  ;;  %vm1117_vm1 = vcmp.le.s32.totalorder %v20949_v6, 16  ;;  %vm16018_vm0 = vmand %vm1067_vm9, %vm1115_vm2  ;;  %v21010_v9 = vld [vmem:[#allocation39_spill] sm:$0xff] }
 0x472   : > { %v5579_v49 = vsel %vm20938_vm3, %v5511_v20, 0.0  ;;  %vm1068_vm11 = vcmp.ge.s32.totalorder %v20950_v23, 1  ;;  %vm1116_vm13 = vcmp.le.s32.totalorder %v20950_v23, 16  ;;  %v5581_v58 = vsel %vm20951_vm4, %v5512_v34, 0.0  ;;  %vm16023_vm6 = vmand %vm1069_vm7, %vm1117_vm1 }
 0x473   : > { %v5580_v22 = vadd.f32 %v5579_v49, %v5578_v1  ;;  %v12178_v21 = vpop.f32.mrb[24].mxu0  ;;  %v20952_v35 = vmov 0  ;;  %vm1070_vm3 = vcmp.ge.s32.totalorder %v20955_v28, 1  ;;  %v20957_v50 = vsel %vm16023_vm6, 4294967295, %v20956_v50  ;;  %vm16035_vm2 = vmand %vm1068_vm11, %vm1116_vm13 }
 0x474   : > { %v20953_v35 = vsel %vm16018_vm0, 4294967295, %v20952_v35  ;;  %v5292_v20 = vpop.f32.mrb[25].mxu0  ;;  %20958 = vst [vmem:[#allocation89_spill] sm:$0xff] %v20957_v50  ;;  %v16028_v1 = vadd.f32 %v12178_v21, %v15693_v15  ;;  %vm1118_vm4 = vcmp.le.s32.totalorder %v20955_v28, 16  ;;  %vm20961_vm9 = vcmask 261120  }
 0x475   : > { %20954 = vst [vmem:[#allocation88_spill] sm:$0xff] %v20953_v35  ;;  %v5582_v6 = vadd.f32 %v5581_v58, %v5580_v22  ;;  %v16031_v49 = vadd.f32 %v15693_v15, %v5292_v20  ;;  %v12179_v34 = vpop.f32.mrb[26].mxu0  ;;  %v5583_v23 = vsel %vm20961_vm9, %v5513_v36, 0.0  ;;  %v20963_v14 = vsel %vm16035_vm2, 4294967295, %v20962_v14  ;;  %vm20967_vm7 = vmmov %vm20961_vm9 }
 0x476   : > { %20959 = vst [vmem:[#allocation90_spill] sm:$0xff] %v16028_v1  ;;  %20964 = vst [vmem:[#allocation85_spill] sm:$0xff] %v20963_v14  ;;  %v5295_v22 = vpop.f32.mrb[27].mxu0  ;;  %v16043_v21 = vadd.f32 %v12179_v34, %v15693_v15  ;;  %v20968_v36 = vmov 0  ;;  %vm1071_vm1 = vcmp.ge.s32.totalorder %v20971_v54, 1  ;;  %vm1119_vm11 = vcmp.le.s32.totalorder %v20971_v54, 16 }
 0x477   : > { %20960 = vst [vmem:[#allocation91_spill] sm:$0xff] %v16031_v49  ;;  %v5514_v58 = vsel %vm16018_vm0, %v16031_v49, 0.0  ;;  %v5584_v52 = vadd.f32 %v5583_v23, %v5582_v6  ;;  %v16046_v20 = vadd.f32 %v15693_v15, %v5295_v22  ;;  %vm16051_vm13 = vmand %vm1070_vm3, %vm1118_vm4  ;;  %v5516_v23 = vsel %vm16023_vm6, %v16028_v1, 0.0  ;;  %v20974_v1 = vld [vmem:[#allocation32_spill] sm:$0xff]  ;;  %v20979_v54 = vld [vmem:[#allocation34_spill] sm:$0xff] }
 0x478   : > { %20965 = vst [vmem:[#allocation92_spill] sm:$0xff] %v16043_v21  ;;  %v5585_v0 = vsel %vm20967_vm7, %v5514_v58, 0.0  ;;  %v20969_v36 = vsel %vm16051_vm13, 4294967295, %v20968_v36  ;;  %vm20972_vm9 = vmmov %vm20967_vm7  ;;  %v20973_v58 = vld [vmem:[#allocation33_spill] sm:$0xff]  ;;  %v5517_v28 = vsel %vm16051_vm13, %v16043_v21, 0.0  ;;  %vm1072_vm7 = vcmp.ge.s32.totalorder %v20974_v1, 1 }
 0x479   : > { %20966 = vst [vmem:[#allocation48_spill] sm:$0xff] %v16046_v20  ;;  %20970 = vst [vmem:[#allocation49_spill] sm:$0xff] %v20969_v36  ;;  %v5586_v6 = vadd.f32 %v5585_v0, %v5584_v52  ;;  %v5515_v34 = vsel %vm16035_vm2, %v16046_v20, 0.0  ;;  %vm1073_vm3 = vcmp.ge.s32.totalorder %v20973_v58, 1  ;;  %vm1121_vm4 = vcmp.le.s32.totalorder %v20973_v58, 16  ;;  %v20991_v49 = vld [vmem:[#allocation35_spill] sm:$0xff] }
 0x47a   : > { %v5587_v22 = vsel %vm20972_vm9, %v5515_v34, 0.0  ;;  %vm1120_vm6 = vcmp.le.s32.totalorder %v20974_v1, 16  ;;  %vm20975_vm0 = vmmov %vm20972_vm9  ;;  %v20976_v0 = vmov 0  ;;  %vm1074_vm9 = vcmp.ge.s32.totalorder %v20979_v54, 1 }
 0x47b   : > { %v5588_v35 = vadd.f32 %v5587_v22, %v5586_v6  ;;  %v12182_v50 = vpop.f32.mrb[28].mxu0  ;;  %v5589_v52 = vsel %vm20975_vm0, %v5516_v23, 0.0  ;;  %vm16072_vm2 = vmand %vm1071_vm1, %vm1119_vm11  ;;  %v20980_v14 = vmov 0  ;;  %vm1122_vm0 = vcmp.le.s32.totalorder %v20979_v54, 16 }
 0x47c   : > { %v20977_v0 = vsel %vm16072_vm2, 4294967295, %v20976_v0  ;;  %v5308_v34 = vpop.f32.mrb[29].mxu0  ;;  %vm16077_vm10 = vmand %vm1073_vm3, %vm1121_vm4  ;;  %v16082_v6 = vadd.f32 %v12182_v50, %v15693_v15  ;;  %vm20983_vm1 = vcmask 261120   ;;  %v20984_v36 = vmov 0 }
 0x47d   : > { %20978 = vst [vmem:[#allocation93_spill] sm:$0xff] %v20977_v0  ;;  %v5590_v58 = vadd.f32 %v5589_v52, %v5588_v35  ;;  %v20981_v14 = vsel %vm16077_vm10, 4294967295, %v20980_v14  ;;  %v16085_v22 = vadd.f32 %v15693_v15, %v5308_v34  ;;  %v12183_v23 = vpop.f32.mrb[30].mxu0  ;;  %v5591_v1 = vsel %vm20983_vm1, %v5517_v28, 0.0  ;;  %vm16089_vm11 = vmand %vm1072_vm7, %vm1120_vm6 }
 0x47e   : > { %20982 = vst [vmem:[#allocation94_spill] sm:$0xff] %v20981_v14  ;;  %v20985_v36 = vsel %vm16089_vm11, 4294967295, %v20984_v36  ;;  %v5311_v35 = vpop.f32.mrb[31].mxu0  ;;  %v16097_v50 = vadd.f32 %v12183_v23, %v15693_v15  ;;  %vm20987_vm3 = vmmov %vm20983_vm1  ;;  %v20988_v28 = vmov 0  ;;  %vm1075_vm4 = vcmp.ge.s32.totalorder %v20991_v49, 1 }
 0x47f   : > { %20986 = vst [vmem:[#allocation95_spill] sm:$0xff] %v20985_v36  ;;  %v5518_v52 = vsel %vm16072_vm2, %v16085_v22, 0.0  ;;  %v5592_v21 = vadd.f32 %v5591_v1, %v5590_v58  ;;  %v16100_v34 = vadd.f32 %v15693_v15, %v5311_v35  ;;  %vm16105_vm6 = vmand %vm1074_vm9, %vm1122_vm0  ;;  %v5520_v1 = vsel %vm16077_vm10, %v16082_v6, 0.0 }
 0x480   : > { %v5593_v20 = vsel %vm20987_vm3, %v5518_v52, 0.0  ;;  %v20989_v28 = vsel %vm16105_vm6, 4294967295, %v20988_v28  ;;  %vm1123_vm7 = vcmp.le.s32.totalorder %v20991_v49, 16  ;;  %v20992_v52 = vld [vmem:[#allocation37_spill] sm:$0xff]  ;;  %v5521_v54 = vsel %vm16105_vm6, %v16097_v50, 0.0  ;;  %vm20994_vm2 = vmmov %vm20983_vm1  ;;  %v20998_v49 = vld [vmem:[#allocation38_spill] sm:$0xff] }
 0x481   : > { %20990 = vst [vmem:[#allocation96_spill] sm:$0xff] %v20989_v28  ;;  %v5594_v58 = vadd.f32 %v5593_v20, %v5592_v21  ;;  %v5519_v23 = vsel %vm16089_vm11, %v16100_v34, 0.0  ;;  %vm1077_vm9 = vcmp.ge.s32.totalorder %v20992_v52, 1  ;;  %vm1125_vm0 = vcmp.le.s32.totalorder %v20992_v52, 16  ;;  %vm16126_vm11 = vmand %vm1075_vm4, %vm1123_vm7 }
 0x482   : > { %v5595_v35 = vsel %vm20983_vm1, %v5519_v23, 0.0  ;;  %vm1076_vm3 = vcmp.ge.s32.totalorder %v20993_v24, 1  ;;  %vm1124_vm10 = vcmp.le.s32.totalorder %v20993_v24, 16  ;;  %v5597_v21 = vsel %vm20994_vm2, %v5520_v1, 0.0  ;;  %vm16131_vm13 = vmand %vm1077_vm9, %vm1125_vm0 }
 0x483   : > { %v5596_v0 = vadd.f32 %v5595_v35, %v5594_v58  ;;  %v12186_v14 = vpop.f32.mrb[32].mxu0  ;;  %v20995_v20 = vmov 0  ;;  %vm1078_vm1 = vcmp.ge.s32.totalorder %v20998_v49, 1  ;;  %v20999_v36 = vmov 0  ;;  %vm16143_vm7 = vmand %vm1076_vm3, %vm1124_vm10 }
 0x484   : > { %v20996_v20 = vsel %vm16126_vm11, 4294967295, %v20995_v20  ;;  %v5324_v23 = vpop.f32.mrb[33].mxu0  ;;  %v21000_v36 = vsel %vm16131_vm13, 4294967295, %v20999_v36  ;;  %v16136_v58 = vadd.f32 %v12186_v14, %v15693_v15  ;;  %vm1126_vm2 = vcmp.le.s32.totalorder %v20998_v49, 16 }
 0x485   : > { %20997 = vst [vmem:[#allocation97_spill] sm:$0xff] %v20996_v20  ;;  %v5598_v52 = vadd.f32 %v5597_v21, %v5596_v0  ;;  %21001 = vst [vmem:[#allocation98_spill] sm:$0xff] %v21000_v36  ;;  %v16139_v35 = vadd.f32 %v15693_v15, %v5324_v23  ;;  %v12187_v1 = vpop.f32.mrb[34].mxu0  ;;  %vm21002_vm4 = vcmask 261120   ;;  %v21003_v28 = vmov 0 }
 0x486   : > { %v5599_v24 = vsel %vm21002_vm4, %v5521_v54, 0.0  ;;  %v21004_v28 = vsel %vm16143_vm7, 4294967295, %v21003_v28  ;;  %v5327_v0 = vpop.f32.mrb[35].mxu0  ;;  %v16151_v14 = vadd.f32 %v12187_v1, %v15693_v15  ;;  %vm21006_vm9 = vmmov %vm21002_vm4  ;;  %v21007_v54 = vmov 0 }
 0x487   : > { %21005 = vst [vmem:[#allocation99_spill] sm:$0xff] %v21004_v28  ;;  %v5522_v21 = vsel %vm16126_vm11, %v16139_v35, 0.0  ;;  %v5600_v42 = vadd.f32 %v5599_v24, %v5598_v52  ;;  %v16154_v23 = vadd.f32 %v15693_v15, %v5327_v0  ;;  %vm16159_vm10 = vmand %vm1078_vm1, %vm1126_vm2  ;;  %vm1079_vm0 = vcmp.ge.s32.totalorder %v21010_v9, 1 }
 0x488   : > { %v5601_v16 = vsel %vm21006_vm9, %v5522_v21, 0.0  ;;  %v21008_v54 = vsel %vm16159_vm10, 4294967295, %v21007_v54  ;;  %v5524_v24 = vsel %vm16131_vm13, %v16136_v58, 0.0  ;;  %vm1127_vm3 = vcmp.le.s32.totalorder %v21010_v9, 16  ;;  %v21011_v21 = vld [vmem:[#allocation41_spill] sm:$0xff]  ;;  %vm21013_vm11 = vmmov %vm21002_vm4  ;;  %v21017_v9 = vld [vmem:[#allocation42_spill] sm:$0xff] }
 0x489   : > { %21009 = vst [vmem:[#allocation100_spill] sm:$0xff] %v21008_v54  ;;  %v5602_v52 = vadd.f32 %v5601_v16, %v5600_v42  ;;  %v5523_v1 = vsel %vm16143_vm7, %v16154_v23, 0.0  ;;  %vm1081_vm1 = vcmp.ge.s32.totalorder %v21011_v21, 1  ;;  %vm1129_vm2 = vcmp.le.s32.totalorder %v21011_v21, 16  ;;  %vm16180_vm7 = vmand %vm1079_vm0, %vm1127_vm3 }
 0x48a   : > { %v5603_v0 = vsel %vm21002_vm4, %v5523_v1, 0.0  ;;  %v5525_v49 = vsel %vm16159_vm10, %v16151_v14, 0.0  ;;  %vm1080_vm9 = vcmp.ge.s32.totalorder %v21012_v47, 1  ;;  %vm1128_vm13 = vcmp.le.s32.totalorder %v21012_v47, 16  ;;  %vm16185_vm6 = vmand %vm1081_vm1, %vm1129_vm2 }
 0x48b   : > { %v5604_v20 = vadd.f32 %v5603_v0, %v5602_v52  ;;  %v12190_v36 = vpop.f32.mrb[36].mxu0  ;;  %v5605_v16 = vsel %vm21013_vm11, %v5524_v24, 0.0  ;;  %v21014_v42 = vmov 0  ;;  %vm1082_vm4 = vcmp.ge.s32.totalorder %v21017_v9, 1  ;;  %vm16197_vm3 = vmand %vm1080_vm9, %vm1128_vm13 }
 0x48c   : > { %v21015_v42 = vsel %vm16180_vm7, 4294967295, %v21014_v42  ;;  %v5340_v1 = vpop.f32.mrb[37].mxu0  ;;  %v21018_v28 = vmov 0  ;;  %v16190_v52 = vadd.f32 %v12190_v36, %v15693_v15  ;;  %vm1130_vm11 = vcmp.le.s32.totalorder %v21017_v9, 16 }
 0x48d   : > { %21016 = vst [vmem:[#allocation101_spill] sm:$0xff] %v21015_v42  ;;  %v5606_v21 = vadd.f32 %v5605_v16, %v5604_v20  ;;  %v21019_v28 = vsel %vm16185_vm6, 4294967295, %v21018_v28  ;;  %v16193_v0 = vadd.f32 %v15693_v15, %v5340_v1  ;;  %v12191_v24 = vpop.f32.mrb[38].mxu0  ;;  %vm21021_vm0 = vcmask 261120   ;;  %vm16213_vm13 = vmand %vm1082_vm4, %vm1130_vm11 }
 0x48e   : > { %21020 = vst [vmem:[#allocation102_spill] sm:$0xff] %v21019_v28  ;;  %v5607_v47 = vsel %vm21021_vm0, %v5525_v49, 0.0  ;;  %v21022_v54 = vmov 0  ;;  %v5343_v20 = vpop.f32.mrb[39].mxu0  ;;  %v16205_v36 = vadd.f32 %v12191_v24, %v15693_v15  ;;  %vm21025_vm1 = vmmov %vm21021_vm0  ;;  %v21026_v49 = vmov 0 }
 0x48f   : > { %v21023_v54 = vsel %vm16197_vm3, 4294967295, %v21022_v54  ;;  %v5526_v16 = vsel %vm16180_vm7, %v16193_v0, 0.0  ;;  %v5608_v45 = vadd.f32 %v5607_v47, %v5606_v21  ;;  %v16208_v1 = vadd.f32 %v15693_v15, %v5343_v20  ;;  %vm21032_vm7 = vmmov %vm21021_vm0 }
 0x490   : > { %21024 = vst [vmem:[#allocation103_spill] sm:$0xff] %v21023_v54  ;;  %v5609_v13 = vsel %vm21025_vm1, %v5526_v16, 0.0  ;;  %v21027_v49 = vsel %vm16213_vm13, 4294967295, %v21026_v49  ;;  %vm1083_vm2 = vcmp.ge.s32.totalorder %v21029_v7, 1  ;;  %v5528_v47 = vsel %vm16185_vm6, %v16190_v52, 0.0  ;;  %v21030_v16 = vld [vmem:[#allocation45_spill] sm:$0xff] }
 0x491   : > { %21028 = vst [vmem:[#allocation104_spill] sm:$0xff] %v21027_v49  ;;  %v5610_v21 = vadd.f32 %v5609_v13, %v5608_v45  ;;  %v5527_v24 = vsel %vm16197_vm3, %v16208_v1, 0.0  ;;  %vm1131_vm9 = vcmp.le.s32.totalorder %v21029_v7, 16  ;;  %vm1085_vm4 = vcmp.ge.s32.totalorder %v21030_v16, 1  ;;  %v21036_v7 = vld [vmem:[#allocation46_spill] sm:$0xff] }
 0x492   : > { %v5611_v20 = vsel %vm21021_vm0, %v5527_v24, 0.0  ;;  %vm1133_vm11 = vcmp.le.s32.totalorder %v21030_v16, 16  ;;  %v5529_v9 = vsel %vm16213_vm13, %v16205_v36, 0.0  ;;  %vm1084_vm1 = vcmp.ge.s32.totalorder %v21031_v25, 1  ;;  %vm16234_vm3 = vmand %vm1083_vm2, %vm1131_vm9 }
 0x493   : > { %v5612_v42 = vadd.f32 %v5611_v20, %v5610_v21  ;;  %v12194_v28 = vpop.f32.mrb[40].mxu0  ;;  %vm1132_vm6 = vcmp.le.s32.totalorder %v21031_v25, 16  ;;  %v5613_v13 = vsel %vm21032_vm7, %v5528_v47, 0.0  ;;  %v21033_v45 = vmov 0  ;;  %vm16239_vm10 = vmand %vm1085_vm4, %vm1133_vm11 }
 0x494   : > { %v21034_v45 = vsel %vm16234_vm3, 4294967295, %v21033_v45  ;;  %v5356_v24 = vpop.f32.mrb[41].mxu0  ;;  %vm1086_vm0 = vcmp.ge.s32.totalorder %v21036_v7, 1  ;;  %v21037_v54 = vmov 0  ;;  %v16244_v21 = vadd.f32 %v12194_v28, %v15693_v15  ;;  %vm16251_vm9 = vmand %vm1084_vm1, %vm1132_vm6 }
 0x495   : > { %21035 = vst [vmem:[#allocation105_spill] sm:$0xff] %v21034_v45  ;;  %v5614_v16 = vadd.f32 %v5613_v13, %v5612_v42  ;;  %v21038_v54 = vsel %vm16239_vm10, 4294967295, %v21037_v54  ;;  %v16247_v20 = vadd.f32 %v15693_v15, %v5356_v24  ;;  %vm1134_vm7 = vcmp.le.s32.totalorder %v21036_v7, 16  ;;  %v12195_v47 = vpop.f32.mrb[42].mxu0 }
 0x496   : > { %21039 = vst [vmem:[#allocation106_spill] sm:$0xff] %v21038_v54  ;;  %vm21040_vm2 = vcmask 261120   ;;  %v21041_v49 = vmov 0  ;;  %v5359_v42 = vpop.f32.mrb[43].mxu0  ;;  %v16259_v28 = vadd.f32 %v12195_v47, %v15693_v15  ;;  %vm16267_vm6 = vmand %vm1086_vm0, %vm1134_vm7  ;;  %vm1087_vm11 = vcmp.ge.s32.totalorder %v21048_v44, 1 }
 0x497   : > { %v5615_v25 = vsel %vm21040_vm2, %v5529_v9, 0.0  ;;  %v21042_v49 = vsel %vm16251_vm9, 4294967295, %v21041_v49  ;;  %v5530_v13 = vsel %vm16234_vm3, %v16247_v20, 0.0  ;;  %v16262_v24 = vadd.f32 %v15693_v15, %v5359_v42  ;;  %vm21044_vm4 = vmmov %vm21040_vm2 }
 0x498   : > { %21043 = vst [vmem:[#allocation107_spill] sm:$0xff] %v21042_v49  ;;  %v5616_v40 = vadd.f32 %v5615_v25, %v5614_v16  ;;  %v5617_v27 = vsel %vm21044_vm4, %v5530_v13, 0.0  ;;  %v21045_v9 = vmov 0  ;;  %v5532_v25 = vsel %vm16239_vm10, %v16244_v21, 0.0  ;;  %v21049_v13 = vld [vmem:[#allocation75_spill] sm:$0xff]  ;;  %vm21051_vm3 = vmmov %vm21040_vm2 }
 0x499   : > { %v21046_v9 = vsel %vm16267_vm6, 4294967295, %v21045_v9  ;;  %v5531_v47 = vsel %vm16251_vm9, %v16262_v24, 0.0  ;;  %vm1135_vm1 = vcmp.le.s32.totalorder %v21048_v44, 16  ;;  %vm1089_vm0 = vcmp.ge.s32.totalorder %v21049_v13, 1  ;;  %v21055_v44 = vld [vmem:[#allocation76_spill] sm:$0xff] }
 0x49a   : > { %21047 = vst [vmem:[#allocation108_spill] sm:$0xff] %v21046_v9  ;;  %v5618_v16 = vadd.f32 %v5617_v27, %v5616_v40  ;;  %v5619_v42 = vsel %vm21040_vm2, %v5531_v47, 0.0  ;;  %vm1137_vm7 = vcmp.le.s32.totalorder %v21049_v13, 16  ;;  %v5533_v7 = vsel %vm16267_vm6, %v16259_v28, 0.0  ;;  %vm16288_vm9 = vmand %vm1087_vm11, %vm1135_vm1 }
 0x49b   : > { %v12198_v54 = vpop.f32.mrb[44].mxu0  ;;  %vm1088_vm4 = vcmp.ge.s32.totalorder %v21050_v17, 1  ;;  %vm1136_vm10 = vcmp.le.s32.totalorder %v21050_v17, 16  ;;  %v5621_v27 = vsel %vm21051_vm3, %v5532_v25, 0.0  ;;  %v21052_v40 = vmov 0  ;;  %vm16293_vm13 = vmand %vm1089_vm0, %vm1137_vm7 }
 0x49c   : > { %v5620_v45 = vadd.f32 %v5619_v42, %v5618_v16  ;;  %v21053_v40 = vsel %vm16288_vm9, 4294967295, %v21052_v40  ;;  %v5372_v47 = vpop.f32.mrb[45].mxu0  ;;  %vm1090_vm2 = vcmp.ge.s32.totalorder %v21055_v44, 1  ;;  %v21056_v49 = vmov 0  ;;  %vm16305_vm1 = vmand %vm1088_vm4, %vm1136_vm10 }
 0x49d   : > { %21054 = vst [vmem:[#allocation109_spill] sm:$0xff] %v21053_v40  ;;  %v21057_v49 = vsel %vm16293_vm13, 4294967295, %v21056_v49  ;;  %v16298_v16 = vadd.f32 %v12198_v54, %v15693_v15  ;;  %v16301_v42 = vadd.f32 %v15693_v15, %v5372_v47  ;;  %vm1138_vm3 = vcmp.le.s32.totalorder %v21055_v44, 16  ;;  %v12199_v25 = vpop.f32.mrb[46].mxu0 }
 0x49e   : > { %v5622_v13 = vadd.f32 %v5621_v27, %v5620_v45  ;;  %21058 = vst [vmem:[#allocation110_spill] sm:$0xff] %v21057_v49  ;;  %vm21059_vm11 = vcmask 261120   ;;  %v21060_v9 = vmov 0  ;;  %v5375_v45 = vpop.f32.mrb[47].mxu0  ;;  %v16313_v54 = vadd.f32 %v12199_v25, %v15693_v15  ;;  %vm16321_vm10 = vmand %vm1090_vm2, %vm1138_vm3 }
 0x49f   : > { %v5623_v17 = vsel %vm21059_vm11, %v5533_v7, 0.0  ;;  %v21061_v9 = vsel %vm16305_vm1, 4294967295, %v21060_v9  ;;  %v5534_v27 = vsel %vm16288_vm9, %v16301_v42, 0.0  ;;  %v16316_v47 = vadd.f32 %v15693_v15, %v5375_v45  ;;  %vm21063_vm0 = vmmov %vm21059_vm11 }
 0x4a0   : > { %21062 = vst [vmem:[#allocation111_spill] sm:$0xff] %v21061_v9  ;;  %v5624_v41 = vadd.f32 %v5623_v17, %v5622_v13  ;;  %v5625_v56 = vsel %vm21063_vm0, %v5534_v27, 0.0  ;;  %v21064_v7 = vmov 0  ;;  %v5536_v40 = vsel %vm16293_vm13, %v16298_v16, 0.0  ;;  %vm21067_vm7 = vmmov %vm21063_vm0 }
 0x4a1   : > { %v21065_v7 = vsel %vm16321_vm10, 4294967295, %v21064_v7  ;;  %v5535_v17 = vsel %vm16305_vm1, %v16316_v47, 0.0  ;;  %v5537_v13 = vsel %vm16321_vm10, %v16313_v54, 0.0  ;;  %vm21068_vm4 = vmmov %vm21063_vm0 }
 0x4a2   : > { %21066 = vst [vmem:[#allocation112_spill] sm:$0xff] %v21065_v7  ;;  %v5626_v43 = vadd.f32 %v5625_v56, %v5624_v41  ;;  %v5627_v15 = vsel %vm21067_vm7, %v5535_v17, 0.0  ;;  %v5629_v45 = vsel %vm21068_vm4, %v5536_v40, 0.0  ;;  %vm21069_vm2 = vmmov %vm21063_vm0  ;;  %vm21074_vm4 = vnez %v20853_v48 }
 0x4a3   : > { %v5631_v44 = vsel %vm21069_vm2, %v5537_v13, 0.0  ;;  %vm21070_vm3 = vmmov %vm21063_vm0 }
 0x4a4   : > { %v5628_v25 = vadd.f32 %v5627_v15, %v5626_v43  ;;  %vm21071_vm11 = vmmov %vm21063_vm0  ;;  %vm21072_vm0 = vnez %v20856_v19  ;;  %v21087_v43 = vld [vmem:[#allocation68_spill] sm:$0xff] }
 0x4a5   : > { %vm21073_vm7 = vmmov %vm21069_vm2 }
 0x4a6   : > { %v5630_v27 = vadd.f32 %v5629_v45, %v5628_v25 }
 0x4a8   : > { %v5632_v46 = vadd.f32 %v5631_v44, %v5630_v27  ;;  %v21084_v44 = vld [vmem:[#allocation65_spill] sm:$0xff] }
 0x4aa   : > { %v5633_v49 = vrot.slane %v5632_v46, 4 }
 0x4ac   : > { %v5634_v38 = vadd.f32 %v5633_v49, %v5632_v46 }
 0x4ae   : > { %v5635_v56 = vrot.slane %v5634_v38, 2 }
 0x4b0   : > { %v5636_v41 = vadd.f32 %v5635_v56, %v5634_v38 }
 0x4b2   : > { %v5637_v55 = vrot.slane %v5636_v41, 1 }
 0x4b4   : > { %v5638_v9 = vadd.f32 %v5637_v55, %v5636_v41 }
 0x4b6   : > { %v16337_v62 = vmul.f32 0.00390625, %v5638_v9 }
 0x4b8   : > { %v5640_v27 = vsub.f32 %v15709_v39, %v16337_v62  ;;  %v5641_v56 = vsub.f32 %v15724_v51, %v16337_v62  ;;  %v5642_v41 = vsub.f32 %v15706_v12, %v16337_v62  ;;  %v5643_v15 = vsub.f32 %v15721_v8, %v16337_v62 }
 0x4b9   : > { %v5644_v39 = vsub.f32 %v15761_v60, %v16337_v62  ;;  %v5648_v46 = vsub.f32 %v15815_v3, %v16337_v62 }
 0x4ba   : > { %v16389_v13 = vsel %vm15697_vm14, %v5640_v27, 0.0  ;;  %v16393_v25 = vsel %vm15713_vm15, %v5641_v56, 0.0  ;;  %v16399_v51 = vsel %vm15701_vm8, %v5642_v41, 0.0  ;;  %v5645_v27 = vsub.f32 %v15776_v59, %v16337_v62 }
 0x4bb   : > { %v5736_v12 = vmul.f32 %v16389_v13, %v16389_v13  ;;  %v5737_v8 = vmul.f32 %v16393_v25, %v16393_v25  ;;  %v16409_v56 = vsel %vm15726_vm12, %v5643_v15, 0.0  ;;  %v5738_v60 = vmul.f32 %v16399_v51, %v16399_v51 }
 0x4bc   : > { %v5646_v41 = vsub.f32 %v15758_v2, %v16337_v62  ;;  %v16417_v45 = vsel %vm15748_vm5, %v5644_v39, 0.0  ;;  %v5739_v9 = vmul.f32 %v16409_v56, %v16409_v56  ;;  %v5647_v15 = vsub.f32 %v15773_v32, %v16337_v62 }
 0x4bd   : > { %v5784_v49 = vsel %vm21070_vm3, %v5736_v12, 0.0  ;;  %v5785_v59 = vsel %vm21071_vm11, %v5737_v8, 0.0  ;;  %v16427_v38 = vsel %vm21072_vm0, %v5645_v27, 0.0  ;;  %v5740_v2 = vmul.f32 %v16417_v45, %v16417_v45  ;;  %vm21076_vm11 = vmmov %vm21069_vm2 }
 0x4be   : > { %v5786_v55 = vadd.f32 %v5785_v59, %v5784_v49  ;;  %v5787_v39 = vsel %vm21073_vm7, %v5738_v60, 0.0  ;;  %v16436_v12 = vsel %vm21074_vm4, %v5646_v41, 0.0  ;;  %v5741_v32 = vmul.f32 %v16427_v38, %v16427_v38 }
 0x4bf   : > { %v5789_v27 = vsel %vm21069_vm2, %v5739_v9, 0.0  ;;  %v5649_v49 = vsub.f32 %v15830_v18, %v16337_v62  ;;  %vm21075_vm3 = vnez %v20859_v10  ;;  %v5742_v3 = vmul.f32 %v16436_v12, %v16436_v12 }
 0x4c0   : > { %v5788_v8 = vadd.f32 %v5787_v39, %v5786_v55  ;;  %v16445_v59 = vsel %vm21075_vm3, %v5647_v15, 0.0  ;;  %v5791_v41 = vsel %vm21076_vm11, %v5740_v2, 0.0  ;;  %v5650_v55 = vsub.f32 %v15812_v5, %v16337_v62  ;;  %vm21079_vm11 = vmmov %vm21069_vm2 }
 0x4c1   : > { %vm21077_vm7 = vnez %v20865_v33  ;;  %v5743_v18 = vmul.f32 %v16445_v59, %v16445_v59  ;;  %v5793_v15 = vsel %vm21069_vm2, %v5741_v32, 0.0  ;;  %vm21078_vm3 = vnez %v20873_v4 }
 0x4c2   : > { %v5790_v60 = vadd.f32 %v5789_v27, %v5788_v8  ;;  %v16454_v39 = vsel %vm21077_vm7, %v5648_v46, 0.0  ;;  %v5651_v8 = vsub.f32 %v15827_v57, %v16337_v62  ;;  %v16463_v27 = vsel %vm21078_vm3, %v5649_v49, 0.0 }
 0x4c3   : > { %v5744_v5 = vmul.f32 %v16454_v39, %v16454_v39  ;;  %v5795_v46 = vsel %vm21079_vm11, %v5742_v3, 0.0  ;;  %vm21080_vm7 = vnez %v20869_v63  ;;  %v5745_v57 = vmul.f32 %v16463_v27, %v16463_v27  ;;  %vm21082_vm11 = vmmov %vm21069_vm2 }
 0x4c4   : > { %v5792_v9 = vadd.f32 %v5791_v41, %v5790_v60  ;;  %v5652_v60 = vsub.f32 %v15869_v53, %v16337_v62  ;;  %v16472_v41 = vsel %vm21080_vm7, %v5650_v55, 0.0  ;;  %v5797_v49 = vsel %vm21069_vm2, %v5743_v18, 0.0 }
 0x4c5   : > { %vm21081_vm3 = vnez %v20877_v61  ;;  %v5746_v53 = vmul.f32 %v16472_v41, %v16472_v41  ;;  %v5799_v55 = vsel %vm21082_vm11, %v5744_v5, 0.0  ;;  %vm21085_vm7 = vnez %v21084_v44  ;;  %vm21089_vm11 = vmmov %vm21069_vm2  ;;  %v21091_v44 = vld [vmem:[#allocation66_spill] sm:$0xff] }
 0x4c6   : > { %v5794_v2 = vadd.f32 %v5793_v15, %v5792_v9  ;;  %v5653_v9 = vsub.f32 %v15884_v30, %v16337_v62  ;;  %v16481_v15 = vsel %vm21081_vm3, %v5651_v8, 0.0  ;;  %v16490_v40 = vsel %vm21085_vm7, %v5652_v60, 0.0 }
 0x4c7   : > { %v5747_v30 = vmul.f32 %v16481_v15, %v16481_v15  ;;  %v5801_v8 = vsel %vm21069_vm2, %v5745_v57, 0.0  ;;  %vm21088_vm3 = vnez %v21087_v43  ;;  %v5803_v60 = vsel %vm21089_vm11, %v5746_v53, 0.0  ;;  %v21094_v43 = vld [vmem:[#allocation70_spill] sm:$0xff]  ;;  %vm21096_vm11 = vmmov %vm21069_vm2 }
 0x4c8   : > { %v5796_v32 = vadd.f32 %v5795_v46, %v5794_v2  ;;  %v21083_v2 = vld [vmem:[#allocation67_spill] sm:$0xff]  ;;  %v16499_v17 = vsel %vm21088_vm3, %v5653_v9, 0.0  ;;  %vm21092_vm7 = vnez %v21091_v44  ;;  %vm21095_vm3 = vnez %v21094_v43  ;;  %v21101_v43 = vld [vmem:[#allocation77_spill] sm:$0xff] }
 0x4c9   : > { %v5654_v46 = vsub.f32 %v21083_v2, %v16337_v62  ;;  %v5748_v2 = vmul.f32 %v16490_v40, %v16490_v40  ;;  %v5805_v9 = vsel %vm21069_vm2, %v5747_v30, 0.0  ;;  %v21098_v44 = vld [vmem:[#allocation71_spill] sm:$0xff] }
 0x4ca   : > { %v5798_v3 = vadd.f32 %v5797_v49, %v5796_v32  ;;  %v21086_v32 = vld [vmem:[#allocation69_spill] sm:$0xff] }
 0x4cb   : > { %v5655_v49 = vsub.f32 %v21086_v32, %v16337_v62  ;;  %v16508_v61 = vsel %vm21092_vm7, %v5654_v46, 0.0  ;;  %v5749_v32 = vmul.f32 %v16499_v17, %v16499_v17  ;;  %v5807_v46 = vsel %vm21096_vm11, %v5748_v2, 0.0  ;;  %vm21103_vm11 = vmmov %vm21069_vm2 }
 0x4cc   : > { %v5800_v18 = vadd.f32 %v5799_v55, %v5798_v3  ;;  %v21090_v3 = vld [vmem:[#allocation74_spill] sm:$0xff]  ;;  %vm21099_vm7 = vnez %v21098_v44  ;;  %v21105_v44 = vld [vmem:[#allocation72_spill] sm:$0xff] }
 0x4cd   : > { %v5656_v55 = vsub.f32 %v21090_v3, %v16337_v62  ;;  %v16517_v4 = vsel %vm21095_vm3, %v5655_v49, 0.0  ;;  %v5750_v3 = vmul.f32 %v16508_v61, %v16508_v61  ;;  %v5809_v49 = vsel %vm21069_vm2, %v5749_v32, 0.0 }
 0x4ce   : > { %v5802_v5 = vadd.f32 %v5801_v8, %v5800_v18  ;;  %v21093_v18 = vld [vmem:[#allocation79_spill] sm:$0xff]  ;;  %vm21102_vm3 = vnez %v21101_v43  ;;  %v21108_v43 = vld [vmem:[#allocation80_spill] sm:$0xff] }
 0x4cf   : > { %v5657_v8 = vsub.f32 %v21093_v18, %v16337_v62  ;;  %v16526_v63 = vsel %vm21099_vm7, %v5656_v55, 0.0  ;;  %v5751_v18 = vmul.f32 %v16517_v4, %v16517_v4  ;;  %v5811_v55 = vsel %vm21103_vm11, %v5750_v3, 0.0  ;;  %vm21110_vm11 = vmmov %vm21069_vm2 }
 0x4d0   : > { %v5804_v57 = vadd.f32 %v5803_v60, %v5802_v5  ;;  %v21097_v5 = vld [vmem:[#allocation73_spill] sm:$0xff]  ;;  %vm21106_vm7 = vnez %v21105_v44 }
 0x4d1   : > { %v5658_v60 = vsub.f32 %v21097_v5, %v16337_v62  ;;  %v16535_v33 = vsel %vm21102_vm3, %v5657_v8, 0.0  ;;  %v5752_v5 = vmul.f32 %v16526_v63, %v16526_v63  ;;  %v5813_v8 = vsel %vm21069_vm2, %v5751_v18, 0.0  ;;  %v21112_v44 = vld [vmem:[#allocation81_spill] sm:$0xff] }
 0x4d2   : > { %v5806_v53 = vadd.f32 %v5805_v9, %v5804_v57  ;;  %v21100_v57 = vld [vmem:[#allocation78_spill] sm:$0xff]  ;;  %vm21109_vm3 = vnez %v21108_v43  ;;  %v21115_v43 = vld [vmem:[#allocation51_spill] sm:$0xff] }
 0x4d3   : > { %v5659_v9 = vsub.f32 %v21100_v57, %v16337_v62  ;;  %v16544_v10 = vsel %vm21106_vm7, %v5658_v60, 0.0  ;;  %v5753_v57 = vmul.f32 %v16535_v33, %v16535_v33  ;;  %v5815_v60 = vsel %vm21110_vm11, %v5752_v5, 0.0  ;;  %vm21117_vm11 = vmmov %vm21069_vm2 }
 0x4d4   : > { %v5808_v30 = vadd.f32 %v5807_v46, %v5806_v53  ;;  %v21104_v53 = vld [vmem:[#allocation84_spill] sm:$0xff]  ;;  %vm21113_vm7 = vnez %v21112_v44  ;;  %v21119_v44 = vld [vmem:[#allocation82_spill] sm:$0xff] }
 0x4d5   : > { %v5660_v46 = vsub.f32 %v21104_v53, %v16337_v62  ;;  %v16553_v19 = vsel %vm21109_vm3, %v5659_v9, 0.0  ;;  %v5754_v53 = vmul.f32 %v16544_v10, %v16544_v10  ;;  %v5817_v9 = vsel %vm21069_vm2, %v5753_v57, 0.0 }
 0x4d6   : > { %v5810_v2 = vadd.f32 %v5809_v49, %v5808_v30  ;;  %v21107_v30 = vld [vmem:[#allocation86_spill] sm:$0xff]  ;;  %vm21116_vm3 = vnez %v21115_v43  ;;  %v21122_v43 = vld [vmem:[#allocation87_spill] sm:$0xff] }
 0x4d7   : > { %v5661_v49 = vsub.f32 %v21107_v30, %v16337_v62  ;;  %v16562_v48 = vsel %vm21113_vm7, %v5660_v46, 0.0  ;;  %v5755_v30 = vmul.f32 %v16553_v19, %v16553_v19  ;;  %v5819_v46 = vsel %vm21117_vm11, %v5754_v53, 0.0  ;;  %vm21125_vm11 = vmmov %vm21069_vm2 }
 0x4d8   : > { %v5812_v32 = vadd.f32 %v5811_v55, %v5810_v2  ;;  %v21111_v2 = vld [vmem:[#allocation83_spill] sm:$0xff]  ;;  %vm21120_vm7 = vnez %v21119_v44  ;;  %v21127_v44 = vld [vmem:[#allocation88_spill] sm:$0xff] }
 0x4d9   : > { %v5662_v55 = vsub.f32 %v21111_v2, %v16337_v62  ;;  %v16571_v11 = vsel %vm21116_vm3, %v5661_v49, 0.0  ;;  %v5756_v2 = vmul.f32 %v16562_v48, %v16562_v48  ;;  %v5821_v49 = vsel %vm21069_vm2, %v5755_v30, 0.0 }
 0x4da   : > { %v5814_v3 = vadd.f32 %v5813_v8, %v5812_v32  ;;  %v21114_v32 = vld [vmem:[#allocation52_spill] sm:$0xff]  ;;  %vm21123_vm3 = vnez %v21122_v43  ;;  %v21130_v43 = vld [vmem:[#allocation85_spill] sm:$0xff] }
 0x4db   : > { %v5663_v8 = vsub.f32 %v21114_v32, %v16337_v62  ;;  %v16580_v31 = vsel %vm21120_vm7, %v5662_v55, 0.0  ;;  %v5757_v32 = vmul.f32 %v16571_v11, %v16571_v11  ;;  %v5823_v55 = vsel %vm21125_vm11, %v5756_v2, 0.0  ;;  %vm21132_vm11 = vmmov %vm21069_vm2 }
 0x4dc   : > { %v5816_v18 = vadd.f32 %v5815_v60, %v5814_v3  ;;  %v21118_v3 = vld [vmem:[#allocation91_spill] sm:$0xff]  ;;  %vm21128_vm7 = vnez %v21127_v44  ;;  %v21133_v44 = vld [vmem:[#allocation89_spill] sm:$0xff] }
 0x4dd   : > { %v5664_v60 = vsub.f32 %v21118_v3, %v16337_v62  ;;  %v16589_v29 = vsel %vm21123_vm3, %v5663_v8, 0.0  ;;  %v5758_v3 = vmul.f32 %v16580_v31, %v16580_v31  ;;  %v5825_v8 = vsel %vm21069_vm2, %v5757_v32, 0.0 }
 0x4de   : > { %v5818_v5 = vadd.f32 %v5817_v9, %v5816_v18  ;;  %v21121_v18 = vld [vmem:[#allocation48_spill] sm:$0xff]  ;;  %21124 = vst [vmem:[#allocation67_spill] sm:$0xff] %v16589_v29  ;;  %vm21131_vm3 = vnez %v21130_v43  ;;  %v21139_v43 = vld [vmem:[#allocation93_spill] sm:$0xff] }
 0x4df   : > { %v5665_v9 = vsub.f32 %v21121_v18, %v16337_v62  ;;  %v16598_v37 = vsel %vm21128_vm7, %v5664_v60, 0.0  ;;  %v5759_v18 = vmul.f32 %v16589_v29, %v16589_v29  ;;  %v5827_v60 = vsel %vm21132_vm11, %v5758_v3, 0.0  ;;  %v21135_v29 = vld [vmem:[#allocation49_spill] sm:$0xff] }
 0x4e0   : > { %v5820_v57 = vadd.f32 %v5819_v46, %v5818_v5  ;;  %v21126_v5 = vld [vmem:[#allocation90_spill] sm:$0xff]  ;;  %vm21134_vm7 = vnez %v21133_v44  ;;  %vm21136_vm0 = vnez %v21135_v29  ;;  %vm21140_vm11 = vnez %v21139_v43 }
 0x4e1   : > { %v5666_v46 = vsub.f32 %v21126_v5, %v16337_v62  ;;  %v16607_v26 = vsel %vm21131_vm3, %v5665_v9, 0.0  ;;  %v5760_v5 = vmul.f32 %v16598_v37, %v16598_v37  ;;  %vm21137_vm3 = vmmov %vm21069_vm2 }
 0x4e2   : > { %v5822_v53 = vadd.f32 %v5821_v49, %v5820_v57  ;;  %v21129_v57 = vld [vmem:[#allocation92_spill] sm:$0xff]  ;;  %v5761_v32 = vmul.f32 %v16607_v26, %v16607_v26 }
 0x4e3   : > { %v5667_v49 = vsub.f32 %v21129_v57, %v16337_v62  ;;  %v5829_v57 = vsel %vm21069_vm2, %v5759_v18, 0.0  ;;  %v5831_v3 = vsel %vm21137_vm3, %v5760_v5, 0.0  ;;  %vm21144_vm3 = vmmov %vm21069_vm2 }
 0x4e4   : > { %v5824_v30 = vadd.f32 %v5823_v55, %v5822_v53  ;;  %v16614_v53 = vsel %vm21134_vm7, %v5666_v46, 0.0  ;;  %v21138_v46 = vsub.f32 %v16085_v22, %v16337_v62 }
 0x4e5   : > { %v16621_v9 = vsel %vm21136_vm0, %v5667_v49, 0.0  ;;  %v5833_v49 = vsel %vm21069_vm2, %v5761_v32, 0.0 }
 0x4e6   : > { %v5826_v2 = vadd.f32 %v5825_v8, %v5824_v30  ;;  %v5762_v8 = vmul.f32 %v16614_v53, %v16614_v53  ;;  %v5763_v18 = vmul.f32 %v16621_v9, %v16621_v9 }
 0x4e8   : > { %v5828_v55 = vadd.f32 %v5827_v60, %v5826_v2  ;;  %v16631_v2 = vsel %vm21140_vm11, %v21138_v46, 0.0  ;;  %v5835_v46 = vsel %vm21144_vm3, %v5762_v8, 0.0  ;;  %vm21151_vm3 = vmmov %vm21069_vm2 }
 0x4e9   : > { %v5764_v22 = vmul.f32 %v16631_v2, %v16631_v2 }
 0x4ea   : > { %v5830_v30 = vadd.f32 %v5829_v57, %v5828_v55  ;;  %v21141_v55 = vsub.f32 %v16100_v34, %v16337_v62  ;;  %v21142_v57 = vld [vmem:[#allocation95_spill] sm:$0xff] }
 0x4eb   : > { %vm21143_vm0 = vnez %v21142_v57 }
 0x4ec   : > { %v5832_v60 = vadd.f32 %v5831_v3, %v5830_v30  ;;  %v16641_v29 = vsel %vm21143_vm0, %v21141_v55, 0.0  ;;  %v21145_v30 = vsub.f32 %v16082_v6, %v16337_v62  ;;  %v21146_v3 = vld [vmem:[#allocation94_spill] sm:$0xff]  ;;  %v5837_v55 = vsel %vm21069_vm2, %v5763_v18, 0.0 }
 0x4ed   : > { %vm21147_vm11 = vnez %v21146_v3  ;;  %v5765_v34 = vmul.f32 %v16641_v29, %v16641_v29 }
 0x4ee   : > { %v5834_v5 = vadd.f32 %v5833_v49, %v5832_v60  ;;  %v16651_v43 = vsel %vm21147_vm11, %v21145_v30, 0.0  ;;  %v21148_v60 = vsub.f32 %v16097_v50, %v16337_v62  ;;  %v21149_v49 = vld [vmem:[#allocation96_spill] sm:$0xff]  ;;  %v5839_v30 = vsel %vm21151_vm3, %v5764_v22, 0.0  ;;  %v13560_v50 = vld [vmem:[%s19941_s3 + $0x10] sm:$0xff]   ;;  %v13561_v22 = vld [vmem:[%s19941_s3 + $0x18] sm:$0xff]  }
 0x4ef   : > { %vm21150_vm0 = vnez %v21149_v49  ;;  %v5766_v6 = vmul.f32 %v16651_v43, %v16651_v43  ;;  %12200 = vmatprep.subr.bf16.mxu1 %v13560_v50  ;;  %v21161_v49 = vld [vmem:[#allocation98_spill] sm:$0xff] }
 0x4f0   : > { %v5836_v32 = vadd.f32 %v5835_v46, %v5834_v5  ;;  %v16661_v57 = vsel %vm21150_vm0, %v21148_v60, 0.0  ;;  %v21152_v5 = vsub.f32 %v16139_v35, %v16337_v62  ;;  %v21153_v46 = vld [vmem:[#allocation97_spill] sm:$0xff]  ;;  %v21155_v35 = vsub.f32 %v16154_v23, %v16337_v62  ;;  %v21156_v60 = vld [vmem:[#allocation99_spill] sm:$0xff]  ;;  %12201 = vmatpush3.bf16.msra.mxu1 %v13560_v50 }
 0x4f1   : > { %vm21154_vm11 = vnez %v21153_v46  ;;  %vm21157_vm3 = vnez %v21156_v60  ;;  %12202 = vmatprep.subr.bf16.mxu1 %v13561_v22  ;;  %v21165_v50 = vsub.f32 %v16151_v14, %v16337_v62  ;;  %v21169_v60 = vsub.f32 %v16193_v0, %v16337_v62 }
 0x4f2   : > { %v5838_v8 = vadd.f32 %v5837_v55, %v5836_v32  ;;  %v16671_v3 = vsel %vm21154_vm11, %v21152_v5, 0.0  ;;  %v5767_v32 = vmul.f32 %v16661_v57, %v16661_v57  ;;  %v5841_v55 = vsel %vm21069_vm2, %v5765_v34, 0.0  ;;  %vm21159_vm11 = vmmov %vm21069_vm2 }
 0x4f3   : > { %v16687_v5 = vsel %vm21157_vm3, %v21155_v35, 0.0  ;;  %v5843_v46 = vsel %vm21159_vm11, %v5766_v6, 0.0  ;;  %v21160_v34 = vsub.f32 %v16136_v58, %v16337_v62  ;;  %vm21162_vm2 = vnez %v21161_v49  ;;  %vm21164_vm3 = vmmov %vm21159_vm11  ;;  %v21166_v58 = vld [vmem:[#allocation100_spill] sm:$0xff]  ;;  %v21170_v49 = vld [vmem:[#allocation101_spill] sm:$0xff] }
 0x4f4   : > { %v5840_v18 = vadd.f32 %v5839_v30, %v5838_v8  ;;  %21158 = vst [vmem:[#allocation69_spill] sm:$0xff] %v16687_v5  ;;  %v5768_v30 = vmul.f32 %v16671_v3, %v16671_v3  ;;  %v5845_v6 = vsel %vm21164_vm3, %v5767_v32, 0.0  ;;  %vm21167_vm11 = vnez %v21166_v58  ;;  %12203 = vmatpush3.bf16.msra.mxu1 %v13561_v22 }
 0x4f5   : > { %v16697_v44 = vsel %vm21162_vm2, %v21160_v34, 0.0  ;;  %v16712_v35 = vsel %vm21167_vm11, %v21165_v50, 0.0  ;;  %vm21168_vm2 = vmmov %vm21164_vm3  ;;  %vm21171_vm0 = vnez %v21170_v49 }
 0x4f6   : > { %v5842_v8 = vadd.f32 %v5841_v55, %v5840_v18  ;;  %v16702_v18 = vld [vmem:[%s19941_s3] sm:$0xff]   ;;  %v5769_v55 = vmul.f32 %v16687_v5, %v16687_v5  ;;  %v16722_v32 = vsel %vm21171_vm0, %v21169_v60, 0.0  ;;  %v5771_v14 = vmul.f32 %v16712_v35, %v16712_v35  ;;  %vm21172_vm3 = vmmov %vm21168_vm2 }
 0x4f7   : > { %21163 = vst [vmem:[#allocation74_spill] sm:$0xff] %v16702_v18  ;;  %12252 = vmatprep.subr.bf16.mxu1 %v16702_v18  ;;  %v5772_v60 = vmul.f32 %v16722_v32, %v16722_v32  ;;  %vm21176_vm0 = vmmov %vm21172_vm3 }
 0x4f8   : > { %v5844_v23 = vadd.f32 %v5843_v46, %v5842_v8  ;;  %v5770_v46 = vmul.f32 %v16697_v44, %v16697_v44  ;;  %v5847_v8 = vsel %vm21168_vm2, %v5768_v30, 0.0  ;;  %v21174_v30 = vld [vmem:[#allocation103_spill] sm:$0xff] }
 0x4f9   : > { %vm21175_vm2 = vnez %v21174_v30 }
 0x4fa   : > { %v5846_v34 = vadd.f32 %v5845_v6, %v5844_v23  ;;  %v5849_v23 = vsel %vm21172_vm3, %v5769_v55, 0.0  ;;  %v21173_v6 = vsub.f32 %v16208_v1, %v16337_v62  ;;  %v5851_v50 = vsel %vm21176_vm0, %v5770_v46, 0.0  ;;  %vm21180_vm3 = vmmov %vm21176_vm0 }
 0x4fc   : > { %v5848_v5 = vadd.f32 %v5847_v8, %v5846_v34  ;;  %v16733_v22 = vsel %vm21175_vm2, %v21173_v6, 0.0  ;;  %v21177_v34 = vsub.f32 %v16190_v52, %v16337_v62  ;;  %v21178_v8 = vld [vmem:[#allocation102_spill] sm:$0xff]  ;;  %v5853_v6 = vsel %vm21180_vm3, %v5771_v14, 0.0  ;;  %vm21188_vm3 = vmmov %vm21176_vm0 }
 0x4fd   : > { %vm21179_vm11 = vnez %v21178_v8  ;;  %v5773_v1 = vmul.f32 %v16733_v22, %v16733_v22 }
 0x4fe   : > { %v5850_v0 = vadd.f32 %v5849_v23, %v5848_v5  ;;  %v16743_v49 = vsel %vm21179_vm11, %v21177_v34, 0.0  ;;  %v21181_v5 = vsub.f32 %v16205_v36, %v16337_v62  ;;  %v21182_v23 = vld [vmem:[#allocation104_spill] sm:$0xff]  ;;  %v5855_v34 = vsel %vm21176_vm0, %v5772_v60, 0.0 }
 0x4ff   : > { %vm21183_vm2 = vnez %v21182_v23  ;;  %v5774_v52 = vmul.f32 %v16743_v49, %v16743_v49 }
 0x500   : > { %v5852_v55 = vadd.f32 %v5851_v50, %v5850_v0  ;;  %v16753_v30 = vsel %vm21183_vm2, %v21181_v5, 0.0  ;;  %v21184_v0 = vsub.f32 %v16247_v20, %v16337_v62  ;;  %v21185_v50 = vld [vmem:[#allocation105_spill] sm:$0xff]  ;;  %v5857_v5 = vsel %vm21188_vm3, %v5773_v1, 0.0  ;;  %vm21197_vm3 = vmmov %vm21176_vm0 }
 0x501   : > { %vm21186_vm11 = vnez %v21185_v50  ;;  %v5775_v36 = vmul.f32 %v16753_v30, %v16753_v30 }
 0x502   : > { %v5854_v46 = vadd.f32 %v5853_v6, %v5852_v55  ;;  %v16763_v8 = vsel %vm21186_vm11, %v21184_v0, 0.0  ;;  %v21189_v55 = vsub.f32 %v16262_v24, %v16337_v62  ;;  %v21190_v6 = vld [vmem:[#allocation107_spill] sm:$0xff]  ;;  %v5859_v0 = vsel %vm21176_vm0, %v5774_v52, 0.0 }
 0x503   : > { %21187 = vst [vmem:[#allocation79_spill] sm:$0xff] %v16763_v8  ;;  %vm21191_vm2 = vnez %v21190_v6  ;;  %v5776_v20 = vmul.f32 %v16763_v8, %v16763_v8 }
 0x504   : > { %v5856_v14 = vadd.f32 %v5855_v34, %v5854_v46  ;;  %v16773_v23 = vsel %vm21191_vm2, %v21189_v55, 0.0  ;;  %v21193_v46 = vsub.f32 %v16244_v21, %v16337_v62  ;;  %v21194_v34 = vld [vmem:[#allocation106_spill] sm:$0xff]  ;;  %v5861_v55 = vsel %vm21197_vm3, %v5775_v36, 0.0  ;;  %vm21202_vm3 = vmmov %vm21176_vm0 }
 0x505   : > { %21192 = vst [vmem:[#allocation73_spill] sm:$0xff] %v16773_v23  ;;  %vm21195_vm11 = vnez %v21194_v34  ;;  %v5777_v24 = vmul.f32 %v16773_v23, %v16773_v23  ;;  %v5863_v34 = vsel %vm21176_vm0, %v5776_v20, 0.0 }
 0x506   : > { %v5858_v60 = vadd.f32 %v5857_v5, %v5856_v14  ;;  %v16783_v50 = vsel %vm21195_vm11, %v21193_v46, 0.0  ;;  %v21198_v14 = vsub.f32 %v16259_v28, %v16337_v62  ;;  %v21203_v28 = vsub.f32 %v16316_v47, %v16337_v62 }
 0x507   : > { %21196 = vst [vmem:[#allocation78_spill] sm:$0xff] %v16783_v50  ;;  %v5778_v21 = vmul.f32 %v16783_v50, %v16783_v50  ;;  %v5865_v18 = vsel %vm21202_vm3, %v5777_v24, 0.0  ;;  %v21208_v47 = vsub.f32 %v16313_v54, %v16337_v62  ;;  %vm21209_vm3 = vmmov %vm21176_vm0 }
 0x508   : > { %v5860_v1 = vadd.f32 %v5859_v0, %v5858_v60  ;;  %v5731_v6 = vsel %vm16267_vm6, %v21198_v14, 0.0  ;;  %v21200_v60 = vsub.f32 %v16301_v42, %v16337_v62  ;;  %vm21205_vm6 = vmmov %vm21176_vm0  ;;  %v21206_v42 = vsub.f32 %v16298_v16, %v16337_v62 }
 0x509   : > { %v5779_v36 = vmul.f32 %v5731_v6, %v5731_v6  ;;  %v5867_v20 = vsel %vm21205_vm6, %v5778_v21, 0.0  ;;  %vm21210_vm6 = vmmov %vm21176_vm0 }
 0x50a   : > { %v5862_v52 = vadd.f32 %v5861_v55, %v5860_v1  ;;  %v5732_v46 = vsel %vm16288_vm9, %v21200_v60, 0.0  ;;  %v5733_v1 = vsel %vm16305_vm1, %v21203_v28, 0.0  ;;  %v5734_v60 = vsel %vm16293_vm13, %v21206_v42, 0.0  ;;  %vm21211_vm1 = vmmov %vm21176_vm0 }
 0x50b   : > { %v5780_v5 = vmul.f32 %v5732_v46, %v5732_v46  ;;  %v5869_v24 = vsel %vm21176_vm0, %v5779_v36, 0.0  ;;  %v5735_v28 = vsel %vm16321_vm10, %v21208_v47, 0.0  ;;  %vm21212_vm13 = vmmov %vm21176_vm0 }
 0x50c   : > { %v5864_v58 = vadd.f32 %v5863_v34, %v5862_v52  ;;  %v5781_v52 = vmul.f32 %v5733_v1, %v5733_v1  ;;  %v5783_v0 = vmul.f32 %v5735_v28, %v5735_v28 }
 0x50d   : > { %v5871_v21 = vsel %vm21209_vm3, %v5780_v5, 0.0  ;;  %vm21216_vm3 = vmmov %vm21176_vm0 }
 0x50e   : > { %v5866_v55 = vadd.f32 %v5865_v18, %v5864_v58  ;;  %v5782_v58 = vmul.f32 %v5734_v60, %v5734_v60  ;;  %v5873_v16 = vsel %vm21210_vm6, %v5781_v52, 0.0  ;;  %v5877_v36 = vsel %vm21212_vm13, %v5783_v0, 0.0  ;;  %vm21214_vm13 = vmmov %vm21176_vm0 }
 0x50f   : > { %vm21217_vm6 = vmmov %vm21176_vm0 }
 0x510   : > { %v5868_v34 = vadd.f32 %v5867_v20, %v5866_v55  ;;  %v5875_v55 = vsel %vm21211_vm1, %v5782_v58, 0.0  ;;  %vm21215_vm1 = vmmov %vm21176_vm0 }
 0x512   : > { %v5870_v18 = vadd.f32 %v5869_v24, %v5868_v34 }
 0x514   : > { %v5872_v14 = vadd.f32 %v5871_v21, %v5870_v18 }
 0x516   : > { %v5874_v50 = vadd.f32 %v5873_v16, %v5872_v14  ;;  %v21218_v16 = vld [vmem:[#allocation67_spill] sm:$0xff] }
 0x518   : > { %v5876_v20 = vadd.f32 %v5875_v55, %v5874_v50 }
 0x51a   : > { %v5878_v42 = vadd.f32 %v5877_v36, %v5876_v20  ;;  %v21219_v20 = vld [vmem:[#allocation69_spill] sm:$0xff] }
 0x51c   : > { %v5879_v23 = vrot.slane %v5878_v42, 4 }
 0x51e   : > { %v5880_v62 = vadd.f32 %v5879_v23, %v5878_v42 }
 0x520   : > { %v5881_v54 = vrot.slane %v5880_v62, 2 }
 0x522   : > { %v5882_v7 = vadd.f32 %v5881_v54, %v5880_v62 }
 0x524   : > { %v5883_v47 = vrot.slane %v5882_v7, 1 }
 0x526   : > { %v5884_v34 = vadd.f32 %v5883_v47, %v5882_v7 }
 0x528   : > { %v5885_v24 = vmul.f32 0.00390625, %v5884_v34 }
 0x52a   : > { %v5886_v8 = vadd.f32 1e-05, %v5885_v24  ;;  %v21221_v24 = vld [vmem:[#allocation47_spill] sm:$0xff] }
 0x52c   : > { %13578 = vrsqrt.f32 %v5886_v8 }
 0x536   : > { %v16823_v5 = vpop.eup %13578 }
 0x537   : > { %v16826_v52 = vmul.f32 %v16823_v5, %v5731_v6  ;;  %v5932_v14 = vmul.f32 %v16823_v5, %v5732_v46  ;;  %v16830_v50 = vmul.f32 %v16823_v5, %v5733_v1  ;;  %v16833_v0 = vmul.f32 %v16823_v5, %v5734_v60 }
 0x538   : > { %v16836_v23 = vmul.f32 %v16823_v5, %v5735_v28  ;;  %v16840_v7 = vmul.f32 %v16823_v5, %v16389_v13  ;;  %v16844_v8 = vmul.f32 %v16823_v5, %v16393_v25  ;;  %v16848_v6 = vmul.f32 %v16823_v5, %v16399_v51 }
 0x539   : > { %21213 = vst [vmem:[#allocation84_spill] sm:$0xff] %v16826_v52  ;;  %v20429_v46 = vmax.f32 %v16826_v52, 0.0  ;;  %v5980_v1 = vmax.f32 %v5932_v14, 0.0  ;;  %v5981_v60 = vmax.f32 %v16830_v50, 0.0  ;;  %v5982_v28 = vmax.f32 %v16833_v0, 0.0  ;;  %v21295_v52 = vld [vmem:[#allocation4_spill] sm:$0xff] }
 0x53a   : > { %v20430_v18 = vmax.f32 %v16836_v23, 0.0  ;;  %v16856_v13 = vmul.f32 %v16823_v5, %v16409_v56  ;;  %v16860_v25 = vmul.f32 %v16823_v5, %v16417_v45  ;;  %v16864_v51 = vmul.f32 %v16823_v5, %v16427_v38 }
 0x53b   : > { %6027 = vst.msk [vmem:[#allocation2 + $0x178] sm:$0xff] %vm21214_vm13, %v20429_v46  ;;  %v16874_v56 = vmul.f32 %v16823_v5, %v16436_v12  ;;  %v16878_v45 = vmul.f32 %v16823_v5, %v16445_v59  ;;  %v16882_v38 = vmul.f32 %v16823_v5, %v16454_v39  ;;  %v16886_v58 = vmul.f32 %v16823_v5, %v16463_v27 }
 0x53c   : > { %6028 = vst.msk [vmem:[#allocation2 + $0x180] sm:$0xff] %vm21215_vm1, %v5980_v1  ;;  %v16893_v12 = vmul.f32 %v16823_v5, %v16472_v41  ;;  %v16897_v59 = vmul.f32 %v16823_v5, %v16481_v15  ;;  %v16901_v39 = vmul.f32 %v16823_v5, %v16490_v40  ;;  %v16905_v27 = vmul.f32 %v16823_v5, %v16499_v17 }
 0x53d   : > { %6029 = vst.msk [vmem:[#allocation2 + $0x188] sm:$0xff] %vm21176_vm0, %v5981_v60  ;;  %v16909_v21 = vmul.f32 %v16823_v5, %v16508_v61  ;;  %v16913_v41 = vmul.f32 %v16823_v5, %v16517_v4  ;;  %v16917_v15 = vmul.f32 %v16823_v5, %v16526_v63  ;;  %v16921_v40 = vmul.f32 %v16823_v5, %v16535_v33 }
 0x53e   : > { %6030 = vst.msk [vmem:[#allocation2 + $0x190] sm:$0xff] %vm21216_vm3, %v5982_v28  ;;  %v16925_v17 = vmul.f32 %v16823_v5, %v16544_v10  ;;  %v16929_v61 = vmul.f32 %v16823_v5, %v16553_v19  ;;  %v16933_v4 = vmul.f32 %v16823_v5, %v16562_v48  ;;  %v16937_v63 = vmul.f32 %v16823_v5, %v16571_v11 }
 0x53f   : > { %6031 = vst.msk [vmem:[#allocation2 + $0x198] sm:$0xff] %vm21217_vm6, %v20430_v18  ;;  %v16941_v33 = vmul.f32 %v16823_v5, %v16580_v31  ;;  %v16945_v10 = vmul.f32 %v16823_v5, %v21218_v16  ;;  %v16949_v19 = vmul.f32 %v16823_v5, %v16598_v37  ;;  %v16953_v48 = vmul.f32 %v16823_v5, %v16607_v26  ;;  %v21229_v16 = vld [vmem:[#allocation75_spill] sm:$0xff]  ;;  %v21237_v18 = vld [vmem:[#allocation78_spill] sm:$0xff] }
 0x540   : > { %v16957_v11 = vmul.f32 %v16823_v5, %v16614_v53  ;;  %v16961_v31 = vmul.f32 %v16823_v5, %v16621_v9  ;;  %v16965_v55 = vmul.f32 %v16823_v5, %v16631_v2  ;;  %v16969_v37 = vmul.f32 %v16823_v5, %v16641_v29 }
 0x541   : > { %v16973_v26 = vmul.f32 %v16823_v5, %v16651_v43  ;;  %v16977_v53 = vmul.f32 %v16823_v5, %v16661_v57  ;;  %v16981_v9 = vmul.f32 %v16823_v5, %v16671_v3  ;;  %v16985_v2 = vmul.f32 %v16823_v5, %v21219_v20 }
 0x542   : > { %v16989_v62 = vmul.f32 %v16823_v5, %v16697_v44  ;;  %v16993_v43 = vmul.f32 %v16823_v5, %v16712_v35  ;;  %v16997_v57 = vmul.f32 %v16823_v5, %v16722_v32  ;;  %v17001_v3 = vmul.f32 %v16823_v5, %v16733_v22  ;;  %v21225_v32 = vld [vmem:[#allocation79_spill] sm:$0xff]  ;;  %v21227_v22 = vld [vmem:[#allocation50_spill] sm:$0xff] }
 0x543   : > { %v6124_v29 = vld [vmem:[#allocation2 + $0x17e] sm:$0xff]  ;;  %vm21222_vm13 = vcmp.eq.s32.totalorder %v21221_v24, 17  ;;  %v17007_v44 = vmul.f32 %v16823_v5, %v16743_v49  ;;  %v17011_v35 = vmul.f32 %v16823_v5, %v16753_v30  ;;  %v17015_v50 = vmul.f32 %v16823_v5, %v21225_v32 }
 0x544   : > { %v6076_v36 = vld [vmem:[#allocation2 + $0x182] sm:$0xff]  ;;  %21220 = vst [vmem:[#allocation86_spill] sm:$0xff] %v17001_v3  ;;  %v6172_v14 = vsel %vm21222_vm13, %v6124_v29, %v5980_v1  ;;  %vm21228_vm1 = vcmp.eq.s32.totalorder %v21227_v22, 17  ;;  %vm21230_vm0 = vcmp.eq.s32.totalorder %v21229_v16, 17  ;;  %vm21231_vm3 = vcmp.eq.s32.totalorder %v21221_v24, 0  ;;  %v21232_v29 = vld [vmem:[#allocation73_spill] sm:$0xff] }
 0x545   : > { %v6077_v42 = vld [vmem:[#allocation2 + $0x18a] sm:$0xff]  ;;  %21223 = vst [vmem:[#allocation83_spill] sm:$0xff] %v17007_v44  ;;  %21224 = vst [vmem:[#allocation52_spill] sm:$0xff] %v17011_v35  ;;  %v6220_v1 = vsel %vm21231_vm3, %v6076_v36, %v6172_v14  ;;  %v17025_v49 = vmul.f32 %v16823_v5, %v21232_v29  ;;  %v17027_v46 = vld [vmem:[#allocation2 + $0x17a] sm:$0xff]  ;;  %vm21235_vm6 = vcmp.eq.s32.totalorder %v21227_v22, 0  ;;  %vm21236_vm13 = vcmp.eq.s32.totalorder %v21229_v16, 0 }
 0x546   : > { %v6078_v54 = vld [vmem:[#allocation2 + $0x192] sm:$0xff]  ;;  %v6125_v47 = vld [vmem:[#allocation2 + $0x186] sm:$0xff]  ;;  %21226 = vst [vmem:[#allocation91_spill] sm:$0xff] %v17015_v50  ;;  %21234 = vst [vmem:[#allocation90_spill] sm:$0xff] %v17027_v46  ;;  %v20455_v36 = vmax.f32 %v16840_v7, 0.0  ;;  %v20436_v24 = vmax.f32 %v16878_v45, 0.0 }
 0x547   : > { %v6126_v34 = vld [vmem:[#allocation2 + $0x18e] sm:$0xff]  ;;  %v6173_v0 = vsel %vm21228_vm1, %v6125_v47, %v5981_v60  ;;  %21233 = vst [vmem:[#allocation48_spill] sm:$0xff] %v17025_v49  ;;  %v17035_v60 = vmul.f32 %v16823_v5, %v21237_v18  ;;  %vm21239_vm1 = vcmask 261120   ;;  %v20447_v47 = vmax.f32 %v16844_v8, 0.0 }
 0x548   : > { %v6174_v20 = vsel %vm21230_vm0, %v6126_v34, %v5982_v28  ;;  %v6221_v30 = vsel %vm21235_vm6, %v6077_v42, %v6173_v0  ;;  %v17037_v28 = vld [vmem:[#allocation2 + $0x196] sm:$0xff]  ;;  %6268 = vst.msk [vmem:[#allocation2 + $0x180] sm:$0xff] %vm21239_vm1, %v6220_v1  ;;  %vm21240_vm0 = vmmov %vm21239_vm1  ;;  %v20433_v34 = vmax.f32 %v16848_v6, 0.0  ;;  %v20432_v42 = vmax.f32 %v16856_v13, 0.0 }
 0x549   : > { %v6222_v32 = vsel %vm21236_vm13, %v6078_v54, %v6174_v20  ;;  %21238 = vst [vmem:[#allocation92_spill] sm:$0xff] %v17035_v60  ;;  %6269 = vst.msk [vmem:[#allocation2 + $0x188] sm:$0xff] %vm21240_vm0, %v6221_v30  ;;  %v20431_v54 = vmax.f32 %v16860_v25, 0.0  ;;  %v20434_v5 = vmax.f32 %v16864_v51, 0.0  ;;  %v20437_v18 = vmax.f32 %v16874_v56, 0.0 }
 0x54a   : > { %vm21241_vm3 = vmmov %vm21240_vm0  ;;  %v20435_v14 = vmax.f32 %v16882_v38, 0.0  ;;  %v20438_v22 = vmax.f32 %v16886_v58, 0.0  ;;  %v20441_v0 = vmax.f32 %v16893_v12, 0.0  ;;  %v20440_v16 = vmax.f32 %v16897_v59, 0.0  ;;  %5987 = vst.msk [vmem:[#allocation2 + $0x38] sm:$0xff] %vm21240_vm0, %v20432_v42 }
 0x54b   : > { %6270 = vst.msk [vmem:[#allocation2 + $0x190] sm:$0xff] %vm21241_vm3, %v6222_v32  ;;  %vm21242_vm6 = vmmov %vm21240_vm0  ;;  %v20439_v20 = vmax.f32 %v16901_v39, 0.0  ;;  %v20442_v1 = vmax.f32 %v16905_v27, 0.0  ;;  %v20445_v29 = vmax.f32 %v16909_v21, 0.0  ;;  %v20444_v30 = vmax.f32 %v16913_v41, 0.0 }
 0x54c   : > { %5984 = vst.msk [vmem:[#allocation2 + $0x20] sm:$0xff] %vm21242_vm6, %v20455_v36  ;;  %vm21243_vm13 = vmmov %vm21240_vm0  ;;  %v20443_v32 = vmax.f32 %v16917_v15, 0.0  ;;  %v20451_v42 = vmax.f32 %v16925_v17, 0.0  ;;  %v20464_v36 = vmax.f32 %v17011_v35, 0.0  ;;  %v21294_v46 = vmax.f32 %v16856_v13, 0.0 }
 0x54d   : > { %5985 = vst.msk [vmem:[#allocation2 + $0x28] sm:$0xff] %vm21243_vm13, %v20447_v47  ;;  %vm21244_vm1 = vmmov %vm21240_vm0  ;;  %v20459_v47 = vmax.f32 %v16981_v9, 0.0 }
 0x54e   : > { %5986 = vst.msk [vmem:[#allocation2 + $0x30] sm:$0xff] %vm21244_vm1, %v20433_v34  ;;  %vm21245_vm3 = vmmov %vm21240_vm0  ;;  %v20449_v34 = vmax.f32 %v16929_v61, 0.0 }
 0x54f   : > { %5988 = vst.msk [vmem:[#allocation2 + $0x40] sm:$0xff] %vm21245_vm3, %v20431_v54  ;;  %vm21246_vm6 = vmmov %vm21240_vm0  ;;  %v20446_v54 = vmax.f32 %v16921_v40, 0.0 }
 0x550   : > { %5989 = vst.msk [vmem:[#allocation2 + $0x48] sm:$0xff] %vm21246_vm6, %v20434_v5  ;;  %vm21247_vm13 = vmmov %vm21240_vm0  ;;  %v20448_v5 = vmax.f32 %v16933_v4, 0.0 }
 0x551   : > { %5990 = vst.msk [vmem:[#allocation2 + $0x50] sm:$0xff] %vm21247_vm13, %v20437_v18  ;;  %vm21248_vm1 = vmmov %vm21240_vm0  ;;  %v20454_v18 = vmax.f32 %v16945_v10, 0.0 }
 0x552   : > { %5991 = vst.msk [vmem:[#allocation2 + $0x58] sm:$0xff] %vm21248_vm1, %v20436_v24  ;;  %vm21249_vm3 = vmmov %vm21240_vm0  ;;  %v20452_v24 = vmax.f32 %v16941_v33, 0.0 }
 0x553   : > { %5992 = vst.msk [vmem:[#allocation2 + $0x60] sm:$0xff] %vm21240_vm0, %v20435_v14  ;;  %vm21250_vm6 = vmmov %vm21240_vm0  ;;  %v20450_v14 = vmax.f32 %v16937_v63, 0.0 }
 0x554   : > { %5993 = vst.msk [vmem:[#allocation2 + $0x68] sm:$0xff] %vm21249_vm3, %v20438_v22  ;;  %vm21251_vm13 = vmmov %vm21240_vm0  ;;  %v20453_v22 = vmax.f32 %v16949_v19, 0.0 }
 0x555   : > { %5994 = vst.msk [vmem:[#allocation2 + $0x70] sm:$0xff] %vm21250_vm6, %v20441_v0  ;;  %vm21252_vm1 = vmmov %vm21240_vm0  ;;  %v20458_v0 = vmax.f32 %v16961_v31, 0.0 }
 0x556   : > { %5995 = vst.msk [vmem:[#allocation2 + $0x78] sm:$0xff] %vm21251_vm13, %v20440_v16  ;;  %vm21253_vm3 = vmmov %vm21240_vm0  ;;  %v20475_v16 = vmax.f32 %v16957_v11, 0.0 }
 0x557   : > { %5996 = vst.msk [vmem:[#allocation2 + $0x80] sm:$0xff] %vm21252_vm1, %v20439_v20  ;;  %vm21254_vm6 = vmmov %vm21240_vm0  ;;  %v20456_v20 = vmax.f32 %v16953_v48, 0.0 }
 0x558   : > { %5997 = vst.msk [vmem:[#allocation2 + $0x88] sm:$0xff] %vm21240_vm0, %v20442_v1  ;;  %vm21255_vm13 = vmmov %vm21240_vm0  ;;  %v20457_v1 = vmax.f32 %v16965_v55, 0.0 }
 0x559   : > { %5998 = vst.msk [vmem:[#allocation2 + $0x90] sm:$0xff] %vm21253_vm3, %v20445_v29  ;;  %vm21256_vm1 = vmmov %vm21240_vm0  ;;  %v20461_v29 = vmax.f32 %v16973_v26, 0.0 }
 0x55a   : > { %5999 = vst.msk [vmem:[#allocation2 + $0x98] sm:$0xff] %vm21254_vm6, %v20444_v30  ;;  %vm21257_vm3 = vmmov %vm21240_vm0  ;;  %v20474_v30 = vmax.f32 %v16969_v37, 0.0 }
 0x55b   : > { %6000 = vst.msk [vmem:[#allocation2 + $0xa0] sm:$0xff] %vm21255_vm13, %v20443_v32  ;;  %vm21258_vm6 = vmmov %vm21240_vm0  ;;  %v17134_v32 = vld [vmem:[#allocation2 + $0x180] sm:$0xff] }
 0x55c   : > { %6001 = vst.msk [vmem:[#allocation2 + $0xa8] sm:$0xff] %vm21256_vm1, %v20446_v54  ;;  %21259 = vst [vmem:[#allocation67_spill] sm:$0xff] %v17134_v32  ;;  %v20460_v54 = vmax.f32 %v16977_v53, 0.0  ;;  %v6089_v35 = vld [vmem:[#allocation2 + $0x66] sm:$0xff] }
 0x55d   : > { %6002 = vst.msk [vmem:[#allocation2 + $0xb0] sm:$0xff] %vm21240_vm0, %v20451_v42  ;;  %vm21260_vm13 = vmmov %vm21240_vm0  ;;  %v20470_v42 = vmax.f32 %v16993_v43, 0.0 }
 0x55e   : > { %6003 = vst.msk [vmem:[#allocation2 + $0xb8] sm:$0xff] %vm21257_vm3, %v20449_v34  ;;  %vm21261_vm1 = vmmov %vm21240_vm0  ;;  %v20473_v34 = vmax.f32 %v16985_v2, 0.0 }
 0x55f   : > { %6004 = vst.msk [vmem:[#allocation2 + $0xc0] sm:$0xff] %vm21258_vm6, %v20448_v5  ;;  %vm21262_vm3 = vmmov %vm21240_vm0  ;;  %v6079_v5 = vld [vmem:[#allocation2 + $0x19a] sm:$0xff] }
 0x560   : > { %6005 = vst.msk [vmem:[#allocation2 + $0xc8] sm:$0xff] %vm21260_vm13, %v20450_v14  ;;  %vm21263_vm6 = vmmov %vm21240_vm0  ;;  %v20471_v14 = vmax.f32 %v16989_v62, 0.0 }
 0x561   : > { %6006 = vst.msk [vmem:[#allocation2 + $0xd0] sm:$0xff] %vm21261_vm1, %v20452_v24  ;;  %v20469_v24 = vmax.f32 %v16997_v57, 0.0  ;;  %vm21264_vm13 = vmmov %vm21240_vm0 }
 0x562   : > { %6007 = vst.msk [vmem:[#allocation2 + $0xd8] sm:$0xff] %vm21240_vm0, %v20454_v18  ;;  %vm21265_vm1 = vmmov %vm21240_vm0  ;;  %v20465_v18 = vmax.f32 %v17007_v44, 0.0  ;;  %v21301_v44 = vmax.f32 %v16864_v51, 0.0  ;;  %v6091_v51 = vld [vmem:[#allocation2 + $0x76] sm:$0xff] }
 0x563   : > { %6008 = vst.msk [vmem:[#allocation2 + $0xe0] sm:$0xff] %vm21262_vm3, %v20453_v22  ;;  %vm21266_vm3 = vmmov %vm21240_vm0  ;;  %v20467_v22 = vmax.f32 %v17001_v3, 0.0  ;;  %v6093_v3 = vld [vmem:[#allocation2 + $0x86] sm:$0xff] }
 0x564   : > { %6283 = vst.msk [vmem:[#allocation2 + $0x1b0] sm:$0xff] %vm21263_vm6, %v17134_v32  ;;  %vm21267_vm6 = vmmov %vm21240_vm0 }
 0x565   : > { %6009 = vst.msk [vmem:[#allocation2 + $0xe8] sm:$0xff] %vm21264_vm13, %v20456_v20  ;;  %v20466_v20 = vmax.f32 %v17015_v50, 0.0  ;;  %vm21268_vm13 = vmmov %vm21240_vm0  ;;  %v6088_v50 = vld [vmem:[#allocation2 + $0x5e] sm:$0xff] }
 0x566   : > { %6010 = vst.msk [vmem:[#allocation2 + $0xf0] sm:$0xff] %vm21265_vm1, %v20475_v16  ;;  %vm21269_vm1 = vmmov %vm21240_vm0  ;;  %v21292_v16 = vld [vmem:[#allocation8_spill] sm:$0xff] }
 0x567   : > { %6011 = vst.msk [vmem:[#allocation2 + $0xf8] sm:$0xff] %vm21240_vm0, %v20458_v0  ;;  %6016 = vst.msk [vmem:[#allocation2 + $0x120] sm:$0xff] %vm21240_vm0, %v20459_v47  ;;  %v20472_v0 = vmax.f32 %v17035_v60, 0.0  ;;  %v21274_v47 = vmax.f32 %v16836_v23, 0.0 }
 0x568   : > { %6012 = vst.msk [vmem:[#allocation2 + $0x100] sm:$0xff] %vm21266_vm3, %v20457_v1  ;;  %v20468_v1 = vmax.f32 %v17025_v49, 0.0  ;;  %vm21270_vm3 = vmmov %vm21240_vm0  ;;  %v21298_v49 = vld [vmem:[#allocation5_spill] sm:$0xff] }
 0x569   : > { %6013 = vst.msk [vmem:[#allocation2 + $0x108] sm:$0xff] %vm21267_vm6, %v20474_v30  ;;  %vm21271_vm6 = vmmov %vm21240_vm0  ;;  %v21289_v30 = vld [vmem:[#allocation7_spill] sm:$0xff] }
 0x56a   : > { %6014 = vst.msk [vmem:[#allocation2 + $0x110] sm:$0xff] %vm21268_vm13, %v20461_v29  ;;  %vm21272_vm13 = vmmov %vm21240_vm0 }
 0x56b   : > { %6015 = vst.msk [vmem:[#allocation2 + $0x118] sm:$0xff] %vm21269_vm1, %v20460_v54  ;;  %vm21273_vm1 = vmmov %vm21240_vm0  ;;  %v21275_v54 = vld [vmem:[#allocation76_spill] sm:$0xff] }
 0x56c   : > { %6017 = vst.msk [vmem:[#allocation2 + $0x128] sm:$0xff] %vm21270_vm3, %v20473_v34  ;;  %vm21276_vm0 = vcmp.eq.s32.totalorder %v21275_v54, 17  ;;  %vm21277_vm3 = vmmov %vm21273_vm1  ;;  %vm21280_vm10 = vcmp.eq.s32.totalorder %v21275_v54, 0  ;;  %v6084_v34 = vld [vmem:[#allocation2 + $0x3e] sm:$0xff] }
 0x56d   : > { %6018 = vst.msk [vmem:[#allocation2 + $0x130] sm:$0xff] %vm21271_vm6, %v20471_v14  ;;  %v6175_v29 = vsel %vm21276_vm0, %v17037_v28, %v21274_v47  ;;  %vm21278_vm6 = vmmov %vm21273_vm1  ;;  %v6080_v28 = vld [vmem:[#allocation2 + $0x1e] sm:$0xff]  ;;  %v6082_v14 = vld [vmem:[#allocation2 + $0x2e] sm:$0xff] }
 0x56e   : > { %6019 = vst.msk [vmem:[#allocation2 + $0x138] sm:$0xff] %vm21272_vm13, %v20470_v42  ;;  %vm21279_vm13 = vmmov %vm21273_vm1  ;;  %v6223_v23 = vsel %vm21280_vm10, %v6079_v5, %v6175_v29  ;;  %v6032_v47 = vld [vmem:[#allocation2 + $0x22] sm:$0xff]  ;;  %v6033_v5 = vld [vmem:[#allocation2 + $0x2a] sm:$0xff]  ;;  %vm21290_vm10 = vcmp.eq.s32.totalorder %v21289_v30, 17 }
 0x56f   : > { %6020 = vst.msk [vmem:[#allocation2 + $0x140] sm:$0xff] %vm21273_vm1, %v20469_v24  ;;  %6024 = vst.msk [vmem:[#allocation2 + $0x160] sm:$0xff] %vm21273_vm1, %v20466_v20  ;;  %v6034_v29 = vld [vmem:[#allocation2 + $0x32] sm:$0xff]  ;;  %v6081_v24 = vld [vmem:[#allocation2 + $0x26] sm:$0xff] }
 0x570   : > { %6021 = vst.msk [vmem:[#allocation2 + $0x148] sm:$0xff] %vm21277_vm3, %v20467_v22  ;;  %vm21281_vm0 = vmmov %vm21273_vm1  ;;  %v6035_v22 = vld [vmem:[#allocation2 + $0x3a] sm:$0xff]  ;;  %v6037_v42 = vld [vmem:[#allocation2 + $0x4a] sm:$0xff] }
 0x571   : > { %6022 = vst.msk [vmem:[#allocation2 + $0x150] sm:$0xff] %vm21278_vm6, %v20465_v18  ;;  %vm21282_vm3 = vmmov %vm21281_vm0  ;;  %v21285_v18 = vld [vmem:[#allocation3_spill] sm:$0xff] }
 0x572   : > { %6023 = vst.msk [vmem:[#allocation2 + $0x158] sm:$0xff] %vm21279_vm13, %v20464_v36  ;;  %vm21283_vm6 = vmmov %vm21281_vm0  ;;  %v21284_v36 = vmax.f32 %v16840_v7, 0.0  ;;  %vm21286_vm13 = vcmp.eq.s32.totalorder %v21285_v18, 17  ;;  %vm21287_vm1 = vcmp.eq.s32.totalorder %v21285_v18, 0  ;;  %v6086_v18 = vld [vmem:[#allocation2 + $0x4e] sm:$0xff] }
 0x573   : > { %6025 = vst.msk [vmem:[#allocation2 + $0x168] sm:$0xff] %vm21281_vm0, %v20468_v1  ;;  %v6036_v1 = vld [vmem:[#allocation2 + $0x42] sm:$0xff] }
 0x574   : > { %6026 = vst.msk [vmem:[#allocation2 + $0x170] sm:$0xff] %vm21282_vm3, %v20472_v0  ;;  %v6128_v20 = vsel %vm21286_vm13, %v6080_v28, %v21284_v36  ;;  %v6083_v0 = vld [vmem:[#allocation2 + $0x36] sm:$0xff]  ;;  %v6085_v28 = vld [vmem:[#allocation2 + $0x46] sm:$0xff]  ;;  %vm21293_vm3 = vcmp.eq.s32.totalorder %v21292_v16, 17  ;;  %vm21299_vm13 = vcmp.eq.s32.totalorder %v21298_v49, 17 }
 0x575   : > { %6271 = vst.msk [vmem:[#allocation2 + $0x198] sm:$0xff] %vm21283_vm6, %v6223_v23  ;;  %v6176_v54 = vsel %vm21287_vm1, %v6032_v47, %v6128_v20  ;;  %v21288_v23 = vmax.f32 %v16844_v8, 0.0  ;;  %v6038_v36 = vld [vmem:[#allocation2 + $0x52] sm:$0xff]  ;;  %v21291_v47 = vmax.f32 %v16848_v6, 0.0  ;;  %vm21296_vm6 = vcmp.eq.s32.totalorder %v21295_v52, 17 }
 0x576   : > { %6224 = vst.msk [vmem:[#allocation2 + $0x20] sm:$0xff] %vm21281_vm0, %v6176_v54  ;;  %v6087_v20 = vld [vmem:[#allocation2 + $0x56] sm:$0xff]  ;;  %v6131_v60 = vsel %vm21296_vm6, %v6083_v0, %v21294_v46  ;;  %v21297_v8 = vmax.f32 %v16860_v25, 0.0  ;;  %vm21300_vm1 = vcmp.eq.s32.totalorder %v21289_v30, 0  ;;  %v6090_v6 = vld [vmem:[#allocation2 + $0x6e] sm:$0xff]  ;;  %v21307_v0 = vmax.f32 %v16878_v45, 0.0 }
 0x577   : > { %v6129_v7 = vsel %vm21290_vm10, %v6081_v24, %v21288_v23  ;;  %v6130_v32 = vsel %vm21293_vm3, %v6082_v14, %v21291_v47  ;;  %v6039_v23 = vld [vmem:[#allocation2 + $0x5a] sm:$0xff]  ;;  %v21304_v47 = vmax.f32 %v16874_v56, 0.0  ;;  %v21305_v46 = vld [vmem:[#allocation9_spill] sm:$0xff]  ;;  %vm21310_vm6 = vcmp.eq.s32.totalorder %v21292_v16, 0  ;;  %v21316_v45 = vld [vmem:[#allocation12_spill] sm:$0xff] }
 0x578   : > { %v6132_v24 = vsel %vm21299_vm13, %v6084_v34, %v21297_v8  ;;  %v6177_v54 = vsel %vm21300_vm1, %v6033_v5, %v6129_v7  ;;  %v21302_v14 = vld [vmem:[#allocation6_spill] sm:$0xff]  ;;  %vm21306_vm0 = vcmp.eq.s32.totalorder %v21305_v46, 17  ;;  %v6178_v5 = vsel %vm21310_vm6, %v6034_v29, %v6130_v32  ;;  %v6040_v7 = vld [vmem:[#allocation2 + $0x62] sm:$0xff]  ;;  %v21319_v16 = vld [vmem:[#allocation13_spill] sm:$0xff] }
 0x579   : > { %vm21303_vm10 = vcmp.eq.s32.totalorder %v21302_v14, 17  ;;  %v6134_v25 = vsel %vm21306_vm0, %v6086_v18, %v21304_v47  ;;  %v21308_v34 = vld [vmem:[#allocation10_spill] sm:$0xff]  ;;  %vm21311_vm13 = vcmask 261120   ;;  %v21313_v56 = vld [vmem:[#allocation11_spill] sm:$0xff]  ;;  %v21315_v18 = vmax.f32 %v16886_v58, 0.0 }
 0x57a   : > { %v6133_v13 = vsel %vm21303_vm10, %v6085_v28, %v21301_v44  ;;  %vm21309_vm3 = vcmp.eq.s32.totalorder %v21308_v34, 17  ;;  %6225 = vst.msk [vmem:[#allocation2 + $0x28] sm:$0xff] %vm21311_vm13, %v6177_v54  ;;  %v6092_v8 = vld [vmem:[#allocation2 + $0x7e] sm:$0xff]  ;;  %v21312_v44 = vmax.f32 %v16882_v38, 0.0  ;;  %vm21314_vm1 = vcmp.eq.s32.totalorder %v21313_v56, 17  ;;  %vm21322_vm6 = vmmov %vm21311_vm13  ;;  %v6041_v38 = vld [vmem:[#allocation2 + $0x6a] sm:$0xff] }
 0x57b   : > { %v6135_v30 = vsel %vm21309_vm3, %v6087_v20, %v21307_v0  ;;  %vm21317_vm10 = vcmp.eq.s32.totalorder %v21316_v45, 17  ;;  %v21318_v20 = vmax.f32 %v16893_v12, 0.0  ;;  %vm21320_vm0 = vcmp.eq.s32.totalorder %v21319_v16, 17  ;;  %6226 = vst.msk [vmem:[#allocation2 + $0x30] sm:$0xff] %vm21322_vm6, %v6178_v5  ;;  %v6094_v54 = vld [vmem:[#allocation2 + $0x8e] sm:$0xff]  ;;  %v6095_v0 = vld [vmem:[#allocation2 + $0x96] sm:$0xff] }
 0x57c   : > { %v6136_v28 = vsel %vm21314_vm1, %v6088_v50, %v21312_v44  ;;  %v6137_v47 = vsel %vm21317_vm10, %v6089_v35, %v21315_v18  ;;  %vm21321_vm3 = vcmp.eq.s32.totalorder %v21295_v52, 0  ;;  %v6096_v50 = vld [vmem:[#allocation2 + $0x9e] sm:$0xff]  ;;  %v21323_v58 = vmax.f32 %v16897_v59, 0.0  ;;  %v6042_v59 = vld [vmem:[#allocation2 + $0x72] sm:$0xff] }
 0x57d   : > { %v17278_v32 = vsel %vm21320_vm0, %v6090_v6, %v21318_v20  ;;  %v6179_v29 = vsel %vm21321_vm3, %v6035_v22, %v6131_v60  ;;  %v21324_v44 = vld [vmem:[#allocation14_spill] sm:$0xff]  ;;  %v21326_v12 = vmax.f32 %v16901_v39, 0.0  ;;  %v21327_v18 = vld [vmem:[#allocation15_spill] sm:$0xff]  ;;  %v21329_v52 = vmax.f32 %v16905_v27, 0.0  ;;  %v21330_v60 = vld [vmem:[#allocation16_spill] sm:$0xff] }
 0x57e   : > { %vm21325_vm13 = vcmp.eq.s32.totalorder %v21324_v44, 17  ;;  %vm21328_vm1 = vcmp.eq.s32.totalorder %v21327_v18, 17  ;;  %vm21331_vm10 = vcmp.eq.s32.totalorder %v21330_v60, 17  ;;  %vm21332_vm0 = vcmp.eq.s32.totalorder %v21298_v49, 0  ;;  %vm21333_vm3 = vmmov %vm21322_vm6  ;;  %v6098_v20 = vld [vmem:[#allocation2 + $0xae] sm:$0xff] }
 0x57f   : > { %v17287_v35 = vsel %vm21325_vm13, %v6091_v51, %v21323_v58  ;;  %v17293_v6 = vsel %vm21328_vm1, %v6092_v8, %v21326_v12  ;;  %v17299_v22 = vsel %vm21331_vm10, %v6093_v3, %v21329_v52  ;;  %v6180_v5 = vsel %vm21332_vm0, %v6036_v1, %v6132_v24  ;;  %6227 = vst.msk [vmem:[#allocation2 + $0x38] sm:$0xff] %vm21333_vm3, %v6179_v29  ;;  %v6097_v51 = vld [vmem:[#allocation2 + $0xa6] sm:$0xff]  ;;  %v6099_v58 = vld [vmem:[#allocation2 + $0xb6] sm:$0xff]  ;;  %vm21344_vm0 = vmmov %vm21333_vm3 }
 0x580   : > { %v21334_v39 = vmax.f32 %v16909_v21, 0.0  ;;  %v21335_v18 = vld [vmem:[#allocation17_spill] sm:$0xff]  ;;  %v21337_v27 = vmax.f32 %v16913_v41, 0.0  ;;  %v21338_v12 = vld [vmem:[#allocation18_spill] sm:$0xff]  ;;  %v21340_v49 = vmax.f32 %v16917_v15, 0.0  ;;  %v21341_v1 = vld [vmem:[#allocation19_spill] sm:$0xff] }
 0x581   : > { %vm21336_vm6 = vcmp.eq.s32.totalorder %v21335_v18, 17  ;;  %vm21339_vm13 = vcmp.eq.s32.totalorder %v21338_v12, 17  ;;  %vm21342_vm1 = vcmp.eq.s32.totalorder %v21341_v1, 17  ;;  %vm21343_vm10 = vcmp.eq.s32.totalorder %v21302_v14, 0  ;;  %6228 = vst.msk [vmem:[#allocation2 + $0x40] sm:$0xff] %vm21344_vm0, %v6180_v5  ;;  %v6043_v21 = vld [vmem:[#allocation2 + $0x7a] sm:$0xff] }
 0x582   : > { %v17308_v8 = vsel %vm21336_vm6, %v6094_v54, %v21334_v39  ;;  %v17314_v3 = vsel %vm21339_vm13, %v6095_v0, %v21337_v27  ;;  %v17320_v24 = vsel %vm21342_vm1, %v6096_v50, %v21340_v49  ;;  %v6181_v29 = vsel %vm21343_vm10, %v6037_v42, %v6133_v13  ;;  %v6100_v54 = vld [vmem:[#allocation2 + $0xbe] sm:$0xff]  ;;  %v6101_v52 = vld [vmem:[#allocation2 + $0xc6] sm:$0xff]  ;;  %v6102_v39 = vld [vmem:[#allocation2 + $0xce] sm:$0xff] }
 0x583   : > { %v21345_v41 = vmax.f32 %v16921_v40, 0.0  ;;  %v21346_v12 = vld [vmem:[#allocation20_spill] sm:$0xff]  ;;  %v21348_v15 = vmax.f32 %v16925_v17, 0.0  ;;  %v21349_v27 = vld [vmem:[#allocation21_spill] sm:$0xff]  ;;  %v21351_v42 = vmax.f32 %v16929_v61, 0.0  ;;  %v21352_v14 = vld [vmem:[#allocation22_spill] sm:$0xff] }
 0x584   : > { %vm21347_vm3 = vcmp.eq.s32.totalorder %v21346_v12, 17  ;;  %vm21350_vm6 = vcmp.eq.s32.totalorder %v21349_v27, 17  ;;  %vm21353_vm13 = vcmp.eq.s32.totalorder %v21352_v14, 17  ;;  %vm21354_vm1 = vcmp.eq.s32.totalorder %v21305_v46, 0  ;;  %vm21355_vm10 = vmmov %vm21344_vm0  ;;  %v6044_v40 = vld [vmem:[#allocation2 + $0x82] sm:$0xff]  ;;  %v21363_v46 = vld [vmem:[#allocation25_spill] sm:$0xff] }
 0x585   : > { %v17329_v0 = vsel %vm21347_vm3, %v6097_v51, %v21345_v41  ;;  %v17335_v50 = vsel %vm21350_vm6, %v6098_v20, %v21348_v15  ;;  %v17341_v13 = vsel %vm21353_vm13, %v6099_v58, %v21351_v42  ;;  %v6182_v5 = vsel %vm21354_vm1, %v6038_v36, %v6134_v25  ;;  %6229 = vst.msk [vmem:[#allocation2 + $0x48] sm:$0xff] %vm21355_vm10, %v6181_v29  ;;  %v6103_v51 = vld [vmem:[#allocation2 + $0xd6] sm:$0xff]  ;;  %v6104_v49 = vld [vmem:[#allocation2 + $0xde] sm:$0xff]  ;;  %v6105_v41 = vld [vmem:[#allocation2 + $0xe6] sm:$0xff] }
 0x586   : > { %v21356_v17 = vmax.f32 %v16933_v4, 0.0  ;;  %v21357_v27 = vld [vmem:[#allocation23_spill] sm:$0xff]  ;;  %v21359_v61 = vmax.f32 %v16937_v63, 0.0  ;;  %v21360_v15 = vld [vmem:[#allocation24_spill] sm:$0xff]  ;;  %v21362_v36 = vmax.f32 %v16941_v33, 0.0  ;;  %vm21364_vm6 = vcmp.eq.s32.totalorder %v21363_v46, 17  ;;  %vm21366_vm1 = vmmov %vm21355_vm10 }
 0x587   : > { %vm21358_vm0 = vcmp.eq.s32.totalorder %v21357_v27, 17  ;;  %vm21361_vm3 = vcmp.eq.s32.totalorder %v21360_v15, 17  ;;  %vm21365_vm13 = vcmp.eq.s32.totalorder %v21308_v34, 0  ;;  %6230 = vst.msk [vmem:[#allocation2 + $0x50] sm:$0xff] %vm21366_vm1, %v6182_v5  ;;  %v17367_v4 = vld [vmem:[#allocation2 + $0x8a] sm:$0xff]  ;;  %v6107_v42 = vld [vmem:[#allocation2 + $0xf6] sm:$0xff] }
 0x588   : > { %v17350_v20 = vsel %vm21358_vm0, %v6100_v54, %v21356_v17  ;;  %v17356_v58 = vsel %vm21361_vm3, %v6101_v52, %v21359_v61  ;;  %v17362_v25 = vsel %vm21364_vm6, %v6102_v39, %v21362_v36  ;;  %v6183_v29 = vsel %vm21365_vm13, %v6039_v23, %v6135_v30  ;;  %v6106_v54 = vld [vmem:[#allocation2 + $0xee] sm:$0xff]  ;;  %v6108_v63 = vld [vmem:[#allocation2 + $0xfe] sm:$0xff]  ;;  %vm21377_vm13 = vmmov %vm21366_vm1 }
 0x589   : > { %v21367_v17 = vmax.f32 %v16945_v10, 0.0  ;;  %v21368_v52 = vld [vmem:[#allocation26_spill] sm:$0xff]  ;;  %v21370_v33 = vmax.f32 %v16949_v19, 0.0  ;;  %v21371_v39 = vld [vmem:[#allocation27_spill] sm:$0xff]  ;;  %v21373_v23 = vmax.f32 %v16953_v48, 0.0  ;;  %v21374_v34 = vld [vmem:[#allocation28_spill] sm:$0xff] }
 0x58a   : > { %vm21369_vm10 = vcmp.eq.s32.totalorder %v21368_v52, 17  ;;  %vm21372_vm0 = vcmp.eq.s32.totalorder %v21371_v39, 17  ;;  %vm21375_vm3 = vcmp.eq.s32.totalorder %v21374_v34, 17  ;;  %vm21376_vm6 = vcmp.eq.s32.totalorder %v21313_v56, 0  ;;  %6231 = vst.msk [vmem:[#allocation2 + $0x58] sm:$0xff] %vm21377_vm13, %v6183_v29  ;;  %v6046_v10 = vld [vmem:[#allocation2 + $0x92] sm:$0xff] }
 0x58b   : > { %v17373_v61 = vsel %vm21369_vm10, %v6103_v51, %v21367_v17  ;;  %v17379_v36 = vsel %vm21372_vm0, %v6104_v49, %v21370_v33  ;;  %v17385_v30 = vsel %vm21375_vm3, %v6105_v41, %v21373_v23  ;;  %v6184_v5 = vsel %vm21376_vm6, %v6040_v7, %v6136_v28  ;;  %v6109_v51 = vld [vmem:[#allocation2 + $0x106] sm:$0xff]  ;;  %v6110_v17 = vld [vmem:[#allocation2 + $0x10e] sm:$0xff]  ;;  %v6111_v52 = vld [vmem:[#allocation2 + $0x116] sm:$0xff] }
 0x58c   : > { %v21378_v19 = vmax.f32 %v16957_v11, 0.0  ;;  %v21379_v39 = vld [vmem:[#allocation29_spill] sm:$0xff]  ;;  %v21381_v48 = vmax.f32 %v16961_v31, 0.0  ;;  %v21382_v33 = vld [vmem:[#allocation30_spill] sm:$0xff]  ;;  %v21384_v7 = vmax.f32 %v16965_v55, 0.0  ;;  %v21385_v56 = vld [vmem:[#allocation31_spill] sm:$0xff] }
 0x58d   : > { %vm21380_vm1 = vcmp.eq.s32.totalorder %v21379_v39, 17  ;;  %vm21383_vm10 = vcmp.eq.s32.totalorder %v21382_v33, 17  ;;  %vm21386_vm0 = vcmp.eq.s32.totalorder %v21385_v56, 17  ;;  %vm21387_vm3 = vcmp.eq.s32.totalorder %v21316_v45, 0  ;;  %vm21388_vm6 = vmmov %vm21377_vm13  ;;  %v6047_v11 = vld [vmem:[#allocation2 + $0x9a] sm:$0xff]  ;;  %v6049_v23 = vld [vmem:[#allocation2 + $0xaa] sm:$0xff] }
 0x58e   : > { %v17394_v49 = vsel %vm21380_vm1, %v6106_v54, %v21378_v19  ;;  %v17400_v41 = vsel %vm21383_vm10, %v6107_v42, %v21381_v48  ;;  %v17406_v28 = vsel %vm21386_vm0, %v6108_v63, %v21384_v7  ;;  %v6185_v29 = vsel %vm21387_vm3, %v6041_v38, %v6137_v47  ;;  %6232 = vst.msk [vmem:[#allocation2 + $0x60] sm:$0xff] %vm21388_vm6, %v6184_v5  ;;  %v6048_v54 = vld [vmem:[#allocation2 + $0xa2] sm:$0xff]  ;;  %v6050_v19 = vld [vmem:[#allocation2 + $0xb2] sm:$0xff]  ;;  %vm21401_vm3 = vmmov %vm21388_vm6 }
 0x58f   : > { %v6112_v31 = vld [vmem:[#allocation2 + $0x11e] sm:$0xff]  ;;  %v6113_v39 = vld [vmem:[#allocation2 + $0x126] sm:$0xff]  ;;  %v6114_v33 = vld [vmem:[#allocation2 + $0x12e] sm:$0xff]  ;;  %v21389_v42 = vmax.f32 %v16969_v37, 0.0  ;;  %v21393_v63 = vmax.f32 %v16973_v26, 0.0  ;;  %v21396_v47 = vmax.f32 %v16977_v53, 0.0 }
 0x590   : > { %v21390_v48 = vld [vmem:[#allocation32_spill] sm:$0xff]  ;;  %v21394_v7 = vld [vmem:[#allocation33_spill] sm:$0xff]  ;;  %v21397_v38 = vld [vmem:[#allocation34_spill] sm:$0xff]  ;;  %vm21400_vm0 = vcmp.eq.s32.totalorder %v21319_v16, 0  ;;  %6233 = vst.msk [vmem:[#allocation2 + $0x68] sm:$0xff] %vm21401_vm3, %v6185_v29 }
 0x591   : > { %vm21391_vm13 = vcmp.eq.s32.totalorder %v21390_v48, 17  ;;  %vm21395_vm1 = vcmp.eq.s32.totalorder %v21394_v7, 17  ;;  %vm21398_vm10 = vcmp.eq.s32.totalorder %v21397_v38, 17  ;;  %v6186_v37 = vsel %vm21400_vm0, %v6042_v59, %v17278_v32  ;;  %v6053_v48 = vld [vmem:[#allocation2 + $0xca] sm:$0xff]  ;;  %v6054_v26 = vld [vmem:[#allocation2 + $0xd2] sm:$0xff]  ;;  %v6116_v7 = vld [vmem:[#allocation2 + $0x13e] sm:$0xff] }
 0x592   : > { %v17415_v55 = vsel %vm21391_vm13, %v6109_v51, %v21389_v42  ;;  %v17421_v45 = vsel %vm21395_vm1, %v6110_v17, %v21393_v63  ;;  %v17427_v5 = vsel %vm21398_vm10, %v6111_v52, %v21396_v47  ;;  %v6051_v51 = vld [vmem:[#allocation2 + $0xba] sm:$0xff]  ;;  %v6052_v42 = vld [vmem:[#allocation2 + $0xc2] sm:$0xff]  ;;  %v21402_v63 = vmax.f32 %v16981_v9, 0.0  ;;  %v21411_v59 = vld [vmem:[#allocation37_spill] sm:$0xff] }
 0x593   : > { %21392 = vst [vmem:[#allocation69_spill] sm:$0xff] %v17415_v55  ;;  %21399 = vst [vmem:[#allocation47_spill] sm:$0xff] %v17427_v5  ;;  %v6115_v55 = vld [vmem:[#allocation2 + $0x136] sm:$0xff]  ;;  %v6117_v17 = vld [vmem:[#allocation2 + $0x146] sm:$0xff]  ;;  %v21406_v52 = vmax.f32 %v16985_v2, 0.0  ;;  %v21410_v32 = vmax.f32 %v16989_v62, 0.0 }
 0x594   : > { %v21403_v53 = vld [vmem:[#allocation35_spill] sm:$0xff]  ;;  %v21407_v47 = vld [vmem:[#allocation36_spill] sm:$0xff]  ;;  %vm21412_vm1 = vcmp.eq.s32.totalorder %v21411_v59, 17  ;;  %vm21414_vm10 = vcmp.eq.s32.totalorder %v21324_v44, 0  ;;  %vm21415_vm0 = vmmov %vm21401_vm3 }
 0x595   : > { %vm21404_vm6 = vcmp.eq.s32.totalorder %v21403_v53, 17  ;;  %vm21408_vm13 = vcmp.eq.s32.totalorder %v21407_v47, 17  ;;  %v17449_v29 = vsel %vm21412_vm1, %v6114_v33, %v21410_v32  ;;  %v6187_v9 = vsel %vm21414_vm10, %v6043_v21, %v17287_v35  ;;  %6234 = vst.msk [vmem:[#allocation2 + $0x70] sm:$0xff] %vm21415_vm0, %v6186_v37  ;;  %v6057_v53 = vld [vmem:[#allocation2 + $0xea] sm:$0xff]  ;;  %v6058_v2 = vld [vmem:[#allocation2 + $0xf2] sm:$0xff]  ;;  %v21421_v32 = vld [vmem:[#allocation39_spill] sm:$0xff] }
 0x596   : > { %v17437_v38 = vsel %vm21404_vm6, %v6112_v31, %v21402_v63  ;;  %v17443_v16 = vsel %vm21408_vm13, %v6113_v39, %v21406_v52  ;;  %21413 = vst [vmem:[#allocation75_spill] sm:$0xff] %v17449_v29  ;;  %v6055_v31 = vld [vmem:[#allocation2 + $0xda] sm:$0xff]  ;;  %v6056_v63 = vld [vmem:[#allocation2 + $0xe2] sm:$0xff]  ;;  %v21416_v52 = vmax.f32 %v16993_v43, 0.0  ;;  %v21420_v33 = vmax.f32 %v16997_v57, 0.0  ;;  %vm21431_vm10 = vmmov %vm21415_vm0 }
 0x597   : > { %21405 = vst [vmem:[#allocation79_spill] sm:$0xff] %v17437_v38  ;;  %21409 = vst [vmem:[#allocation50_spill] sm:$0xff] %v17443_v16  ;;  %v6118_v38 = vld [vmem:[#allocation2 + $0x14e] sm:$0xff]  ;;  %v6119_v47 = vld [vmem:[#allocation2 + $0x156] sm:$0xff]  ;;  %vm21422_vm6 = vcmp.eq.s32.totalorder %v21421_v32, 17 }
 0x598   : > { %v6120_v39 = vld [vmem:[#allocation2 + $0x15e] sm:$0xff]  ;;  %v17465_v44 = vsel %vm21422_vm6, %v6116_v7, %v21420_v33  ;;  %v21426_v37 = vld [vmem:[#allocation40_spill] sm:$0xff]  ;;  %6235 = vst.msk [vmem:[#allocation2 + $0x78] sm:$0xff] %vm21431_vm10, %v6187_v9  ;;  %v6062_v57 = vld [vmem:[#allocation2 + $0x112] sm:$0xff] }
 0x599   : > { %v21417_v62 = vld [vmem:[#allocation38_spill] sm:$0xff]  ;;  %21423 = vst [vmem:[#allocation78_spill] sm:$0xff] %v17465_v44  ;;  %vm21427_vm13 = vcmp.eq.s32.totalorder %v21426_v37, 17  ;;  %v21429_v16 = vld [vmem:[#allocation15_spill] sm:$0xff]  ;;  %v6122_v32 = vld [vmem:[#allocation2 + $0x16e] sm:$0xff] }
 0x59a   : > { %vm21418_vm3 = vcmp.eq.s32.totalorder %v21417_v62, 17  ;;  %v21424_v35 = vld [vmem:[#allocation86_spill] sm:$0xff]  ;;  %vm21430_vm1 = vcmp.eq.s32.totalorder %v21429_v16, 0  ;;  %v6061_v62 = vld [vmem:[#allocation2 + $0x10a] sm:$0xff]  ;;  %v21432_v33 = vld [vmem:[#allocation83_spill] sm:$0xff] }
 0x59b   : > { %v17459_v59 = vsel %vm21418_vm3, %v6115_v55, %v21416_v52  ;;  %v21425_v21 = vmax.f32 %v21424_v35, 0.0  ;;  %v6188_v43 = vsel %vm21430_vm1, %v6044_v40, %v17293_v6  ;;  %v6059_v55 = vld [vmem:[#allocation2 + $0xfa] sm:$0xff]  ;;  %v6060_v52 = vld [vmem:[#allocation2 + $0x102] sm:$0xff]  ;;  %v21433_v44 = vmax.f32 %v21432_v33, 0.0  ;;  %v21434_v35 = vld [vmem:[#allocation41_spill] sm:$0xff] }
 0x59c   : > { %21419 = vst [vmem:[#allocation73_spill] sm:$0xff] %v17459_v59  ;;  %v6121_v59 = vld [vmem:[#allocation2 + $0x166] sm:$0xff]  ;;  %v6123_v7 = vld [vmem:[#allocation2 + $0x176] sm:$0xff]  ;;  %vm21435_vm0 = vcmp.eq.s32.totalorder %v21434_v35, 17  ;;  %vm21446_vm1 = vmmov %vm21431_vm10 }
 0x59d   : > { %v17471_v29 = vsel %vm21427_vm13, %v6117_v17, %v21425_v21  ;;  %v17481_v37 = vsel %vm21435_vm0, %v6118_v38, %v21433_v44  ;;  %v21436_v17 = vld [vmem:[#allocation52_spill] sm:$0xff]  ;;  %v21440_v40 = vld [vmem:[#allocation91_spill] sm:$0xff]  ;;  %vm21445_vm13 = vcmp.eq.s32.totalorder %v21330_v60, 0  ;;  %6236 = vst.msk [vmem:[#allocation2 + $0x80] sm:$0xff] %vm21446_vm1, %v6188_v43 }
 0x59e   : > { %21428 = vst [vmem:[#allocation76_spill] sm:$0xff] %v17471_v29  ;;  %v21437_v21 = vmax.f32 %v21436_v17, 0.0  ;;  %v21438_v29 = vld [vmem:[#allocation42_spill] sm:$0xff]  ;;  %v21441_v16 = vmax.f32 %v21440_v40, 0.0  ;;  %v21442_v9 = vld [vmem:[#allocation43_spill] sm:$0xff]  ;;  %v6189_v33 = vsel %vm21445_vm13, %v17367_v4, %v17299_v22  ;;  %v21447_v38 = vld [vmem:[#allocation48_spill] sm:$0xff] }
 0x59f   : > { %vm21439_vm3 = vcmp.eq.s32.totalorder %v21438_v29, 17  ;;  %vm21443_vm6 = vcmp.eq.s32.totalorder %v21442_v9, 17  ;;  %v21448_v44 = vmax.f32 %v21447_v38, 0.0  ;;  %v21449_v17 = vld [vmem:[#allocation44_spill] sm:$0xff]  ;;  %v21453_v40 = vld [vmem:[#allocation45_spill] sm:$0xff]  ;;  %vm21460_vm13 = vmmov %vm21446_vm1 }
 0x5a0   : > { %v17487_v6 = vsel %vm21439_vm3, %v6119_v47, %v21437_v21  ;;  %v17493_v5 = vsel %vm21443_vm6, %v6120_v39, %v21441_v16  ;;  %vm21450_vm10 = vcmp.eq.s32.totalorder %v21449_v17, 17  ;;  %v21451_v47 = vld [vmem:[#allocation92_spill] sm:$0xff]  ;;  %vm21454_vm0 = vcmp.eq.s32.totalorder %v21453_v40, 17  ;;  %6237 = vst.msk [vmem:[#allocation2 + $0x88] sm:$0xff] %vm21460_vm13, %v6189_v33  ;;  %v17522_v4 = vld [vmem:[#allocation2 + $0x38] sm:$0xff] }
 0x5a1   : > { %21444 = vst [vmem:[#allocation3_spill] sm:$0xff] %v17493_v5  ;;  %v17504_v29 = vsel %vm21450_vm10, %v6121_v59, %v21448_v44  ;;  %v21452_v21 = vmax.f32 %v21451_v47, 0.0  ;;  %v21455_v39 = vld [vmem:[#allocation84_spill] sm:$0xff]  ;;  %v21457_v5 = vld [vmem:[#allocation46_spill] sm:$0xff]  ;;  %vm21459_vm6 = vcmp.eq.s32.totalorder %v21335_v18, 0  ;;  %21461 = vst [vmem:[#allocation7_spill] sm:$0xff] %v17522_v4 }
 0x5a2   : > { %v21456_v16 = vmax.f32 %v21455_v39, 0.0  ;;  %vm21458_vm3 = vcmp.eq.s32.totalorder %v21457_v5, 17  ;;  %v6190_v22 = vsel %vm21459_vm6, %v6046_v10, %v17308_v8  ;;  %v17524_v59 = vld [vmem:[#allocation2 + $0x40] sm:$0xff]  ;;  %v17526_v43 = vld [vmem:[#allocation2 + $0x48] sm:$0xff]  ;;  %v21464_v47 = vld [vmem:[#allocation18_spill] sm:$0xff]  ;;  %vm21466_vm10 = vcmp.eq.s32.totalorder %v21341_v1, 0 }
 0x5a3   : > { %v17510_v9 = vsel %vm21454_vm0, %v6122_v32, %v21452_v21  ;;  %21462 = vst [vmem:[#allocation8_spill] sm:$0xff] %v17524_v59  ;;  %21463 = vst [vmem:[#allocation4_spill] sm:$0xff] %v17526_v43  ;;  %v6063_v32 = vld [vmem:[#allocation2 + $0x11a] sm:$0xff]  ;;  %v6064_v38 = vld [vmem:[#allocation2 + $0x122] sm:$0xff]  ;;  %vm21465_vm1 = vcmp.eq.s32.totalorder %v21464_v47, 0  ;;  %v6192_v18 = vsel %vm21466_vm10, %v6048_v54, %v17320_v24  ;;  %vm21467_vm0 = vcmp.eq.s32.totalorder %v21346_v12, 0 }
 0x5a4   : > { %v17516_v60 = vsel %vm21458_vm3, %v6123_v7, %v21456_v16  ;;  %v6065_v44 = vld [vmem:[#allocation2 + $0x12a] sm:$0xff]  ;;  %v6191_v7 = vsel %vm21465_vm1, %v6047_v11, %v17314_v3  ;;  %v6193_v8 = vsel %vm21467_vm0, %v6049_v23, %v17329_v0  ;;  %vm21470_vm6 = vmmov %vm21460_vm13  ;;  %v6066_v3 = vld [vmem:[#allocation2 + $0x132] sm:$0xff]  ;;  %vm21474_vm10 = vcmp.eq.s32.totalorder %v21352_v14, 0 }
 0x5a5   : > { %v21468_v10 = vld [vmem:[#allocation21_spill] sm:$0xff]  ;;  %6238 = vst.msk [vmem:[#allocation2 + $0x90] sm:$0xff] %vm21470_vm6, %v6190_v22  ;;  %vm21471_vm13 = vmmov %vm21470_vm6  ;;  %v6067_v1 = vld [vmem:[#allocation2 + $0x13a] sm:$0xff]  ;;  %v6195_v12 = vsel %vm21474_vm10, %v6051_v51, %v17341_v13  ;;  %vm21475_vm0 = vcmp.eq.s32.totalorder %v21357_v27, 0 }
 0x5a6   : > { %vm21469_vm3 = vcmp.eq.s32.totalorder %v21468_v10, 0  ;;  %6275 = vst.msk [vmem:[#allocation2 + $0x8] sm:$0xff] %vm21471_vm13, %v17522_v4  ;;  %vm21472_vm9 = vmmov %vm21470_vm6  ;;  %v6068_v24 = vld [vmem:[#allocation2 + $0x142] sm:$0xff]  ;;  %v6196_v0 = vsel %vm21475_vm0, %v6052_v42, %v17350_v20  ;;  %v6069_v14 = vld [vmem:[#allocation2 + $0x14a] sm:$0xff] }
 0x5a7   : > { %v6194_v33 = vsel %vm21469_vm3, %v6050_v19, %v17335_v50  ;;  %6276 = vst.msk [vmem:[#allocation2 + $0x10] sm:$0xff] %vm21472_vm9, %v17524_v59  ;;  %vm21473_vm1 = vmmov %vm21470_vm6  ;;  %vm21476_vm3 = vcmp.eq.s32.totalorder %v21360_v15, 0  ;;  %vm21477_vm9 = vcmp.eq.s32.totalorder %v21363_v46, 0  ;;  %v6070_v13 = vld [vmem:[#allocation2 + $0x152] sm:$0xff]  ;;  %v6071_v27 = vld [vmem:[#allocation2 + $0x15a] sm:$0xff] }
 0x5a8   : > { %6277 = vst.msk [vmem:[#allocation2 + $0x18] sm:$0xff] %vm21473_vm1, %v17526_v43  ;;  %v6197_v50 = vsel %vm21476_vm3, %v6053_v48, %v17356_v58  ;;  %v6198_v11 = vsel %vm21477_vm9, %v6054_v26, %v17362_v25  ;;  %vm21478_vm6 = vmmov %vm21473_vm1  ;;  %v21481_v20 = vld [vmem:[#allocation26_spill] sm:$0xff]  ;;  %v21483_v58 = vld [vmem:[#allocation27_spill] sm:$0xff]  ;;  %vm21485_vm3 = vcmp.eq.s32.totalorder %v21374_v34, 0 }
 0x5a9   : > { %6239 = vst.msk [vmem:[#allocation2 + $0x98] sm:$0xff] %vm21478_vm6, %v6191_v7  ;;  %vm21479_vm13 = vmmov %vm21473_vm1  ;;  %vm21482_vm10 = vcmp.eq.s32.totalorder %v21481_v20, 0  ;;  %vm21484_vm0 = vcmp.eq.s32.totalorder %v21483_v58, 0  ;;  %v6201_v25 = vsel %vm21485_vm3, %v6057_v53, %v17385_v30  ;;  %v21486_v54 = vld [vmem:[#allocation29_spill] sm:$0xff]  ;;  %v21495_v51 = vld [vmem:[#allocation32_spill] sm:$0xff] }
 0x5aa   : > { %6240 = vst.msk [vmem:[#allocation2 + $0xa0] sm:$0xff] %vm21479_vm13, %v6192_v18  ;;  %vm21480_vm2 = vmmov %vm21473_vm1  ;;  %v6199_v15 = vsel %vm21482_vm10, %v6055_v31, %v17373_v61  ;;  %v6200_v46 = vsel %vm21484_vm0, %v6056_v63, %v17379_v36  ;;  %vm21487_vm9 = vcmp.eq.s32.totalorder %v21486_v54, 0  ;;  %v6072_v61 = vld [vmem:[#allocation2 + $0x162] sm:$0xff]  ;;  %v6073_v19 = vld [vmem:[#allocation2 + $0x16a] sm:$0xff]  ;;  %vm21493_vm0 = vcmp.eq.s32.totalorder %v21385_v56, 0 }
 0x5ab   : > { %6241 = vst.msk [vmem:[#allocation2 + $0xa8] sm:$0xff] %vm21473_vm1, %v6193_v8  ;;  %v6202_v23 = vsel %vm21487_vm9, %v6058_v2, %v17394_v49  ;;  %vm21489_vm6 = vmmov %vm21473_vm1  ;;  %v6074_v48 = vld [vmem:[#allocation2 + $0x172] sm:$0xff]  ;;  %v6204_v30 = vsel %vm21493_vm0, %v6060_v52, %v17406_v28  ;;  %vm21496_vm3 = vcmp.eq.s32.totalorder %v21495_v51, 0  ;;  %v21505_v28 = vld [vmem:[#allocation79_spill] sm:$0xff] }
 0x5ac   : > { %6242 = vst.msk [vmem:[#allocation2 + $0xb0] sm:$0xff] %vm21480_vm2, %v6194_v33  ;;  %vm21488_vm2 = vmmov %vm21473_vm1  ;;  %v21491_v36 = vld [vmem:[#allocation30_spill] sm:$0xff]  ;;  %v21494_v49 = vld [vmem:[#allocation69_spill] sm:$0xff] }
 0x5ad   : > { %6243 = vst.msk [vmem:[#allocation2 + $0xb8] sm:$0xff] %vm21488_vm2, %v6195_v12  ;;  %vm21490_vm13 = vmmov %vm21473_vm1  ;;  %vm21492_vm10 = vcmp.eq.s32.totalorder %v21491_v36, 0  ;;  %v6205_v42 = vsel %vm21496_vm3, %v6061_v62, %v21494_v49  ;;  %v21497_v26 = vld [vmem:[#allocation33_spill] sm:$0xff]  ;;  %v21503_v31 = vld [vmem:[#allocation34_spill] sm:$0xff] }
 0x5ae   : > { %6244 = vst.msk [vmem:[#allocation2 + $0xc0] sm:$0xff] %vm21489_vm6, %v6196_v0  ;;  %v6203_v34 = vsel %vm21492_vm10, %v6059_v55, %v17400_v41  ;;  %vm21498_vm9 = vcmp.eq.s32.totalorder %v21497_v26, 0  ;;  %vm21499_vm2 = vmmov %vm21473_vm1  ;;  %v21502_v41 = vld [vmem:[#allocation47_spill] sm:$0xff]  ;;  %vm21504_vm10 = vcmp.eq.s32.totalorder %v21503_v31, 0  ;;  %v21508_v62 = vld [vmem:[#allocation50_spill] sm:$0xff] }
 0x5af   : > { %6245 = vst.msk [vmem:[#allocation2 + $0xc8] sm:$0xff] %vm21490_vm13, %v6197_v50  ;;  %v6206_v53 = vsel %vm21498_vm9, %v6062_v57, %v17421_v45  ;;  %vm21500_vm6 = vmmov %vm21473_vm1  ;;  %v6207_v56 = vsel %vm21504_vm10, %v6063_v32, %v21502_v41  ;;  %v21506_v63 = vld [vmem:[#allocation35_spill] sm:$0xff]  ;;  %v21509_v55 = vld [vmem:[#allocation36_spill] sm:$0xff] }
 0x5b0   : > { %6246 = vst.msk [vmem:[#allocation2 + $0xd0] sm:$0xff] %vm21473_vm1, %v6198_v11  ;;  %vm21501_vm13 = vmmov %vm21473_vm1  ;;  %vm21507_vm0 = vcmp.eq.s32.totalorder %v21506_v63, 0  ;;  %vm21510_vm3 = vcmp.eq.s32.totalorder %v21509_v55, 0  ;;  %v21511_v52 = vld [vmem:[#allocation75_spill] sm:$0xff]  ;;  %v21512_v57 = vld [vmem:[#allocation37_spill] sm:$0xff] }
 0x5b1   : > { %6247 = vst.msk [vmem:[#allocation2 + $0xd8] sm:$0xff] %vm21499_vm2, %v6199_v15  ;;  %v6208_v2 = vsel %vm21507_vm0, %v6064_v38, %v21505_v28  ;;  %v6209_v45 = vsel %vm21510_vm3, %v6065_v44, %v21508_v62  ;;  %vm21513_vm9 = vcmp.eq.s32.totalorder %v21512_v57, 0  ;;  %vm21514_vm2 = vmmov %vm21473_vm1  ;;  %v21517_v39 = vld [vmem:[#allocation73_spill] sm:$0xff]  ;;  %v21518_v16 = vld [vmem:[#allocation38_spill] sm:$0xff] }
 0x5b2   : > { %6248 = vst.msk [vmem:[#allocation2 + $0xe0] sm:$0xff] %vm21500_vm6, %v6200_v46  ;;  %v6210_v21 = vsel %vm21513_vm9, %v6066_v3, %v21511_v52  ;;  %vm21515_vm6 = vmmov %vm21473_vm1  ;;  %vm21519_vm10 = vcmp.eq.s32.totalorder %v21518_v16, 0  ;;  %v21520_v32 = vld [vmem:[#allocation78_spill] sm:$0xff]  ;;  %v21521_v38 = vld [vmem:[#allocation39_spill] sm:$0xff]  ;;  %vm21526_vm9 = vcmp.eq.s32.totalorder %v21434_v35, 0 }
 0x5b3   : > { %6249 = vst.msk [vmem:[#allocation2 + $0xe8] sm:$0xff] %vm21501_vm13, %v6201_v25  ;;  %vm21516_vm13 = vmmov %vm21473_vm1  ;;  %v6211_v22 = vsel %vm21519_vm10, %v6067_v1, %v21517_v39  ;;  %vm21522_vm0 = vcmp.eq.s32.totalorder %v21521_v38, 0  ;;  %v21523_v47 = vld [vmem:[#allocation76_spill] sm:$0xff]  ;;  %v6214_v8 = vsel %vm21526_vm9, %v6070_v13, %v17481_v37  ;;  %v17627_v10 = vld [vmem:[#allocation2 + $0x20] sm:$0xff]  ;;  %vm21538_vm9 = vcmp.eq.s32.totalorder %v21453_v40, 0 }
 0x5b4   : > { %6250 = vst.msk [vmem:[#allocation2 + $0xf0] sm:$0xff] %vm21473_vm1, %v6202_v23  ;;  %6254 = vst.msk [vmem:[#allocation2 + $0x110] sm:$0xff] %vm21473_vm1, %v6206_v53  ;;  %v6212_v44 = vsel %vm21522_vm0, %v6068_v24, %v21520_v32  ;;  %v21524_v7 = vld [vmem:[#allocation40_spill] sm:$0xff]  ;;  %v21532_v3 = vld [vmem:[#allocation42_spill] sm:$0xff]  ;;  %v6218_v0 = vsel %vm21538_vm9, %v6074_v48, %v17510_v9 }
 0x5b5   : > { %6251 = vst.msk [vmem:[#allocation2 + $0xf8] sm:$0xff] %vm21514_vm2, %v6203_v34  ;;  %vm21525_vm3 = vcmp.eq.s32.totalorder %v21524_v7, 0  ;;  %vm21527_vm2 = vmmov %vm21473_vm1  ;;  %v17629_v33 = vld [vmem:[#allocation2 + $0x28] sm:$0xff]  ;;  %vm21533_vm10 = vcmp.eq.s32.totalorder %v21532_v3, 0  ;;  %v21534_v24 = vld [vmem:[#allocation3_spill] sm:$0xff] }
 0x5b6   : > { %6252 = vst.msk [vmem:[#allocation2 + $0x100] sm:$0xff] %vm21515_vm6, %v6204_v30  ;;  %v6213_v18 = vsel %vm21525_vm3, %v6069_v14, %v21523_v47  ;;  %vm21528_vm6 = vmmov %vm21473_vm1  ;;  %v6215_v1 = vsel %vm21533_vm10, %v6071_v27, %v17487_v6  ;;  %v21535_v12 = vld [vmem:[#allocation43_spill] sm:$0xff]  ;;  %vm21537_vm3 = vcmp.eq.s32.totalorder %v21449_v17, 0  ;;  %v17647_v6 = vld [vmem:[#allocation2 + $0x30] sm:$0xff]  ;;  %vm21544_vm10 = vcmp.eq.s32.totalorder %v21457_v5, 0 }
 0x5b7   : > { %6253 = vst.msk [vmem:[#allocation2 + $0x108] sm:$0xff] %vm21516_vm13, %v6205_v42  ;;  %vm21529_vm13 = vmmov %vm21473_vm1  ;;  %vm21536_vm0 = vcmp.eq.s32.totalorder %v21535_v12, 0  ;;  %v6217_v35 = vsel %vm21537_vm3, %v6073_v19, %v17504_v29  ;;  %v17649_v50 = vld [vmem:[#allocation2 + $0x2f] sm:$0xff]  ;;  %v17651_v11 = vld [vmem:[#allocation2 + $0x37] sm:$0xff]  ;;  %v6410_v48 = vpack.c.bf16 %v17647_v6, %v17629_v33 }
 0x5b8   : > { %6255 = vst.msk [vmem:[#allocation2 + $0x118] sm:$0xff] %vm21527_vm2, %v6207_v56  ;;  %21530 = vst [vmem:[#allocation5_spill] sm:$0xff] %v17627_v10  ;;  %v6216_v37 = vsel %vm21536_vm0, %v6072_v61, %v21534_v24  ;;  %v21543_v29 = vld [vmem:[#allocation90_spill] sm:$0xff]  ;;  %v6360_v9 = vld [vmem:[#allocation2 + $0x8] sm:$0xff] }
 0x5b9   : > { %6256 = vst.msk [vmem:[#allocation2 + $0x120] sm:$0xff] %vm21528_vm6, %v6208_v2  ;;  %21531 = vst [vmem:[#allocation6_spill] sm:$0xff] %v17629_v33  ;;  %v6219_v17 = vsel %vm21544_vm10, %v21543_v29, %v17516_v60  ;;  %v6361_v40 = vld [vmem:[#allocation2 + $0x10] sm:$0xff]  ;;  %v6362_v14 = vld [vmem:[#allocation2 + $0x18] sm:$0xff] }
 0x5ba   : > { %6257 = vst.msk [vmem:[#allocation2 + $0x128] sm:$0xff] %vm21529_vm13, %v6209_v45  ;;  %vm21539_vm2 = vmmov %vm21473_vm1  ;;  %v13563_v13 = vld [vmem:[%s19941_s3 + $0x8] sm:$0xff]   ;;  %v6408_v27 = vpack.c.bf16 %v6361_v40, %v6360_v9  ;;  %v6409_v5 = vpack.c.bf16 %v17627_v10, %v6362_v14  ;;  %v17666_v60 = vld [vmem:[#allocation2 + $0x3f] sm:$0xff]  ;;  %v6411_v40 = vpack.c.bf16 %v17524_v59, %v17522_v4 }
 0x5bb   : > { %6258 = vst.msk [vmem:[#allocation2 + $0x130] sm:$0xff] %vm21473_vm1, %v6210_v21  ;;  %vm21540_vm6 = vmmov %vm21473_vm1  ;;  %v17668_v20 = vld [vmem:[#allocation2 + $0x47] sm:$0xff]  ;;  %v17670_v15 = vld [vmem:[#allocation2 + $0x4f] sm:$0xff] }
 0x5bc   : > { %6259 = vst.msk [vmem:[#allocation2 + $0x138] sm:$0xff] %vm21539_vm2, %v6211_v22  ;;  %vm21541_vm13 = vmmov %vm21473_vm1  ;;  %v17672_v58 = vld [vmem:[#allocation2 + $0x50] sm:$0xff]  ;;  %v17674_v46 = vld [vmem:[#allocation2 + $0x58] sm:$0xff] }
 0x5bd   : > { %6260 = vst.msk [vmem:[#allocation2 + $0x140] sm:$0xff] %vm21540_vm6, %v6212_v44  ;;  %21542 = vst [vmem:[#allocation9_spill] sm:$0xff] %v17647_v6  ;;  %v17676_v25 = vld [vmem:[#allocation2 + $0x60] sm:$0xff]  ;;  %v17678_v54 = vld [vmem:[#allocation2 + $0x68] sm:$0xff]  ;;  %v6412_v9 = vpack.c.bf16 %v17672_v58, %v17526_v43 }
 0x5be   : > { %6261 = vst.msk [vmem:[#allocation2 + $0x148] sm:$0xff] %vm21541_vm13, %v6213_v18  ;;  %vm21545_vm0 = vmmov %vm21473_vm1  ;;  %v17680_v23 = vld [vmem:[#allocation2 + $0x57] sm:$0xff]  ;;  %v17682_v61 = vld [vmem:[#allocation2 + $0x5f] sm:$0xff]  ;;  %v6413_v18 = vpack.c.bf16 %v17676_v25, %v17674_v46 }
 0x5bf   : > { %6262 = vst.msk [vmem:[#allocation2 + $0x150] sm:$0xff] %vm21473_vm1, %v6214_v8  ;;  %vm21546_vm3 = vmmov %vm21545_vm0  ;;  %v17684_v19 = vld [vmem:[#allocation2 + $0x67] sm:$0xff]  ;;  %v17689_v36 = vld [vmem:[#allocation2 + $0x70] sm:$0xff] }
 0x5c0   : > { %6263 = vst.msk [vmem:[#allocation2 + $0x158] sm:$0xff] %vm21545_vm0, %v6215_v1  ;;  %vm21547_vm9 = vmmov %vm21545_vm0  ;;  %v17691_v34 = vld [vmem:[#allocation2 + $0x78] sm:$0xff]  ;;  %v17693_v30 = vld [vmem:[#allocation2 + $0x80] sm:$0xff]  ;;  %v6414_v33 = vpack.c.bf16 %v17689_v36, %v17678_v54 }
 0x5c1   : > { %6264 = vst.msk [vmem:[#allocation2 + $0x160] sm:$0xff] %vm21546_vm3, %v6216_v37  ;;  %vm21548_vm2 = vmmov %vm21545_vm0  ;;  %v17695_v49 = vld [vmem:[#allocation2 + $0x88] sm:$0xff]  ;;  %v17698_v51 = vld [vmem:[#allocation2 + $0x90] sm:$0xff] }
 0x5c2   : > { %6265 = vst.msk [vmem:[#allocation2 + $0x168] sm:$0xff] %vm21547_vm9, %v6217_v35  ;;  %vm21549_vm6 = vmmov %vm21545_vm0  ;;  %v17700_v42 = vld [vmem:[#allocation2 + $0x98] sm:$0xff]  ;;  %v17702_v26 = vld [vmem:[#allocation2 + $0xa0] sm:$0xff] }
 0x5c3   : > { %6266 = vst.msk [vmem:[#allocation2 + $0x170] sm:$0xff] %vm21548_vm2, %v6218_v0  ;;  %21550 = vst [vmem:[#allocation10_spill] sm:$0xff] %v17672_v58  ;;  %v17704_v53 = vld [vmem:[#allocation2 + $0xa8] sm:$0xff]  ;;  %v17706_v41 = vld [vmem:[#allocation2 + $0xb0] sm:$0xff] }
 0x5c4   : > { %6267 = vst.msk [vmem:[#allocation2 + $0x178] sm:$0xff] %vm21549_vm6, %v6219_v17  ;;  %21551 = vst [vmem:[#allocation11_spill] sm:$0xff] %v17674_v46  ;;  %v17711_v31 = vld [vmem:[%s19941_s3 + $0x20] sm:$0xff]   ;;  %v21565_v63 = vld [vmem:[#allocation74_spill] sm:$0xff] }
 0x5c5   : > { %21552 = vst [vmem:[#allocation12_spill] sm:$0xff] %v17676_v25  ;;  %21553 = vst [vmem:[#allocation13_spill] sm:$0xff] %v17678_v54  ;;  %v17719_v2 = vld [vmem:[#allocation2 + $0xb8] sm:$0xff]  ;;  %v17721_v62 = vld [vmem:[#allocation2 + $0xc0] sm:$0xff] }
 0x5c6   : > { %vm21554_vm13 = vmmov %vm21545_vm0  ;;  %21555 = vst [vmem:[#allocation14_spill] sm:$0xff] %v17689_v36  ;;  %v17723_v55 = vld [vmem:[#allocation2 + $0xc8] sm:$0xff]  ;;  %v17729_v57 = vld [vmem:[#allocation2 + $0xd0] sm:$0xff] }
 0x5c7   : > { %12204 = vmatprep.mubr.msk.bf16.mxu1 %vm21554_vm13, %v6408_v27  ;;  %21556 = vst [vmem:[#allocation16_spill] sm:$0xff] %v17691_v34  ;;  %21557 = vst [vmem:[#allocation17_spill] sm:$0xff] %v17693_v30  ;;  %v17731_v21 = vld [vmem:[#allocation2 + $0xd8] sm:$0xff]  ;;  %v17733_v39 = vld [vmem:[#allocation2 + $0xe0] sm:$0xff] }
 0x5c8   : > { %21558 = vst [vmem:[#allocation19_spill] sm:$0xff] %v17695_v49  ;;  %vm21559_vm1 = vmmov %vm21545_vm0  ;;  %v17739_v32 = vld [vmem:[#allocation2 + $0xe8] sm:$0xff]  ;;  %v17741_v38 = vld [vmem:[#allocation2 + $0xf0] sm:$0xff] }
 0x5c9   : > { %12205 = vmatmul.mubr.msk.bf16.vlgmr.msra.gmra.mrb[0].mxu1 %vm21559_vm1, %v6409_v5  ;;  %21560 = vst [vmem:[#allocation20_spill] sm:$0xff] %v17698_v51  ;;  %21561 = vst [vmem:[#allocation22_spill] sm:$0xff] %v17700_v42  ;;  %v17743_v44 = vld [vmem:[#allocation2 + $0xf8] sm:$0xff]  ;;  %v17751_v8 = vld [vmem:[#allocation2 + $0x100] sm:$0xff] }
 0x5ca   : > { %21562 = vst [vmem:[#allocation23_spill] sm:$0xff] %v17702_v26  ;;  %21563 = vst [vmem:[#allocation24_spill] sm:$0xff] %v17704_v53  ;;  %12253 = vmatpush3.bf16.msra.mxu1 %v21565_v63  ;;  %v17753_v3 = vld [vmem:[#allocation2 + $0x108] sm:$0xff]  ;;  %v17755_v1 = vld [vmem:[#allocation2 + $0x110] sm:$0xff] }
 0x5cb   : > { %21564 = vst [vmem:[#allocation25_spill] sm:$0xff] %v17706_v41  ;;  %vm21566_vm10 = vmmov %vm21545_vm0  ;;  %12254 = vmatprep.subr.bf16.mxu1 %v13563_v13  ;;  %v17761_v37 = vld [vmem:[#allocation2 + $0x118] sm:$0xff]  ;;  %v17763_v35 = vld [vmem:[#allocation2 + $0x120] sm:$0xff] }
 0x5cc   : > { %12208 = vmatprep.mubr.msk.bf16.mxu1 %vm21566_vm10, %v6410_v48  ;;  %21567 = vst [vmem:[#allocation28_spill] sm:$0xff] %v17719_v2  ;;  %21568 = vst [vmem:[#allocation31_spill] sm:$0xff] %v17721_v62  ;;  %v17765_v0 = vld [vmem:[#allocation2 + $0x128] sm:$0xff]  ;;  %v17775_v14 = vld [vmem:[#allocation2 + $0x130] sm:$0xff] }
 0x5cd   : > { %21569 = vst [vmem:[#allocation86_spill] sm:$0xff] %v17723_v55  ;;  %21570 = vst [vmem:[#allocation15_spill] sm:$0xff] %v17729_v57  ;;  %v17779_v27 = vld [vmem:[#allocation2 + $0x140] sm:$0xff]  ;;  %v17790_v17 = vld [vmem:[#allocation2 + $0x148] sm:$0xff] }
 0x5ce   : > { %21571 = vst [vmem:[#allocation83_spill] sm:$0xff] %v17731_v21  ;;  %21572 = vst [vmem:[#allocation41_spill] sm:$0xff] %v17733_v39  ;;  %12255 = vmatpush3.bf16.msra.mxu1 %v13563_v13  ;;  %v17777_v13 = vld [vmem:[#allocation2 + $0x138] sm:$0xff]  ;;  %v17782_v5 = vld [vmem:[#allocation2 + $0x27] sm:$0xff] }
 0x5cf   : > { %21573 = vst [vmem:[#allocation52_spill] sm:$0xff] %v17739_v32  ;;  %21574 = vst [vmem:[#allocation91_spill] sm:$0xff] %v17741_v38  ;;  %12304 = vmatprep.subr.bf16.mxu1 %v17711_v31  ;;  %v17792_v29 = vld [vmem:[#allocation2 + $0x150] sm:$0xff]  ;;  %v17794_v12 = vld [vmem:[#allocation2 + $0x158] sm:$0xff] }
 0x5d0   : > { %21575 = vst [vmem:[#allocation48_spill] sm:$0xff] %v17743_v44  ;;  %21576 = vst [vmem:[#allocation44_spill] sm:$0xff] %v17751_v8  ;;  %v17801_v48 = vld [vmem:[#allocation2 + $0x160] sm:$0xff]  ;;  %v17803_v63 = vld [vmem:[#allocation2 + $0x168] sm:$0xff] }
 0x5d1   : > { %21577 = vst [vmem:[#allocation92_spill] sm:$0xff] %v17753_v3  ;;  %21578 = vst [vmem:[#allocation45_spill] sm:$0xff] %v17755_v1  ;;  %12209 = vmatmul.mubr.msk.bf16.gmra.mrb[4].mxu1 %vm21545_vm0, %v6411_v40  ;;  %v17805_v7 = vld [vmem:[#allocation2 + $0x170] sm:$0xff]  ;;  %v17807_v47 = vld [vmem:[#allocation2 + $0x178] sm:$0xff] }
 0x5d2   : > { %21579 = vst [vmem:[#allocation84_spill] sm:$0xff] %v17761_v37  ;;  %21580 = vst [vmem:[#allocation46_spill] sm:$0xff] %v17763_v35  ;;  %v17809_v22 = vld [vmem:[#allocation2 + $0x1f] sm:$0xff]  ;;  %v17811_v16 = vld [vmem:[#allocation2 + $0x6f] sm:$0xff] }
 0x5d3   : > { %21581 = vst [vmem:[#allocation18_spill] sm:$0xff] %v17765_v0  ;;  %21582 = vst [vmem:[#allocation21_spill] sm:$0xff] %v17775_v14  ;;  %v17813_v52 = vld [vmem:[#allocation2 + $0x77] sm:$0xff]  ;;  %v17822_v45 = vld [vmem:[#allocation2 + $0x7f] sm:$0xff] }
 0x5d4   : > { %21583 = vst [vmem:[#allocation26_spill] sm:$0xff] %v17777_v13  ;;  %21584 = vst [vmem:[#allocation27_spill] sm:$0xff] %v17779_v27  ;;  %v17824_v28 = vld [vmem:[#allocation2 + $0x87] sm:$0xff]  ;;  %v17826_v56 = vld [vmem:[#allocation2 + $0x8f] sm:$0xff] }
 0x5d5   : > { %21585 = vst [vmem:[#allocation29_spill] sm:$0xff] %v17790_v17  ;;  %21586 = vst [vmem:[#allocation30_spill] sm:$0xff] %v17792_v29  ;;  %v17832_v59 = vld [vmem:[#allocation2 + $0x97] sm:$0xff]  ;;  %v17834_v40 = vld [vmem:[#allocation2 + $0x9f] sm:$0xff] }
 0x5d6   : > { %21587 = vst [vmem:[#allocation69_spill] sm:$0xff] %v17794_v12  ;;  %21588 = vst [vmem:[#allocation32_spill] sm:$0xff] %v17801_v48  ;;  %v17836_v43 = vld [vmem:[#allocation2 + $0xa7] sm:$0xff]  ;;  %v17842_v6 = vld [vmem:[#allocation2 + $0xaf] sm:$0xff] }
 0x5d7   : > { %21589 = vst [vmem:[#allocation33_spill] sm:$0xff] %v17803_v63  ;;  %21590 = vst [vmem:[#allocation47_spill] sm:$0xff] %v17805_v7  ;;  %v17844_v4 = vld [vmem:[#allocation2 + $0xb7] sm:$0xff]  ;;  %v17846_v58 = vld [vmem:[#allocation2 + $0xbf] sm:$0xff] }
 0x5d8   : > { %21591 = vst [vmem:[#allocation34_spill] sm:$0xff] %v17807_v47  ;;  %21592 = vst [vmem:[#allocation79_spill] sm:$0xff] %v17811_v16  ;;  %v17864_v16 = vld [vmem:[#allocation2 + $0xdf] sm:$0xff]  ;;  %v17866_v24 = vld [vmem:[#allocation2 + $0xe7] sm:$0xff] }
 0x5d9   : > { %21593 = vst [vmem:[#allocation35_spill] sm:$0xff] %v17813_v52  ;;  %vm21594_vm3 = vmmov %vm21545_vm0  ;;  %v17854_v52 = vld [vmem:[#allocation2 + $0xc7] sm:$0xff]  ;;  %v17892_v25 = vld [vmem:[#allocation2 + $0x117] sm:$0xff] }
 0x5da   : > { %12212 = vmatprep.mubr.msk.bf16.mxu1 %vm21594_vm3, %v6412_v9  ;;  %21595 = vst [vmem:[#allocation50_spill] sm:$0xff] %v17822_v45  ;;  %21596 = vst [vmem:[#allocation36_spill] sm:$0xff] %v17824_v28  ;;  %v17856_v9 = vld [vmem:[#allocation2 + $0xcf] sm:$0xff]  ;;  %v17862_v45 = vld [vmem:[#allocation2 + $0xd7] sm:$0xff] }
 0x5db   : > { %21597 = vst [vmem:[#allocation75_spill] sm:$0xff] %v17834_v40  ;;  %21598 = vst [vmem:[#allocation37_spill] sm:$0xff] %v17836_v43  ;;  %v17878_v28 = vld [vmem:[#allocation2 + $0xf7] sm:$0xff]  ;;  %v17890_v43 = vld [vmem:[#allocation2 + $0x10f] sm:$0xff] }
 0x5dc   : > { %21599 = vst [vmem:[#allocation73_spill] sm:$0xff] %v17842_v6  ;;  %21600 = vst [vmem:[#allocation38_spill] sm:$0xff] %v17844_v4  ;;  %v17876_v4 = vld [vmem:[#allocation2 + $0xef] sm:$0xff]  ;;  %v17880_v6 = vld [vmem:[#allocation2 + $0xff] sm:$0xff] }
 0x5dd   : > { %21601 = vst [vmem:[#allocation78_spill] sm:$0xff] %v17846_v58  ;;  %21602 = vst [vmem:[#allocation39_spill] sm:$0xff] %v17854_v52  ;;  %v17888_v52 = vld [vmem:[#allocation2 + $0x107] sm:$0xff]  ;;  %v17897_v58 = vld [vmem:[#allocation2 + $0x11f] sm:$0xff] }
 0x5de   : > { %21603 = vst [vmem:[#allocation76_spill] sm:$0xff] %v17862_v45  ;;  %21604 = vst [vmem:[#allocation40_spill] sm:$0xff] %v17864_v16  ;;  %v17899_v40 = vld [vmem:[#allocation2 + $0x127] sm:$0xff]  ;;  %v17901_v45 = vld [vmem:[#allocation2 + $0x12f] sm:$0xff] }
 0x5df   : > { %21605 = vst [vmem:[#allocation42_spill] sm:$0xff] %v17866_v24  ;;  %21606 = vst [vmem:[#allocation3_spill] sm:$0xff] %v17876_v4  ;;  %v17908_v54 = vld [vmem:[#allocation2 + $0x137] sm:$0xff]  ;;  %v17910_v24 = vld [vmem:[#allocation2 + $0x13f] sm:$0xff] }
 0x5e0   : > { %21607 = vst [vmem:[#allocation43_spill] sm:$0xff] %v17878_v28  ;;  %21608 = vst [vmem:[#allocation90_spill] sm:$0xff] %v17888_v52  ;;  %v17912_v46 = vld [vmem:[#allocation2 + $0x147] sm:$0xff]  ;;  %v17916_v28 = vld [vmem:[#allocation2 + $0x14f] sm:$0xff] }
 0x5e1   : > { %21609 = vst [vmem:[#allocation74_spill] sm:$0xff] %v17890_v43  ;;  %21610 = vst [vmem:[#allocation113_spill] sm:$0xff] %v17892_v25  ;;  %v17918_v4 = vld [vmem:[#allocation2 + $0x157] sm:$0xff]  ;;  %v17920_v16 = vld [vmem:[#allocation2 + $0x15f] sm:$0xff] }
 0x5e2   : > { %vm21611_vm9 = vmmov %vm21545_vm0  ;;  %21612 = vst [vmem:[#allocation114_spill] sm:$0xff] %v17897_v58  ;;  %v17926_v10 = vld [vmem:[#allocation2 + $0x167] sm:$0xff]  ;;  %v17928_v25 = vld [vmem:[#allocation2 + $0x16f] sm:$0xff] }
 0x5e3   : > { %12213 = vmatmul.mubr.msk.bf16.gmra.mrb[8].mxu1 %vm21611_vm9, %v6413_v18  ;;  %21613 = vst [vmem:[#allocation115_spill] sm:$0xff] %v17899_v40  ;;  %vm21614_vm2 = vmmov %vm21545_vm0  ;;  %v17930_v43 = vld [vmem:[#allocation2 + $0x177] sm:$0xff]  ;;  %v17938_v52 = vld [vmem:[#allocation2 + $0x21] sm:$0xff]  ;;  %v6416_v40 = vpack.c.bf16 %v17698_v51, %v17695_v49 }
 0x5e4   : > { %12216 = vmatprep.mubr.msk.bf16.mxu1 %vm21614_vm2, %v6414_v33  ;;  %21615 = vst [vmem:[#allocation116_spill] sm:$0xff] %v17908_v54  ;;  %21616 = vst [vmem:[#allocation117_spill] sm:$0xff] %v17910_v24  ;;  %v17940_v36 = vld [vmem:[#allocation2 + $0x29] sm:$0xff]  ;;  %v6415_v33 = vpack.c.bf16 %v17693_v30, %v17691_v34  ;;  %v17946_v24 = vld [vmem:[#allocation2 + $0x39] sm:$0xff] }
 0x5e5   : > { %21617 = vst [vmem:[#allocation118_spill] sm:$0xff] %v17912_v46  ;;  %21618 = vst [vmem:[#allocation119_spill] sm:$0xff] %v17916_v28  ;;  %v17944_v46 = vld [vmem:[#allocation2 + $0x31] sm:$0xff]  ;;  %v17948_v54 = vld [vmem:[#allocation2 + $0x41] sm:$0xff] }
 0x5e6   : > { %21619 = vst [vmem:[#allocation120_spill] sm:$0xff] %v17918_v4  ;;  %21620 = vst [vmem:[#allocation121_spill] sm:$0xff] %v17920_v16  ;;  %v17954_v58 = vld [vmem:[#allocation2 + $0x49] sm:$0xff]  ;;  %v17963_v34 = vld [vmem:[#allocation2 + $0x61] sm:$0xff] }
 0x5e7   : > { %21621 = vst [vmem:[#allocation122_spill] sm:$0xff] %v17926_v10  ;;  %21622 = vst [vmem:[#allocation123_spill] sm:$0xff] %v17928_v25  ;;  %v17958_v25 = vld [vmem:[#allocation2 + $0x59] sm:$0xff]  ;;  %v17965_v10 = vld [vmem:[#allocation2 + $0x69] sm:$0xff] }
 0x5e8   : > { %21623 = vst [vmem:[#allocation124_spill] sm:$0xff] %v17930_v43  ;;  %21624 = vst [vmem:[#allocation125_spill] sm:$0xff] %v17938_v52  ;;  %v17956_v43 = vld [vmem:[#allocation2 + $0x51] sm:$0xff]  ;;  %v17974_v49 = vld [vmem:[#allocation2 + $0x79] sm:$0xff] }
 0x5e9   : > { %21625 = vst [vmem:[#allocation126_spill] sm:$0xff] %v17940_v36  ;;  %21626 = vst [vmem:[#allocation127_spill] sm:$0xff] %v17944_v46  ;;  %v17967_v16 = vld [vmem:[#allocation2 + $0x71] sm:$0xff]  ;;  %v17976_v36 = vld [vmem:[#allocation2 + $0x81] sm:$0xff] }
 0x5ea   : > { %21627 = vst [vmem:[#allocation128_spill] sm:$0xff] %v17946_v24  ;;  %21628 = vst [vmem:[#allocation129_spill] sm:$0xff] %v17948_v54  ;;  %v17978_v30 = vld [vmem:[#allocation2 + $0x89] sm:$0xff]  ;;  %v17982_v24 = vld [vmem:[#allocation2 + $0x91] sm:$0xff] }
 0x5eb   : > { %21629 = vst [vmem:[#allocation130_spill] sm:$0xff] %v17954_v58  ;;  %21630 = vst [vmem:[#allocation131_spill] sm:$0xff] %v17956_v43  ;;  %v17984_v46 = vld [vmem:[#allocation2 + $0x99] sm:$0xff]  ;;  %v17986_v52 = vld [vmem:[#allocation2 + $0xa1] sm:$0xff] }
 0x5ec   : > { %21631 = vst [vmem:[#allocation132_spill] sm:$0xff] %v17958_v25  ;;  %vm21632_vm6 = vmmov %vm21545_vm0  ;;  %v17992_v18 = vld [vmem:[#allocation2 + $0xa9] sm:$0xff]  ;;  %v17994_v25 = vld [vmem:[#allocation2 + $0xb1] sm:$0xff] }
 0x5ed   : > { %12217 = vmatmul.mubr.msk.bf16.gmra.mrb[12].mxu1 %vm21632_vm6, %v6415_v33  ;;  %21633 = vst [vmem:[#allocation133_spill] sm:$0xff] %v17963_v34  ;;  %21634 = vst [vmem:[#allocation134_spill] sm:$0xff] %v17965_v10  ;;  %v17996_v43 = vld [vmem:[#allocation2 + $0xb9] sm:$0xff]  ;;  %v18000_v10 = vld [vmem:[#allocation2 + $0xc1] sm:$0xff] }
 0x5ee   : > { %21635 = vst [vmem:[#allocation135_spill] sm:$0xff] %v17967_v16  ;;  %vm21636_vm13 = vmmov %vm21545_vm0  ;;  %v18002_v34 = vld [vmem:[#allocation2 + $0xc9] sm:$0xff]  ;;  %v18004_v58 = vld [vmem:[#allocation2 + $0xd1] sm:$0xff] }
 0x5ef   : > { %12220 = vmatprep.mubr.msk.bf16.mxu1 %vm21636_vm13, %v6416_v40  ;;  %21637 = vst [vmem:[#allocation136_spill] sm:$0xff] %v17974_v49  ;;  %21638 = vst [vmem:[#allocation137_spill] sm:$0xff] %v17976_v36  ;;  %v18012_v36 = vld [vmem:[#allocation2 + $0xe1] sm:$0xff]  ;;  %v18014_v49 = vld [vmem:[#allocation2 + $0xe9] sm:$0xff] }
 0x5f0   : > { %21639 = vst [vmem:[#allocation138_spill] sm:$0xff] %v17978_v30  ;;  %21640 = vst [vmem:[#allocation139_spill] sm:$0xff] %v17982_v24  ;;  %v18010_v30 = vld [vmem:[#allocation2 + $0xd9] sm:$0xff]  ;;  %v18020_v24 = vld [vmem:[#allocation2 + $0xf1] sm:$0xff] }
 0x5f1   : > { %21641 = vst [vmem:[#allocation140_spill] sm:$0xff] %v17984_v46  ;;  %21642 = vst [vmem:[#allocation141_spill] sm:$0xff] %v17986_v52  ;;  %v6417_v46 = vpack.c.bf16 %v17702_v26, %v17700_v42  ;;  %v18022_v16 = vld [vmem:[#allocation2 + $0xf9] sm:$0xff]  ;;  %v18024_v51 = vld [vmem:[#allocation2 + $0x101] sm:$0xff] }
 0x5f2   : > { %21643 = vst [vmem:[#allocation142_spill] sm:$0xff] %v17992_v18  ;;  %21644 = vst [vmem:[#allocation143_spill] sm:$0xff] %v17994_v25  ;;  %v6418_v25 = vpack.c.bf16 %v17706_v41, %v17704_v53  ;;  %v18032_v18 = vld [vmem:[#allocation2 + $0x109] sm:$0xff]  ;;  %v18034_v33 = vld [vmem:[#allocation2 + $0x111] sm:$0xff]  ;;  %v6428_v41 = vpack.c.bf16 %v17792_v29, %v17790_v17 }
 0x5f3   : > { %21645 = vst [vmem:[#allocation144_spill] sm:$0xff] %v17996_v43  ;;  %21646 = vst [vmem:[#allocation145_spill] sm:$0xff] %v18000_v10  ;;  %v18036_v26 = vld [vmem:[#allocation2 + $0x119] sm:$0xff]  ;;  %v18043_v40 = vld [vmem:[#allocation2 + $0x129] sm:$0xff] }
 0x5f4   : > { %21647 = vst [vmem:[#allocation146_spill] sm:$0xff] %v18002_v34  ;;  %21648 = vst [vmem:[#allocation147_spill] sm:$0xff] %v18004_v58  ;;  %v18041_v34 = vld [vmem:[#allocation2 + $0x121] sm:$0xff]  ;;  %v18052_v53 = vld [vmem:[#allocation2 + $0x139] sm:$0xff] }
 0x5f5   : > { %21649 = vst [vmem:[#allocation148_spill] sm:$0xff] %v18010_v30  ;;  %21650 = vst [vmem:[#allocation149_spill] sm:$0xff] %v18012_v36  ;;  %v18045_v30 = vld [vmem:[#allocation2 + $0x131] sm:$0xff]  ;;  %v18056_v42 = vld [vmem:[#allocation2 + $0x149] sm:$0xff] }
 0x5f6   : > { %21651 = vst [vmem:[#allocation150_spill] sm:$0xff] %v18014_v49  ;;  %21652 = vst [vmem:[#allocation151_spill] sm:$0xff] %v18020_v24  ;;  %v18054_v49 = vld [vmem:[#allocation2 + $0x141] sm:$0xff]  ;;  %v18062_v24 = vld [vmem:[#allocation2 + $0x159] sm:$0xff] }
 0x5f7   : > { %21653 = vst [vmem:[#allocation152_spill] sm:$0xff] %v18022_v16  ;;  %21654 = vst [vmem:[#allocation153_spill] sm:$0xff] %v18024_v51  ;;  %v18060_v16 = vld [vmem:[#allocation2 + $0x151] sm:$0xff]  ;;  %v18064_v36 = vld [vmem:[#allocation2 + $0x161] sm:$0xff] }
 0x5f8   : > { %21655 = vst [vmem:[#allocation154_spill] sm:$0xff] %v18032_v18  ;;  %21656 = vst [vmem:[#allocation155_spill] sm:$0xff] %v18034_v33  ;;  %v18070_v43 = vld [vmem:[#allocation2 + $0x169] sm:$0xff]  ;;  %v18074_v33 = vld [vmem:[#allocation2 + $0x179] sm:$0xff]  ;;  %v6420_v18 = vpack.c.bf16 %v17729_v57, %v17723_v55 }
 0x5f9   : > { %21657 = vst [vmem:[#allocation156_spill] sm:$0xff] %v18036_v26  ;;  %vm21658_vm1 = vmmov %vm21545_vm0  ;;  %v18072_v26 = vld [vmem:[#allocation2 + $0x171] sm:$0xff] }
 0x5fa   : > { %12221 = vmatmul.mubr.msk.bf16.gmra.mrb[16].mxu1 %vm21658_vm1, %v6417_v46  ;;  %21659 = vst [vmem:[#allocation157_spill] sm:$0xff] %v18041_v34  ;;  %21660 = vst [vmem:[#allocation158_spill] sm:$0xff] %v18043_v40  ;;  %v18078_v40 = vld [vmem:[#allocation2 + $0x188] sm:$0xff]  ;;  %v18080_v34 = vld [vmem:[#allocation2 + $0x190] sm:$0xff]  ;;  %v6419_v46 = vpack.c.bf16 %v17721_v62, %v17719_v2 }
 0x5fb   : > { %21661 = vst [vmem:[#allocation159_spill] sm:$0xff] %v18045_v30  ;;  %vm21662_vm10 = vmmov %vm21545_vm0  ;;  %v21728_v57 = vld [vmem:[#allocation122_spill] sm:$0xff]  ;;  %v21733_v2 = vld [vmem:[#allocation124_spill] sm:$0xff] }
 0x5fc   : > { %12224 = vmatprep.mubr.msk.bf16.mxu1 %vm21662_vm10, %v6418_v25  ;;  %21663 = vst [vmem:[#allocation160_spill] sm:$0xff] %v18054_v49  ;;  %21664 = vst [vmem:[#allocation161_spill] sm:$0xff] %v18056_v42  ;;  %v18086_v25 = vld [vmem:[#allocation2 + $0x189] sm:$0xff]  ;;  %v6421_v49 = vpack.c.bf16 %v17733_v39, %v17731_v21  ;;  %v21724_v39 = vld [vmem:[#allocation118_spill] sm:$0xff] }
 0x5fd   : > { %21665 = vst [vmem:[#allocation162_spill] sm:$0xff] %v18062_v24  ;;  %21666 = vst [vmem:[#allocation163_spill] sm:$0xff] %v18078_v40  ;;  %v18088_v42 = vld [vmem:[#allocation2 + $0x170] sm:$0xff]  ;;  %v6423_v40 = vpack.c.bf16 %v17751_v8, %v17743_v44  ;;  %v21729_v21 = vld [vmem:[#allocation123_spill] sm:$0xff] }
 0x5fe   : > { %21667 = vst [vmem:[#allocation164_spill] sm:$0xff] %v18080_v34  ;;  %21668 = vst [vmem:[#allocation165_spill] sm:$0xff] %v18086_v25  ;;  %v18096_v24 = vld [vmem:[#allocation2 + $0x191] sm:$0xff]  ;;  %v6422_v34 = vpack.c.bf16 %v17741_v38, %v17739_v32  ;;  %v6352_v32 = vpack.c.bf16 %v17916_v28, %v21724_v39  ;;  %v6354_v62 = vpack.c.bf16 %v21729_v21, %v21728_v57  ;;  %v21738_v21 = vld [vmem:[#allocation127_spill] sm:$0xff] }
 0x5ff   : > { %21669 = vst [vmem:[#allocation166_spill] sm:$0xff] %v18088_v42  ;;  %6281 = vst.msk [vmem:[#allocation2 + $0x1a0] sm:$0xff] %vm21545_vm0, %v18088_v42  ;;  %v18110_v42 = vld [vmem:[#allocation2 + $0x178] sm:$0xff] }
 0x600   : > { %21670 = vst [vmem:[#allocation167_spill] sm:$0xff] %v18096_v24  ;;  %vm21671_vm3 = vmmov %vm21545_vm0  ;;  %v7055_v55 = vld [vmem:[#allocation2 + $0x11] sm:$0xff] }
 0x601   : > { %vm21672_vm9 = vmmov %vm21545_vm0  ;;  %21675 = vst [vmem:[#allocation168_spill] sm:$0xff] %v18110_v42 }
 0x602   : > { %12225 = vmatmul.mubr.msk.bf16.gmra.mrb[20].mxu1 %vm21671_vm3, %v6419_v46  ;;  %vm21673_vm2 = vmmov %vm21545_vm0  ;;  %v6427_v46 = vpack.c.bf16 %v17779_v27, %v17777_v13  ;;  %v21710_v13 = vld [vmem:[#allocation3_spill] sm:$0xff] }
 0x603   : > { %12228 = vmatprep.mubr.msk.bf16.mxu1 %vm21672_vm9, %v6420_v18  ;;  %vm21674_vm6 = vmmov %vm21545_vm0  ;;  %v6424_v18 = vpack.c.bf16 %v17755_v1, %v17753_v3  ;;  %v21715_v1 = vld [vmem:[#allocation74_spill] sm:$0xff]  ;;  %v21720_v3 = vld [vmem:[#allocation115_spill] sm:$0xff] }
 0x604   : > { %vm21676_vm13 = vmmov %vm21545_vm0  ;;  %v6350_v38 = vpack.c.bf16 %v17901_v45, %v21720_v3 }
 0x605   : > { %6282 = vst.msk [vmem:[#allocation2 + $0x1a8] sm:$0xff] %vm21676_vm13, %v18110_v42  ;;  %vm21677_vm1 = vmmov %vm21545_vm0  ;;  %v6285_v42 = vld [vmem:[#allocation2 + $0xf] sm:$0xff] }
 0x606   : > { %vm21678_vm10 = vmmov %vm21545_vm0 }
 0x607   : > { %vm21679_vm3 = vmmov %vm21545_vm0 }
 0x608   : > { %vm21680_vm9 = vmmov %vm21545_vm0 }
 0x609   : > { %vm21683_vm13 = vmmov %vm21545_vm0 }
 0x60a   : > { %12229 = vmatmul.mubr.msk.bf16.gmra.mrb[24].mxu1 %vm21673_vm2, %v6421_v49  ;;  %v6425_v49 = vpack.c.bf16 %v17763_v35, %v17761_v37  ;;  %vm21681_vm2 = vmmov %vm21545_vm0 }
 0x60b   : > { %12232 = vmatprep.mubr.msk.bf16.mxu1 %vm21674_vm6, %v6422_v34  ;;  %v6426_v34 = vpack.c.bf16 %v17775_v14, %v17765_v0  ;;  %vm21682_vm6 = vmmov %vm21545_vm0  ;;  %v21709_v14 = vld [vmem:[#allocation42_spill] sm:$0xff] }
 0x60c   : > { %v6346_v35 = vpack.c.bf16 %v21710_v13, %v21709_v14  ;;  %v21714_v0 = vld [vmem:[#allocation90_spill] sm:$0xff] }
 0x60d   : > { %v6348_v37 = vpack.c.bf16 %v21715_v1, %v21714_v0 }
 0x612   : > { %12233 = vmatmul.mubr.msk.bf16.gmra.mrb[28].mxu1 %vm21677_vm1, %v6423_v40  ;;  %v6429_v40 = vpack.c.bf16 %v17801_v48, %v17794_v12  ;;  %vm21685_vm1 = vmmov %vm21545_vm0  ;;  %v21700_v48 = vld [vmem:[#allocation73_spill] sm:$0xff]  ;;  %v21704_v12 = vld [vmem:[#allocation39_spill] sm:$0xff] }
 0x613   : > { %12236 = vmatprep.mubr.msk.bf16.mxu1 %vm21678_vm10, %v6424_v18  ;;  %v6430_v18 = vpack.c.bf16 %v17805_v7, %v17803_v63  ;;  %vm21686_vm10 = vmmov %vm21545_vm0  ;;  %v21695_v7 = vld [vmem:[#allocation36_spill] sm:$0xff]  ;;  %v6344_v27 = vpack.c.bf16 %v17856_v9, %v21704_v12 }
 0x61a   : > { %12237 = vmatmul.mubr.msk.bf16.gmra.mrb[32].mxu1 %vm21545_vm0, %v6425_v49  ;;  %v18138_v49 = vld [vmem:[#allocation2 + $0x180] sm:$0xff] }
 0x61b   : > { %12240 = vmatprep.mubr.msk.bf16.mxu1 %vm21679_vm3, %v6426_v34  ;;  %21684 = vst [vmem:[#allocation169_spill] sm:$0xff] %v18138_v49  ;;  %v6284_v34 = vld [vmem:[#allocation2 + $0x7] sm:$0xff]  ;;  %v6431_v24 = vpack.c.bf16 %v18138_v49, %v17807_v47  ;;  %vm21687_vm3 = vmmov %vm21545_vm0  ;;  %v6340_v47 = vpack.c.bf16 %v17826_v56, %v21695_v7  ;;  %v21699_v49 = vld [vmem:[#allocation37_spill] sm:$0xff] }
 0x61c   : > { %v6342_v63 = vpack.c.bf16 %v21700_v48, %v21699_v49 }
 0x622   : > { %12241 = vmatmul.mubr.msk.bf16.gmra.mrb[36].mxu1 %vm21680_vm9, %v6427_v46  ;;  %v6332_v46 = vpack.c.bf16 %v6285_v42, %v6284_v34  ;;  %v13566_v42 = vld [vmem:[%s19941_s3 + $0x30] sm:$0xff]   ;;  %v6336_v34 = vpack.c.bf16 %v17670_v15, %v17668_v20  ;;  %vm21688_vm9 = vmmov %vm21545_vm0 }
 0x623   : > { %12244 = vmatprep.mubr.msk.bf16.mxu1 %vm21681_vm2, %v6428_v41  ;;  %v6286_v41 = vld [vmem:[#allocation2 + $0x17] sm:$0xff]  ;;  %vm21689_vm2 = vmmov %vm21545_vm0 }
 0x624   : > { %v6333_v25 = vpack.c.bf16 %v17809_v22, %v6286_v41  ;;  %v21693_v41 = vld [vmem:[#allocation35_spill] sm:$0xff] }
 0x62a   : > { %12245 = vmatmul.mubr.msk.bf16.gmra.mrb[40].mxu1 %vm21682_vm6, %v6429_v40  ;;  %v13565_v40 = vld [vmem:[%s19941_s3 + $0x28] sm:$0xff]   ;;  %vm21691_vm6 = vmmov %vm21545_vm0 }
 0x62b   : > { %12248 = vmatprep.mubr.msk.bf16.mxu1 %vm21683_vm13, %v6430_v18  ;;  %v6334_v18 = vpack.c.bf16 %v17649_v50, %v17782_v5  ;;  %vm21692_vm13 = vmmov %vm21545_vm0 }
 0x632   : > { %12249 = vmatmul.mubr.msk.bf16.gmra.mrb[44].mxu1 %vm21685_vm1, %v6431_v24  ;;  %v6335_v24 = vpack.c.bf16 %v17666_v60, %v17651_v11  ;;  %vm21696_vm1 = vmmov %vm21545_vm0 }
 0x633   : > { %12256 = vmatprep.mubr.msk.bf16.mxu1 %vm21686_vm10, %v6332_v46  ;;  %vm21697_vm10 = vmmov %vm21545_vm0 }
 0x63a   : > { %12257 = vmatmul.mubr.msk.bf16.vlgmr.msra.gmra.mrb[0].mxu1 %vm21545_vm0, %v6333_v25  ;;  %v21690_v25 = vld [vmem:[#allocation79_spill] sm:$0xff] }
 0x63b   : > { %12305 = vmatpush3.bf16.msra.mxu1 %v17711_v31  ;;  %12260 = vmatprep.mubr.msk.bf16.mxu1 %vm21687_vm3, %v6334_v18  ;;  %v6337_v31 = vpack.c.bf16 %v17682_v61, %v17680_v23  ;;  %v6338_v46 = vpack.c.bf16 %v21690_v25, %v17684_v19  ;;  %vm21701_vm3 = vmmov %vm21545_vm0 }
 0x63c   : > { %12306 = vmatprep.subr.bf16.mxu1 %v13565_v40 }
 0x63f   : > { %12307 = vmatpush3.bf16.msra.mxu1 %v13565_v40  ;;  %v21694_v40 = vld [vmem:[#allocation50_spill] sm:$0xff] }
 0x640   : > { %12356 = vmatprep.subr.bf16.mxu1 %v13566_v42  ;;  %v6339_v18 = vpack.c.bf16 %v21694_v40, %v21693_v41 }
 0x642   : > { %12261 = vmatmul.mubr.msk.bf16.gmra.mrb[4].mxu1 %vm21688_vm9, %v6335_v24  ;;  %v21698_v24 = vld [vmem:[#allocation75_spill] sm:$0xff]  ;;  %vm21705_vm9 = vmmov %vm21545_vm0 }
 0x643   : > { %12264 = vmatprep.mubr.msk.bf16.mxu1 %vm21689_vm2, %v6336_v34  ;;  %v6341_v34 = vpack.c.bf16 %v21698_v24, %v17832_v59  ;;  %vm21706_vm2 = vmmov %vm21545_vm0 }
 0x64a   : > { %12265 = vmatmul.mubr.msk.bf16.gmra.mrb[8].mxu1 %vm21691_vm6, %v6337_v31  ;;  %v21702_v31 = vld [vmem:[#allocation38_spill] sm:$0xff]  ;;  %vm21711_vm6 = vmmov %vm21545_vm0 }
 0x64b   : > { %12268 = vmatprep.mubr.msk.bf16.mxu1 %vm21692_vm13, %v6338_v46  ;;  %v21703_v46 = vld [vmem:[#allocation78_spill] sm:$0xff]  ;;  %vm21712_vm13 = vmmov %vm21545_vm0 }
 0x64c   : > { %v6343_v29 = vpack.c.bf16 %v21703_v46, %v21702_v31 }
 0x652   : > { %12269 = vmatmul.mubr.msk.bf16.gmra.mrb[12].mxu1 %vm21696_vm1, %v6339_v18  ;;  %v21708_v18 = vld [vmem:[#allocation40_spill] sm:$0xff]  ;;  %vm21716_vm1 = vmmov %vm21545_vm0 }
 0x653   : > { %12272 = vmatprep.mubr.msk.bf16.mxu1 %vm21697_vm10, %v6340_v47  ;;  %v21707_v47 = vld [vmem:[#allocation76_spill] sm:$0xff]  ;;  %vm21717_vm10 = vmmov %vm21545_vm0 }
 0x654   : > { %v6345_v17 = vpack.c.bf16 %v21708_v18, %v21707_v47 }
 0x65a   : > { %12273 = vmatmul.mubr.msk.bf16.gmra.mrb[16].mxu1 %vm21545_vm0, %v6341_v34 }
 0x65b   : > { %12276 = vmatprep.mubr.msk.bf16.mxu1 %vm21701_vm3, %v6342_v63  ;;  %v21713_v63 = vld [vmem:[#allocation43_spill] sm:$0xff]  ;;  %vm21721_vm3 = vmmov %vm21545_vm0 }
 0x65c   : > { %v6347_v34 = vpack.c.bf16 %v17880_v6, %v21713_v63 }
 0x662   : > { %12277 = vmatmul.mubr.msk.bf16.gmra.mrb[20].mxu1 %vm21705_vm9, %v6343_v29  ;;  %v21718_v29 = vld [vmem:[#allocation113_spill] sm:$0xff]  ;;  %vm21725_vm9 = vmmov %vm21545_vm0 }
 0x663   : > { %12280 = vmatprep.mubr.msk.bf16.mxu1 %vm21706_vm2, %v6344_v27  ;;  %v21719_v27 = vld [vmem:[#allocation114_spill] sm:$0xff]  ;;  %vm21726_vm2 = vmmov %vm21545_vm0 }
 0x664   : > { %v6349_v8 = vpack.c.bf16 %v21719_v27, %v21718_v29 }
 0x66a   : > { %12281 = vmatmul.mubr.msk.bf16.gmra.mrb[24].mxu1 %vm21711_vm6, %v6345_v17  ;;  %v21723_v17 = vld [vmem:[#allocation117_spill] sm:$0xff]  ;;  %vm21730_vm6 = vmmov %vm21545_vm0 }
 0x66b   : > { %12284 = vmatprep.mubr.msk.bf16.mxu1 %vm21712_vm13, %v6346_v35  ;;  %v21722_v35 = vld [vmem:[#allocation116_spill] sm:$0xff]  ;;  %vm21731_vm13 = vmmov %vm21545_vm0 }
 0x66c   : > { %v6351_v44 = vpack.c.bf16 %v21723_v17, %v21722_v35  ;;  %v21754_v17 = vld [vmem:[#allocation139_spill] sm:$0xff] }
 0x672   : > { %12285 = vmatmul.mubr.msk.bf16.gmra.mrb[28].mxu1 %vm21716_vm1, %v6347_v34  ;;  %vm21734_vm1 = vmmov %vm21545_vm0 }
 0x673   : > { %12288 = vmatprep.mubr.msk.bf16.mxu1 %vm21717_vm10, %v6348_v37  ;;  %v21727_v37 = vld [vmem:[#allocation121_spill] sm:$0xff]  ;;  %vm21735_vm10 = vmmov %vm21545_vm0 }
 0x674   : > { %v6353_v34 = vpack.c.bf16 %v21727_v37, %v17918_v4  ;;  %v21736_v37 = vld [vmem:[#allocation125_spill] sm:$0xff] }
 0x67a   : > { %12289 = vmatmul.mubr.msk.bf16.gmra.mrb[32].mxu1 %vm21545_vm0, %v6349_v8  ;;  %v7054_v8 = vld [vmem:[#allocation2 + $0x9] sm:$0xff] }
 0x67b   : > { %12292 = vmatprep.mubr.msk.bf16.mxu1 %vm21721_vm3, %v6350_v38  ;;  %v18216_v38 = vld [vmem:[#allocation2 + $0x17f] sm:$0xff]  ;;  %vm21739_vm3 = vmmov %vm21545_vm0 }
 0x67c   : > { %21732 = vst [vmem:[#allocation79_spill] sm:$0xff] %v18216_v38  ;;  %v6355_v28 = vpack.c.bf16 %v18216_v38, %v21733_v2  ;;  %v21753_v38 = vld [vmem:[#allocation138_spill] sm:$0xff] }
 0x682   : > { %12293 = vmatmul.mubr.msk.bf16.gmra.mrb[36].mxu1 %vm21725_vm9, %v6351_v44  ;;  %v7102_v44 = vpack.c.bf16 %v7055_v55, %v7054_v8  ;;  %v21740_v55 = vld [vmem:[#allocation128_spill] sm:$0xff]  ;;  %vm21743_vm9 = vmmov %vm21545_vm0 }
 0x683   : > { %12296 = vmatprep.mubr.msk.bf16.mxu1 %vm21726_vm2, %v6352_v32  ;;  %v7056_v32 = vld [vmem:[#allocation2 + $0x19] sm:$0xff]  ;;  %v7105_v8 = vpack.c.bf16 %v17948_v54, %v21740_v55  ;;  %vm21744_vm2 = vmmov %vm21545_vm0  ;;  %v21752_v54 = vld [vmem:[#allocation137_spill] sm:$0xff] }
 0x684   : > { %v7103_v4 = vpack.c.bf16 %v21736_v37, %v7056_v32  ;;  %v21742_v32 = vld [vmem:[#allocation131_spill] sm:$0xff] }
 0x68a   : > { %12297 = vmatmul.mubr.msk.bf16.gmra.mrb[40].mxu1 %vm21730_vm6, %v6353_v34  ;;  %v13567_v34 = vld [vmem:[%s19941_s3 + $0x38] sm:$0xff]   ;;  %vm21749_vm6 = vmmov %vm21545_vm0 }
 0x68b   : > { %12300 = vmatprep.mubr.msk.bf16.mxu1 %vm21731_vm13, %v6354_v62  ;;  %v21737_v62 = vld [vmem:[#allocation126_spill] sm:$0xff]  ;;  %vm21750_vm13 = vmmov %vm21545_vm0 }
 0x68c   : > { %v7104_v57 = vpack.c.bf16 %v21738_v21, %v21737_v62  ;;  %v21747_v21 = vld [vmem:[#allocation134_spill] sm:$0xff]  ;;  %v21748_v62 = vld [vmem:[#allocation135_spill] sm:$0xff] }
 0x68d   : > { %v7108_v2 = vpack.c.bf16 %v21748_v62, %v21747_v21 }
 0x692   : > { %12301 = vmatmul.mubr.msk.bf16.gmra.mrb[44].mxu1 %vm21734_vm1, %v6355_v28  ;;  %v13568_v28 = vld [vmem:[%s19941_s3 + $0x40] sm:$0xff]   ;;  %vm21755_vm1 = vmmov %vm21545_vm0 }
 0x693   : > { %12308 = vmatprep.mubr.msk.bf16.mxu1 %vm21735_vm10, %v7102_v44  ;;  %v21741_v44 = vld [vmem:[#allocation130_spill] sm:$0xff]  ;;  %vm21756_vm10 = vmmov %vm21545_vm0 }
 0x694   : > { %v7106_v37 = vpack.c.bf16 %v21742_v32, %v21741_v44  ;;  %v7110_v32 = vpack.c.bf16 %v21754_v17, %v21753_v38  ;;  %v21768_v38 = vld [vmem:[#allocation151_spill] sm:$0xff] }
 0x69a   : > { %12309 = vmatmul.mubr.msk.bf16.vlgmr.msra.gmra.mrb[0].mxu1 %vm21545_vm0, %v7103_v4  ;;  %v21745_v4 = vld [vmem:[#allocation132_spill] sm:$0xff] }
 0x69b   : > { %12357 = vmatpush3.bf16.msra.mxu1 %v13566_v42  ;;  %12312 = vmatprep.mubr.msk.bf16.mxu1 %vm21739_vm3, %v7104_v57  ;;  %v21746_v42 = vld [vmem:[#allocation133_spill] sm:$0xff]  ;;  %vm21760_vm3 = vmmov %vm21545_vm0 }
 0x69c   : > { %12358 = vmatprep.subr.bf16.mxu1 %v13567_v34  ;;  %v7107_v57 = vpack.c.bf16 %v21746_v42, %v21745_v4  ;;  %v21758_v42 = vld [vmem:[#allocation142_spill] sm:$0xff]  ;;  %v21759_v4 = vld [vmem:[#allocation143_spill] sm:$0xff] }
 0x69d   : > { %v7112_v62 = vpack.c.bf16 %v21759_v4, %v21758_v42 }
 0x69f   : > { %12359 = vmatpush3.bf16.msra.mxu1 %v13567_v34  ;;  %v21751_v34 = vld [vmem:[#allocation136_spill] sm:$0xff] }
 0x6a0   : > { %12408 = vmatprep.subr.bf16.mxu1 %v13568_v28  ;;  %v7109_v55 = vpack.c.bf16 %v21752_v54, %v21751_v34  ;;  %v21762_v54 = vld [vmem:[#allocation146_spill] sm:$0xff] }
 0x6a1   : > { %v7114_v17 = vpack.c.bf16 %v18004_v58, %v21762_v54 }
 0x6a2   : > { %12313 = vmatmul.mubr.msk.bf16.gmra.mrb[4].mxu1 %vm21743_vm9, %v7105_v8  ;;  %vm21763_vm9 = vmmov %vm21545_vm0 }
 0x6a3   : > { %12316 = vmatprep.mubr.msk.bf16.mxu1 %vm21744_vm2, %v7106_v37  ;;  %v21757_v37 = vld [vmem:[#allocation140_spill] sm:$0xff]  ;;  %vm21764_vm2 = vmmov %vm21545_vm0 }
 0x6a4   : > { %v7111_v8 = vpack.c.bf16 %v17986_v52, %v21757_v37  ;;  %v21767_v37 = vld [vmem:[#allocation150_spill] sm:$0xff] }
 0x6a5   : > { %v7116_v4 = vpack.c.bf16 %v21768_v38, %v21767_v37 }
 0x6aa   : > { %12317 = vmatmul.mubr.msk.bf16.gmra.mrb[8].mxu1 %vm21749_vm6, %v7107_v57  ;;  %vm21769_vm6 = vmmov %vm21545_vm0 }
 0x6ab   : > { %12320 = vmatprep.mubr.msk.bf16.mxu1 %vm21750_vm13, %v7108_v2  ;;  %v21761_v2 = vld [vmem:[#allocation144_spill] sm:$0xff]  ;;  %vm21770_vm13 = vmmov %vm21545_vm0 }
 0x6ac   : > { %v7113_v57 = vpack.c.bf16 %v18000_v10, %v21761_v2  ;;  %v21772_v10 = vld [vmem:[#allocation154_spill] sm:$0xff]  ;;  %v21773_v2 = vld [vmem:[#allocation155_spill] sm:$0xff] }
 0x6ad   : > { %v7118_v58 = vpack.c.bf16 %v21773_v2, %v21772_v10 }
 0x6b2   : > { %12321 = vmatmul.mubr.msk.bf16.gmra.mrb[12].mxu1 %vm21755_vm1, %v7109_v55  ;;  %v21765_v55 = vld [vmem:[#allocation148_spill] sm:$0xff]  ;;  %vm21774_vm1 = vmmov %vm21545_vm0 }
 0x6b3   : > { %12324 = vmatprep.mubr.msk.bf16.mxu1 %vm21756_vm10, %v7110_v32  ;;  %v21766_v32 = vld [vmem:[#allocation149_spill] sm:$0xff]  ;;  %vm21775_vm10 = vmmov %vm21545_vm0 }
 0x6b4   : > { %v7115_v52 = vpack.c.bf16 %v21766_v32, %v21765_v55  ;;  %v21778_v55 = vld [vmem:[#allocation158_spill] sm:$0xff] }
 0x6b5   : > { %v7120_v38 = vpack.c.bf16 %v18045_v30, %v21778_v55  ;;  %v7124_v30 = vpack.c.bf16 %v18072_v26, %v18070_v43 }
 0x6ba   : > { %12325 = vmatmul.mubr.msk.bf16.gmra.mrb[16].mxu1 %vm21545_vm0, %v7111_v8 }
 0x6bb   : > { %12328 = vmatprep.mubr.msk.bf16.mxu1 %vm21760_vm3, %v7112_v62  ;;  %v21771_v62 = vld [vmem:[#allocation152_spill] sm:$0xff]  ;;  %vm21779_vm3 = vmmov %vm21545_vm0 }
 0x6bc   : > { %v7117_v8 = vpack.c.bf16 %v18024_v51, %v21771_v62  ;;  %v21781_v51 = vld [vmem:[#allocation161_spill] sm:$0xff] }
 0x6bd   : > { %v7122_v2 = vpack.c.bf16 %v18060_v16, %v21781_v51 }
 0x6c2   : > { %12329 = vmatmul.mubr.msk.bf16.gmra.mrb[20].mxu1 %vm21763_vm9, %v7113_v57  ;;  %v21777_v57 = vld [vmem:[#allocation157_spill] sm:$0xff]  ;;  %vm21782_vm9 = vmmov %vm21545_vm0 }
 0x6c3   : > { %12332 = vmatprep.mubr.msk.bf16.mxu1 %vm21764_vm2, %v7114_v17  ;;  %v21776_v17 = vld [vmem:[#allocation156_spill] sm:$0xff]  ;;  %vm21783_vm2 = vmmov %vm21545_vm0 }
 0x6c4   : > { %v7119_v32 = vpack.c.bf16 %v21777_v57, %v21776_v17 }
 0x6ca   : > { %12333 = vmatmul.mubr.msk.bf16.gmra.mrb[24].mxu1 %vm21769_vm6, %v7115_v52  ;;  %v21780_v52 = vld [vmem:[#allocation160_spill] sm:$0xff]  ;;  %vm21785_vm6 = vmmov %vm21545_vm0 }
 0x6cb   : > { %12336 = vmatprep.mubr.msk.bf16.mxu1 %vm21770_vm13, %v7116_v4  ;;  %v7121_v4 = vpack.c.bf16 %v21780_v52, %v18052_v53  ;;  %vm21786_vm13 = vmmov %vm21545_vm0 }
 0x6d2   : > { %12337 = vmatmul.mubr.msk.bf16.gmra.mrb[28].mxu1 %vm21774_vm1, %v7117_v8  ;;  %vm21787_vm1 = vmmov %vm21545_vm0 }
 0x6d3   : > { %12340 = vmatprep.mubr.msk.bf16.mxu1 %vm21775_vm10, %v7118_v58  ;;  %v21784_v58 = vld [vmem:[#allocation162_spill] sm:$0xff]  ;;  %vm21789_vm10 = vmmov %vm21545_vm0 }
 0x6d4   : > { %v7123_v8 = vpack.c.bf16 %v18064_v36, %v21784_v58 }
 0x6da   : > { %12341 = vmatmul.mubr.msk.bf16.gmra.mrb[32].mxu1 %vm21545_vm0, %v7119_v32 }
 0x6db   : > { %12344 = vmatprep.mubr.msk.bf16.mxu1 %vm21779_vm3, %v7120_v38  ;;  %v18293_v38 = vld [vmem:[#allocation2 + $0x181] sm:$0xff]  ;;  %vm21792_vm3 = vmmov %vm21545_vm0 }
 0x6dc   : > { %v7125_v32 = vpack.c.bf16 %v18293_v38, %v18074_v33 }
 0x6e2   : > { %12345 = vmatmul.mubr.msk.bf16.gmra.mrb[36].mxu1 %vm21782_vm9, %v7121_v4  ;;  %v13569_v4 = vld [vmem:[%s19941_s3 + $0x48] sm:$0xff]   ;;  %vm21794_vm9 = vmmov %vm21545_vm0 }
 0x6e3   : > { %12348 = vmatprep.mubr.msk.bf16.mxu1 %vm21783_vm2, %v7122_v2  ;;  %v21788_v2 = vpack.c.bf16 %v17782_v5, %v17809_v22  ;;  %v13570_v22 = vld [vmem:[%s19941_s3 + $0x50] sm:$0xff]   ;;  %v21793_v5 = vpack.c.bf16 %v17680_v23, %v17670_v15  ;;  %vm21796_vm2 = vmmov %vm21545_vm0  ;;  %v21803_v15 = vpack.c.bf16 %v21699_v49, %v21698_v24  ;;  %v21805_v23 = vpack.c.bf16 %v21702_v31, %v21700_v48  ;;  %v21828_v49 = vld [vmem:[#allocation122_spill] sm:$0xff] }
 0x6e4   : > { %v21821_v48 = vld [vmem:[#allocation117_spill] sm:$0xff]  ;;  %v21833_v24 = vld [vmem:[#allocation124_spill] sm:$0xff]  ;;  %v21834_v31 = vld [vmem:[#allocation123_spill] sm:$0xff] }
 0x6ea   : > { %12349 = vmatmul.mubr.msk.bf16.gmra.mrb[40].mxu1 %vm21785_vm6, %v7123_v8  ;;  %v21790_v8 = vpack.c.bf16 %v17651_v11, %v17649_v50  ;;  %v21795_v50 = vpack.c.bf16 %v17684_v19, %v17682_v61  ;;  %v21797_v11 = vpack.c.bf16 %v21693_v41, %v21690_v25  ;;  %vm21798_vm6 = vmmov %vm21545_vm0  ;;  %v21806_v61 = vpack.c.bf16 %v21704_v12, %v21703_v46  ;;  %v21829_v25 = vld [vmem:[#allocation121_spill] sm:$0xff]  ;;  %v18388_v41 = vld [vmem:[#allocation2 + $0x187] sm:$0xff] }
 0x6eb   : > { %12352 = vmatprep.mubr.msk.bf16.mxu1 %vm21786_vm13, %v7124_v30  ;;  %v21791_v30 = vpack.c.bf16 %v17668_v20, %v17666_v60  ;;  %v21799_v60 = vpack.c.bf16 %v21695_v7, %v21694_v40  ;;  %vm21800_vm13 = vmmov %vm21545_vm0  ;;  %v21801_v20 = vpack.c.bf16 %v17832_v59, %v17826_v56  ;;  %v21808_v59 = vpack.c.bf16 %v21707_v47, %v17856_v9  ;;  %v21825_v9 = vld [vmem:[#allocation119_spill] sm:$0xff]  ;;  %v18397_v46 = vld [vmem:[#allocation2 + $0x18f] sm:$0xff] }
 0x6ec   : > { %v21810_v19 = vpack.c.bf16 %v21709_v14, %v21708_v18  ;;  %v21812_v56 = vpack.c.bf16 %v21713_v63, %v21710_v13  ;;  %v21814_v7 = vpack.c.bf16 %v21714_v0, %v17880_v6  ;;  %v21816_v12 = vpack.c.bf16 %v21718_v29, %v21715_v1  ;;  %v21824_v0 = vld [vmem:[#allocation120_spill] sm:$0xff]  ;;  %v18399_v47 = vld [vmem:[#allocation2 + $0x197] sm:$0xff] }
 0x6ed   : > { %v21818_v14 = vpack.c.bf16 %v21720_v3, %v21719_v27  ;;  %v21820_v13 = vpack.c.bf16 %v21722_v35, %v17901_v45  ;;  %v21822_v6 = vpack.c.bf16 %v21724_v39, %v21821_v48  ;;  %v21826_v1 = vpack.c.bf16 %v21824_v0, %v21825_v9  ;;  %v21832_v45 = vld [vmem:[#allocation79_spill] sm:$0xff]  ;;  %v21839_v63 = vld [vmem:[#allocation6_spill] sm:$0xff]  ;;  %v21840_v29 = vld [vmem:[#allocation5_spill] sm:$0xff] }
 0x6ee   : > { %v21830_v3 = vpack.c.bf16 %v21828_v49, %v21829_v25  ;;  %v7557_v40 = vpack.c.bf16 %v18388_v41, %v21832_v45  ;;  %v21835_v39 = vpack.c.bf16 %v21833_v24, %v21834_v31  ;;  %v7558_v18 = vpack.c.bf16 %v18399_v47, %v18397_v46  ;;  %v13571_v35 = vld [vmem:[%s19941_s3 + $0x58] sm:$0xff]   ;;  %v21870_v48 = vld [vmem:[#allocation24_spill] sm:$0xff]  ;;  %v21882_v24 = vld [vmem:[#allocation15_spill] sm:$0xff] }
 0x6ef   : > { %v21841_v27 = vpack.c.bf16 %v21839_v63, %v21840_v29  ;;  %v21874_v9 = vld [vmem:[#allocation28_spill] sm:$0xff]  ;;  %v21877_v25 = vld [vmem:[#allocation86_spill] sm:$0xff] }
 0x6f0   : > { %v21889_v29 = vld [vmem:[#allocation48_spill] sm:$0xff] }
 0x6f2   : > { %12353 = vmatmul.mubr.msk.bf16.gmra.mrb[44].mxu1 %vm21787_vm1, %v7125_v32  ;;  %vm21802_vm1 = vmmov %vm21545_vm0  ;;  %v21844_v32 = vld [vmem:[#allocation9_spill] sm:$0xff] }
 0x6f3   : > { %12360 = vmatprep.mubr.msk.bf16.mxu1 %vm21789_vm10, %v21788_v2  ;;  %vm21804_vm10 = vmmov %vm21545_vm0 }
 0x6fa   : > { %12361 = vmatmul.mubr.msk.bf16.vlgmr.msra.gmra.mrb[0].mxu1 %vm21545_vm0, %v21790_v8  ;;  %v21847_v8 = vld [vmem:[#allocation8_spill] sm:$0xff] }
 0x6fb   : > { %12409 = vmatpush3.bf16.msra.mxu1 %v13568_v28  ;;  %12364 = vmatprep.mubr.msk.bf16.mxu1 %vm21792_vm3, %v21791_v30  ;;  %vm21807_vm3 = vmmov %vm21545_vm0  ;;  %v21843_v28 = vld [vmem:[#allocation7_spill] sm:$0xff] }
 0x6fc   : > { %12410 = vmatprep.subr.bf16.mxu1 %v13569_v4  ;;  %v21845_v2 = vpack.c.bf16 %v21843_v28, %v21844_v32  ;;  %v21893_v28 = vld [vmem:[#allocation92_spill] sm:$0xff] }
 0x6fd   : > { %v21894_v32 = vld [vmem:[#allocation44_spill] sm:$0xff] }
 0x6ff   : > { %12411 = vmatpush3.bf16.msra.mxu1 %v13569_v4  ;;  %v21846_v4 = vld [vmem:[#allocation4_spill] sm:$0xff] }
 0x700   : > { %12460 = vmatprep.subr.bf16.mxu1 %v13570_v22  ;;  %v21848_v30 = vpack.c.bf16 %v21846_v4, %v21847_v8  ;;  %v21897_v4 = vld [vmem:[#allocation84_spill] sm:$0xff]  ;;  %v21898_v8 = vld [vmem:[#allocation45_spill] sm:$0xff] }
 0x702   : > { %12365 = vmatmul.mubr.msk.bf16.gmra.mrb[4].mxu1 %vm21794_vm9, %v21793_v5  ;;  %vm21809_vm9 = vmmov %vm21545_vm0  ;;  %v13572_v5 = vld [vmem:[%s19941_s3 + $0x60] sm:$0xff]  }
 0x703   : > { %12368 = vmatprep.mubr.msk.bf16.mxu1 %vm21796_vm2, %v21795_v50  ;;  %vm21811_vm2 = vmmov %vm21545_vm0  ;;  %v21850_v50 = vld [vmem:[#allocation11_spill] sm:$0xff] }
 0x70a   : > { %12369 = vmatmul.mubr.msk.bf16.gmra.mrb[8].mxu1 %vm21798_vm6, %v21797_v11  ;;  %vm21813_vm6 = vmmov %vm21545_vm0  ;;  %v21851_v11 = vld [vmem:[#allocation10_spill] sm:$0xff] }
 0x70b   : > { %12372 = vmatprep.mubr.msk.bf16.mxu1 %vm21800_vm13, %v21799_v60  ;;  %vm21815_vm13 = vmmov %vm21545_vm0  ;;  %v21852_v60 = vpack.c.bf16 %v21850_v50, %v21851_v11  ;;  %v21901_v50 = vld [vmem:[#allocation18_spill] sm:$0xff] }
 0x70c   : > { %v21902_v11 = vld [vmem:[#allocation46_spill] sm:$0xff] }
 0x712   : > { %12373 = vmatmul.mubr.msk.bf16.gmra.mrb[12].mxu1 %vm21802_vm1, %v21801_v20  ;;  %vm21817_vm1 = vmmov %vm21545_vm0  ;;  %v21854_v20 = vld [vmem:[#allocation13_spill] sm:$0xff] }
 0x713   : > { %12376 = vmatprep.mubr.msk.bf16.mxu1 %vm21804_vm10, %v21803_v15  ;;  %vm21819_vm10 = vmmov %vm21545_vm0  ;;  %v21855_v15 = vld [vmem:[#allocation12_spill] sm:$0xff] }
 0x71a   : > { %12377 = vmatmul.mubr.msk.bf16.gmra.mrb[16].mxu1 %vm21545_vm0, %v21805_v23  ;;  %v21858_v23 = vld [vmem:[#allocation16_spill] sm:$0xff] }
 0x71b   : > { %12380 = vmatprep.mubr.msk.bf16.mxu1 %vm21807_vm3, %v21806_v61  ;;  %vm21823_vm3 = vmmov %vm21545_vm0  ;;  %v21859_v61 = vld [vmem:[#allocation14_spill] sm:$0xff] }
 0x722   : > { %12381 = vmatmul.mubr.msk.bf16.gmra.mrb[20].mxu1 %vm21809_vm9, %v21808_v59  ;;  %vm21827_vm9 = vmmov %vm21545_vm0  ;;  %v21860_v59 = vpack.c.bf16 %v21858_v23, %v21859_v61  ;;  %v21908_v23 = vld [vmem:[#allocation29_spill] sm:$0xff]  ;;  %v21909_v61 = vld [vmem:[#allocation27_spill] sm:$0xff] }
 0x723   : > { %12384 = vmatprep.mubr.msk.bf16.mxu1 %vm21811_vm2, %v21810_v19  ;;  %vm21831_vm2 = vmmov %vm21545_vm0  ;;  %v21862_v19 = vld [vmem:[#allocation19_spill] sm:$0xff] }
 0x72a   : > { %12385 = vmatmul.mubr.msk.bf16.gmra.mrb[24].mxu1 %vm21813_vm6, %v21812_v56  ;;  %vm21836_vm6 = vmmov %vm21545_vm0  ;;  %v21863_v56 = vld [vmem:[#allocation17_spill] sm:$0xff] }
 0x72b   : > { %12388 = vmatprep.mubr.msk.bf16.mxu1 %vm21815_vm13, %v21814_v7  ;;  %vm21837_vm13 = vmmov %vm21545_vm0  ;;  %v21864_v7 = vpack.c.bf16 %v21862_v19, %v21863_v56  ;;  %v21912_v19 = vld [vmem:[#allocation69_spill] sm:$0xff]  ;;  %v21913_v56 = vld [vmem:[#allocation30_spill] sm:$0xff] }
 0x732   : > { %12389 = vmatmul.mubr.msk.bf16.gmra.mrb[28].mxu1 %vm21817_vm1, %v21816_v12  ;;  %vm21838_vm1 = vmmov %vm21545_vm0  ;;  %v21866_v12 = vld [vmem:[#allocation22_spill] sm:$0xff] }
 0x733   : > { %12392 = vmatprep.mubr.msk.bf16.mxu1 %vm21819_vm10, %v21818_v14  ;;  %vm21842_vm10 = vmmov %vm21545_vm0  ;;  %v21867_v14 = vld [vmem:[#allocation20_spill] sm:$0xff] }
 0x73a   : > { %12393 = vmatmul.mubr.msk.bf16.gmra.mrb[32].mxu1 %vm21545_vm0, %v21820_v13  ;;  %v21868_v13 = vpack.c.bf16 %v21866_v12, %v21867_v14  ;;  %v21916_v12 = vld [vmem:[#allocation33_spill] sm:$0xff]  ;;  %v21917_v14 = vld [vmem:[#allocation32_spill] sm:$0xff] }
 0x73b   : > { %12396 = vmatprep.mubr.msk.bf16.mxu1 %vm21823_vm3, %v21822_v6  ;;  %vm21849_vm3 = vmmov %vm21545_vm0  ;;  %v21871_v6 = vld [vmem:[#allocation23_spill] sm:$0xff] }
 0x73c   : > { %v21872_v0 = vpack.c.bf16 %v21870_v48, %v21871_v6  ;;  %v21920_v48 = vld [vmem:[#allocation169_spill] sm:$0xff]  ;;  %v21921_v6 = vld [vmem:[#allocation163_spill] sm:$0xff] }
 0x742   : > { %12397 = vmatmul.mubr.msk.bf16.gmra.mrb[36].mxu1 %vm21827_vm9, %v21826_v1  ;;  %vm21853_vm9 = vmmov %vm21545_vm0  ;;  %v21875_v1 = vld [vmem:[#allocation25_spill] sm:$0xff] }
 0x743   : > { %12400 = vmatprep.mubr.msk.bf16.mxu1 %vm21831_vm2, %v21830_v3  ;;  %vm21857_vm2 = vmmov %vm21545_vm0  ;;  %v21876_v49 = vpack.c.bf16 %v21874_v9, %v21875_v1  ;;  %v21878_v3 = vld [vmem:[#allocation31_spill] sm:$0xff]  ;;  %v21922_v9 = vld [vmem:[#allocation34_spill] sm:$0xff] }
 0x744   : > { %v21879_v45 = vpack.c.bf16 %v21877_v25, %v21878_v3  ;;  %v21923_v1 = vld [vmem:[#allocation47_spill] sm:$0xff]  ;;  %v18501_v25 = vld [vmem:[#allocation2 + $0x198] sm:$0xff]  ;;  %v21927_v3 = vld [vmem:[#allocation164_spill] sm:$0xff] }
 0x74a   : > { %12401 = vmatmul.mubr.msk.bf16.gmra.mrb[40].mxu1 %vm21836_vm6, %v21835_v39  ;;  %vm21861_vm6 = vmmov %vm21545_vm0  ;;  %v21885_v39 = vld [vmem:[#allocation52_spill] sm:$0xff] }
 0x74b   : > { %12404 = vmatprep.mubr.msk.bf16.mxu1 %vm21837_vm13, %v7557_v40  ;;  %vm21865_vm13 = vmmov %vm21545_vm0  ;;  %v21881_v40 = vld [vmem:[#allocation83_spill] sm:$0xff] }
 0x74c   : > { %v21883_v31 = vpack.c.bf16 %v21881_v40, %v21882_v24  ;;  %v21929_v40 = vld [vmem:[#allocation126_spill] sm:$0xff]  ;;  %v21930_v24 = vld [vmem:[#allocation125_spill] sm:$0xff] }
 0x752   : > { %12405 = vmatmul.mubr.msk.bf16.gmra.mrb[44].mxu1 %vm21838_vm1, %v7558_v18  ;;  %vm21869_vm1 = vmmov %vm21545_vm0  ;;  %v21886_v18 = vld [vmem:[#allocation41_spill] sm:$0xff] }
 0x753   : > { %12412 = vmatprep.mubr.msk.bf16.mxu1 %vm21842_vm10, %v21841_v27  ;;  %vm21873_vm10 = vmmov %vm21545_vm0  ;;  %v21887_v63 = vpack.c.bf16 %v21885_v39, %v21886_v18  ;;  %v21890_v27 = vld [vmem:[#allocation91_spill] sm:$0xff]  ;;  %v13573_v39 = vld [vmem:[%s19941_s3 + $0x68] sm:$0xff]  }
 0x754   : > { %v21933_v18 = vld [vmem:[#allocation128_spill] sm:$0xff] }
 0x75a   : > { %12413 = vmatmul.mubr.msk.bf16.vlgmr.msra.gmra.mrb[0].mxu1 %vm21545_vm0, %v21845_v2  ;;  %v21895_v2 = vpack.c.bf16 %v21893_v28, %v21894_v32  ;;  %v13574_v28 = vld [vmem:[%s19941_s3 + $0x70] sm:$0xff]   ;;  %v21939_v32 = vld [vmem:[#allocation132_spill] sm:$0xff] }
 0x75b   : > { %12461 = vmatpush3.bf16.msra.mxu1 %v13570_v22  ;;  %12416 = vmatprep.mubr.msk.bf16.mxu1 %vm21849_vm3, %v21848_v30  ;;  %v21856_v22 = vpack.c.bf16 %v21854_v20, %v21855_v15  ;;  %vm21880_vm3 = vmmov %vm21545_vm0  ;;  %v21899_v30 = vpack.c.bf16 %v21897_v4, %v21898_v8  ;;  %v21905_v20 = vld [vmem:[#allocation26_spill] sm:$0xff]  ;;  %v21906_v15 = vld [vmem:[#allocation21_spill] sm:$0xff] }
 0x75c   : > { %12462 = vmatprep.subr.bf16.mxu1 %v13571_v35  ;;  %v21943_v8 = vld [vmem:[#allocation133_spill] sm:$0xff] }
 0x75f   : > { %12463 = vmatpush3.bf16.msra.mxu1 %v13571_v35  ;;  %v21891_v35 = vpack.c.bf16 %v21889_v29, %v21890_v27  ;;  %v21936_v27 = vld [vmem:[#allocation129_spill] sm:$0xff] }
 0x760   : > { %12512 = vmatprep.subr.bf16.mxu1 %v13572_v5 }
 0x762   : > { %12417 = vmatmul.mubr.msk.bf16.gmra.mrb[4].mxu1 %vm21853_vm9, %v21852_v60  ;;  %vm21884_vm9 = vmmov %vm21545_vm0  ;;  %v21903_v60 = vpack.c.bf16 %v21901_v50, %v21902_v11  ;;  %v21949_v50 = vld [vmem:[#allocation138_spill] sm:$0xff]  ;;  %v21950_v11 = vld [vmem:[#allocation137_spill] sm:$0xff] }
 0x763   : > { %12420 = vmatprep.mubr.msk.bf16.mxu1 %vm21857_vm2, %v21856_v22  ;;  %vm21888_vm2 = vmmov %vm21545_vm0  ;;  %v21907_v22 = vpack.c.bf16 %v21905_v20, %v21906_v15  ;;  %v21953_v20 = vld [vmem:[#allocation140_spill] sm:$0xff]  ;;  %v21954_v15 = vld [vmem:[#allocation139_spill] sm:$0xff] }
 0x76a   : > { %12421 = vmatmul.mubr.msk.bf16.gmra.mrb[8].mxu1 %vm21861_vm6, %v21860_v59  ;;  %vm21892_vm6 = vmmov %vm21545_vm0  ;;  %v21910_v59 = vpack.c.bf16 %v21908_v23, %v21909_v61  ;;  %v21957_v23 = vld [vmem:[#allocation141_spill] sm:$0xff]  ;;  %v21960_v61 = vld [vmem:[#allocation144_spill] sm:$0xff] }
 0x76b   : > { %12424 = vmatprep.mubr.msk.bf16.mxu1 %vm21865_vm13, %v21864_v7  ;;  %vm21896_vm13 = vmmov %vm21545_vm0  ;;  %v21914_v7 = vpack.c.bf16 %v21912_v19, %v21913_v56  ;;  %v21963_v19 = vld [vmem:[#allocation145_spill] sm:$0xff] }
 0x76c   : > { %v21964_v56 = vpack.c.bf16 %v21762_v54, %v21963_v19 }
 0x772   : > { %12425 = vmatmul.mubr.msk.bf16.gmra.mrb[12].mxu1 %vm21869_vm1, %v21868_v13  ;;  %vm21900_vm1 = vmmov %vm21545_vm0  ;;  %v21918_v13 = vpack.c.bf16 %v21916_v12, %v21917_v14  ;;  %v21967_v12 = vld [vmem:[#allocation147_spill] sm:$0xff] }
 0x773   : > { %12428 = vmatprep.mubr.msk.bf16.mxu1 %vm21873_vm10, %v21872_v0  ;;  %vm21904_vm10 = vmmov %vm21545_vm0  ;;  %v7990_v0 = vpack.c.bf16 %v21921_v6, %v21920_v48  ;;  %v21973_v48 = vld [vmem:[#allocation151_spill] sm:$0xff] }
 0x77a   : > { %12429 = vmatmul.mubr.msk.bf16.gmra.mrb[16].mxu1 %vm21545_vm0, %v21876_v49  ;;  %v21924_v49 = vpack.c.bf16 %v21922_v9, %v21923_v1  ;;  %v21976_v9 = vld [vmem:[#allocation153_spill] sm:$0xff]  ;;  %v21979_v1 = vld [vmem:[#allocation155_spill] sm:$0xff] }
 0x77b   : > { %12432 = vmatprep.mubr.msk.bf16.mxu1 %vm21880_vm3, %v21879_v45  ;;  %vm21911_vm3 = vmmov %vm21545_vm0  ;;  %v7991_v45 = vpack.c.bf16 %v18501_v25, %v21927_v3  ;;  %v21977_v54 = vpack.c.bf16 %v21772_v10, %v21976_v9  ;;  %v21986_v10 = vpack.c.bf16 %v21781_v51, %v21780_v52  ;;  %v18603_v51 = vld [vmem:[#allocation2 + $0x199] sm:$0xff]  ;;  %v8813_v9 = vld [vmem:[#allocation2 + $0x10f] sm:$0xff] }
 0x77c   : > { %v8787_v52 = vld [vmem:[#allocation2 + $0x3f] sm:$0xff] }
 0x782   : > { %12433 = vmatmul.mubr.msk.bf16.gmra.mrb[20].mxu1 %vm21884_vm9, %v21883_v31  ;;  %vm21915_vm9 = vmmov %vm21545_vm0  ;;  %v21931_v31 = vpack.c.bf16 %v21929_v40, %v21930_v24  ;;  %v21993_v40 = vpack.c.bf16 %v18074_v33, %v18072_v26  ;;  %v8791_v26 = vld [vmem:[#allocation2 + $0x5f] sm:$0xff] }
 0x783   : > { %12436 = vmatprep.mubr.msk.bf16.mxu1 %vm21888_vm2, %v21887_v63  ;;  %vm21919_vm2 = vmmov %vm21545_vm0  ;;  %v21934_v63 = vld [vmem:[#allocation127_spill] sm:$0xff] }
 0x784   : > { %v21935_v29 = vpack.c.bf16 %v21933_v18, %v21934_v63  ;;  %v18617_v63 = vld [vmem:[%s19941_s3 + $0x80] sm:$0xff]  }
 0x78a   : > { %12437 = vmatmul.mubr.msk.bf16.gmra.mrb[24].mxu1 %vm21892_vm6, %v21891_v35  ;;  %vm21925_vm6 = vmmov %vm21545_vm0  ;;  %v21937_v35 = vpack.c.bf16 %v21741_v44, %v21936_v27  ;;  %v21946_v44 = vld [vmem:[#allocation135_spill] sm:$0xff]  ;;  %v8793_v27 = vld [vmem:[#allocation2 + $0x6f] sm:$0xff] }
 0x78b   : > { %12440 = vmatprep.mubr.msk.bf16.mxu1 %vm21896_vm13, %v21895_v2  ;;  %vm21926_vm13 = vmmov %vm21545_vm0  ;;  %v21940_v2 = vld [vmem:[#allocation131_spill] sm:$0xff] }
 0x78c   : > { %v21941_v4 = vpack.c.bf16 %v21939_v32, %v21940_v2  ;;  %v8795_v32 = vld [vmem:[#allocation2 + $0x7f] sm:$0xff] }
 0x792   : > { %12441 = vmatmul.mubr.msk.bf16.gmra.mrb[28].mxu1 %vm21900_vm1, %v21899_v30  ;;  %vm21928_vm1 = vmmov %vm21545_vm0  ;;  %v21947_v30 = vpack.c.bf16 %v21751_v34, %v21946_v44  ;;  %v8799_v44 = vld [vmem:[#allocation2 + $0x9f] sm:$0xff] }
 0x793   : > { %12444 = vmatprep.mubr.msk.bf16.mxu1 %vm21904_vm10, %v21903_v60  ;;  %vm21932_vm10 = vmmov %vm21545_vm0  ;;  %v21951_v60 = vpack.c.bf16 %v21949_v50, %v21950_v11  ;;  %v8800_v11 = vld [vmem:[#allocation2 + $0xa7] sm:$0xff] }
 0x79a   : > { %12445 = vmatmul.mubr.msk.bf16.gmra.mrb[32].mxu1 %vm21545_vm0, %v21907_v22  ;;  %v21955_v22 = vpack.c.bf16 %v21953_v20, %v21954_v15  ;;  %v8802_v20 = vld [vmem:[#allocation2 + $0xb7] sm:$0xff]  ;;  %v8803_v15 = vld [vmem:[#allocation2 + $0xbf] sm:$0xff] }
 0x79b   : > { %12448 = vmatprep.mubr.msk.bf16.mxu1 %vm21911_vm3, %v21910_v59  ;;  %vm21938_vm3 = vmmov %vm21545_vm0  ;;  %v21961_v59 = vld [vmem:[#allocation143_spill] sm:$0xff] }
 0x79c   : > { %v21962_v34 = vpack.c.bf16 %v21960_v61, %v21961_v59  ;;  %v8805_v61 = vld [vmem:[#allocation2 + $0xcf] sm:$0xff]  ;;  %v8806_v59 = vld [vmem:[#allocation2 + $0xd7] sm:$0xff] }
 0x7a2   : > { %12449 = vmatmul.mubr.msk.bf16.gmra.mrb[36].mxu1 %vm21915_vm9, %v21914_v7  ;;  %vm21942_vm9 = vmmov %vm21545_vm0  ;;  %v21966_v7 = vld [vmem:[#allocation148_spill] sm:$0xff] }
 0x7a3   : > { %12452 = vmatprep.mubr.msk.bf16.mxu1 %vm21919_vm2, %v21918_v13  ;;  %vm21945_vm2 = vmmov %vm21545_vm0  ;;  %v21968_v14 = vpack.c.bf16 %v21966_v7, %v21967_v12  ;;  %v21970_v13 = vld [vmem:[#allocation149_spill] sm:$0xff]  ;;  %v8808_v7 = vld [vmem:[#allocation2 + $0xe7] sm:$0xff] }
 0x7a4   : > { %v8809_v12 = vld [vmem:[#allocation2 + $0xef] sm:$0xff] }
 0x7aa   : > { %12453 = vmatmul.mubr.msk.bf16.gmra.mrb[40].mxu1 %vm21925_vm6, %v21924_v49  ;;  %vm21948_vm6 = vmmov %vm21545_vm0  ;;  %v21980_v49 = vpack.c.bf16 %v21776_v17, %v21979_v1  ;;  %v21988_v17 = vpack.c.bf16 %v21784_v58, %v18060_v16  ;;  %v8786_v16 = vld [vmem:[#allocation2 + $0x37] sm:$0xff]  ;;  %v21996_v58 = vld [vmem:[#allocation167_spill] sm:$0xff] }
 0x7ab   : > { %12456 = vmatprep.mubr.msk.bf16.mxu1 %vm21926_vm13, %v7990_v0  ;;  %vm21952_vm13 = vmmov %vm21545_vm0  ;;  %v21974_v0 = vpack.c.bf16 %v21771_v62, %v21973_v48  ;;  %v8424_v24 = vpack.c.bf16 %v18603_v51, %v21996_v58  ;;  %v8815_v1 = vld [vmem:[#allocation2 + $0x11f] sm:$0xff] }
 0x7b2   : > { %12457 = vmatmul.mubr.msk.bf16.gmra.mrb[44].mxu1 %vm21928_vm1, %v7991_v45  ;;  %vm21956_vm1 = vmmov %vm21545_vm0  ;;  %v21984_v45 = vld [vmem:[#allocation159_spill] sm:$0xff] }
 0x7b3   : > { %12464 = vmatprep.mubr.msk.bf16.mxu1 %vm21932_vm10, %v21931_v31  ;;  %vm21959_vm10 = vmmov %vm21545_vm0  ;;  %v21985_v62 = vpack.c.bf16 %v18052_v53, %v21984_v45  ;;  %v8790_v31 = vld [vmem:[#allocation2 + $0x57] sm:$0xff]  ;;  %v8816_v45 = vld [vmem:[#allocation2 + $0x127] sm:$0xff] }
 0x7b4   : > { %v8836_v18 = vpack.c.bf16 %v8791_v26, %v8790_v31  ;;  %v8825_v31 = vld [vmem:[#allocation2 + $0x16f] sm:$0xff]  ;;  %v8826_v26 = vld [vmem:[#allocation2 + $0x177] sm:$0xff] }
 0x7ba   : > { %12465 = vmatmul.mubr.msk.bf16.vlgmr.msra.gmra.mrb[0].mxu1 %vm21545_vm0, %v21935_v29  ;;  %v8792_v29 = vld [vmem:[#allocation2 + $0x67] sm:$0xff] }
 0x7bb   : > { %12513 = vmatpush3.bf16.msra.mxu1 %v13572_v5  ;;  %12468 = vmatprep.mubr.msk.bf16.mxu1 %vm21938_vm3, %v21937_v35  ;;  %v21944_v5 = vpack.c.bf16 %v21747_v21, %v21943_v8  ;;  %v21958_v21 = vpack.c.bf16 %v21758_v42, %v21957_v23  ;;  %vm21965_vm3 = vmmov %vm21545_vm0  ;;  %v21971_v42 = vpack.c.bf16 %v21767_v37, %v21970_v13  ;;  %v8794_v35 = vld [vmem:[#allocation2 + $0x77] sm:$0xff]  ;;  %v8797_v8 = vld [vmem:[#allocation2 + $0x8f] sm:$0xff] }
 0x7bc   : > { %12514 = vmatprep.subr.bf16.mxu1 %v13573_v39  ;;  %v21982_v37 = vpack.c.bf16 %v21778_v55, %v21777_v57  ;;  %v21990_v55 = vpack.c.bf16 %v18070_v43, %v18064_v36  ;;  %v21992_v57 = vld [vmem:[#allocation165_spill] sm:$0xff]  ;;  %v8834_v43 = vpack.c.bf16 %v8787_v52, %v8786_v16  ;;  %v8788_v36 = vld [vmem:[#allocation2 + $0x47] sm:$0xff]  ;;  %v8837_v2 = vpack.c.bf16 %v8793_v27, %v8792_v29  ;;  %v8811_v13 = vld [vmem:[#allocation2 + $0xff] sm:$0xff] }
 0x7bd   : > { %v8423_v53 = vpack.c.bf16 %v21992_v57, %v18293_v38  ;;  %v8789_v38 = vld [vmem:[#allocation2 + $0x4f] sm:$0xff]  ;;  %v8842_v23 = vpack.c.bf16 %v8803_v15, %v8802_v20  ;;  %v8822_v52 = vld [vmem:[#allocation2 + $0x157] sm:$0xff]  ;;  %v8831_v29 = vld [vmem:[#allocation2 + $0x19f] sm:$0xff]  ;;  %v8855_v27 = vpack.c.bf16 %v18397_v46, %v18388_v41 }
 0x7be   : > { %v8835_v33 = vpack.c.bf16 %v8789_v38, %v8788_v36  ;;  %v8821_v16 = vld [vmem:[#allocation2 + $0x14f] sm:$0xff]  ;;  %v8824_v38 = vld [vmem:[#allocation2 + $0x167] sm:$0xff]  ;;  %v9227_v15 = vld [vmem:[#allocation2 + $0x78] sm:$0xff] }
 0x7bf   : > { %12515 = vmatpush3.bf16.msra.mxu1 %v13573_v39  ;;  %v13575_v39 = vld [vmem:[%s19941_s3 + $0x78] sm:$0xff]   ;;  %v9224_v41 = vld [vmem:[#allocation2 + $0x60] sm:$0xff]  ;;  %v9226_v20 = vld [vmem:[#allocation2 + $0x70] sm:$0xff] }
 0x7c0   : > { %12564 = vmatprep.subr.bf16.mxu1 %v13574_v28 }
 0x7c2   : > { %12469 = vmatmul.mubr.msk.bf16.gmra.mrb[4].mxu1 %vm21942_vm9, %v21941_v4  ;;  %vm21969_vm9 = vmmov %vm21545_vm0  ;;  %v8838_v4 = vpack.c.bf16 %v8795_v32, %v8794_v35  ;;  %v8856_v35 = vpack.c.bf16 %v8831_v29, %v18399_v47  ;;  %v8832_v32 = vld [vmem:[#allocation2 + $0x1a7] sm:$0xff] }
 0x7c3   : > { %12472 = vmatprep.mubr.msk.bf16.mxu1 %vm21945_vm2, %v21944_v5  ;;  %vm21972_vm2 = vmmov %vm21545_vm0  ;;  %v8798_v5 = vld [vmem:[#allocation2 + $0x97] sm:$0xff]  ;;  %v13577_v47 = vld [vmem:[%s19941_s3 + $0x88] sm:$0xff]  }
 0x7c4   : > { %v8840_v50 = vpack.c.bf16 %v8799_v44, %v8798_v5  ;;  %v9221_v44 = vld [vmem:[#allocation2 + $0x48] sm:$0xff] }
 0x7c5   : > { %v9253_v29 = vld [vmem:[#allocation2 + $0x148] sm:$0xff] }
 0x7ca   : > { %12473 = vmatmul.mubr.msk.bf16.gmra.mrb[8].mxu1 %vm21948_vm6, %v21947_v30  ;;  %vm21975_vm6 = vmmov %vm21545_vm0 }
 0x7cb   : > { %12476 = vmatprep.mubr.msk.bf16.mxu1 %vm21952_vm13, %v21951_v60  ;;  %vm21978_vm13 = vmmov %vm21545_vm0  ;;  %v8801_v60 = vld [vmem:[#allocation2 + $0xaf] sm:$0xff] }
 0x7d2   : > { %12477 = vmatmul.mubr.msk.bf16.gmra.mrb[12].mxu1 %vm21956_vm1, %v21955_v22  ;;  %vm21981_vm1 = vmmov %vm21545_vm0  ;;  %v8841_v22 = vpack.c.bf16 %v8801_v60, %v8800_v11  ;;  %v9225_v60 = vld [vmem:[#allocation2 + $0x68] sm:$0xff] }
 0x7d3   : > { %12480 = vmatprep.mubr.msk.bf16.mxu1 %vm21959_vm10, %v21958_v21  ;;  %vm21983_vm10 = vmmov %vm21545_vm0  ;;  %v8804_v21 = vld [vmem:[#allocation2 + $0xc7] sm:$0xff] }
 0x7d4   : > { %v8843_v19 = vpack.c.bf16 %v8805_v61, %v8804_v21  ;;  %v9229_v61 = vld [vmem:[#allocation2 + $0x88] sm:$0xff] }
 0x7da   : > { %12481 = vmatmul.mubr.msk.bf16.gmra.mrb[16].mxu1 %vm21545_vm0, %v21962_v34  ;;  %v8807_v34 = vld [vmem:[#allocation2 + $0xdf] sm:$0xff] }
 0x7db   : > { %12484 = vmatprep.mubr.msk.bf16.mxu1 %vm21965_vm3, %v21964_v56  ;;  %vm21987_vm3 = vmmov %vm21545_vm0  ;;  %v8844_v56 = vpack.c.bf16 %v8807_v34, %v8806_v59  ;;  %v9230_v59 = vld [vmem:[#allocation2 + $0x90] sm:$0xff]  ;;  %v9231_v34 = vld [vmem:[#allocation2 + $0x98] sm:$0xff] }
 0x7e2   : > { %12485 = vmatmul.mubr.msk.bf16.gmra.mrb[20].mxu1 %vm21969_vm9, %v21968_v14  ;;  %vm21989_vm9 = vmmov %vm21545_vm0  ;;  %v8810_v14 = vld [vmem:[#allocation2 + $0xf7] sm:$0xff] }
 0x7e3   : > { %12488 = vmatprep.mubr.msk.bf16.mxu1 %vm21972_vm2, %v21971_v42  ;;  %vm21991_vm2 = vmmov %vm21545_vm0  ;;  %v8845_v42 = vpack.c.bf16 %v8809_v12, %v8808_v7  ;;  %v8846_v48 = vpack.c.bf16 %v8811_v13, %v8810_v14  ;;  %v9233_v7 = vld [vmem:[#allocation2 + $0xa8] sm:$0xff]  ;;  %v9234_v12 = vld [vmem:[#allocation2 + $0xb0] sm:$0xff] }
 0x7e4   : > { %v9235_v14 = vld [vmem:[#allocation2 + $0xb8] sm:$0xff]  ;;  %v9236_v13 = vld [vmem:[#allocation2 + $0xc0] sm:$0xff] }
 0x7ea   : > { %12489 = vmatmul.mubr.msk.bf16.gmra.mrb[24].mxu1 %vm21975_vm6, %v21974_v0  ;;  %vm21994_vm6 = vmmov %vm21545_vm0  ;;  %v8812_v0 = vld [vmem:[#allocation2 + $0x107] sm:$0xff] }
 0x7eb   : > { %12492 = vmatprep.mubr.msk.bf16.mxu1 %vm21978_vm13, %v21977_v54  ;;  %vm21995_vm13 = vmmov %vm21545_vm0  ;;  %v8814_v54 = vld [vmem:[#allocation2 + $0x117] sm:$0xff] }
 0x7f2   : > { %12493 = vmatmul.mubr.msk.bf16.gmra.mrb[28].mxu1 %vm21981_vm1, %v21980_v49  ;;  %vm21997_vm1 = vmmov %vm21545_vm0  ;;  %v8847_v49 = vpack.c.bf16 %v8813_v9, %v8812_v0  ;;  %v9237_v0 = vld [vmem:[#allocation2 + $0xc8] sm:$0xff]  ;;  %v9238_v9 = vld [vmem:[#allocation2 + $0xd0] sm:$0xff] }
 0x7f3   : > { %12496 = vmatprep.mubr.msk.bf16.mxu1 %vm21983_vm10, %v21982_v37  ;;  %vm21998_vm10 = vmmov %vm21545_vm0  ;;  %v8848_v37 = vpack.c.bf16 %v8815_v1, %v8814_v54  ;;  %v9239_v54 = vld [vmem:[#allocation2 + $0xd8] sm:$0xff]  ;;  %v9240_v1 = vld [vmem:[#allocation2 + $0xe0] sm:$0xff] }
 0x7fa   : > { %12497 = vmatmul.mubr.msk.bf16.gmra.mrb[32].mxu1 %vm21545_vm0, %v21985_v62  ;;  %v8817_v62 = vld [vmem:[#allocation2 + $0x12f] sm:$0xff] }
 0x7fb   : > { %12500 = vmatprep.mubr.msk.bf16.mxu1 %vm21987_vm3, %v21986_v10  ;;  %vm21999_vm3 = vmmov %vm21545_vm0  ;;  %v8818_v10 = vld [vmem:[#allocation2 + $0x137] sm:$0xff] }
 0x802   : > { %12501 = vmatmul.mubr.msk.bf16.gmra.mrb[36].mxu1 %vm21989_vm9, %v21988_v17  ;;  %vm22000_vm9 = vmmov %vm21545_vm0  ;;  %v8819_v17 = vld [vmem:[#allocation2 + $0x13f] sm:$0xff] }
 0x803   : > { %12504 = vmatprep.mubr.msk.bf16.mxu1 %vm21991_vm2, %v21990_v55  ;;  %vm22001_vm2 = vmmov %vm21545_vm0  ;;  %v8849_v55 = vpack.c.bf16 %v8817_v62, %v8816_v45  ;;  %v9241_v45 = vld [vmem:[#allocation2 + $0xe8] sm:$0xff]  ;;  %v9242_v62 = vld [vmem:[#allocation2 + $0xf0] sm:$0xff] }
 0x80a   : > { %12505 = vmatmul.mubr.msk.bf16.gmra.mrb[40].mxu1 %vm21994_vm6, %v21993_v40  ;;  %vm22002_vm6 = vmmov %vm21545_vm0  ;;  %v8820_v40 = vld [vmem:[#allocation2 + $0x147] sm:$0xff] }
 0x80b   : > { %12508 = vmatprep.mubr.msk.bf16.mxu1 %vm21995_vm13, %v8423_v53  ;;  %vm22003_vm13 = vmmov %vm21545_vm0  ;;  %v8850_v53 = vpack.c.bf16 %v8819_v17, %v8818_v10  ;;  %v9243_v10 = vld [vmem:[#allocation2 + $0xf8] sm:$0xff]  ;;  %v9244_v17 = vld [vmem:[#allocation2 + $0x100] sm:$0xff] }
 0x812   : > { %12509 = vmatmul.mubr.msk.bf16.gmra.mrb[44].mxu1 %vm21997_vm1, %v8424_v24  ;;  %vm22004_vm1 = vmmov %vm21545_vm0  ;;  %v8823_v24 = vld [vmem:[#allocation2 + $0x15f] sm:$0xff] }
 0x813   : > { %12516 = vmatprep.mubr.msk.bf16.mxu1 %vm21998_vm10, %v8834_v43  ;;  %vm22005_vm10 = vmmov %vm21545_vm0  ;;  %v8851_v43 = vpack.c.bf16 %v8821_v16, %v8820_v40  ;;  %v8852_v36 = vpack.c.bf16 %v8823_v24, %v8822_v52  ;;  %v9245_v40 = vld [vmem:[#allocation2 + $0x108] sm:$0xff]  ;;  %v9246_v16 = vld [vmem:[#allocation2 + $0x110] sm:$0xff] }
 0x814   : > { %v9247_v52 = vld [vmem:[#allocation2 + $0x118] sm:$0xff]  ;;  %v9248_v24 = vld [vmem:[#allocation2 + $0x120] sm:$0xff] }
 0x81a   : > { %12517 = vmatmul.mubr.msk.bf16.vlgmr.msra.gmra.mrb[0].mxu1 %vm21545_vm0, %v8835_v33  ;;  %v8827_v33 = vld [vmem:[#allocation2 + $0x17f] sm:$0xff] }
 0x81b   : > { %12565 = vmatpush3.bf16.msra.mxu1 %v13574_v28  ;;  %12520 = vmatprep.mubr.msk.bf16.mxu1 %vm21999_vm3, %v8836_v18  ;;  %v8796_v28 = vld [vmem:[#allocation2 + $0x87] sm:$0xff]  ;;  %vm22006_vm3 = vmmov %vm21545_vm0  ;;  %v8854_v18 = vpack.c.bf16 %v8827_v33, %v8826_v26  ;;  %v9251_v26 = vld [vmem:[#allocation2 + $0x138] sm:$0xff] }
 0x81c   : > { %12566 = vmatprep.subr.bf16.mxu1 %v13575_v39  ;;  %v8839_v30 = vpack.c.bf16 %v8797_v8, %v8796_v28  ;;  %v9220_v28 = vld [vmem:[#allocation2 + $0x40] sm:$0xff] }
 0x81d   : > { %v9252_v33 = vld [vmem:[#allocation2 + $0x140] sm:$0xff] }
 0x81f   : > { %12567 = vmatpush3.bf16.msra.mxu1 %v13575_v39  ;;  %v8853_v39 = vpack.c.bf16 %v8825_v31, %v8824_v38  ;;  %v9249_v38 = vld [vmem:[#allocation2 + $0x128] sm:$0xff]  ;;  %v9250_v31 = vld [vmem:[#allocation2 + $0x130] sm:$0xff] }
 0x820   : > { %12616 = vmatprep.subr.bf16.mxu1 %v18617_v63 }
 0x822   : > { %12521 = vmatmul.mubr.msk.bf16.gmra.mrb[4].mxu1 %vm22000_vm9, %v8837_v2  ;;  %vm22007_vm9 = vmmov %vm21545_vm0  ;;  %v8833_v2 = vld [vmem:[#allocation2 + $0x1af] sm:$0xff] }
 0x823   : > { %12524 = vmatprep.mubr.msk.bf16.mxu1 %vm22001_vm2, %v8838_v4  ;;  %vm22008_vm2 = vmmov %vm21545_vm0  ;;  %v9219_v4 = vld [vmem:[#allocation2 + $0x38] sm:$0xff]  ;;  %v8857_v8 = vpack.c.bf16 %v8833_v2, %v8832_v32  ;;  %v9256_v32 = vld [vmem:[#allocation2 + $0x160] sm:$0xff] }
 0x824   : > { %v9267_v5 = vpack.c.bf16 %v9220_v28, %v9219_v4  ;;  %v9257_v28 = vld [vmem:[#allocation2 + $0x168] sm:$0xff] }
 0x82a   : > { %12525 = vmatmul.mubr.msk.bf16.gmra.mrb[8].mxu1 %vm22002_vm6, %v8839_v30  ;;  %vm22009_vm6 = vmmov %vm21545_vm0  ;;  %v9222_v30 = vld [vmem:[#allocation2 + $0x50] sm:$0xff] }
 0x82b   : > { %12528 = vmatprep.mubr.msk.bf16.mxu1 %vm22003_vm13, %v8840_v50  ;;  %vm22010_vm13 = vmmov %vm21545_vm0  ;;  %v9223_v50 = vld [vmem:[#allocation2 + $0x58] sm:$0xff]  ;;  %v9268_v46 = vpack.c.bf16 %v9222_v30, %v9221_v44  ;;  %v22036_v44 = vld [vmem:[#allocation168_spill] sm:$0xff] }
 0x82c   : > { %v9269_v11 = vpack.c.bf16 %v9224_v41, %v9223_v50  ;;  %v22037_v30 = vld [vmem:[#allocation67_spill] sm:$0xff] }
 0x82d   : > { %v9287_v50 = vpack.c.bf16 %v22037_v30, %v22036_v44  ;;  %v9264_v41 = vld [vmem:[#allocation2 + $0x1a0] sm:$0xff]  ;;  %v9687_v44 = vld [vmem:[#allocation2 + $0x151] sm:$0xff] }
 0x82e   : > { %v9688_v30 = vld [vmem:[#allocation2 + $0x159] sm:$0xff] }
 0x832   : > { %12529 = vmatmul.mubr.msk.bf16.gmra.mrb[12].mxu1 %vm22004_vm1, %v8841_v22  ;;  %vm22011_vm1 = vmmov %vm21545_vm0  ;;  %v9228_v22 = vld [vmem:[#allocation2 + $0x80] sm:$0xff] }
 0x833   : > { %12532 = vmatprep.mubr.msk.bf16.mxu1 %vm22005_vm10, %v8842_v23  ;;  %vm22012_vm10 = vmmov %vm21545_vm0  ;;  %v9270_v23 = vpack.c.bf16 %v9226_v20, %v9225_v60  ;;  %v9271_v21 = vpack.c.bf16 %v9228_v22, %v9227_v15  ;;  %v9266_v60 = vld [vmem:[#allocation2 + $0x1b0] sm:$0xff]  ;;  %v9652_v20 = vld [vmem:[#allocation2 + $0x39] sm:$0xff] }
 0x834   : > { %v9653_v15 = vld [vmem:[#allocation2 + $0x41] sm:$0xff] }
 0x83a   : > { %12533 = vmatmul.mubr.msk.bf16.gmra.mrb[16].mxu1 %vm21545_vm0, %v8843_v19  ;;  %v9232_v19 = vld [vmem:[#allocation2 + $0xa0] sm:$0xff] }
 0x83b   : > { %12536 = vmatprep.mubr.msk.bf16.mxu1 %vm22006_vm3, %v8844_v56  ;;  %vm22013_vm3 = vmmov %vm21545_vm0  ;;  %v9272_v56 = vpack.c.bf16 %v9230_v59, %v9229_v61  ;;  %v9655_v61 = vld [vmem:[#allocation2 + $0x51] sm:$0xff]  ;;  %v9657_v59 = vld [vmem:[#allocation2 + $0x61] sm:$0xff] }
 0x842   : > { %12537 = vmatmul.mubr.msk.bf16.gmra.mrb[20].mxu1 %vm22007_vm9, %v8845_v42  ;;  %vm22014_vm9 = vmmov %vm21545_vm0  ;;  %v9274_v42 = vpack.c.bf16 %v9234_v12, %v9233_v7 }
 0x843   : > { %12540 = vmatprep.mubr.msk.bf16.mxu1 %vm22008_vm2, %v8846_v48  ;;  %vm22015_vm2 = vmmov %vm21545_vm0  ;;  %v9275_v48 = vpack.c.bf16 %v9236_v13, %v9235_v14  ;;  %v9662_v14 = vld [vmem:[#allocation2 + $0x89] sm:$0xff]  ;;  %v9663_v13 = vld [vmem:[#allocation2 + $0x91] sm:$0xff] }
 0x84a   : > { %12541 = vmatmul.mubr.msk.bf16.gmra.mrb[24].mxu1 %vm22009_vm6, %v8847_v49  ;;  %vm22016_vm6 = vmmov %vm21545_vm0  ;;  %v9276_v49 = vpack.c.bf16 %v9238_v9, %v9237_v0  ;;  %v9705_v0 = vpack.c.bf16 %v9663_v13, %v9662_v14 }
 0x84b   : > { %12544 = vmatprep.mubr.msk.bf16.mxu1 %vm22010_vm13, %v8848_v37  ;;  %vm22017_vm13 = vmmov %vm21545_vm0  ;;  %v9277_v37 = vpack.c.bf16 %v9240_v1, %v9239_v54  ;;  %v9666_v54 = vld [vmem:[#allocation2 + $0xa9] sm:$0xff]  ;;  %v9667_v1 = vld [vmem:[#allocation2 + $0xb1] sm:$0xff] }
 0x852   : > { %12545 = vmatmul.mubr.msk.bf16.gmra.mrb[28].mxu1 %vm22011_vm1, %v8849_v55  ;;  %vm22018_vm1 = vmmov %vm21545_vm0  ;;  %v9278_v55 = vpack.c.bf16 %v9242_v62, %v9241_v45  ;;  %v9707_v45 = vpack.c.bf16 %v9667_v1, %v9666_v54 }
 0x853   : > { %12548 = vmatprep.mubr.msk.bf16.mxu1 %vm22012_vm10, %v8850_v53  ;;  %vm22019_vm10 = vmmov %vm21545_vm0  ;;  %v9279_v53 = vpack.c.bf16 %v9244_v17, %v9243_v10  ;;  %v9670_v10 = vld [vmem:[#allocation2 + $0xc9] sm:$0xff]  ;;  %v9671_v17 = vld [vmem:[#allocation2 + $0xd1] sm:$0xff] }
 0x85a   : > { %12549 = vmatmul.mubr.msk.bf16.gmra.mrb[32].mxu1 %vm21545_vm0, %v8851_v43  ;;  %v9280_v43 = vpack.c.bf16 %v9246_v16, %v9245_v40  ;;  %v9709_v40 = vpack.c.bf16 %v9671_v17, %v9670_v10 }
 0x85b   : > { %12552 = vmatprep.mubr.msk.bf16.mxu1 %vm22013_vm3, %v8852_v36  ;;  %vm22020_vm3 = vmmov %vm21545_vm0  ;;  %v9281_v36 = vpack.c.bf16 %v9248_v24, %v9247_v52  ;;  %v9674_v52 = vld [vmem:[#allocation2 + $0xe9] sm:$0xff]  ;;  %v9675_v24 = vld [vmem:[#allocation2 + $0xf1] sm:$0xff] }
 0x862   : > { %12553 = vmatmul.mubr.msk.bf16.gmra.mrb[36].mxu1 %vm22014_vm9, %v8853_v39  ;;  %vm22021_vm9 = vmmov %vm21545_vm0  ;;  %v9282_v39 = vpack.c.bf16 %v9250_v31, %v9249_v38  ;;  %v9711_v38 = vpack.c.bf16 %v9675_v24, %v9674_v52 }
 0x863   : > { %12556 = vmatprep.mubr.msk.bf16.mxu1 %vm22015_vm2, %v8854_v18  ;;  %vm22022_vm2 = vmmov %vm21545_vm0  ;;  %v9283_v18 = vpack.c.bf16 %v9252_v33, %v9251_v26  ;;  %v9678_v26 = vld [vmem:[#allocation2 + $0x109] sm:$0xff]  ;;  %v9679_v33 = vld [vmem:[#allocation2 + $0x111] sm:$0xff] }
 0x86a   : > { %12557 = vmatmul.mubr.msk.bf16.gmra.mrb[40].mxu1 %vm22016_vm6, %v8855_v27  ;;  %vm22023_vm6 = vmmov %vm21545_vm0  ;;  %v9254_v27 = vld [vmem:[#allocation2 + $0x150] sm:$0xff] }
 0x86b   : > { %12560 = vmatprep.mubr.msk.bf16.mxu1 %vm22017_vm13, %v8856_v35  ;;  %vm22024_vm13 = vmmov %vm21545_vm0  ;;  %v9255_v35 = vld [vmem:[#allocation2 + $0x158] sm:$0xff]  ;;  %v9284_v2 = vpack.c.bf16 %v9254_v27, %v9253_v29  ;;  %v9713_v29 = vpack.c.bf16 %v9679_v33, %v9678_v26 }
 0x86c   : > { %v9285_v4 = vpack.c.bf16 %v9256_v32, %v9255_v35  ;;  %v9682_v35 = vld [vmem:[#allocation2 + $0x129] sm:$0xff]  ;;  %v9683_v32 = vld [vmem:[#allocation2 + $0x131] sm:$0xff] }
 0x872   : > { %12561 = vmatmul.mubr.msk.bf16.gmra.mrb[44].mxu1 %vm22018_vm1, %v8857_v8  ;;  %vm22025_vm1 = vmmov %vm21545_vm0  ;;  %v22035_v8 = vld [vmem:[#allocation166_spill] sm:$0xff] }
 0x873   : > { %12568 = vmatprep.mubr.msk.bf16.mxu1 %vm22019_vm10, %v9267_v5  ;;  %vm22026_vm10 = vmmov %vm21545_vm0  ;;  %v9286_v5 = vpack.c.bf16 %v22035_v8, %v9257_v28  ;;  %v9715_v28 = vpack.c.bf16 %v9683_v32, %v9682_v35  ;;  %v22079_v32 = vld [vmem:[#allocation60_spill] sm:$0xff] }
 0x87a   : > { %12569 = vmatmul.mubr.msk.bf16.vlgmr.msra.gmra.mrb[0].mxu1 %vm21545_vm0, %v9268_v46  ;;  %v9289_v46 = vpack.c.bf16 %v9264_v41, %v18501_v25  ;;  %v9656_v25 = vld [vmem:[#allocation2 + $0x59] sm:$0xff] }
 0x87b   : > { %12617 = vmatpush3.bf16.msra.mxu1 %v18617_v63  ;;  %12572 = vmatprep.mubr.msk.bf16.mxu1 %vm22020_vm3, %v9269_v11  ;;  %v9273_v63 = vpack.c.bf16 %v9232_v19, %v9231_v34  ;;  %vm22027_vm3 = vmmov %vm21545_vm0  ;;  %v9265_v11 = vld [vmem:[#allocation2 + $0x1a8] sm:$0xff]  ;;  %v9659_v19 = vld [vmem:[#allocation2 + $0x71] sm:$0xff] }
 0x87c   : > { %12618 = vmatprep.subr.bf16.mxu1 %v13577_v47  ;;  %v9290_v22 = vpack.c.bf16 %v9266_v60, %v9265_v11  ;;  %v9691_v11 = vld [vmem:[#allocation2 + $0x171] sm:$0xff]  ;;  %v9692_v60 = vld [vmem:[#allocation2 + $0x179] sm:$0xff] }
 0x87f   : > { %12619 = vmatpush3.bf16.msra.mxu1 %v13577_v47  ;;  %v22040_v47 = vpack.c.bf16 %v21927_v3, %v21921_v6  ;;  %v9702_v6 = vpack.c.bf16 %v9657_v59, %v9656_v25  ;;  %v9658_v3 = vld [vmem:[#allocation2 + $0x69] sm:$0xff]  ;;  %v9699_v59 = vld [vmem:[#allocation2 + $0x1b1] sm:$0xff] }
 0x880   : > { %v9703_v7 = vpack.c.bf16 %v9659_v19, %v9658_v3  ;;  %v9698_v25 = vld [vmem:[#allocation2 + $0x1a9] sm:$0xff] }
 0x882   : > { %12573 = vmatmul.mubr.msk.bf16.gmra.mrb[4].mxu1 %vm22021_vm9, %v9270_v23  ;;  %vm22028_vm9 = vmmov %vm21545_vm0  ;;  %v9700_v23 = vpack.c.bf16 %v9653_v15, %v9652_v20  ;;  %v9693_v20 = vld [vmem:[#allocation2 + $0x181] sm:$0xff] }
 0x883   : > { %12576 = vmatprep.mubr.msk.bf16.mxu1 %vm22022_vm2, %v9271_v21  ;;  %vm22029_vm2 = vmmov %vm21545_vm0  ;;  %v9654_v21 = vld [vmem:[#allocation2 + $0x49] sm:$0xff] }
 0x884   : > { %v9701_v34 = vpack.c.bf16 %v9655_v61, %v9654_v21  ;;  %v22062_v61 = vpack.c.bf16 %v21996_v58, %v21992_v57 }
 0x88a   : > { %12577 = vmatmul.mubr.msk.bf16.gmra.mrb[8].mxu1 %vm22023_vm6, %v9272_v56  ;;  %vm22030_vm6 = vmmov %vm21545_vm0  ;;  %v9660_v56 = vld [vmem:[#allocation2 + $0x79] sm:$0xff] }
 0x88b   : > { %12580 = vmatprep.mubr.msk.bf16.mxu1 %vm22024_vm13, %v9273_v63  ;;  %vm22031_vm13 = vmmov %vm21545_vm0  ;;  %v9661_v63 = vld [vmem:[#allocation2 + $0x81] sm:$0xff] }
 0x88c   : > { %v9704_v12 = vpack.c.bf16 %v9661_v63, %v9660_v56 }
 0x892   : > { %12581 = vmatmul.mubr.msk.bf16.gmra.mrb[12].mxu1 %vm22025_vm1, %v9274_v42  ;;  %vm22032_vm1 = vmmov %vm21545_vm0  ;;  %v9664_v42 = vld [vmem:[#allocation2 + $0x99] sm:$0xff] }
 0x893   : > { %12584 = vmatprep.mubr.msk.bf16.mxu1 %vm22026_vm10, %v9275_v48  ;;  %vm22033_vm10 = vmmov %vm21545_vm0  ;;  %v9665_v48 = vld [vmem:[#allocation2 + $0xa1] sm:$0xff] }
 0x894   : > { %v9706_v9 = vpack.c.bf16 %v9665_v48, %v9664_v42 }
 0x89a   : > { %12585 = vmatmul.mubr.msk.bf16.gmra.mrb[16].mxu1 %vm21545_vm0, %v9276_v49  ;;  %v9668_v49 = vld [vmem:[#allocation2 + $0xb9] sm:$0xff] }
 0x89b   : > { %12588 = vmatprep.mubr.msk.bf16.mxu1 %vm22027_vm3, %v9277_v37  ;;  %vm22034_vm3 = vmmov %vm21545_vm0  ;;  %v9669_v37 = vld [vmem:[#allocation2 + $0xc1] sm:$0xff] }
 0x89c   : > { %v9708_v62 = vpack.c.bf16 %v9669_v37, %v9668_v49 }
 0x8a2   : > { %12589 = vmatmul.mubr.msk.bf16.gmra.mrb[20].mxu1 %vm22028_vm9, %v9278_v55  ;;  %vm22038_vm9 = vmmov %vm21545_vm0  ;;  %v9672_v55 = vld [vmem:[#allocation2 + $0xd9] sm:$0xff] }
 0x8a3   : > { %12592 = vmatprep.mubr.msk.bf16.mxu1 %vm22029_vm2, %v9279_v53  ;;  %vm22039_vm2 = vmmov %vm21545_vm0  ;;  %v9673_v53 = vld [vmem:[#allocation2 + $0xe1] sm:$0xff] }
 0x8a4   : > { %v9710_v16 = vpack.c.bf16 %v9673_v53, %v9672_v55 }
 0x8aa   : > { %12593 = vmatmul.mubr.msk.bf16.gmra.mrb[24].mxu1 %vm22030_vm6, %v9280_v43  ;;  %vm22041_vm6 = vmmov %vm21545_vm0  ;;  %v9676_v43 = vld [vmem:[#allocation2 + $0xf9] sm:$0xff] }
 0x8ab   : > { %12596 = vmatprep.mubr.msk.bf16.mxu1 %vm22031_vm13, %v9281_v36  ;;  %vm22042_vm13 = vmmov %vm21545_vm0  ;;  %v9677_v36 = vld [vmem:[#allocation2 + $0x101] sm:$0xff] }
 0x8ac   : > { %v9712_v31 = vpack.c.bf16 %v9677_v36, %v9676_v43 }
 0x8b2   : > { %12597 = vmatmul.mubr.msk.bf16.gmra.mrb[28].mxu1 %vm22032_vm1, %v9282_v39  ;;  %vm22043_vm1 = vmmov %vm21545_vm0  ;;  %v9680_v39 = vld [vmem:[#allocation2 + $0x119] sm:$0xff] }
 0x8b3   : > { %12600 = vmatprep.mubr.msk.bf16.mxu1 %vm22033_vm10, %v9283_v18  ;;  %vm22044_vm10 = vmmov %vm21545_vm0  ;;  %v9681_v18 = vld [vmem:[#allocation2 + $0x121] sm:$0xff] }
 0x8b4   : > { %v9714_v27 = vpack.c.bf16 %v9681_v18, %v9680_v39 }
 0x8ba   : > { %12601 = vmatmul.mubr.msk.bf16.gmra.mrb[32].mxu1 %vm21545_vm0, %v9284_v2  ;;  %v9684_v2 = vld [vmem:[#allocation2 + $0x139] sm:$0xff] }
 0x8bb   : > { %12604 = vmatprep.mubr.msk.bf16.mxu1 %vm22034_vm3, %v9285_v4  ;;  %vm22045_vm3 = vmmov %vm21545_vm0  ;;  %v9685_v4 = vld [vmem:[#allocation2 + $0x141] sm:$0xff] }
 0x8bc   : > { %v9716_v8 = vpack.c.bf16 %v9685_v4, %v9684_v2 }
 0x8c2   : > { %12605 = vmatmul.mubr.msk.bf16.gmra.mrb[36].mxu1 %vm22038_vm9, %v9286_v5  ;;  %vm22046_vm9 = vmmov %vm21545_vm0  ;;  %v9686_v5 = vld [vmem:[#allocation2 + $0x149] sm:$0xff] }
 0x8c3   : > { %12608 = vmatprep.mubr.msk.bf16.mxu1 %vm22039_vm2, %v9287_v50  ;;  %vm22047_vm2 = vmmov %vm21545_vm0  ;;  %v9689_v50 = vld [vmem:[#allocation2 + $0x161] sm:$0xff]  ;;  %v9717_v41 = vpack.c.bf16 %v9687_v44, %v9686_v5 }
 0x8ca   : > { %12609 = vmatmul.mubr.msk.bf16.gmra.mrb[40].mxu1 %vm22041_vm6, %v22040_v47  ;;  %vm22048_vm6 = vmmov %vm21545_vm0  ;;  %v9690_v47 = vld [vmem:[#allocation2 + $0x169] sm:$0xff] }
 0x8cb   : > { %12612 = vmatprep.mubr.msk.bf16.mxu1 %vm22042_vm13, %v9289_v46  ;;  %vm22049_vm13 = vmmov %vm21545_vm0  ;;  %v9718_v46 = vpack.c.bf16 %v9689_v50, %v9688_v30  ;;  %v9719_v15 = vpack.c.bf16 %v9691_v11, %v9690_v47  ;;  %v22082_v11 = vld [vmem:[#allocation61_spill] sm:$0xff] }
 0x8d2   : > { %12613 = vmatmul.mubr.msk.bf16.gmra.mrb[44].mxu1 %vm22043_vm1, %v9290_v22  ;;  %vm22050_vm1 = vmmov %vm21545_vm0  ;;  %v9720_v22 = vpack.c.bf16 %v9693_v20, %v9692_v60 }
 0x8d3   : > { %12620 = vmatprep.mubr.msk.bf16.mxu1 %vm22044_vm10, %v9700_v23  ;;  %vm22051_vm10 = vmmov %vm21545_vm0  ;;  %v9697_v23 = vld [vmem:[#allocation2 + $0x1a1] sm:$0xff] }
 0x8d4   : > { %v9722_v21 = vpack.c.bf16 %v9697_v23, %v18603_v51 }
 0x8da   : > { %12621 = vmatmul.mubr.msk.bf16.vlgmr.msra.gmra.mrb[0].mxu1 %vm21545_vm0, %v9701_v34  ;;  %v9723_v34 = vpack.c.bf16 %v9699_v59, %v9698_v25  ;;  %v22087_v59 = vld [vmem:[#allocation63_spill] sm:$0xff] }
 0x8db   : > { %12624 = vmatprep.mubr.msk.bf16.mxu1 %vm22045_vm3, %v9702_v6  ;;  %vm22052_vm3 = vmmov %vm21545_vm0  ;;  %v18710_v6 = vld [vmem:[%s19942_s4] ss:$0 sm:$0xff] }
 0x8e2   : > { %12625 = vmatmul.mubr.msk.bf16.gmra.mrb[4].mxu1 %vm22046_vm9, %v9703_v7  ;;  %vm22053_vm9 = vmmov %vm21545_vm0 }
 0x8e3   : > { %12628 = vmatprep.mubr.msk.bf16.mxu1 %vm22047_vm2, %v9704_v12  ;;  %vm22054_vm2 = vmmov %vm21545_vm0 }
 0x8ea   : > { %12629 = vmatmul.mubr.msk.bf16.gmra.mrb[8].mxu1 %vm22048_vm6, %v9705_v0  ;;  %vm22055_vm6 = vmmov %vm21545_vm0 }
 0x8eb   : > { %12632 = vmatprep.mubr.msk.bf16.mxu1 %vm22049_vm13, %v9706_v9  ;;  %vm22056_vm13 = vmmov %vm21545_vm0 }
 0x8f2   : > { %12633 = vmatmul.mubr.msk.bf16.gmra.mrb[12].mxu1 %vm22050_vm1, %v9707_v45  ;;  %vm22057_vm1 = vmmov %vm21545_vm0 }
 0x8f3   : > { %12636 = vmatprep.mubr.msk.bf16.mxu1 %vm22051_vm10, %v9708_v62  ;;  %vm22058_vm10 = vmmov %vm21545_vm0 }
 0x8fa   : > { %12637 = vmatmul.mubr.msk.bf16.gmra.mrb[16].mxu1 %vm21545_vm0, %v9709_v40 }
 0x8fb   : > { %12640 = vmatprep.mubr.msk.bf16.mxu1 %vm22052_vm3, %v9710_v16  ;;  %vm22059_vm3 = vmmov %vm21545_vm0 }
 0x902   : > { %12641 = vmatmul.mubr.msk.bf16.gmra.mrb[20].mxu1 %vm22053_vm9, %v9711_v38  ;;  %vm22060_vm9 = vmmov %vm21545_vm0 }
 0x903   : > { %12644 = vmatprep.mubr.msk.bf16.mxu1 %vm22054_vm2, %v9712_v31  ;;  %vm22061_vm2 = vmmov %vm21545_vm0 }
 0x90a   : > { %12645 = vmatmul.mubr.msk.bf16.gmra.mrb[24].mxu1 %vm22055_vm6, %v9713_v29  ;;  %vm22063_vm6 = vmmov %vm21545_vm0  ;;  %v22076_v29 = vld [vmem:[#allocation59_spill] sm:$0xff] }
 0x90b   : > { %12648 = vmatprep.mubr.msk.bf16.mxu1 %vm22056_vm13, %v9714_v27  ;;  %vm22064_vm13 = vmmov %vm21545_vm0 }
 0x912   : > { %12649 = vmatmul.mubr.msk.bf16.gmra.mrb[28].mxu1 %vm22057_vm1, %v9715_v28  ;;  %vm22065_vm1 = vmmov %vm21545_vm0 }
 0x913   : > { %12652 = vmatprep.mubr.msk.bf16.mxu1 %vm22058_vm10, %v9716_v8  ;;  %vm22069_vm10 = vmmov %vm21545_vm0 }
 0x91a   : > { %12653 = vmatmul.mubr.msk.bf16.gmra.mrb[32].mxu1 %vm21545_vm0, %v9717_v41 }
 0x91b   : > { %12656 = vmatprep.mubr.msk.bf16.mxu1 %vm22059_vm3, %v9718_v46  ;;  %vm22071_vm3 = vmmov %vm21545_vm0 }
 0x922   : > { %12657 = vmatmul.mubr.msk.bf16.gmra.mrb[36].mxu1 %vm22060_vm9, %v9719_v15  ;;  %vm22072_vm9 = vmmov %vm21545_vm0 }
 0x923   : > { %12660 = vmatprep.mubr.msk.bf16.mxu1 %vm22061_vm2, %v9720_v22  ;;  %vm22074_vm2 = vmmov %vm21545_vm0 }
 0x92a   : > { %12661 = vmatmul.mubr.msk.bf16.gmra.mrb[40].mxu1 %vm22063_vm6, %v22062_v61  ;;  %vm22077_vm6 = vnez %v22076_v29 }
 0x92b   : > { %12664 = vmatprep.mubr.msk.bf16.mxu1 %vm22064_vm13, %v9722_v21  ;;  %vm22078_vm13 = vmmov %vm21545_vm0  ;;  %v22085_v21 = vld [vmem:[#allocation62_spill] sm:$0xff] }
 0x932   : > { %12665 = vmatmul.mubr.msk.bf16.gmra.mrb[44].mxu1 %vm22065_vm1, %v9723_v34  ;;  %vm22080_vm1 = vnez %v22079_v32 }
 0x9ad   : > { %v12622_v3 = vpop.f32.mrb[0].mxu1 }
 0x9ae   : > { %v9846_v19 = vpop.f32.mrb[1].mxu1  ;;  %v18713_v51 = vadd.f32 %v12622_v3, %v18710_v6 }
 0x9af   : > { %v18716_v57 = vadd.f32 %v18710_v6, %v9846_v19  ;;  %v12623_v58 = vpop.f32.mrb[2].mxu1  ;;  %v22090_v19 = vld [vmem:[#allocation64_spill] sm:$0xff] }
 0x9b0   : > { %v9849_v56 = vpop.f32.mrb[3].mxu1  ;;  %v18722_v12 = vadd.f32 %v12623_v58, %v18710_v6  ;;  %v10142_v42 = vsel %vm15701_vm8, %v18713_v51, 0.0 }
 0x9b1   : > { %v10140_v7 = vsel %vm15697_vm14, %v18716_v57, 0.0  ;;  %v18725_v14 = vadd.f32 %v18710_v6, %v9849_v56  ;;  %v10191_v62 = vsel %vm22071_vm3, %v10142_v42, 0.0  ;;  %vm22083_vm3 = vnez %v22082_v11 }
 0x9b2   : > { %v10188_v9 = vsel %vm22069_vm10, %v10140_v7, 0.0  ;;  %v10143_v49 = vsel %vm15726_vm12, %v18722_v12, 0.0  ;;  %vm22081_vm10 = vmmov %vm21545_vm0 }
 0x9b3   : > { %v10141_v0 = vsel %vm15713_vm15, %v18725_v14, 0.0  ;;  %v10193_v16 = vsel %vm22072_vm9, %v10143_v49, 0.0  ;;  %vm22084_vm9 = vmmov %vm21545_vm0 }
 0x9b4   : > { %v10189_v54 = vsel %vm21545_vm0, %v10141_v0, 0.0 }
 0x9b5   : > { %v10190_v37 = vadd.f32 %v10189_v54, %v10188_v9  ;;  %v12626_v45 = vpop.f32.mrb[4].mxu1 }
 0x9b6   : > { %v9862_v10 = vpop.f32.mrb[5].mxu1  ;;  %v18740_v55 = vadd.f32 %v12626_v45, %v18710_v6 }
 0x9b7   : > { %v10192_v17 = vadd.f32 %v10191_v62, %v10190_v37  ;;  %v18743_v53 = vadd.f32 %v18710_v6, %v9862_v10  ;;  %v12627_v40 = vpop.f32.mrb[6].mxu1  ;;  %v22095_v10 = vld [vmem:[#allocation65_spill] sm:$0xff] }
 0x9b8   : > { %v9865_v52 = vpop.f32.mrb[7].mxu1  ;;  %v18750_v38 = vadd.f32 %v12627_v40, %v18710_v6  ;;  %v10146_v39 = vsel %vm21074_vm4, %v18740_v55, 0.0 }
 0x9b9   : > { %v10144_v43 = vsel %vm15748_vm5, %v18743_v53, 0.0  ;;  %v10194_v36 = vadd.f32 %v10193_v16, %v10192_v17  ;;  %v18753_v31 = vadd.f32 %v18710_v6, %v9865_v52  ;;  %v10199_v8 = vsel %vm22081_vm10, %v10146_v39, 0.0  ;;  %vm22089_vm10 = vmmov %vm21545_vm0 }
 0x9ba   : > { %v10195_v26 = vsel %vm22074_vm2, %v10144_v43, 0.0  ;;  %v10147_v2 = vsel %vm22080_vm1, %v18750_v38, 0.0  ;;  %vm22086_vm2 = vnez %v22085_v21 }
 0x9bb   : > { %v10196_v18 = vadd.f32 %v10195_v26, %v10194_v36  ;;  %v10145_v27 = vsel %vm22077_vm6, %v18753_v31, 0.0  ;;  %v10201_v46 = vsel %vm21545_vm0, %v10147_v2, 0.0  ;;  %vm22091_vm0 = vnez %v22090_v19  ;;  %v22098_v36 = vld [vmem:[#allocation66_spill] sm:$0xff] }
 0x9bc   : > { %v10197_v35 = vsel %vm22078_vm13, %v10145_v27, 0.0  ;;  %vm22088_vm13 = vnez %v22087_v59  ;;  %v22103_v2 = vld [vmem:[#allocation70_spill] sm:$0xff] }
 0x9bd   : > { %v10198_v4 = vadd.f32 %v10197_v35, %v10196_v18  ;;  %v12630_v28 = vpop.f32.mrb[8].mxu1  ;;  %v22100_v18 = vld [vmem:[#allocation68_spill] sm:$0xff] }
 0x9be   : > { %v9878_v5 = vpop.f32.mrb[9].mxu1  ;;  %v18768_v30 = vadd.f32 %v12630_v28, %v18710_v6 }
 0x9bf   : > { %v10200_v44 = vadd.f32 %v10199_v8, %v10198_v4  ;;  %v18771_v50 = vadd.f32 %v18710_v6, %v9878_v5  ;;  %v12631_v41 = vpop.f32.mrb[10].mxu1 }
 0x9c0   : > { %v9881_v47 = vpop.f32.mrb[11].mxu1  ;;  %v18778_v15 = vadd.f32 %v12631_v41, %v18710_v6  ;;  %v10150_v61 = vsel %vm22086_vm2, %v18768_v30, 0.0 }
 0x9c1   : > { %v10148_v60 = vsel %vm22083_vm3, %v18771_v50, 0.0  ;;  %v10202_v20 = vadd.f32 %v10201_v46, %v10200_v44  ;;  %v18781_v22 = vadd.f32 %v18710_v6, %v9881_v47  ;;  %vm22092_vm3 = vmmov %vm22084_vm9 }
 0x9c2   : > { %v10203_v23 = vsel %vm22084_vm9, %v10148_v60, 0.0  ;;  %v10151_v58 = vsel %vm22091_vm0, %v18778_v15, 0.0  ;;  %v10207_v42 = vsel %vm22092_vm3, %v10150_v61, 0.0  ;;  %vm22094_vm9 = vmmov %vm22092_vm3  ;;  %vm22099_vm0 = vnez %v22098_v36  ;;  %v22109_v61 = vld [vmem:[#allocation71_spill] sm:$0xff]  ;;  %v22194_v36 = vld [vmem:[#allocation109_spill] sm:$0xff] }
 0x9c3   : > { %v10204_v25 = vadd.f32 %v10203_v23, %v10202_v20  ;;  %v10149_v34 = vsel %vm22088_vm13, %v18781_v22, 0.0  ;;  %v10209_v45 = vsel %vm22094_vm9, %v10151_v58, 0.0  ;;  %vm22101_vm9 = vnez %v22100_v18  ;;  %vm22102_vm2 = vmmov %vm22092_vm3 }
 0x9c4   : > { %v10205_v3 = vsel %vm22089_vm10, %v10149_v34, 0.0  ;;  %vm22096_vm10 = vnez %v22095_v10  ;;  %vm22105_vm13 = vmmov %vm22102_vm2 }
 0x9c5   : > { %v10206_v56 = vadd.f32 %v10205_v3, %v10204_v25  ;;  %v12634_v7 = vpop.f32.mrb[12].mxu1 }
 0x9c6   : > { %v9894_v0 = vpop.f32.mrb[13].mxu1  ;;  %v18796_v54 = vadd.f32 %v12634_v7, %v18710_v6  ;;  %v22114_v7 = vld [vmem:[#allocation72_spill] sm:$0xff] }
 0x9c7   : > { %v10208_v9 = vadd.f32 %v10207_v42, %v10206_v56  ;;  %v18799_v49 = vadd.f32 %v18710_v6, %v9894_v0  ;;  %v12635_v37 = vpop.f32.mrb[14].mxu1 }
 0x9c8   : > { %22093 = vst [vmem:[#allocation35_spill] sm:$0xff] %v18796_v54  ;;  %v9897_v62 = vpop.f32.mrb[15].mxu1  ;;  %v18806_v16 = vadd.f32 %v12635_v37, %v18710_v6  ;;  %v10154_v26 = vsel %vm22099_vm0, %v18796_v54, 0.0 }
 0x9c9   : > { %v10152_v17 = vsel %vm22096_vm10, %v18799_v49, 0.0  ;;  %v10210_v40 = vadd.f32 %v10209_v45, %v10208_v9  ;;  %v18809_v52 = vadd.f32 %v18710_v6, %v9897_v62  ;;  %vm22104_vm10 = vnez %v22103_v2  ;;  %v22116_v9 = vld [vmem:[#allocation77_spill] sm:$0xff]  ;;  %v22119_v62 = vld [vmem:[#allocation80_spill] sm:$0xff] }
 0x9ca   : > { %22097 = vst [vmem:[#allocation50_spill] sm:$0xff] %v18806_v16  ;;  %v10211_v43 = vsel %vm22092_vm3, %v10152_v17, 0.0  ;;  %v10155_v4 = vsel %vm22104_vm10, %v18806_v16, 0.0  ;;  %v10215_v5 = vsel %vm22105_vm13, %v10154_v26, 0.0  ;;  %vm22108_vm3 = vmmov %vm22102_vm2  ;;  %vm22115_vm10 = vnez %v22114_v7  ;;  %v22174_v7 = vld [vmem:[#allocation101_spill] sm:$0xff] }
 0x9cb   : > { %v10212_v39 = vadd.f32 %v10211_v43, %v10210_v40  ;;  %v10153_v27 = vsel %vm22101_vm9, %v18809_v52, 0.0  ;;  %v10217_v20 = vsel %vm22108_vm3, %v10155_v4, 0.0  ;;  %vm22113_vm13 = vmmov %vm22108_vm3  ;;  %vm22117_vm3 = vnez %v22116_v9 }
 0x9cc   : > { %v10213_v35 = vsel %vm22102_vm2, %v10153_v27, 0.0  ;;  %vm22110_vm2 = vnez %v22109_v61  ;;  %vm22118_vm0 = vmmov %vm22113_vm13  ;;  %v22185_v61 = vld [vmem:[#allocation105_spill] sm:$0xff] }
 0x9cd   : > { %v10214_v28 = vadd.f32 %v10213_v35, %v10212_v39  ;;  %v12638_v8 = vpop.f32.mrb[16].mxu1  ;;  %vm22121_vm9 = vmmov %vm22118_vm0 }
 0x9ce   : > { %v9910_v44 = vpop.f32.mrb[17].mxu1  ;;  %v18824_v46 = vadd.f32 %v12638_v8, %v18710_v6 }
 0x9cf   : > { %v10216_v41 = vadd.f32 %v10215_v5, %v10214_v28  ;;  %v18827_v47 = vadd.f32 %v18710_v6, %v9910_v44  ;;  %v12639_v60 = vpop.f32.mrb[18].mxu1  ;;  %v22125_v44 = vld [vmem:[#allocation81_spill] sm:$0xff] }
 0x9d0   : > { %22106 = vst [vmem:[#allocation36_spill] sm:$0xff] %v18824_v46  ;;  %v9913_v23 = vpop.f32.mrb[19].mxu1  ;;  %v18834_v3 = vadd.f32 %v12639_v60, %v18710_v6  ;;  %v10158_v42 = vsel %vm22115_vm10, %v18824_v46, 0.0  ;;  %vm22133_vm10 = vmmov %vm22121_vm9 }
 0x9d1   : > { %22107 = vst [vmem:[#allocation75_spill] sm:$0xff] %v18827_v47  ;;  %v10156_v25 = vsel %vm22110_vm2, %v18827_v47, 0.0  ;;  %v10218_v34 = vadd.f32 %v10217_v20, %v10216_v41  ;;  %v18837_v58 = vadd.f32 %v18710_v6, %v9913_v23  ;;  %vm22120_vm2 = vnez %v22119_v62 }
 0x9d2   : > { %22111 = vst [vmem:[#allocation37_spill] sm:$0xff] %v18834_v3  ;;  %v10219_v56 = vsel %vm22113_vm13, %v10156_v25, 0.0  ;;  %v10159_v17 = vsel %vm22120_vm2, %v18834_v3, 0.0  ;;  %v10223_v26 = vsel %vm22121_vm9, %v10158_v42, 0.0  ;;  %vm22124_vm13 = vmmov %vm22118_vm0 }
 0x9d3   : > { %22112 = vst [vmem:[#allocation73_spill] sm:$0xff] %v18837_v58  ;;  %v10220_v0 = vadd.f32 %v10219_v56, %v10218_v34  ;;  %v10157_v37 = vsel %vm22117_vm3, %v18837_v58, 0.0  ;;  %v10225_v8 = vsel %vm22124_vm13, %v10159_v17, 0.0  ;;  %v22129_v34 = vld [vmem:[#allocation82_spill] sm:$0xff]  ;;  %v22134_v17 = vld [vmem:[#allocation87_spill] sm:$0xff]  ;;  %vm22136_vm3 = vmmov %vm22121_vm9 }
 0x9d4   : > { %v10221_v45 = vsel %vm22118_vm0, %v10157_v37, 0.0  ;;  %vm22126_vm0 = vnez %v22125_v44  ;;  %vm22130_vm2 = vnez %v22129_v34  ;;  %v22162_v44 = vld [vmem:[#allocation97_spill] sm:$0xff] }
 0x9d5   : > { %v10222_v40 = vadd.f32 %v10221_v45, %v10220_v0  ;;  %v12642_v43 = vpop.f32.mrb[20].mxu1  ;;  %v22131_v0 = vld [vmem:[#allocation51_spill] sm:$0xff] }
 0x9d6   : > { %v9926_v39 = vpop.f32.mrb[21].mxu1  ;;  %v18852_v35 = vadd.f32 %v12642_v43, %v18710_v6  ;;  %vm22132_vm13 = vnez %v22131_v0 }
 0x9d7   : > { %v10224_v27 = vadd.f32 %v10223_v26, %v10222_v40  ;;  %v18855_v4 = vadd.f32 %v18710_v6, %v9926_v39  ;;  %v12643_v28 = vpop.f32.mrb[22].mxu1 }
 0x9d8   : > { %22122 = vst [vmem:[#allocation38_spill] sm:$0xff] %v18852_v35  ;;  %v9929_v5 = vpop.f32.mrb[23].mxu1  ;;  %v18862_v20 = vadd.f32 %v12643_v28, %v18710_v6  ;;  %v10162_v56 = vsel %vm22130_vm2, %v18852_v35, 0.0 }
 0x9d9   : > { %22123 = vst [vmem:[#allocation78_spill] sm:$0xff] %v18855_v4  ;;  %v10160_v41 = vsel %vm22126_vm0, %v18855_v4, 0.0  ;;  %v10226_v60 = vadd.f32 %v10225_v8, %v10224_v27  ;;  %v18865_v23 = vadd.f32 %v18710_v6, %v9929_v5  ;;  %vm22135_vm0 = vnez %v22134_v17 }
 0x9da   : > { %22127 = vst [vmem:[#allocation39_spill] sm:$0xff] %v18862_v20  ;;  %v10227_v25 = vsel %vm22121_vm9, %v10160_v41, 0.0  ;;  %v10163_v40 = vsel %vm22135_vm0, %v18862_v20, 0.0  ;;  %v10231_v39 = vsel %vm22136_vm3, %v10162_v56, 0.0  ;;  %vm22139_vm9 = vmmov %vm22136_vm3 }
 0x9db   : > { %22128 = vst [vmem:[#allocation76_spill] sm:$0xff] %v18865_v23  ;;  %v10228_v42 = vadd.f32 %v10227_v25, %v10226_v60  ;;  %v10161_v37 = vsel %vm22132_vm13, %v18865_v23, 0.0  ;;  %v10233_v60 = vsel %vm22139_vm9, %v10163_v40, 0.0  ;;  %v22145_v40 = vld [vmem:[#allocation85_spill] sm:$0xff]  ;;  %vm22147_vm0 = vmmov %vm22136_vm3 }
 0x9dc   : > { %v10229_v45 = vsel %vm22133_vm10, %v10161_v37, 0.0  ;;  %v22140_v37 = vld [vmem:[#allocation88_spill] sm:$0xff]  ;;  %vm22146_vm9 = vnez %v22145_v40  ;;  %vm22150_vm2 = vmmov %vm22147_vm0 }
 0x9dd   : > { %v10230_v43 = vadd.f32 %v10229_v45, %v10228_v42  ;;  %v12646_v26 = vpop.f32.mrb[24].mxu1  ;;  %vm22141_vm10 = vnez %v22140_v37 }
 0x9de   : > { %v9942_v27 = vpop.f32.mrb[25].mxu1  ;;  %v18880_v8 = vadd.f32 %v12646_v26, %v18710_v6 }
 0x9df   : > { %v10232_v28 = vadd.f32 %v10231_v39, %v10230_v43  ;;  %v18883_v5 = vadd.f32 %v18710_v6, %v9942_v27  ;;  %v12647_v41 = vpop.f32.mrb[26].mxu1 }
 0x9e0   : > { %22137 = vst [vmem:[#allocation40_spill] sm:$0xff] %v18880_v8  ;;  %v9945_v25 = vpop.f32.mrb[27].mxu1  ;;  %v18890_v45 = vadd.f32 %v12647_v41, %v18710_v6  ;;  %v10166_v39 = vsel %vm21134_vm7, %v18880_v8, 0.0  ;;  %v22152_v8 = vld [vmem:[#allocation93_spill] sm:$0xff]  ;;  %vm22158_vm7 = vmmov %vm22150_vm2 }
 0x9e1   : > { %22138 = vst [vmem:[#allocation42_spill] sm:$0xff] %v18883_v5  ;;  %v10164_v17 = vsel %vm22141_vm10, %v18883_v5, 0.0  ;;  %v10234_v42 = vadd.f32 %v10233_v60, %v10232_v28  ;;  %v18893_v56 = vadd.f32 %v18710_v6, %v9945_v25  ;;  %v22148_v28 = vld [vmem:[#allocation49_spill] sm:$0xff]  ;;  %v10239_v5 = vsel %vm22150_vm2, %v10166_v39, 0.0 }
 0x9e2   : > { %22142 = vst [vmem:[#allocation3_spill] sm:$0xff] %v18890_v45  ;;  %v10235_v43 = vsel %vm22136_vm3, %v10164_v17, 0.0  ;;  %vm22149_vm10 = vnez %v22148_v28  ;;  %vm22151_vm3 = vmmov %vm22147_vm0 }
 0x9e3   : > { %22143 = vst [vmem:[#allocation43_spill] sm:$0xff] %v18893_v56  ;;  %v10236_v27 = vadd.f32 %v10235_v43, %v10234_v42  ;;  %v10165_v34 = vsel %vm22146_vm9, %v18893_v56, 0.0  ;;  %v10167_v41 = vsel %vm22149_vm10, %v18890_v45, 0.0  ;;  %vm22161_vm9 = vmmov %vm22150_vm2 }
 0x9e4   : > { %v10237_v37 = vsel %vm22147_vm0, %v10165_v34, 0.0  ;;  %v10241_v40 = vsel %vm22151_vm3, %v10167_v41, 0.0  ;;  %vm22153_vm0 = vnez %v22152_v8  ;;  %v22156_v41 = vld [vmem:[#allocation95_spill] sm:$0xff] }
 0x9e5   : > { %v10238_v60 = vadd.f32 %v10237_v37, %v10236_v27  ;;  %v12650_v25 = vpop.f32.mrb[28].mxu1  ;;  %vm22157_vm3 = vnez %v22156_v41 }
 0x9e6   : > { %v9958_v17 = vpop.f32.mrb[29].mxu1  ;;  %v18908_v26 = vadd.f32 %v12650_v25, %v18710_v6 }
 0x9e7   : > { %v10240_v0 = vadd.f32 %v10239_v5, %v10238_v60  ;;  %v18911_v42 = vadd.f32 %v18710_v6, %v9958_v17  ;;  %v12651_v43 = vpop.f32.mrb[30].mxu1  ;;  %v22154_v60 = vld [vmem:[#allocation94_spill] sm:$0xff] }
 0x9e8   : > { %v9961_v34 = vpop.f32.mrb[31].mxu1  ;;  %v18918_v27 = vadd.f32 %v12651_v43, %v18710_v6  ;;  %vm22155_vm10 = vnez %v22154_v60 }
 0x9e9   : > { %v10168_v28 = vsel %vm22153_vm0, %v18911_v42, 0.0  ;;  %v10242_v37 = vadd.f32 %v10241_v40, %v10240_v0  ;;  %v18921_v5 = vadd.f32 %v18710_v6, %v9961_v34  ;;  %v10170_v25 = vsel %vm22155_vm10, %v18908_v26, 0.0  ;;  %v22159_v0 = vld [vmem:[#allocation96_spill] sm:$0xff] }
 0x9ea   : > { %v10243_v39 = vsel %vm22150_vm2, %v10168_v28, 0.0  ;;  %vm22160_vm0 = vnez %v22159_v0  ;;  %v10247_v56 = vsel %vm22161_vm9, %v10170_v25, 0.0  ;;  %vm22164_vm9 = vmmov %vm22150_vm2 }
 0x9eb   : > { %v10244_v17 = vadd.f32 %v10243_v39, %v10242_v37  ;;  %v10169_v45 = vsel %vm22157_vm3, %v18921_v5, 0.0  ;;  %v10171_v40 = vsel %vm22160_vm0, %v18918_v27, 0.0  ;;  %vm22169_vm10 = vmmov %vm22164_vm9 }
 0x9ec   : > { %v10245_v8 = vsel %vm22158_vm7, %v10169_v45, 0.0  ;;  %v10249_v41 = vsel %vm22150_vm2, %v10171_v40, 0.0  ;;  %vm22163_vm7 = vnez %v22162_v44  ;;  %v22167_v40 = vld [vmem:[#allocation99_spill] sm:$0xff]  ;;  %vm22172_vm3 = vmmov %vm22164_vm9 }
 0x9ed   : > { %v10246_v43 = vadd.f32 %v10245_v8, %v10244_v17  ;;  %v12654_v34 = vpop.f32.mrb[32].mxu1  ;;  %vm22168_vm2 = vnez %v22167_v40 }
 0x9ee   : > { %v9974_v28 = vpop.f32.mrb[33].mxu1  ;;  %v18936_v60 = vadd.f32 %v12654_v34, %v18710_v6 }
 0x9ef   : > { %v10248_v20 = vadd.f32 %v10247_v56, %v10246_v43  ;;  %v18939_v37 = vadd.f32 %v18710_v6, %v9974_v28  ;;  %v12655_v39 = vpop.f32.mrb[34].mxu1  ;;  %v22165_v43 = vld [vmem:[#allocation98_spill] sm:$0xff] }
 0x9f0   : > { %v9977_v45 = vpop.f32.mrb[35].mxu1  ;;  %v18946_v17 = vadd.f32 %v12655_v39, %v18710_v6  ;;  %vm22166_vm0 = vnez %v22165_v43 }
 0x9f1   : > { %v10172_v0 = vsel %vm22163_vm7, %v18939_v37, 0.0  ;;  %v10250_v8 = vadd.f32 %v10249_v41, %v10248_v20  ;;  %v18949_v56 = vadd.f32 %v18710_v6, %v9977_v45  ;;  %v10174_v34 = vsel %vm22166_vm0, %v18936_v60, 0.0  ;;  %v22170_v20 = vld [vmem:[#allocation100_spill] sm:$0xff]  ;;  %vm22180_vm0 = vmmov %vm22172_vm3 }
 0x9f2   : > { %v10251_v25 = vsel %vm22164_vm9, %v10172_v0, 0.0  ;;  %vm22171_vm7 = vnez %v22170_v20  ;;  %v10255_v62 = vsel %vm22172_vm3, %v10174_v34, 0.0  ;;  %vm22173_vm9 = vmmov %vm22172_vm3 }
 0x9f3   : > { %v10252_v28 = vadd.f32 %v10251_v25, %v10250_v8  ;;  %v10173_v35 = vsel %vm22168_vm2, %v18949_v56, 0.0  ;;  %v10175_v41 = vsel %vm22171_vm7, %v18946_v17, 0.0  ;;  %vm22183_vm2 = vmmov %vm22180_vm0 }
 0x9f4   : > { %v10253_v44 = vsel %vm22169_vm10, %v10173_v35, 0.0  ;;  %v10257_v40 = vsel %vm22173_vm9, %v10175_v41, 0.0  ;;  %vm22175_vm10 = vnez %v22174_v7  ;;  %v22178_v41 = vld [vmem:[#allocation103_spill] sm:$0xff] }
 0x9f5   : > { %v10254_v39 = vadd.f32 %v10253_v44, %v10252_v28  ;;  %v12658_v45 = vpop.f32.mrb[36].mxu1  ;;  %vm22179_vm9 = vnez %v22178_v41 }
 0x9f6   : > { %v9990_v0 = vpop.f32.mrb[37].mxu1  ;;  %v18964_v43 = vadd.f32 %v12658_v45, %v18710_v6 }
 0x9f7   : > { %v10256_v23 = vadd.f32 %v10255_v62, %v10254_v39  ;;  %v18967_v8 = vadd.f32 %v18710_v6, %v9990_v0  ;;  %v12659_v25 = vpop.f32.mrb[38].mxu1  ;;  %v22176_v39 = vld [vmem:[#allocation102_spill] sm:$0xff] }
 0x9f8   : > { %v9993_v35 = vpop.f32.mrb[39].mxu1  ;;  %v18974_v28 = vadd.f32 %v12659_v25, %v18710_v6  ;;  %vm22177_vm7 = vnez %v22176_v39 }
 0x9f9   : > { %v10176_v20 = vsel %vm22175_vm10, %v18967_v8, 0.0  ;;  %v10258_v44 = vadd.f32 %v10257_v40, %v10256_v23  ;;  %v18977_v62 = vadd.f32 %v18710_v6, %v9993_v35  ;;  %v10178_v45 = vsel %vm22177_vm7, %v18964_v43, 0.0  ;;  %v22181_v23 = vld [vmem:[#allocation104_spill] sm:$0xff]  ;;  %vm22193_vm7 = vmmov %vm22183_vm2 }
 0x9fa   : > { %v10259_v34 = vsel %vm22172_vm3, %v10176_v20, 0.0  ;;  %vm22182_vm10 = vnez %v22181_v23  ;;  %v10263_v9 = vsel %vm22183_vm2, %v10178_v45, 0.0  ;;  %vm22184_vm3 = vmmov %vm22180_vm0 }
 0x9fb   : > { %v10260_v0 = vadd.f32 %v10259_v34, %v10258_v44  ;;  %v10177_v4 = vsel %vm22179_vm9, %v18977_v62, 0.0  ;;  %v10179_v40 = vsel %vm22182_vm10, %v18974_v28, 0.0  ;;  %vm22190_vm10 = vmmov %vm22183_vm2 }
 0x9fc   : > { %v10261_v7 = vsel %vm22180_vm0, %v10177_v4, 0.0  ;;  %v10265_v41 = vsel %vm22184_vm3, %v10179_v40, 0.0  ;;  %vm22186_vm0 = vnez %v22185_v61  ;;  %v22188_v40 = vld [vmem:[#allocation107_spill] sm:$0xff] }
 0x9fd   : > { %v10262_v25 = vadd.f32 %v10261_v7, %v10260_v0  ;;  %v12662_v35 = vpop.f32.mrb[40].mxu1  ;;  %vm22189_vm3 = vnez %v22188_v40 }
 0x9fe   : > { %v10006_v20 = vpop.f32.mrb[41].mxu1  ;;  %v18992_v39 = vadd.f32 %v12662_v35, %v18710_v6 }
 0x9ff   : > { %v10264_v3 = vadd.f32 %v10263_v9, %v10262_v25  ;;  %v18995_v44 = vadd.f32 %v18710_v6, %v10006_v20  ;;  %v12663_v34 = vpop.f32.mrb[42].mxu1 }
 0xa00   : > { %v10009_v4 = vpop.f32.mrb[43].mxu1  ;;  %v19002_v0 = vadd.f32 %v12663_v34, %v18710_v6  ;;  %v10182_v35 = vsel %vm21195_vm11, %v18992_v39, 0.0 }
 0xa01   : > { %v10180_v23 = vsel %vm22186_vm0, %v18995_v44, 0.0  ;;  %v10266_v7 = vadd.f32 %v10265_v41, %v10264_v3  ;;  %v19005_v9 = vadd.f32 %v18710_v6, %v10009_v4  ;;  %v22191_v3 = vld [vmem:[#allocation108_spill] sm:$0xff]  ;;  %v10271_v2 = vsel %vm22193_vm7, %v10182_v35, 0.0  ;;  %vm22196_vm7 = vmmov %vm22183_vm2 }
 0xa02   : > { %v10267_v45 = vsel %vm22183_vm2, %v10180_v23, 0.0  ;;  %vm22192_vm0 = vnez %v22191_v3  ;;  %vm22201_vm11 = vmmov %vm22196_vm7 }
 0xa03   : > { %v10268_v20 = vadd.f32 %v10267_v45, %v10266_v7  ;;  %v10181_v46 = vsel %vm22189_vm3, %v19005_v9, 0.0  ;;  %v10183_v41 = vsel %vm22192_vm0, %v19002_v0, 0.0  ;;  %vm22204_vm3 = vmmov %vm22196_vm7 }
 0xa04   : > { %v10269_v61 = vsel %vm22190_vm10, %v10181_v46, 0.0  ;;  %v10273_v40 = vsel %vm22183_vm2, %v10183_v41, 0.0  ;;  %vm22195_vm10 = vnez %v22194_v36  ;;  %v22199_v41 = vld [vmem:[#allocation111_spill] sm:$0xff] }
 0xa05   : > { %v10270_v34 = vadd.f32 %v10269_v61, %v10268_v20  ;;  %v12666_v4 = vpop.f32.mrb[44].mxu1  ;;  %vm22200_vm2 = vnez %v22199_v41 }
 0xa06   : > { %v10022_v23 = vpop.f32.mrb[45].mxu1  ;;  %v19020_v25 = vadd.f32 %v12666_v4, %v18710_v6 }
 0xa07   : > { %v10272_v58 = vadd.f32 %v10271_v2, %v10270_v34  ;;  %v19023_v7 = vadd.f32 %v18710_v6, %v10022_v23  ;;  %v12667_v45 = vpop.f32.mrb[46].mxu1  ;;  %v22197_v34 = vld [vmem:[#allocation110_spill] sm:$0xff] }
 0xa08   : > { %v10025_v46 = vpop.f32.mrb[47].mxu1  ;;  %v19030_v20 = vadd.f32 %v12667_v45, %v18710_v6  ;;  %vm22198_vm0 = vnez %v22197_v34 }
 0xa09   : > { %v10184_v3 = vsel %vm22195_vm10, %v19023_v7, 0.0  ;;  %v10274_v61 = vadd.f32 %v10273_v40, %v10272_v58  ;;  %v19033_v2 = vadd.f32 %v18710_v6, %v10025_v46  ;;  %v10186_v4 = vsel %vm22198_vm0, %v19020_v25, 0.0  ;;  %v22202_v58 = vld [vmem:[#allocation112_spill] sm:$0xff] }
 0xa0a   : > { %v10275_v35 = vsel %vm22196_vm7, %v10184_v3, 0.0  ;;  %vm22203_vm10 = vnez %v22202_v58  ;;  %v10279_v6 = vsel %vm22204_vm3, %v10186_v4, 0.0  ;;  %vm22205_vm7 = vmmov %vm22204_vm3 }
 0xa0b   : > { %v10276_v23 = vadd.f32 %v10275_v35, %v10274_v61  ;;  %v10185_v47 = vsel %vm22200_vm2, %v19033_v2, 0.0  ;;  %v10187_v40 = vsel %vm22203_vm10, %v19030_v20, 0.0 }
 0xa0c   : > { %v10277_v36 = vsel %vm22201_vm11, %v10185_v47, 0.0  ;;  %v10281_v3 = vsel %vm22205_vm7, %v10187_v40, 0.0  ;;  %vm22212_vm11 = vmmov %vm22204_vm3 }
 0xa0d   : > { %v10278_v45 = vadd.f32 %v10277_v36, %v10276_v23 }
 0xa0f   : > { %v10280_v46 = vadd.f32 %v10279_v6, %v10278_v45 }
 0xa11   : > { %v10282_v18 = vadd.f32 %v10281_v3, %v10280_v46 }
 0xa13   : > { %v10283_v34 = vrot.slane %v10282_v18, 4 }
 0xa15   : > { %v10284_v16 = vadd.f32 %v10283_v34, %v10282_v18 }
 0xa17   : > { %v10285_v61 = vrot.slane %v10284_v16, 2 }
 0xa19   : > { %v10286_v35 = vadd.f32 %v10285_v61, %v10284_v16 }
 0xa1b   : > { %v10287_v10 = vrot.slane %v10286_v35, 1 }
 0xa1d   : > { %v10288_v41 = vadd.f32 %v10287_v10, %v10286_v35 }
 0xa1f   : > { %v19048_v54 = vmul.f32 0.00390625, %v10288_v41 }
 0xa21   : > { %v10290_v3 = vsub.f32 %v18716_v57, %v19048_v54  ;;  %v10291_v61 = vsub.f32 %v18725_v14, %v19048_v54  ;;  %v10292_v35 = vsub.f32 %v18713_v51, %v19048_v54  ;;  %v10293_v40 = vsub.f32 %v18722_v12, %v19048_v54 }
 0xa22   : > { %v10294_v57 = vsub.f32 %v18743_v53, %v19048_v54  ;;  %v10295_v63 = vsub.f32 %v18753_v31, %v19048_v54  ;;  %v10296_v13 = vsub.f32 %v18740_v55, %v19048_v54  ;;  %v10297_v1 = vsub.f32 %v18750_v38, %v19048_v54 }
 0xa23   : > { %v19100_v45 = vsel %vm15697_vm14, %v10290_v3, 0.0  ;;  %v19104_v6 = vsel %vm15713_vm15, %v10291_v61, 0.0  ;;  %v19110_v14 = vsel %vm15701_vm8, %v10292_v35, 0.0  ;;  %v19120_v48 = vsel %vm15726_vm12, %v10293_v40, 0.0  ;;  %vm22206_vm14 = vmmov %vm22204_vm3 }
 0xa24   : > { %v10386_v51 = vmul.f32 %v19100_v45, %v19100_v45  ;;  %v10387_v12 = vmul.f32 %v19104_v6, %v19104_v6  ;;  %v10388_v53 = vmul.f32 %v19110_v14, %v19110_v14  ;;  %v19128_v3 = vsel %vm15748_vm5, %v10294_v57, 0.0  ;;  %vm22207_vm8 = vmmov %vm22204_vm3 }
 0xa25   : > { %v10389_v61 = vmul.f32 %v19120_v48, %v19120_v48  ;;  %v19138_v40 = vsel %vm22077_vm6, %v10295_v63, 0.0  ;;  %v10390_v55 = vmul.f32 %v19128_v3, %v19128_v3  ;;  %vm22208_vm5 = vmmov %vm22204_vm3  ;;  %v10298_v57 = vsub.f32 %v18771_v50, %v19048_v54 }
 0xa26   : > { %v10434_v35 = vsel %vm22206_vm14, %v10386_v51, 0.0  ;;  %v10435_v31 = vsel %vm22207_vm8, %v10387_v12, 0.0  ;;  %v10437_v24 = vsel %vm22208_vm5, %v10388_v53, 0.0  ;;  %v19147_v51 = vsel %vm21074_vm4, %v10296_v13, 0.0  ;;  %vm22209_vm15 = vmmov %vm22204_vm3 }
 0xa27   : > { %v10436_v46 = vadd.f32 %v10435_v31, %v10434_v35  ;;  %v10391_v38 = vmul.f32 %v19138_v40, %v19138_v40  ;;  %v10439_v29 = vsel %vm22209_vm15, %v10389_v61, 0.0  ;;  %v10299_v63 = vsub.f32 %v18781_v22, %v19048_v54  ;;  %vm22210_vm12 = vmmov %vm22204_vm3 }
 0xa28   : > { %v19156_v35 = vsel %vm22080_vm1, %v10297_v1, 0.0  ;;  %v10392_v50 = vmul.f32 %v19147_v51, %v19147_v51  ;;  %v10441_v33 = vsel %vm22210_vm12, %v10390_v55, 0.0  ;;  %vm22211_vm4 = vnez %v22082_v11  ;;  %vm22214_vm1 = vmmov %vm22204_vm3 }
 0xa29   : > { %v10438_v12 = vadd.f32 %v10437_v24, %v10436_v46  ;;  %v10300_v46 = vsub.f32 %v18768_v30, %v19048_v54  ;;  %v19165_v13 = vsel %vm22211_vm4, %v10298_v57, 0.0  ;;  %v10393_v22 = vmul.f32 %v19156_v35, %v19156_v35  ;;  %vm22216_vm7 = vmmov %vm22214_vm1 }
 0xa2a   : > { %v10443_v32 = vsel %vm22212_vm11, %v10391_v38, 0.0  ;;  %v10301_v31 = vsub.f32 %v18778_v15, %v19048_v54  ;;  %vm22213_vm6 = vnez %v22087_v59  ;;  %v10394_v30 = vmul.f32 %v19165_v13, %v19165_v13  ;;  %vm22218_vm8 = vmmov %vm22214_vm1 }
 0xa2b   : > { %v10440_v53 = vadd.f32 %v10439_v29, %v10438_v12  ;;  %v19174_v1 = vsel %vm22213_vm6, %v10299_v63, 0.0  ;;  %v10445_v11 = vsel %vm22214_vm1, %v10392_v50, 0.0  ;;  %v10302_v24 = vsub.f32 %v18799_v49, %v19048_v54  ;;  %vm22222_vm15 = vmmov %vm22214_vm1 }
 0xa2c   : > { %vm22215_vm3 = vnez %v22085_v21  ;;  %v10395_v15 = vmul.f32 %v19174_v1, %v19174_v1  ;;  %v10447_v59 = vsel %vm22216_vm7, %v10393_v22, 0.0  ;;  %v10303_v38 = vsub.f32 %v18809_v52, %v19048_v54  ;;  %v22223_v22 = vld [vmem:[#allocation50_spill] sm:$0xff]  ;;  %vm22226_vm4 = vmmov %vm22214_vm1 }
 0xa2d   : > { %v10442_v61 = vadd.f32 %v10441_v33, %v10440_v53  ;;  %v19183_v57 = vsel %vm22215_vm3, %v10300_v46, 0.0  ;;  %vm22217_vm14 = vnez %v22090_v19  ;;  %v10449_v21 = vsel %vm22218_vm8, %v10394_v30, 0.0  ;;  %v22219_v53 = vld [vmem:[#allocation35_spill] sm:$0xff]  ;;  %v22220_v33 = vld [vmem:[#allocation65_spill] sm:$0xff]  ;;  %vm22230_vm6 = vmmov %vm22214_vm1 }
 0xa2e   : > { %v19192_v29 = vsel %vm22217_vm14, %v10301_v31, 0.0  ;;  %v10396_v49 = vmul.f32 %v19183_v57, %v19183_v57  ;;  %v10304_v50 = vsub.f32 %v22219_v53, %v19048_v54  ;;  %vm22221_vm5 = vnez %v22220_v33  ;;  %v22224_v31 = vld [vmem:[#allocation68_spill] sm:$0xff]  ;;  %v22231_v33 = vld [vmem:[#allocation73_spill] sm:$0xff]  ;;  %vm22234_vm3 = vmmov %vm22226_vm4 }
 0xa2f   : > { %v10444_v55 = vadd.f32 %v10443_v32, %v10442_v61  ;;  %v19201_v46 = vsel %vm22221_vm5, %v10302_v24, 0.0  ;;  %v10397_v52 = vmul.f32 %v19192_v29, %v19192_v29  ;;  %v10451_v19 = vsel %vm22222_vm15, %v10395_v15, 0.0  ;;  %vm22238_vm14 = vmmov %vm22234_vm3 }
 0xa30   : > { %v10305_v32 = vsub.f32 %v22223_v22, %v19048_v54  ;;  %vm22225_vm12 = vnez %v22224_v31  ;;  %v10453_v24 = vsel %vm22226_vm4, %v10396_v49, 0.0  ;;  %vm22242_vm5 = vmmov %vm22234_vm3 }
 0xa31   : > { %v10446_v12 = vadd.f32 %v10445_v11, %v10444_v55  ;;  %v19210_v55 = vsel %vm22225_vm12, %v10303_v38, 0.0  ;;  %v10398_v11 = vmul.f32 %v19201_v46, %v19201_v46  ;;  %v10455_v38 = vsel %vm22230_vm6, %v10397_v52, 0.0  ;;  %vm22246_vm12 = vmmov %vm22234_vm3 }
 0xa32   : > { %v10399_v53 = vmul.f32 %v19210_v55, %v19210_v55 }
 0xa33   : > { %v10448_v63 = vadd.f32 %v10447_v59, %v10446_v12  ;;  %v22227_v12 = vld [vmem:[#allocation75_spill] sm:$0xff] }
 0xa34   : > { %v10306_v59 = vsub.f32 %v22227_v12, %v19048_v54  ;;  %v22236_v12 = vld [vmem:[#allocation71_spill] sm:$0xff] }
 0xa35   : > { %v10450_v61 = vadd.f32 %v10449_v21, %v10448_v63  ;;  %v22228_v63 = vld [vmem:[#allocation66_spill] sm:$0xff]  ;;  %vm22237_vm7 = vnez %v22236_v12  ;;  %v22244_v12 = vld [vmem:[#allocation72_spill] sm:$0xff] }
 0xa36   : > { %vm22229_vm11 = vnez %v22228_v63  ;;  %v19237_v63 = vsel %vm22237_vm7, %v10306_v59, 0.0  ;;  %vm22245_vm15 = vnez %v22244_v12  ;;  %v22252_v12 = vld [vmem:[#allocation81_spill] sm:$0xff] }
 0xa37   : > { %v10452_v30 = vadd.f32 %v10451_v19, %v10450_v61  ;;  %v19219_v21 = vsel %vm22229_vm11, %v10304_v50, 0.0  ;;  %v10307_v61 = vsub.f32 %v22231_v33, %v19048_v54  ;;  %v22232_v19 = vld [vmem:[#allocation70_spill] sm:$0xff]  ;;  %v10457_v50 = vsel %vm22234_vm3, %v10398_v11, 0.0  ;;  %vm22250_vm11 = vmmov %vm22234_vm3 }
 0xa38   : > { %vm22233_vm1 = vnez %v22232_v19  ;;  %v10400_v31 = vmul.f32 %v19219_v21, %v19219_v21  ;;  %v22240_v19 = vld [vmem:[#allocation77_spill] sm:$0xff]  ;;  %vm22253_vm6 = vnez %v22252_v12  ;;  %v22259_v12 = vld [vmem:[#allocation82_spill] sm:$0xff] }
 0xa39   : > { %v10454_v15 = vadd.f32 %v10453_v24, %v10452_v30  ;;  %v19228_v22 = vsel %vm22233_vm1, %v10305_v32, 0.0  ;;  %v22235_v30 = vld [vmem:[#allocation36_spill] sm:$0xff]  ;;  %v10459_v32 = vsel %vm22238_vm14, %v10399_v53, 0.0  ;;  %vm22241_vm8 = vnez %v22240_v19  ;;  %vm22254_vm1 = vmmov %vm22234_vm3 }
 0xa3a   : > { %v10308_v24 = vsub.f32 %v22235_v30, %v19048_v54  ;;  %v10401_v33 = vmul.f32 %v19228_v22, %v19228_v22  ;;  %v19246_v41 = vsel %vm22241_vm8, %v10307_v61, 0.0  ;;  %v10402_v30 = vmul.f32 %v19237_v63, %v19237_v63  ;;  %v22248_v19 = vld [vmem:[#allocation80_spill] sm:$0xff]  ;;  %vm22257_vm3 = vmmov %vm22254_vm1 }
 0xa3b   : > { %v10456_v49 = vadd.f32 %v10455_v38, %v10454_v15  ;;  %v22239_v15 = vld [vmem:[#allocation37_spill] sm:$0xff]  ;;  %v10461_v59 = vsel %vm22242_vm5, %v10400_v31, 0.0  ;;  %vm22249_vm4 = vnez %v22248_v19  ;;  %vm22260_vm7 = vnez %v22259_v12  ;;  %vm22261_vm14 = vmmov %vm22254_vm1  ;;  %v22263_v19 = vld [vmem:[#allocation87_spill] sm:$0xff] }
 0xa3c   : > { %v10309_v38 = vsub.f32 %v22239_v15, %v19048_v54  ;;  %v19255_v34 = vsel %vm22245_vm15, %v10308_v24, 0.0  ;;  %v10403_v15 = vmul.f32 %v19246_v41, %v19246_v41  ;;  %v10463_v61 = vsel %vm22246_vm12, %v10401_v33, 0.0  ;;  %vm22266_vm8 = vmmov %vm22254_vm1  ;;  %v22268_v12 = vld [vmem:[#allocation88_spill] sm:$0xff] }
 0xa3d   : > { %v10458_v52 = vadd.f32 %v10457_v50, %v10456_v49  ;;  %v22243_v49 = vld [vmem:[#allocation78_spill] sm:$0xff]  ;;  %v10465_v24 = vsel %vm22250_vm11, %v10402_v30, 0.0  ;;  %vm22269_vm5 = vnez %v22268_v12  ;;  %vm22270_vm15 = vmmov %vm22254_vm1  ;;  %v22275_v12 = vld [vmem:[#allocation89_spill] sm:$0xff] }
 0xa3e   : > { %v10310_v50 = vsub.f32 %v22243_v49, %v19048_v54  ;;  %v19264_v16 = vsel %vm22249_vm4, %v10309_v38, 0.0  ;;  %v10404_v49 = vmul.f32 %v19255_v34, %v19255_v34  ;;  %v10467_v38 = vsel %vm22254_vm1, %v10403_v15, 0.0  ;;  %vm22274_vm4 = vmmov %vm22254_vm1 }
 0xa3f   : > { %v10460_v11 = vadd.f32 %v10459_v32, %v10458_v52  ;;  %v22247_v52 = vld [vmem:[#allocation76_spill] sm:$0xff]  ;;  %vm22276_vm11 = vnez %v22275_v12  ;;  %v22285_v12 = vld [vmem:[#allocation95_spill] sm:$0xff] }
 0xa40   : > { %v10311_v32 = vsub.f32 %v22247_v52, %v19048_v54  ;;  %v19273_v10 = vsel %vm22253_vm6, %v10310_v50, 0.0  ;;  %v10405_v52 = vmul.f32 %v19264_v16, %v19264_v16  ;;  %v10469_v50 = vsel %vm22257_vm3, %v10404_v49, 0.0  ;;  %vm22277_vm6 = vmmov %vm22254_vm1 }
 0xa41   : > { %v10462_v53 = vadd.f32 %v10461_v59, %v10460_v11  ;;  %v22251_v11 = vld [vmem:[#allocation38_spill] sm:$0xff] }
 0xa42   : > { %v10312_v59 = vsub.f32 %v22251_v11, %v19048_v54  ;;  %v19282_v18 = vsel %vm22132_vm13, %v10311_v32, 0.0  ;;  %v10406_v11 = vmul.f32 %v19273_v10, %v19273_v10  ;;  %v10471_v32 = vsel %vm22261_vm14, %v10405_v52, 0.0  ;;  %vm22283_vm14 = vmmov %vm22257_vm3 }
 0xa43   : > { %v10464_v31 = vadd.f32 %v10463_v61, %v10462_v53  ;;  %v22255_v53 = vld [vmem:[#allocation39_spill] sm:$0xff]  ;;  %vm22264_vm13 = vnez %v22263_v19  ;;  %v22272_v19 = vld [vmem:[#allocation85_spill] sm:$0xff] }
 0xa44   : > { %v10313_v61 = vsub.f32 %v22255_v53, %v19048_v54  ;;  %v19291_v23 = vsel %vm22260_vm7, %v10312_v59, 0.0  ;;  %v10407_v53 = vmul.f32 %v19282_v18, %v19282_v18  ;;  %v10473_v59 = vsel %vm22266_vm8, %v10406_v11, 0.0  ;;  %vm22287_vm8 = vmmov %vm22257_vm3 }
 0xa45   : > { %v10466_v33 = vadd.f32 %v10465_v24, %v10464_v31  ;;  %v22258_v31 = vld [vmem:[#allocation42_spill] sm:$0xff]  ;;  %vm22273_vm12 = vnez %v22272_v19  ;;  %v22281_v19 = vld [vmem:[#allocation93_spill] sm:$0xff] }
 0xa46   : > { %v10314_v24 = vsub.f32 %v22258_v31, %v19048_v54  ;;  %v19300_v4 = vsel %vm22264_vm13, %v10313_v61, 0.0  ;;  %v10408_v31 = vmul.f32 %v19291_v23, %v19291_v23  ;;  %v10475_v61 = vsel %vm22270_vm15, %v10407_v53, 0.0  ;;  %vm22291_vm15 = vmmov %vm22257_vm3 }
 0xa47   : > { %v10468_v30 = vadd.f32 %v10467_v38, %v10466_v33  ;;  %v22262_v33 = vld [vmem:[#allocation43_spill] sm:$0xff]  ;;  %22265 = vst [vmem:[#allocation90_spill] sm:$0xff] %v19300_v4  ;;  %vm22282_vm7 = vnez %v22281_v19  ;;  %vm22286_vm13 = vnez %v22285_v12 }
 0xa48   : > { %v10315_v38 = vsub.f32 %v22262_v33, %v19048_v54  ;;  %v19309_v36 = vsel %vm22269_vm5, %v10314_v24, 0.0  ;;  %v10409_v33 = vmul.f32 %v19300_v4, %v19300_v4  ;;  %v10477_v24 = vsel %vm22274_vm4, %v10408_v31, 0.0  ;;  %v22278_v4 = vld [vmem:[#allocation49_spill] sm:$0xff]  ;;  %vm22295_vm4 = vmmov %vm22257_vm3 }
 0xa49   : > { %v10470_v15 = vadd.f32 %v10469_v50, %v10468_v30  ;;  %v22267_v30 = vld [vmem:[#allocation40_spill] sm:$0xff]  ;;  %vm22279_vm1 = vnez %v22278_v4 }
 0xa4a   : > { %v10316_v50 = vsub.f32 %v22267_v30, %v19048_v54  ;;  %v19318_v47 = vsel %vm22273_vm12, %v10315_v38, 0.0  ;;  %v10410_v30 = vmul.f32 %v19309_v36, %v19309_v36 }
 0xa4b   : > { %v10472_v49 = vadd.f32 %v10471_v32, %v10470_v15  ;;  %v22271_v15 = vld [vmem:[#allocation3_spill] sm:$0xff]  ;;  %v10411_v53 = vmul.f32 %v19318_v47, %v19318_v47 }
 0xa4c   : > { %v10317_v32 = vsub.f32 %v22271_v15, %v19048_v54  ;;  %v10479_v15 = vsel %vm22277_vm6, %v10409_v33, 0.0  ;;  %v10481_v31 = vsel %vm22257_vm3, %v10410_v30, 0.0  ;;  %vm22299_vm6 = vmmov %vm22257_vm3 }
 0xa4d   : > { %v10474_v52 = vadd.f32 %v10473_v59, %v10472_v49  ;;  %v19325_v49 = vsel %vm22276_vm11, %v10316_v50, 0.0  ;;  %v22280_v50 = vsub.f32 %v18911_v42, %v19048_v54  ;;  %v10483_v4 = vsel %vm22283_vm14, %v10411_v53, 0.0  ;;  %vm22306_vm14 = vmmov %vm22257_vm3 }
 0xa4e   : > { %v19332_v38 = vsel %vm22279_vm1, %v10317_v32, 0.0  ;;  %v22284_v32 = vsub.f32 %v18921_v5, %v19048_v54 }
 0xa4f   : > { %v10476_v11 = vadd.f32 %v10475_v61, %v10474_v52  ;;  %v10412_v61 = vmul.f32 %v19325_v49, %v19325_v49  ;;  %v10413_v33 = vmul.f32 %v19332_v38, %v19332_v38 }
 0xa51   : > { %v10478_v59 = vadd.f32 %v10477_v24, %v10476_v11  ;;  %v19342_v11 = vsel %vm22282_vm7, %v22280_v50, 0.0  ;;  %v10487_v19 = vsel %vm22291_vm15, %v10413_v33, 0.0  ;;  %vm22314_vm15 = vmmov %vm22257_vm3 }
 0xa52   : > { %v10414_v42 = vmul.f32 %v19342_v11, %v19342_v11 }
 0xa53   : > { %v10480_v52 = vadd.f32 %v10479_v15, %v10478_v59  ;;  %v19352_v59 = vsel %vm22286_vm13, %v22284_v32, 0.0  ;;  %v10485_v15 = vsel %vm22287_vm8, %v10412_v61, 0.0  ;;  %vm22310_vm8 = vmmov %vm22257_vm3 }
 0xa54   : > { %v10415_v5 = vmul.f32 %v19352_v59, %v19352_v59  ;;  %v10489_v12 = vsel %vm22295_vm4, %v10414_v42, 0.0 }
 0xa55   : > { %v10482_v24 = vadd.f32 %v10481_v31, %v10480_v52  ;;  %v22288_v52 = vsub.f32 %v18908_v26, %v19048_v54  ;;  %v22289_v31 = vld [vmem:[#allocation94_spill] sm:$0xff] }
 0xa56   : > { %vm22290_vm5 = vnez %v22289_v31  ;;  %v10491_v31 = vsel %vm22299_vm6, %v10415_v5, 0.0  ;;  %vm22325_vm6 = vmmov %vm22257_vm3 }
 0xa57   : > { %v10484_v30 = vadd.f32 %v10483_v4, %v10482_v24  ;;  %v19362_v50 = vsel %vm22290_vm5, %v22288_v52, 0.0  ;;  %v22292_v24 = vsub.f32 %v18918_v27, %v19048_v54  ;;  %v22293_v4 = vld [vmem:[#allocation96_spill] sm:$0xff] }
 0xa58   : > { %vm22294_vm12 = vnez %v22293_v4  ;;  %v10416_v26 = vmul.f32 %v19362_v50, %v19362_v50 }
 0xa59   : > { %v10486_v53 = vadd.f32 %v10485_v15, %v10484_v30  ;;  %v19372_v32 = vsel %vm22294_vm12, %v22292_v24, 0.0  ;;  %v22296_v30 = vsub.f32 %v18939_v37, %v19048_v54  ;;  %v22297_v15 = vld [vmem:[#allocation97_spill] sm:$0xff]  ;;  %vm22317_vm12 = vmmov %vm22257_vm3 }
 0xa5a   : > { %vm22298_vm11 = vnez %v22297_v15  ;;  %v10417_v27 = vmul.f32 %v19372_v32, %v19372_v32  ;;  %v10493_v4 = vsel %vm22257_vm3, %v10416_v26, 0.0 }
 0xa5b   : > { %v10488_v61 = vadd.f32 %v10487_v19, %v10486_v53  ;;  %v19382_v52 = vsel %vm22298_vm11, %v22296_v30, 0.0  ;;  %v22300_v53 = vsub.f32 %v18949_v56, %v19048_v54  ;;  %v22301_v19 = vld [vmem:[#allocation99_spill] sm:$0xff]  ;;  %vm22321_vm11 = vmmov %vm22257_vm3 }
 0xa5c   : > { %vm22302_vm1 = vnez %v22301_v19  ;;  %v10418_v37 = vmul.f32 %v19382_v52, %v19382_v52  ;;  %v10495_v15 = vsel %vm22306_vm14, %v10417_v27, 0.0  ;;  %vm22332_vm14 = vmmov %vm22257_vm3 }
 0xa5d   : > { %v10490_v33 = vadd.f32 %v10489_v12, %v10488_v61  ;;  %v19392_v24 = vsel %vm22302_vm1, %v22300_v53, 0.0  ;;  %v22303_v61 = vsub.f32 %v18936_v60, %v19048_v54  ;;  %v22304_v12 = vld [vmem:[#allocation98_spill] sm:$0xff] }
 0xa5e   : > { %vm22305_vm7 = vnez %v22304_v12  ;;  %v10419_v56 = vmul.f32 %v19392_v24, %v19392_v24  ;;  %v10497_v19 = vsel %vm22310_vm8, %v10418_v37, 0.0  ;;  %vm22336_vm8 = vmmov %vm22257_vm3 }
 0xa5f   : > { %v10492_v42 = vadd.f32 %v10491_v31, %v10490_v33  ;;  %v19402_v30 = vsel %vm22305_vm7, %v22303_v61, 0.0  ;;  %v22307_v33 = vsub.f32 %v18946_v17, %v19048_v54  ;;  %v22308_v31 = vld [vmem:[#allocation100_spill] sm:$0xff] }
 0xa60   : > { %vm22309_vm13 = vnez %v22308_v31  ;;  %v10420_v60 = vmul.f32 %v19402_v30, %v19402_v30  ;;  %v10499_v12 = vsel %vm22314_vm15, %v10419_v56, 0.0  ;;  %vm22340_vm15 = vmmov %vm22257_vm3 }
 0xa61   : > { %v10494_v5 = vadd.f32 %v10493_v4, %v10492_v42  ;;  %v19412_v53 = vsel %vm22309_vm13, %v22307_v33, 0.0  ;;  %v22311_v42 = vsub.f32 %v18967_v8, %v19048_v54  ;;  %v22312_v4 = vld [vmem:[#allocation101_spill] sm:$0xff] }
 0xa62   : > { %vm22313_vm5 = vnez %v22312_v4  ;;  %v10421_v17 = vmul.f32 %v19412_v53, %v19412_v53  ;;  %v10501_v31 = vsel %vm22317_vm12, %v10420_v60, 0.0 }
 0xa63   : > { %v10496_v26 = vadd.f32 %v10495_v15, %v10494_v5  ;;  %v19422_v61 = vsel %vm22313_vm5, %v22311_v42, 0.0  ;;  %v22315_v5 = vsub.f32 %v18977_v62, %v19048_v54 }
 0xa64   : > { %v10422_v8 = vmul.f32 %v19422_v61, %v19422_v61  ;;  %v10503_v4 = vsel %vm22321_vm11, %v10421_v17, 0.0  ;;  %vm22348_vm11 = vmmov %vm22257_vm3 }
 0xa65   : > { %v10498_v27 = vadd.f32 %v10497_v19, %v10496_v26  ;;  %v19432_v33 = vsel %vm22179_vm9, %v22315_v5, 0.0  ;;  %v22318_v26 = vsub.f32 %v18964_v43, %v19048_v54  ;;  %v22319_v19 = vld [vmem:[#allocation102_spill] sm:$0xff] }
 0xa66   : > { %vm22320_vm4 = vnez %v22319_v19  ;;  %v10423_v62 = vmul.f32 %v19432_v33, %v19432_v33  ;;  %v10505_v15 = vsel %vm22325_vm6, %v10422_v8, 0.0 }
 0xa67   : > { %v10500_v37 = vadd.f32 %v10499_v12, %v10498_v27  ;;  %v19442_v42 = vsel %vm22320_vm4, %v22318_v26, 0.0  ;;  %v22322_v27 = vsub.f32 %v18974_v28, %v19048_v54  ;;  %v22323_v12 = vld [vmem:[#allocation104_spill] sm:$0xff]  ;;  %vm22344_vm4 = vmmov %vm22257_vm3 }
 0xa68   : > { %vm22324_vm9 = vnez %v22323_v12  ;;  %v10424_v43 = vmul.f32 %v19442_v42, %v19442_v42  ;;  %v10507_v19 = vsel %vm22257_vm3, %v10423_v62, 0.0 }
 0xa69   : > { %v10502_v56 = vadd.f32 %v10501_v31, %v10500_v37  ;;  %v19452_v5 = vsel %vm22324_vm9, %v22322_v27, 0.0  ;;  %v22326_v37 = vsub.f32 %v18995_v44, %v19048_v54  ;;  %v22327_v31 = vld [vmem:[#allocation105_spill] sm:$0xff]  ;;  %vm22352_vm9 = vmmov %vm22257_vm3 }
 0xa6a   : > { %vm22328_vm1 = vnez %v22327_v31  ;;  %v10425_v28 = vmul.f32 %v19452_v5, %v19452_v5  ;;  %v10509_v12 = vsel %vm22332_vm14, %v10424_v43, 0.0 }
 0xa6b   : > { %v10504_v60 = vadd.f32 %v10503_v4, %v10502_v56  ;;  %v19462_v26 = vsel %vm22328_vm1, %v22326_v37, 0.0  ;;  %v22329_v56 = vsub.f32 %v19005_v9, %v19048_v54  ;;  %v22330_v4 = vld [vmem:[#allocation107_spill] sm:$0xff] }
 0xa6c   : > { %vm22331_vm7 = vnez %v22330_v4  ;;  %v10426_v44 = vmul.f32 %v19462_v26, %v19462_v26  ;;  %v10511_v31 = vsel %vm22336_vm8, %v10425_v28, 0.0 }
 0xa6d   : > { %v10506_v17 = vadd.f32 %v10505_v15, %v10504_v60  ;;  %v19472_v27 = vsel %vm22331_vm7, %v22329_v56, 0.0  ;;  %v22333_v60 = vsub.f32 %v18992_v39, %v19048_v54  ;;  %v22334_v15 = vld [vmem:[#allocation106_spill] sm:$0xff] }
 0xa6e   : > { %vm22335_vm13 = vnez %v22334_v15  ;;  %v10427_v9 = vmul.f32 %v19472_v27, %v19472_v27  ;;  %v10513_v4 = vsel %vm22340_vm15, %v10426_v44, 0.0 }
 0xa6f   : > { %v10508_v8 = vadd.f32 %v10507_v19, %v10506_v17  ;;  %v19482_v37 = vsel %vm22335_vm13, %v22333_v60, 0.0  ;;  %v22337_v17 = vsub.f32 %v19002_v0, %v19048_v54  ;;  %v22338_v19 = vld [vmem:[#allocation108_spill] sm:$0xff] }
 0xa70   : > { %vm22339_vm5 = vnez %v22338_v19  ;;  %v10428_v39 = vmul.f32 %v19482_v37, %v19482_v37  ;;  %v10515_v15 = vsel %vm22344_vm4, %v10427_v9, 0.0 }
 0xa71   : > { %v10510_v62 = vadd.f32 %v10509_v12, %v10508_v8  ;;  %v19492_v56 = vsel %vm22339_vm5, %v22337_v17, 0.0  ;;  %v22341_v8 = vsub.f32 %v19023_v7, %v19048_v54  ;;  %v22342_v12 = vld [vmem:[#allocation109_spill] sm:$0xff] }
 0xa72   : > { %vm22343_vm12 = vnez %v22342_v12  ;;  %v10429_v0 = vmul.f32 %v19492_v56, %v19492_v56  ;;  %v10517_v19 = vsel %vm22348_vm11, %v10428_v39, 0.0 }
 0xa73   : > { %v10512_v43 = vadd.f32 %v10511_v31, %v10510_v62  ;;  %v19502_v60 = vsel %vm22343_vm12, %v22341_v8, 0.0  ;;  %v22345_v62 = vsub.f32 %v19033_v2, %v19048_v54 }
 0xa74   : > { %v10430_v7 = vmul.f32 %v19502_v60, %v19502_v60  ;;  %v10519_v12 = vsel %vm22352_vm9, %v10429_v0, 0.0 }
 0xa75   : > { %v10514_v28 = vadd.f32 %v10513_v4, %v10512_v43  ;;  %v19512_v17 = vsel %vm22200_vm2, %v22345_v62, 0.0  ;;  %v22349_v43 = vsub.f32 %v19020_v25, %v19048_v54  ;;  %vm22354_vm2 = vmmov %vm22257_vm3 }
 0xa76   : > { %22347 = vst [vmem:[#allocation74_spill] sm:$0xff] %v19512_v17  ;;  %v10431_v2 = vmul.f32 %v19512_v17, %v19512_v17  ;;  %v10521_v62 = vsel %vm22354_vm2, %v10430_v7, 0.0 }
 0xa77   : > { %v10516_v44 = vadd.f32 %v10515_v15, %v10514_v28  ;;  %v19522_v8 = vsel %vm22198_vm0, %v22349_v43, 0.0  ;;  %v22353_v28 = vsub.f32 %v19030_v20, %v19048_v54  ;;  %vm22355_vm0 = vmmov %vm22354_vm2 }
 0xa78   : > { %22351 = vst [vmem:[#allocation113_spill] sm:$0xff] %v19522_v8  ;;  %v10432_v25 = vmul.f32 %v19522_v8, %v19522_v8  ;;  %vm22356_vm6 = vmmov %vm22355_vm0 }
 0xa79   : > { %v10518_v9 = vadd.f32 %v10517_v19, %v10516_v44  ;;  %v19532_v15 = vsel %vm22203_vm10, %v22353_v28, 0.0  ;;  %v10523_v19 = vsel %vm22355_vm0, %v10431_v2, 0.0  ;;  %vm22357_vm1 = vmmov %vm22355_vm0 }
 0xa7a   : > { %v10433_v44 = vmul.f32 %v19532_v15, %v19532_v15  ;;  %v10525_v43 = vsel %vm22356_vm6, %v10432_v25, 0.0  ;;  %vm22378_vm10 = vmmov %vm22355_vm0 }
 0xa7b   : > { %v10520_v39 = vadd.f32 %v10519_v12, %v10518_v9  ;;  %vm22379_vm3 = vmmov %vm22355_vm0 }
 0xa7c   : > { %v10527_v20 = vsel %vm22357_vm1, %v10433_v44, 0.0  ;;  %vm22380_vm7 = vmmov %vm22355_vm0 }
 0xa7d   : > { %v10522_v31 = vadd.f32 %v10521_v62, %v10520_v39  ;;  %vm22381_vm14 = vmmov %vm22355_vm0 }
 0xa7e   : > { %vm22382_vm13 = vmmov %vm22355_vm0 }
 0xa7f   : > { %v10524_v0 = vadd.f32 %v10523_v19, %v10522_v31  ;;  %vm22383_vm8 = vmmov %vm22355_vm0 }
 0xa80   : > { %vm22384_vm5 = vmmov %vm22355_vm0 }
 0xa81   : > { %v10526_v54 = vadd.f32 %v10525_v43, %v10524_v0  ;;  %v10586_v0 = vld [vmem:[%s13673_s29] sm:$0xff]  ;;  %v10588_v43 = vld [vmem:[%s13673_s29 + $0x10] sm:$0xff]  ;;  %vm22385_vm15 = vmmov %vm22355_vm0 }
 0xa82   : > { %vm22386_vm12 = vmmov %vm22355_vm0 }
 0xa83   : > { %v10528_v58 = vadd.f32 %v10527_v20, %v10526_v54  ;;  %v10590_v20 = vld [vmem:[%s13673_s29 + $0x20] sm:$0xff]  ;;  %vm22387_vm4 = vmmov %vm22355_vm0 }
 0xa84   : > { %vm22388_vm11 = vmmov %vm22355_vm0 }
 0xa85   : > { %v10529_v4 = vrot.slane %v10528_v58, 4  ;;  %vm22389_vm9 = vmmov %vm22355_vm0 }
 0xa86   : > { %vm22390_vm2 = vmmov %vm22355_vm0 }
 0xa87   : > { %v10530_v9 = vadd.f32 %v10529_v4, %v10528_v58  ;;  %v10591_v58 = vld [vmem:[%s13673_s29 + $0x28] sm:$0xff]  ;;  %v10592_v4 = vld [vmem:[%s13673_s29 + $0x30] sm:$0xff]  ;;  %vm22391_vm6 = vmmov %vm22355_vm0 }
 0xa88   : > { %vm22392_vm1 = vmmov %vm22355_vm0 }
 0xa89   : > { %v10531_v12 = vrot.slane %v10530_v9, 2 }
 0xa8b   : > { %v10532_v28 = vadd.f32 %v10531_v12, %v10530_v9  ;;  %v10594_v12 = vld [vmem:[%s13673_s29 + $0x40] sm:$0xff] }
 0xa8d   : > { %v10533_v8 = vrot.slane %v10532_v28, 1 }
 0xa8f   : > { %v10534_v17 = vadd.f32 %v10533_v8, %v10532_v28  ;;  %v10595_v28 = vld [vmem:[%s13673_s29 + $0x48] sm:$0xff] }
 0xa91   : > { %v10535_v7 = vmul.f32 0.00390625, %v10534_v17 }
 0xa93   : > { %v10536_v39 = vadd.f32 1e-05, %v10535_v7  ;;  %v10596_v7 = vld [vmem:[%s13673_s29 + $0x50] sm:$0xff] }
 0xa95   : > { %13580 = vrsqrt.f32 %v10536_v39 }
 0xa9f   : > { %v19542_v62 = vpop.eup %13580 }
 0xaa0   : > { %v19546_v2 = vmul.f32 %v19542_v62, %v19100_v45  ;;  %v19550_v25 = vmul.f32 %v19542_v62, %v19104_v6  ;;  %v19554_v31 = vmul.f32 %v19542_v62, %v19110_v14  ;;  %v19558_v8 = vmul.f32 %v19542_v62, %v19120_v48 }
 0xaa1   : > { %v19562_v17 = vmul.f32 %v19542_v62, %v19128_v3  ;;  %v19566_v45 = vmul.f32 %v19542_v62, %v19138_v40  ;;  %v19570_v6 = vmul.f32 %v19542_v62, %v19147_v51  ;;  %v19574_v14 = vmul.f32 %v19542_v62, %v19156_v35 }
 0xaa2   : > { %v19578_v48 = vmul.f32 %v19542_v62, %v19165_v13  ;;  %v19582_v3 = vmul.f32 %v19542_v62, %v19174_v1  ;;  %v19586_v40 = vmul.f32 %v19542_v62, %v19183_v57  ;;  %v19590_v51 = vmul.f32 %v19542_v62, %v19192_v29 }
 0xaa3   : > { %v19594_v35 = vmul.f32 %v19542_v62, %v19201_v46  ;;  %v19598_v13 = vmul.f32 %v19542_v62, %v19210_v55  ;;  %v19602_v1 = vmul.f32 %v19542_v62, %v19219_v21  ;;  %v19606_v57 = vmul.f32 %v19542_v62, %v19228_v22 }
 0xaa4   : > { %v19610_v29 = vmul.f32 %v19542_v62, %v19237_v63  ;;  %v19614_v46 = vmul.f32 %v19542_v62, %v19246_v41  ;;  %v19618_v55 = vmul.f32 %v19542_v62, %v19255_v34  ;;  %v19622_v21 = vmul.f32 %v19542_v62, %v19264_v16  ;;  %v22358_v34 = vld [vmem:[#allocation90_spill] sm:$0xff] }
 0xaa5   : > { %v19626_v22 = vmul.f32 %v19542_v62, %v19273_v10  ;;  %v19630_v63 = vmul.f32 %v19542_v62, %v19282_v18  ;;  %v19634_v41 = vmul.f32 %v19542_v62, %v19291_v23  ;;  %v19638_v44 = vmul.f32 %v19542_v62, %v22358_v34  ;;  %v10598_v34 = vld [vmem:[%s13673_s29 + $0x60] sm:$0xff] }
 0xaa6   : > { %v19642_v16 = vmul.f32 %v19542_v62, %v19309_v36  ;;  %v19646_v10 = vmul.f32 %v19542_v62, %v19318_v47  ;;  %v19650_v18 = vmul.f32 %v19542_v62, %v19325_v49  ;;  %v19654_v23 = vmul.f32 %v19542_v62, %v19332_v38  ;;  %v10587_v38 = vld [vmem:[%s13673_s29 + $0x8] sm:$0xff] }
 0xaa7   : > { %v19658_v36 = vmul.f32 %v19542_v62, %v19342_v11  ;;  %v19662_v19 = vmul.f32 %v19542_v62, %v19352_v59  ;;  %v19666_v47 = vmul.f32 %v19542_v62, %v19362_v50  ;;  %v19670_v49 = vmul.f32 %v19542_v62, %v19372_v32  ;;  %v10589_v11 = vld [vmem:[%s13673_s29 + $0x18] sm:$0xff] }
 0xaa8   : > { %v19678_v59 = vmul.f32 %v19542_v62, %v19382_v52  ;;  %v19682_v50 = vmul.f32 %v19542_v62, %v19392_v24  ;;  %v19686_v32 = vmul.f32 %v19542_v62, %v19402_v30  ;;  %v19690_v54 = vmul.f32 %v19542_v62, %v19412_v53  ;;  %v10593_v52 = vld [vmem:[%s13673_s29 + $0x38] sm:$0xff] }
 0xaa9   : > { %22359 = vst [vmem:[#allocation114_spill] sm:$0xff] %v19670_v49  ;;  %v19698_v24 = vmul.f32 %v19542_v62, %v19422_v61  ;;  %v19702_v30 = vmul.f32 %v19542_v62, %v19432_v33  ;;  %v19706_v53 = vmul.f32 %v19542_v62, %v19442_v42  ;;  %v19710_v9 = vmul.f32 %v19542_v62, %v19452_v5  ;;  %v10597_v61 = vld [vmem:[%s13673_s29 + $0x58] sm:$0xff] }
 0xaaa   : > { %22360 = vst [vmem:[#allocation115_spill] sm:$0xff] %v19678_v59  ;;  %22361 = vst [vmem:[#allocation116_spill] sm:$0xff] %v19682_v50  ;;  %v19718_v39 = vmul.f32 %v19542_v62, %v19462_v26  ;;  %v19722_v33 = vmul.f32 %v19542_v62, %v19472_v27  ;;  %v19726_v42 = vmul.f32 %v19542_v62, %v19482_v37  ;;  %v10599_v26 = vld [vmem:[%s13673_s29 + $0x68] sm:$0xff]  ;;  %v22373_v37 = vld [vmem:[#allocation74_spill] sm:$0xff] }
 0xaab   : > { %22362 = vst [vmem:[#allocation118_spill] sm:$0xff] %v19686_v32  ;;  %22363 = vst [vmem:[#allocation130_spill] sm:$0xff] %v19690_v54  ;;  %v19730_v5 = vmul.f32 %v19542_v62, %v19492_v56  ;;  %v19745_v27 = vmul.f32 %v19542_v62, %v19502_v60  ;;  %v19749_v56 = vmul.f32 %v19542_v62, %v22373_v37  ;;  %v10605_v60 = vld [vmem:[%s13673_s29 + $0x98] sm:$0xff]  ;;  %v10607_v54 = vld [vmem:[%s13673_s29 + $0xa8] sm:$0xff] }
 0xaac   : > { %22364 = vst [vmem:[#allocation134_spill] sm:$0xff] %v19698_v24  ;;  %22365 = vst [vmem:[#allocation136_spill] sm:$0xff] %v19702_v30  ;;  %v10603_v30 = vld [vmem:[%s13673_s29 + $0x88] sm:$0xff]  ;;  %v10604_v24 = vld [vmem:[%s13673_s29 + $0x90] sm:$0xff]  ;;  %v10634_v32 = vadd.f32 %v10586_v0, %v19546_v2  ;;  %v10638_v59 = vadd.f32 %v10590_v20, %v19562_v17  ;;  %v10639_v49 = vadd.f32 %v10591_v58, %v19566_v45 }
 0xaad   : > { %22366 = vst [vmem:[#allocation142_spill] sm:$0xff] %v19706_v53  ;;  %22367 = vst [vmem:[#allocation146_spill] sm:$0xff] %v19710_v9  ;;  %v10601_v9 = vld [vmem:[%s13673_s29 + $0x78] sm:$0xff]  ;;  %v10602_v53 = vld [vmem:[%s13673_s29 + $0x80] sm:$0xff]  ;;  %v10640_v2 = vadd.f32 %v10592_v4, %v19570_v6  ;;  %v10644_v17 = vadd.f32 %v10596_v7, %v19586_v40  ;;  %v10645_v45 = vadd.f32 %v10597_v61, %v19590_v51 }
 0xaae   : > { %22368 = vst [vmem:[#allocation150_spill] sm:$0xff] %v19718_v39  ;;  %22369 = vst [vmem:[#allocation152_spill] sm:$0xff] %v19722_v33  ;;  %v10600_v39 = vld [vmem:[%s13673_s29 + $0x70] sm:$0xff]  ;;  %v19757_v33 = vmul.f32 %v19542_v62, %v19532_v15  ;;  %v10637_v15 = vadd.f32 %v10589_v11, %v19558_v8  ;;  %v10614_v0 = vld [vmem:[%s13673_s29 + $0xe0] sm:$0xff]  ;;  %v10647_v40 = vadd.f32 %v10599_v26, %v19598_v13 }
 0xaaf   : > { %22370 = vst [vmem:[#allocation154_spill] sm:$0xff] %v19726_v42  ;;  %22371 = vst [vmem:[#allocation156_spill] sm:$0xff] %v19730_v5  ;;  %v22375_v5 = vld [vmem:[#allocation113_spill] sm:$0xff]  ;;  %v10615_v8 = vld [vmem:[%s13673_s29 + $0xe8] sm:$0xff]  ;;  %v10648_v51 = vadd.f32 %v10600_v39, %v19602_v1  ;;  %v10649_v11 = vadd.f32 %v10601_v9, %v19606_v57  ;;  %v10650_v1 = vadd.f32 %v10602_v53, %v19610_v29 }
 0xab0   : > { %22372 = vst [vmem:[#allocation157_spill] sm:$0xff] %v19745_v27  ;;  %22374 = vst [vmem:[#allocation158_spill] sm:$0xff] %v19749_v56  ;;  %v19753_v42 = vmul.f32 %v19542_v62, %v22375_v5  ;;  %v10606_v27 = vld [vmem:[%s13673_s29 + $0xa0] sm:$0xff]  ;;  %v10608_v37 = vld [vmem:[%s13673_s29 + $0xb0] sm:$0xff]  ;;  %v10635_v5 = vadd.f32 %v10587_v38, %v19550_v25  ;;  %v10641_v25 = vadd.f32 %v10593_v52, %v19574_v14 }
 0xab1   : > { %22377 = vst [vmem:[#allocation161_spill] sm:$0xff] %v19757_v33  ;;  %v10609_v56 = vld [vmem:[%s13673_s29 + $0xb8] sm:$0xff]  ;;  %v10610_v62 = vld [vmem:[%s13673_s29 + $0xc0] sm:$0xff]  ;;  %v10611_v33 = vld [vmem:[%s13673_s29 + $0xc8] sm:$0xff]  ;;  %v10642_v38 = vadd.f32 %v10594_v12, %v19578_v48  ;;  %v10651_v57 = vadd.f32 %v10603_v30, %v19614_v46  ;;  %v10656_v58 = vadd.f32 %v10608_v37, %v19634_v41 }
 0xab2   : > { %22376 = vst [vmem:[#allocation160_spill] sm:$0xff] %v19753_v42  ;;  %v10636_v42 = vadd.f32 %v10588_v43, %v19554_v31  ;;  %v10612_v50 = vld [vmem:[%s13673_s29 + $0xd0] sm:$0xff]  ;;  %v10613_v31 = vld [vmem:[%s13673_s29 + $0xd8] sm:$0xff]  ;;  %v10643_v43 = vadd.f32 %v10595_v28, %v19582_v3  ;;  %10682 = vst.msk [vmem:[%s19741_s16] sm:$0xff] %vm22378_vm10, %v10634_v32  ;;  %v10646_v3 = vadd.f32 %v10598_v34, %v19594_v35 }
 0xab3   : > { %10683 = vst.msk [vmem:[%s19741_s16 + $0x8] sm:$0xff] %vm22379_vm3, %v10635_v5  ;;  %v10616_v6 = vld [vmem:[%s13673_s29 + $0xf0] sm:$0xff]  ;;  %v10617_v14 = vld [vmem:[%s13673_s29 + $0xf8] sm:$0xff]  ;;  %v10618_v48 = vld [vmem:[%s13673_s29 + $0x100] sm:$0xff]  ;;  %v10657_v4 = vadd.f32 %v10609_v56, %v19638_v44  ;;  %v10658_v41 = vadd.f32 %v10610_v62, %v19642_v16  ;;  %v10659_v44 = vadd.f32 %v10611_v33, %v19646_v10 }
 0xab4   : > { %10684 = vst.msk [vmem:[%s19741_s16 + $0x10] sm:$0xff] %vm22380_vm7, %v10636_v42  ;;  %v10619_v35 = vld [vmem:[%s13673_s29 + $0x108] sm:$0xff]  ;;  %v10620_v32 = vld [vmem:[%s13673_s29 + $0x110] sm:$0xff]  ;;  %v10621_v13 = vld [vmem:[%s13673_s29 + $0x118] sm:$0xff] }
 0xab5   : > { %10685 = vst.msk [vmem:[%s19741_s16 + $0x18] sm:$0xff] %vm22381_vm14, %v10637_v15  ;;  %v10622_v29 = vld [vmem:[%s13673_s29 + $0x120] sm:$0xff]  ;;  %v10623_v20 = vld [vmem:[%s13673_s29 + $0x128] sm:$0xff]  ;;  %v10624_v46 = vld [vmem:[%s13673_s29 + $0x130] sm:$0xff] }
 0xab6   : > { %10686 = vst.msk [vmem:[%s19741_s16 + $0x20] sm:$0xff] %vm22382_vm13, %v10638_v59  ;;  %v10652_v59 = vadd.f32 %v10604_v24, %v19618_v55  ;;  %v10654_v55 = vadd.f32 %v10606_v27, %v19626_v22  ;;  %v10625_v22 = vld [vmem:[%s13673_s29 + $0x138] sm:$0xff]  ;;  %v10626_v52 = vld [vmem:[%s13673_s29 + $0x140] sm:$0xff]  ;;  %v10661_v24 = vadd.f32 %v10613_v31, %v19654_v23  ;;  %vm22393_vm10 = vmmov %vm22355_vm0  ;;  %v10663_v23 = vadd.f32 %v10615_v8, %v19662_v19 }
 0xab7   : > { %10687 = vst.msk [vmem:[%s19741_s16 + $0x28] sm:$0xff] %vm22383_vm8, %v10639_v49  ;;  %v10653_v49 = vadd.f32 %v10605_v60, %v19622_v21  ;;  %v10655_v21 = vadd.f32 %v10607_v54, %v19630_v63  ;;  %v10627_v63 = vld [vmem:[%s13673_s29 + $0x148] sm:$0xff]  ;;  %v10660_v54 = vadd.f32 %v10612_v50, %v19650_v18  ;;  %vm22394_vm3 = vmmov %vm22355_vm0  ;;  %v10628_v16 = vld [vmem:[%s13673_s29 + $0x150] sm:$0xff]  ;;  %v10662_v18 = vadd.f32 %v10614_v0, %v19658_v36 }
 0xab8   : > { %10688 = vst.msk [vmem:[%s19741_s16 + $0x30] sm:$0xff] %vm22384_vm5, %v10640_v2  ;;  %vm22395_vm7 = vmmov %vm22355_vm0  ;;  %v10629_v30 = vld [vmem:[%s13673_s29 + $0x158] sm:$0xff]  ;;  %v10630_v10 = vld [vmem:[%s13673_s29 + $0x160] sm:$0xff]  ;;  %v10664_v50 = vadd.f32 %v10616_v6, %v19666_v47 }
 0xab9   : > { %10689 = vst.msk [vmem:[%s19741_s16 + $0x38] sm:$0xff] %vm22385_vm15, %v10641_v25  ;;  %vm22396_vm14 = vmmov %vm22355_vm0  ;;  %v22397_v53 = vld [vmem:[#allocation114_spill] sm:$0xff]  ;;  %v10631_v12 = vld [vmem:[%s13673_s29 + $0x168] sm:$0xff] }
 0xaba   : > { %10690 = vst.msk [vmem:[%s19741_s16 + $0x40] sm:$0xff] %vm22386_vm12, %v10642_v38  ;;  %v10665_v9 = vadd.f32 %v10617_v14, %v22397_v53  ;;  %vm22398_vm13 = vmmov %vm22355_vm0  ;;  %v10632_v36 = vld [vmem:[%s13673_s29 + $0x170] sm:$0xff]  ;;  %v10633_v19 = vld [vmem:[%s13673_s29 + $0x178] sm:$0xff] }
 0xabb   : > { %10691 = vst.msk [vmem:[%s19741_s16 + $0x48] sm:$0xff] %vm22387_vm4, %v10643_v43  ;;  %vm22399_vm8 = vmmov %vm22355_vm0  ;;  %v22402_v28 = vld [vmem:[#allocation115_spill] sm:$0xff]  ;;  %v22403_v7 = vld [vmem:[#allocation116_spill] sm:$0xff] }
 0xabc   : > { %10692 = vst.msk [vmem:[%s19741_s16 + $0x50] sm:$0xff] %vm22388_vm11, %v10644_v17  ;;  %vm22400_vm5 = vmmov %vm22355_vm0  ;;  %v10666_v47 = vadd.f32 %v10618_v48, %v22402_v28  ;;  %v10667_v61 = vadd.f32 %v10619_v35, %v22403_v7  ;;  %v22404_v39 = vld [vmem:[#allocation118_spill] sm:$0xff]  ;;  %v22411_v56 = vld [vmem:[#allocation136_spill] sm:$0xff] }
 0xabd   : > { %10693 = vst.msk [vmem:[%s19741_s16 + $0x58] sm:$0xff] %vm22389_vm9, %v10645_v45  ;;  %vm22401_vm15 = vmmov %vm22355_vm0  ;;  %v10668_v33 = vadd.f32 %v10620_v32, %v22404_v39  ;;  %v22405_v42 = vld [vmem:[#allocation130_spill] sm:$0xff]  ;;  %v10671_v60 = vadd.f32 %v10623_v20, %v22411_v56  ;;  %v22418_v31 = vld [vmem:[#allocation152_spill] sm:$0xff] }
 0xabe   : > { %10694 = vst.msk [vmem:[%s19741_s16 + $0x60] sm:$0xff] %vm22390_vm2, %v10646_v3  ;;  %v10669_v34 = vadd.f32 %v10621_v13, %v22405_v42  ;;  %vm22406_vm12 = vmmov %vm22355_vm0  ;;  %v22410_v26 = vld [vmem:[#allocation134_spill] sm:$0xff]  ;;  %v10675_v0 = vadd.f32 %v10627_v63, %v22418_v31  ;;  %v22420_v43 = vld [vmem:[#allocation156_spill] sm:$0xff] }
 0xabf   : > { %10695 = vst.msk [vmem:[%s19741_s16 + $0x68] sm:$0xff] %vm22355_vm0, %v10647_v40  ;;  %vm22407_vm4 = vmmov %vm22355_vm0  ;;  %v10670_v27 = vadd.f32 %v10622_v29, %v22410_v26  ;;  %v22412_v37 = vld [vmem:[#allocation142_spill] sm:$0xff]  ;;  %v10677_v17 = vadd.f32 %v10629_v30, %v22420_v43  ;;  %v22425_v45 = vld [vmem:[#allocation157_spill] sm:$0xff] }
 0xac0   : > { %10696 = vst.msk [vmem:[%s19741_s16 + $0x70] sm:$0xff] %vm22391_vm6, %v10648_v51  ;;  %vm22408_vm11 = vmmov %vm22355_vm0  ;;  %v10672_v5 = vadd.f32 %v10624_v46, %v22412_v37  ;;  %v22413_v15 = vld [vmem:[#allocation146_spill] sm:$0xff]  ;;  %v10678_v6 = vadd.f32 %v10630_v10, %v22425_v45  ;;  %v22427_v3 = vld [vmem:[#allocation160_spill] sm:$0xff] }
 0xac1   : > { %10697 = vst.msk [vmem:[%s19741_s16 + $0x78] sm:$0xff] %vm22392_vm1, %v10649_v11  ;;  %vm22409_vm9 = vmmov %vm22355_vm0  ;;  %v10673_v62 = vadd.f32 %v10625_v22, %v22413_v15  ;;  %v22417_v2 = vld [vmem:[#allocation150_spill] sm:$0xff]  ;;  %v10680_v40 = vadd.f32 %v10632_v36, %v22427_v3  ;;  %v22428_v51 = vld [vmem:[#allocation161_spill] sm:$0xff] }
 0xac2   : > { %10698 = vst.msk [vmem:[%s19741_s16 + $0x80] sm:$0xff] %vm22393_vm10, %v10650_v1  ;;  %vm22414_vm2 = vmmov %vm22355_vm0  ;;  %v10674_v25 = vadd.f32 %v10626_v52, %v22417_v2  ;;  %v22419_v8 = vld [vmem:[#allocation154_spill] sm:$0xff]  ;;  %v10681_v11 = vadd.f32 %v10633_v19, %v22428_v51 }
 0xac3   : > { %10699 = vst.msk [vmem:[%s19741_s16 + $0x88] sm:$0xff] %vm22394_vm3, %v10651_v57  ;;  %vm22415_vm6 = vmmov %vm22355_vm0  ;;  %v10676_v38 = vadd.f32 %v10628_v16, %v22419_v8  ;;  %v22426_v14 = vld [vmem:[#allocation158_spill] sm:$0xff] }
 0xac4   : > { %10700 = vst.msk [vmem:[%s19741_s16 + $0x90] sm:$0xff] %vm22395_vm7, %v10652_v59  ;;  %vm22416_vm1 = vmmov %vm22355_vm0  ;;  %v10679_v48 = vadd.f32 %v10631_v12, %v22426_v14 }
 0xac5   : > { %10701 = vst.msk [vmem:[%s19741_s16 + $0x98] sm:$0xff] %vm22396_vm14, %v10653_v49  ;;  %vm22421_vm10 = vmmov %vm22355_vm0 }
 0xac6   : > { %10702 = vst.msk [vmem:[%s19741_s16 + $0xa0] sm:$0xff] %vm22398_vm13, %v10654_v55  ;;  %vm22422_vm3 = vmmov %vm22355_vm0 }
 0xac7   : > { %10703 = vst.msk [vmem:[%s19741_s16 + $0xa8] sm:$0xff] %vm22399_vm8, %v10655_v21  ;;  %vm22423_vm7 = vmmov %vm22355_vm0 }
 0xac8   : > { %10704 = vst.msk [vmem:[%s19741_s16 + $0xb0] sm:$0xff] %vm22400_vm5, %v10656_v58  ;;  %vm22424_vm14 = vmmov %vm22355_vm0 }
 0xac9   : > { %10705 = vst.msk [vmem:[%s19741_s16 + $0xb8] sm:$0xff] %vm22401_vm15, %v10657_v4  ;;  %vm22429_vm13 = vmmov %vm22355_vm0 }
 0xaca   : > { %10706 = vst.msk [vmem:[%s19741_s16 + $0xc0] sm:$0xff] %vm22406_vm12, %v10658_v41  ;;  %vm22430_vm8 = vmmov %vm22355_vm0 }
 0xacb   : > { %10707 = vst.msk [vmem:[%s19741_s16 + $0xc8] sm:$0xff] %vm22407_vm4, %v10659_v44  ;;  %vm22431_vm5 = vmmov %vm22355_vm0 }
 0xacc   : > { %10708 = vst.msk [vmem:[%s19741_s16 + $0xd0] sm:$0xff] %vm22408_vm11, %v10660_v54  ;;  %vm22432_vm15 = vmmov %vm22355_vm0 }
 0xacd   : > { %10709 = vst.msk [vmem:[%s19741_s16 + $0xd8] sm:$0xff] %vm22409_vm9, %v10661_v24  ;;  %vm22433_vm12 = vmmov %vm22355_vm0 }
 0xace   : > { %10710 = vst.msk [vmem:[%s19741_s16 + $0xe0] sm:$0xff] %vm22414_vm2, %v10662_v18  ;;  %vm22434_vm4 = vmmov %vm22355_vm0 }
 0xacf   : > { %10711 = vst.msk [vmem:[%s19741_s16 + $0xe8] sm:$0xff] %vm22355_vm0, %v10663_v23  ;;  %vm22435_vm11 = vmmov %vm22355_vm0 }
 0xad0   : > { %10712 = vst.msk [vmem:[%s19741_s16 + $0xf0] sm:$0xff] %vm22415_vm6, %v10664_v50  ;;  %vm22436_vm9 = vmmov %vm22355_vm0 }
 0xad1   : > { %10713 = vst.msk [vmem:[%s19741_s16 + $0xf8] sm:$0xff] %vm22416_vm1, %v10665_v9  ;;  %vm22437_vm2 = vmmov %vm22355_vm0 }
 0xad2   : > { %10714 = vst.msk [vmem:[%s19741_s16 + $0x100] sm:$0xff] %vm22421_vm10, %v10666_v47  ;;  %vm22438_vm6 = vmmov %vm22355_vm0 }
 0xad3   : > { %10715 = vst.msk [vmem:[%s19741_s16 + $0x108] sm:$0xff] %vm22422_vm3, %v10667_v61  ;;  %vm22439_vm1 = vmmov %vm22355_vm0 }
 0xad4   : > { %10716 = vst.msk [vmem:[%s19741_s16 + $0x110] sm:$0xff] %vm22423_vm7, %v10668_v33 }
 0xad5   : > { %10717 = vst.msk [vmem:[%s19741_s16 + $0x118] sm:$0xff] %vm22424_vm14, %v10669_v34 }
 0xad6   : > { %10718 = vst.msk [vmem:[%s19741_s16 + $0x120] sm:$0xff] %vm22429_vm13, %v10670_v27 }
 0xad7   : > { %10719 = vst.msk [vmem:[%s19741_s16 + $0x128] sm:$0xff] %vm22430_vm8, %v10671_v60 }
 0xad8   : > { %10720 = vst.msk [vmem:[%s19741_s16 + $0x130] sm:$0xff] %vm22431_vm5, %v10672_v5 }
 0xad9   : > { %10721 = vst.msk [vmem:[%s19741_s16 + $0x138] sm:$0xff] %vm22432_vm15, %v10673_v62 }
 0xada   : > { %10722 = vst.msk [vmem:[%s19741_s16 + $0x140] sm:$0xff] %vm22433_vm12, %v10674_v25 }
 0xadb   : > { %10723 = vst.msk [vmem:[%s19741_s16 + $0x148] sm:$0xff] %vm22434_vm4, %v10675_v0 }
 0xadc   : > { %10724 = vst.msk [vmem:[%s19741_s16 + $0x150] sm:$0xff] %vm22435_vm11, %v10676_v38 }
 0xadd   : > { %10725 = vst.msk [vmem:[%s19741_s16 + $0x158] sm:$0xff] %vm22436_vm9, %v10677_v17 }
 0xade   : > { %10726 = vst.msk [vmem:[%s19741_s16 + $0x160] sm:$0xff] %vm22437_vm2, %v10678_v6 }
 0xadf   : > { %10727 = vst.msk [vmem:[%s19741_s16 + $0x168] sm:$0xff] %vm22355_vm0, %v10679_v48 }
 0xae0   : > { %10728 = vst.msk [vmem:[%s19741_s16 + $0x170] sm:$0xff] %vm22438_vm6, %v10680_v40 }
 0xae1   : > { %10729 = vst.msk [vmem:[%s19741_s16 + $0x178] sm:$0xff] %vm22439_vm1, %v10681_v11 }
 0xae2 PF: > { %s15_s18 = sadd.s32 1, %s13589_s18  }
 0xae3   : > { %p12_p4 = scmp.ge.s32.totalorder %s15_s18, 4  }
 0xae5   :  { %14 = sbr.rel (!%p12_p4) target bundleno = 1 (0x1), region = 70 }

</bundles_post_ra>
